<compile_context>
chip_gen: v7x
topology: tpu7x:2x2x1
jax: 0.10.0
libtpu: 0.0.40
codegen_flags: <defaults>
</compile_context>

<pallas_src>
import jax
import jax.numpy as jnp
from jax.experimental import pallas as pl
from jax.experimental.pallas import tpu as pltpu

K = 11                       # self.dim (odd; module keeps 11)
PAD = (K - 1) // 2           # = 5
C = 3                        # module consumes exactly 3 channels
R0 = 8                       # sublane-aligned row where the image interior starts


def convt_kernel(wrow_ref, brow_ref, x_ref, o_ref, pad_ref):
    """Single grid step: all batch elements and channels at once.

    wrow_ref : VMEM (K*K, L) f32 -- per-lane flipped-kernel taps
    brow_ref : VMEM (1, L)   f32 -- per-lane bias
    x_ref    : VMEM (B, C, H, W)
    o_ref    : VMEM (H, L)       -- lane-dense packed output slab
    pad_ref  : VMEM scratch (rows, L + K - 1) -- zero-halo packed slab
    """
    B, Cc, H, W = x_ref.shape
    L = o_ref.shape[1]
    Wp = W + 2 * PAD

    # Zero halo rows + gutter lanes (interiors overwritten right below).
    pad_ref[...] = jnp.zeros_like(pad_ref)
    for b in range(B):
        for c in range(Cc):
            lo = (b * Cc + c) * Wp + PAD
            pad_ref[R0:R0 + H, lo:lo + W] = x_ref[b, c, :, :]

    acc = jnp.zeros((H, L), dtype=jnp.float32)
    for dx in range(K):
        # One lane-shifted slab per dx serves every packed image.
        cols = pad_ref[:, dx:dx + L]                       # (rows, L)
        for dy in range(K):
            t = dy * K + dx
            r = R0 - PAD + dy
            acc = acc + cols[r:r + H, :] * wrow_ref[t:t + 1, :]
    o_ref[...] = (acc + brow_ref[...]).astype(o_ref.dtype)
    # TODO(synk): for W >~ 128 switch the dx/dy taps to 11 banded MXU matmuls
    #             per channel, add an H-tile (parallel) grid axis with a PAD-row
    #             halo + explicit vmem_limit_bytes (v5e's 16 MiB scoped default,
    #             v7x's 64 MiB physical), and bound vreg live ranges with a
    #             fori_loop over dx.  Not needed at the small shapes here.


def inte_tran_nn(x, weights, biases):
    """x: (B, 3, H, W); weights: (3, K, K); biases: (3,). Returns (B, 3, H, W) f32."""
    B, Cin, H, W = x.shape
    assert Cin == C, "InteTranNN consumes exactly 3 input channels"

    Wp = W + 2 * PAD
    N = B * C                          # number of packed image strips
    L = N * Wp                         # lane-dense packed width
    Lp = L + (K - 1)                   # slab width (room for the dx lane shift)
    rows = ((R0 + H + PAD + 7) // 8) * 8   # sublane-aligned slab height

    # conv_transpose(stride=1, pad=5) == correlation with the flipped kernel.
    w_flip = weights[:, ::-1, ::-1].astype(jnp.float32).reshape(C, K * K)    # (3, 121)
    # Per-lane taps / bias: strip s = b*C + c occupies lanes [s*Wp, (s+1)*Wp).
    wrow = jnp.tile(jnp.repeat(w_flip, Wp, axis=0), (B, 1)).T                # (121, L)
    brow = jnp.tile(jnp.repeat(biases.astype(jnp.float32), Wp), B)[None, :]  # (1, L)

    slab = pl.pallas_call(
        convt_kernel,
        out_shape=jax.ShapeDtypeStruct((H, L), jnp.float32),
        grid=(1,),
        in_specs=[
            pl.BlockSpec((K * K, L), lambda i: (0, 0)),          # per-lane weights
            pl.BlockSpec((1, L), lambda i: (0, 0)),              # per-lane bias
            pl.BlockSpec((B, C, H, W), lambda i: (0, 0, 0, 0)),  # x (whole batch)
        ],
        out_specs=pl.BlockSpec((H, L), lambda i: (0, 0)),
        scratch_shapes=[pltpu.VMEM((rows, Lp), jnp.float32)],
    )(wrow, brow, x.astype(jnp.float32))

    # Layout plumbing: crop the 2*PAD gutter lanes and restore (B, C, H, W).
    out = slab.reshape(H, N, Wp)[:, :, :W]
    return jnp.transpose(out, (1, 0, 2)).reshape(B, C, H, W)


def ref_forward(x, weights, biases):
    """Pure-JAX reference of the same conv-transpose semantics."""
    outs = []
    for c in range(C):
        w_f = weights[c, ::-1, ::-1][None, None]                 # (O=1, I=1, K, K)
        y = jax.lax.conv_general_dilated(
            x[:, c:c + 1], w_f, window_strides=(1, 1),
            padding=((PAD, PAD), (PAD, PAD)),
            dimension_numbers=("NCHW", "OIHW", "NCHW")) + biases[c]
        outs.append(y)
    return jnp.concatenate(outs, axis=1)


if __name__ == "__main__":
    key = jax.random.PRNGKey(0)
    kx, kw, kb = jax.random.split(key, 3)

    B, H, W = 2, 16, 16
    x = jax.random.normal(kx, (B, C, H, W), dtype=jnp.float32)

    # ConvTranspose2d per-branch params: weight (1,1,11,11), bias (1,),
    # stacked across the 3 branches; uniform(-1/sqrt(fan), 1/sqrt(fan)) init.
    fan = 1 * K * K
    bound = 1.0 / (fan ** 0.5)
    weights = jax.random.uniform(kw, (C, K, K), jnp.float32, -bound, bound)
    biases = jax.random.uniform(kb, (C,), jnp.float32, -bound, bound)

    out = jax.block_until_ready(inte_tran_nn(x, weights, biases))
    ref = ref_forward(x, weights, biases)

    assert out.shape == (B, C, H, W)
    assert jnp.allclose(out, ref, atol=1e-4, rtol=1e-4), "mismatch vs reference"
    print("KERNEL_OK")
</pallas_src>

<mosaic_0001>
module attributes {stable_mosaic.version = 11 : i64} {
  func.func @convt_kernel(%arg0: i32, %arg1: memref<121x156xf32, #tpu.memory_space<vmem>>, %arg2: memref<1x156xf32, #tpu.memory_space<vmem>>, %arg3: memref<2x3x16x16xf32, #tpu.memory_space<vmem>>, %arg4: memref<16x156xf32, #tpu.memory_space<vmem>>, %arg5: memref<32x166xf32, #tpu.memory_space<vmem>>) attributes {dimension_semantics = [#tpu.dimension_semantics<arbitrary>], iteration_bounds = array<i64: 1>, scalar_prefetch = 0 : i64, scratch_operands = 1 : i64, tpu.core_type = #tpu.core_type<tc>, window_params = [{pipeline_mode = #tpu.pipeline_mode<synchronous>, transform_indices = @transform_0, window_bounds = array<i64: 121, 156>}, {pipeline_mode = #tpu.pipeline_mode<synchronous>, transform_indices = @transform_1, window_bounds = array<i64: 1, 156>}, {pipeline_mode = #tpu.pipeline_mode<synchronous>, transform_indices = @transform_2, window_bounds = array<i64: 2, 3, 16, 16>}, {pipeline_mode = #tpu.pipeline_mode<synchronous>, transform_indices = @transform_3, window_bounds = array<i64: 16, 156>}]} {
    %cst = arith.constant 0.000000e+00 : f32
    %0 = vector.broadcast %cst : f32 to vector<32x166xf32>
    %c0 = arith.constant 0 : index
    %c0_0 = arith.constant 0 : index
    %1 = vector.load %arg5[%c0, %c0_0] : memref<32x166xf32, #tpu.memory_space<vmem>>, vector<32x166xf32>
    tpu.vector_store %arg5[%c0, %c0_0], %0 {strides = array<i32>} : memref<32x166xf32, #tpu.memory_space<vmem>>, vector<32x166xf32>,
    %c0_1 = arith.constant 0 : index
    %c0_2 = arith.constant 0 : index
    %c0_3 = arith.constant 0 : index
    %c0_4 = arith.constant 0 : index
    %2 = vector.load %arg3[%c0_1, %c0_2, %c0_3, %c0_4] : memref<2x3x16x16xf32, #tpu.memory_space<vmem>>, vector<1x1x16x16xf32>
    %3 = vector.shape_cast %2 : vector<1x1x16x16xf32> to vector<16x16xf32>
    %c8 = arith.constant 8 : index
    %c5 = arith.constant 5 : index
    %4 = vector.load %arg5[%c8, %c5] : memref<32x166xf32, #tpu.memory_space<vmem>>, vector<16x16xf32>
    tpu.vector_store %arg5[%c8, %c5], %3 {strides = array<i32>} : memref<32x166xf32, #tpu.memory_space<vmem>>, vector<16x16xf32>,
    %c0_5 = arith.constant 0 : index
    %c1 = arith.constant 1 : index
    %c0_6 = arith.constant 0 : index
    %c0_7 = arith.constant 0 : index
    %5 = vector.load %arg3[%c0_5, %c1, %c0_6, %c0_7] : memref<2x3x16x16xf32, #tpu.memory_space<vmem>>, vector<1x1x16x16xf32>
    %6 = vector.shape_cast %5 : vector<1x1x16x16xf32> to vector<16x16xf32>
    %c8_8 = arith.constant 8 : index
    %c31 = arith.constant 31 : index
    %7 = vector.load %arg5[%c8_8, %c31] : memref<32x166xf32, #tpu.memory_space<vmem>>, vector<16x16xf32>
    tpu.vector_store %arg5[%c8_8, %c31], %6 {strides = array<i32>} : memref<32x166xf32, #tpu.memory_space<vmem>>, vector<16x16xf32>,
    %c0_9 = arith.constant 0 : index
    %c2 = arith.constant 2 : index
    %c0_10 = arith.constant 0 : index
    %c0_11 = arith.constant 0 : index
    %8 = vector.load %arg3[%c0_9, %c2, %c0_10, %c0_11] : memref<2x3x16x16xf32, #tpu.memory_space<vmem>>, vector<1x1x16x16xf32>
    %9 = vector.shape_cast %8 : vector<1x1x16x16xf32> to vector<16x16xf32>
    %c8_12 = arith.constant 8 : index
    %c57 = arith.constant 57 : index
    %10 = vector.load %arg5[%c8_12, %c57] : memref<32x166xf32, #tpu.memory_space<vmem>>, vector<16x16xf32>
    tpu.vector_store %arg5[%c8_12, %c57], %9 {strides = array<i32>} : memref<32x166xf32, #tpu.memory_space<vmem>>, vector<16x16xf32>,
    %c1_13 = arith.constant 1 : index
    %c0_14 = arith.constant 0 : index
    %c0_15 = arith.constant 0 : index
    %c0_16 = arith.constant 0 : index
    %11 = vector.load %arg3[%c1_13, %c0_14, %c0_15, %c0_16] : memref<2x3x16x16xf32, #tpu.memory_space<vmem>>, vector<1x1x16x16xf32>
    %12 = vector.shape_cast %11 : vector<1x1x16x16xf32> to vector<16x16xf32>
    %c8_17 = arith.constant 8 : index
    %c83 = arith.constant 83 : index
    %13 = vector.load %arg5[%c8_17, %c83] : memref<32x166xf32, #tpu.memory_space<vmem>>, vector<16x16xf32>
    tpu.vector_store %arg5[%c8_17, %c83], %12 {strides = array<i32>} : memref<32x166xf32, #tpu.memory_space<vmem>>, vector<16x16xf32>,
    %c1_18 = arith.constant 1 : index
    %c1_19 = arith.constant 1 : index
    %c0_20 = arith.constant 0 : index
    %c0_21 = arith.constant 0 : index
    %14 = vector.load %arg3[%c1_18, %c1_19, %c0_20, %c0_21] : memref<2x3x16x16xf32, #tpu.memory_space<vmem>>, vector<1x1x16x16xf32>
    %15 = vector.shape_cast %14 : vector<1x1x16x16xf32> to vector<16x16xf32>
    %c8_22 = arith.constant 8 : index
    %c109 = arith.constant 109 : index
    %16 = vector.load %arg5[%c8_22, %c109] : memref<32x166xf32, #tpu.memory_space<vmem>>, vector<16x16xf32>
    tpu.vector_store %arg5[%c8_22, %c109], %15 {strides = array<i32>} : memref<32x166xf32, #tpu.memory_space<vmem>>, vector<16x16xf32>,
    %c1_23 = arith.constant 1 : index
    %c2_24 = arith.constant 2 : index
    %c0_25 = arith.constant 0 : index
    %c0_26 = arith.constant 0 : index
    %17 = vector.load %arg3[%c1_23, %c2_24, %c0_25, %c0_26] : memref<2x3x16x16xf32, #tpu.memory_space<vmem>>, vector<1x1x16x16xf32>
    %18 = vector.shape_cast %17 : vector<1x1x16x16xf32> to vector<16x16xf32>
    %c8_27 = arith.constant 8 : index
    %c135 = arith.constant 135 : index
    %19 = vector.load %arg5[%c8_27, %c135] : memref<32x166xf32, #tpu.memory_space<vmem>>, vector<16x16xf32>
    tpu.vector_store %arg5[%c8_27, %c135], %18 {strides = array<i32>} : memref<32x166xf32, #tpu.memory_space<vmem>>, vector<16x16xf32>,
    %cst_28 = arith.constant 0.000000e+00 : f32
    %20 = vector.broadcast %cst_28 : f32 to vector<16x156xf32>
    %c0_29 = arith.constant 0 : index
    %c0_30 = arith.constant 0 : index
    %21 = vector.load %arg5[%c0_29, %c0_30] : memref<32x166xf32, #tpu.memory_space<vmem>>, vector<32x156xf32>
    %22 = vector.extract_strided_slice %21 {offsets = [3, 0], sizes = [16, 156], strides = [1, 1]} : vector<32x156xf32> to vector<16x156xf32>
    %c0_31 = arith.constant 0 : index
    %c0_32 = arith.constant 0 : index
    %23 = vector.load %arg1[%c0_31, %c0_32] : memref<121x156xf32, #tpu.memory_space<vmem>>, vector<1x156xf32>
    %24 = vector.broadcast %23 : vector<1x156xf32> to vector<16x156xf32>
    %25 = arith.mulf %22, %24 : vector<16x156xf32>
    %26 = arith.addf %20, %25 : vector<16x156xf32>
    %27 = vector.extract_strided_slice %21 {offsets = [4, 0], sizes = [16, 156], strides = [1, 1]} : vector<32x156xf32> to vector<16x156xf32>
    %c11 = arith.constant 11 : index
    %c0_33 = arith.constant 0 : index
    %28 = vector.load %arg1[%c11, %c0_33] : memref<121x156xf32, #tpu.memory_space<vmem>>, vector<1x156xf32>
    %29 = vector.broadcast %28 : vector<1x156xf32> to vector<16x156xf32>
    %30 = arith.mulf %27, %29 : vector<16x156xf32>
    %31 = arith.addf %26, %30 : vector<16x156xf32>
    %32 = vector.extract_strided_slice %21 {offsets = [5, 0], sizes = [16, 156], strides = [1, 1]} : vector<32x156xf32> to vector<16x156xf32>
    %c22 = arith.constant 22 : index
    %c0_34 = arith.constant 0 : index
    %33 = vector.load %arg1[%c22, %c0_34] : memref<121x156xf32, #tpu.memory_space<vmem>>, vector<1x156xf32>
    %34 = vector.broadcast %33 : vector<1x156xf32> to vector<16x156xf32>
    %35 = arith.mulf %32, %34 : vector<16x156xf32>
    %36 = arith.addf %31, %35 : vector<16x156xf32>
    %37 = vector.extract_strided_slice %21 {offsets = [6, 0], sizes = [16, 156], strides = [1, 1]} : vector<32x156xf32> to vector<16x156xf32>
    %c33 = arith.constant 33 : index
    %c0_35 = arith.constant 0 : index
    %38 = vector.load %arg1[%c33, %c0_35] : memref<121x156xf32, #tpu.memory_space<vmem>>, vector<1x156xf32>
    %39 = vector.broadcast %38 : vector<1x156xf32> to vector<16x156xf32>
    %40 = arith.mulf %37, %39 : vector<16x156xf32>
    %41 = arith.addf %36, %40 : vector<16x156xf32>
    %42 = vector.extract_strided_slice %21 {offsets = [7, 0], sizes = [16, 156], strides = [1, 1]} : vector<32x156xf32> to vector<16x156xf32>
    %c44 = arith.constant 44 : index
    %c0_36 = arith.constant 0 : index
    %43 = vector.load %arg1[%c44, %c0_36] : memref<121x156xf32, #tpu.memory_space<vmem>>, vector<1x156xf32>
    %44 = vector.broadcast %43 : vector<1x156xf32> to vector<16x156xf32>
    %45 = arith.mulf %42, %44 : vector<16x156xf32>
    %46 = arith.addf %41, %45 : vector<16x156xf32>
    %47 = vector.extract_strided_slice %21 {offsets = [8, 0], sizes = [16, 156], strides = [1, 1]} : vector<32x156xf32> to vector<16x156xf32>
    %c55 = arith.constant 55 : index
    %c0_37 = arith.constant 0 : index
    %48 = vector.load %arg1[%c55, %c0_37] : memref<121x156xf32, #tpu.memory_space<vmem>>, vector<1x156xf32>
    %49 = vector.broadcast %48 : vector<1x156xf32> to vector<16x156xf32>
    %50 = arith.mulf %47, %49 : vector<16x156xf32>
    %51 = arith.addf %46, %50 : vector<16x156xf32>
    %52 = vector.extract_strided_slice %21 {offsets = [9, 0], sizes = [16, 156], strides = [1, 1]} : vector<32x156xf32> to vector<16x156xf32>
    %c66 = arith.constant 66 : index
    %c0_38 = arith.constant 0 : index
    %53 = vector.load %arg1[%c66, %c0_38] : memref<121x156xf32, #tpu.memory_space<vmem>>, vector<1x156xf32>
    %54 = vector.broadcast %53 : vector<1x156xf32> to vector<16x156xf32>
    %55 = arith.mulf %52, %54 : vector<16x156xf32>
    %56 = arith.addf %51, %55 : vector<16x156xf32>
    %57 = vector.extract_strided_slice %21 {offsets = [10, 0], sizes = [16, 156], strides = [1, 1]} : vector<32x156xf32> to vector<16x156xf32>
    %c77 = arith.constant 77 : index
    %c0_39 = arith.constant 0 : index
    %58 = vector.load %arg1[%c77, %c0_39] : memref<121x156xf32, #tpu.memory_space<vmem>>, vector<1x156xf32>
    %59 = vector.broadcast %58 : vector<1x156xf32> to vector<16x156xf32>
    %60 = arith.mulf %57, %59 : vector<16x156xf32>
    %61 = arith.addf %56, %60 : vector<16x156xf32>
    %62 = vector.extract_strided_slice %21 {offsets = [11, 0], sizes = [16, 156], strides = [1, 1]} : vector<32x156xf32> to vector<16x156xf32>
    %c88 = arith.constant 88 : index
    %c0_40 = arith.constant 0 : index
    %63 = vector.load %arg1[%c88, %c0_40] : memref<121x156xf32, #tpu.memory_space<vmem>>, vector<1x156xf32>
    %64 = vector.broadcast %63 : vector<1x156xf32> to vector<16x156xf32>
    %65 = arith.mulf %62, %64 : vector<16x156xf32>
    %66 = arith.addf %61, %65 : vector<16x156xf32>
    %67 = vector.extract_strided_slice %21 {offsets = [12, 0], sizes = [16, 156], strides = [1, 1]} : vector<32x156xf32> to vector<16x156xf32>
    %c99 = arith.constant 99 : index
    %c0_41 = arith.constant 0 : index
    %68 = vector.load %arg1[%c99, %c0_41] : memref<121x156xf32, #tpu.memory_space<vmem>>, vector<1x156xf32>
    %69 = vector.broadcast %68 : vector<1x156xf32> to vector<16x156xf32>
    %70 = arith.mulf %67, %69 : vector<16x156xf32>
    %71 = arith.addf %66, %70 : vector<16x156xf32>
    %72 = vector.extract_strided_slice %21 {offsets = [13, 0], sizes = [16, 156], strides = [1, 1]} : vector<32x156xf32> to vector<16x156xf32>
    %c110 = arith.constant 110 : index
    %c0_42 = arith.constant 0 : index
    %73 = vector.load %arg1[%c110, %c0_42] : memref<121x156xf32, #tpu.memory_space<vmem>>, vector<1x156xf32>
    %74 = vector.broadcast %73 : vector<1x156xf32> to vector<16x156xf32>
    %75 = arith.mulf %72, %74 : vector<16x156xf32>
    %76 = arith.addf %71, %75 : vector<16x156xf32>
    %c0_43 = arith.constant 0 : index
    %c1_44 = arith.constant 1 : index
    %77 = vector.load %arg5[%c0_43, %c1_44] : memref<32x166xf32, #tpu.memory_space<vmem>>, vector<32x156xf32>
    %78 = vector.extract_strided_slice %77 {offsets = [3, 0], sizes = [16, 156], strides = [1, 1]} : vector<32x156xf32> to vector<16x156xf32>
    %c1_45 = arith.constant 1 : index
    %c0_46 = arith.constant 0 : index
    %79 = vector.load %arg1[%c1_45, %c0_46] : memref<121x156xf32, #tpu.memory_space<vmem>>, vector<1x156xf32>
    %80 = vector.broadcast %79 : vector<1x156xf32> to vector<16x156xf32>
    %81 = arith.mulf %78, %80 : vector<16x156xf32>
    %82 = arith.addf %76, %81 : vector<16x156xf32>
    %83 = vector.extract_strided_slice %77 {offsets = [4, 0], sizes = [16, 156], strides = [1, 1]} : vector<32x156xf32> to vector<16x156xf32>
    %c12 = arith.constant 12 : index
    %c0_47 = arith.constant 0 : index
    %84 = vector.load %arg1[%c12, %c0_47] : memref<121x156xf32, #tpu.memory_space<vmem>>, vector<1x156xf32>
    %85 = vector.broadcast %84 : vector<1x156xf32> to vector<16x156xf32>
    %86 = arith.mulf %83, %85 : vector<16x156xf32>
    %87 = arith.addf %82, %86 : vector<16x156xf32>
    %88 = vector.extract_strided_slice %77 {offsets = [5, 0], sizes = [16, 156], strides = [1, 1]} : vector<32x156xf32> to vector<16x156xf32>
    %c23 = arith.constant 23 : index
    %c0_48 = arith.constant 0 : index
    %89 = vector.load %arg1[%c23, %c0_48] : memref<121x156xf32, #tpu.memory_space<vmem>>, vector<1x156xf32>
    %90 = vector.broadcast %89 : vector<1x156xf32> to vector<16x156xf32>
    %91 = arith.mulf %88, %90 : vector<16x156xf32>
    %92 = arith.addf %87, %91 : vector<16x156xf32>
    %93 = vector.extract_strided_slice %77 {offsets = [6, 0], sizes = [16, 156], strides = [1, 1]} : vector<32x156xf32> to vector<16x156xf32>
    %c34 = arith.constant 34 : index
    %c0_49 = arith.constant 0 : index
    %94 = vector.load %arg1[%c34, %c0_49] : memref<121x156xf32, #tpu.memory_space<vmem>>, vector<1x156xf32>
    %95 = vector.broadcast %94 : vector<1x156xf32> to vector<16x156xf32>
    %96 = arith.mulf %93, %95 : vector<16x156xf32>
    %97 = arith.addf %92, %96 : vector<16x156xf32>
    %98 = vector.extract_strided_slice %77 {offsets = [7, 0], sizes = [16, 156], strides = [1, 1]} : vector<32x156xf32> to vector<16x156xf32>
    %c45 = arith.constant 45 : index
    %c0_50 = arith.constant 0 : index
    %99 = vector.load %arg1[%c45, %c0_50] : memref<121x156xf32, #tpu.memory_space<vmem>>, vector<1x156xf32>
    %100 = vector.broadcast %99 : vector<1x156xf32> to vector<16x156xf32>
    %101 = arith.mulf %98, %100 : vector<16x156xf32>
    %102 = arith.addf %97, %101 : vector<16x156xf32>
    %103 = vector.extract_strided_slice %77 {offsets = [8, 0], sizes = [16, 156], strides = [1, 1]} : vector<32x156xf32> to vector<16x156xf32>
    %c56 = arith.constant 56 : index
    %c0_51 = arith.constant 0 : index
    %104 = vector.load %arg1[%c56, %c0_51] : memref<121x156xf32, #tpu.memory_space<vmem>>, vector<1x156xf32>
    %105 = vector.broadcast %104 : vector<1x156xf32> to vector<16x156xf32>
    %106 = arith.mulf %103, %105 : vector<16x156xf32>
    %107 = arith.addf %102, %106 : vector<16x156xf32>
    %108 = vector.extract_strided_slice %77 {offsets = [9, 0], sizes = [16, 156], strides = [1, 1]} : vector<32x156xf32> to vector<16x156xf32>
    %c67 = arith.constant 67 : index
    %c0_52 = arith.constant 0 : index
    %109 = vector.load %arg1[%c67, %c0_52] : memref<121x156xf32, #tpu.memory_space<vmem>>, vector<1x156xf32>
    %110 = vector.broadcast %109 : vector<1x156xf32> to vector<16x156xf32>
    %111 = arith.mulf %108, %110 : vector<16x156xf32>
    %112 = arith.addf %107, %111 : vector<16x156xf32>
    %113 = vector.extract_strided_slice %77 {offsets = [10, 0], sizes = [16, 156], strides = [1, 1]} : vector<32x156xf32> to vector<16x156xf32>
    %c78 = arith.constant 78 : index
    %c0_53 = arith.constant 0 : index
    %114 = vector.load %arg1[%c78, %c0_53] : memref<121x156xf32, #tpu.memory_space<vmem>>, vector<1x156xf32>
    %115 = vector.broadcast %114 : vector<1x156xf32> to vector<16x156xf32>
    %116 = arith.mulf %113, %115 : vector<16x156xf32>
    %117 = arith.addf %112, %116 : vector<16x156xf32>
    %118 = vector.extract_strided_slice %77 {offsets = [11, 0], sizes = [16, 156], strides = [1, 1]} : vector<32x156xf32> to vector<16x156xf32>
    %c89 = arith.constant 89 : index
    %c0_54 = arith.constant 0 : index
    %119 = vector.load %arg1[%c89, %c0_54] : memref<121x156xf32, #tpu.memory_space<vmem>>, vector<1x156xf32>
    %120 = vector.broadcast %119 : vector<1x156xf32> to vector<16x156xf32>
    %121 = arith.mulf %118, %120 : vector<16x156xf32>
    %122 = arith.addf %117, %121 : vector<16x156xf32>
    %123 = vector.extract_strided_slice %77 {offsets = [12, 0], sizes = [16, 156], strides = [1, 1]} : vector<32x156xf32> to vector<16x156xf32>
    %c100 = arith.constant 100 : index
    %c0_55 = arith.constant 0 : index
    %124 = vector.load %arg1[%c100, %c0_55] : memref<121x156xf32, #tpu.memory_space<vmem>>, vector<1x156xf32>
    %125 = vector.broadcast %124 : vector<1x156xf32> to vector<16x156xf32>
    %126 = arith.mulf %123, %125 : vector<16x156xf32>
    %127 = arith.addf %122, %126 : vector<16x156xf32>
    %128 = vector.extract_strided_slice %77 {offsets = [13, 0], sizes = [16, 156], strides = [1, 1]} : vector<32x156xf32> to vector<16x156xf32>
    %c111 = arith.constant 111 : index
    %c0_56 = arith.constant 0 : index
    %129 = vector.load %arg1[%c111, %c0_56] : memref<121x156xf32, #tpu.memory_space<vmem>>, vector<1x156xf32>
    %130 = vector.broadcast %129 : vector<1x156xf32> to vector<16x156xf32>
    %131 = arith.mulf %128, %130 : vector<16x156xf32>
    %132 = arith.addf %127, %131 : vector<16x156xf32>
    %c0_57 = arith.constant 0 : index
    %c2_58 = arith.constant 2 : index
    %133 = vector.load %arg5[%c0_57, %c2_58] : memref<32x166xf32, #tpu.memory_space<vmem>>, vector<32x156xf32>
    %134 = vector.extract_strided_slice %133 {offsets = [3, 0], sizes = [16, 156], strides = [1, 1]} : vector<32x156xf32> to vector<16x156xf32>
    %c2_59 = arith.constant 2 : index
    %c0_60 = arith.constant 0 : index
    %135 = vector.load %arg1[%c2_59, %c0_60] : memref<121x156xf32, #tpu.memory_space<vmem>>, vector<1x156xf32>
    %136 = vector.broadcast %135 : vector<1x156xf32> to vector<16x156xf32>
    %137 = arith.mulf %134, %136 : vector<16x156xf32>
    %138 = arith.addf %132, %137 : vector<16x156xf32>
    %139 = vector.extract_strided_slice %133 {offsets = [4, 0], sizes = [16, 156], strides = [1, 1]} : vector<32x156xf32> to vector<16x156xf32>
    %c13 = arith.constant 13 : index
    %c0_61 = arith.constant 0 : index
    %140 = vector.load %arg1[%c13, %c0_61] : memref<121x156xf32, #tpu.memory_space<vmem>>, vector<1x156xf32>
    %141 = vector.broadcast %140 : vector<1x156xf32> to vector<16x156xf32>
    %142 = arith.mulf %139, %141 : vector<16x156xf32>
    %143 = arith.addf %138, %142 : vector<16x156xf32>
    %144 = vector.extract_strided_slice %133 {offsets = [5, 0], sizes = [16, 156], strides = [1, 1]} : vector<32x156xf32> to vector<16x156xf32>
    %c24 = arith.constant 24 : index
    %c0_62 = arith.constant 0 : index
    %145 = vector.load %arg1[%c24, %c0_62] : memref<121x156xf32, #tpu.memory_space<vmem>>, vector<1x156xf32>
    %146 = vector.broadcast %145 : vector<1x156xf32> to vector<16x156xf32>
    %147 = arith.mulf %144, %146 : vector<16x156xf32>
    %148 = arith.addf %143, %147 : vector<16x156xf32>
    %149 = vector.extract_strided_slice %133 {offsets = [6, 0], sizes = [16, 156], strides = [1, 1]} : vector<32x156xf32> to vector<16x156xf32>
    %c35 = arith.constant 35 : index
    %c0_63 = arith.constant 0 : index
    %150 = vector.load %arg1[%c35, %c0_63] : memref<121x156xf32, #tpu.memory_space<vmem>>, vector<1x156xf32>
    %151 = vector.broadcast %150 : vector<1x156xf32> to vector<16x156xf32>
    %152 = arith.mulf %149, %151 : vector<16x156xf32>
    %153 = arith.addf %148, %152 : vector<16x156xf32>
    %154 = vector.extract_strided_slice %133 {offsets = [7, 0], sizes = [16, 156], strides = [1, 1]} : vector<32x156xf32> to vector<16x156xf32>
    %c46 = arith.constant 46 : index
    %c0_64 = arith.constant 0 : index
    %155 = vector.load %arg1[%c46, %c0_64] : memref<121x156xf32, #tpu.memory_space<vmem>>, vector<1x156xf32>
    %156 = vector.broadcast %155 : vector<1x156xf32> to vector<16x156xf32>
    %157 = arith.mulf %154, %156 : vector<16x156xf32>
    %158 = arith.addf %153, %157 : vector<16x156xf32>
    %159 = vector.extract_strided_slice %133 {offsets = [8, 0], sizes = [16, 156], strides = [1, 1]} : vector<32x156xf32> to vector<16x156xf32>
    %c57_65 = arith.constant 57 : index
    %c0_66 = arith.constant 0 : index
    %160 = vector.load %arg1[%c57_65, %c0_66] : memref<121x156xf32, #tpu.memory_space<vmem>>, vector<1x156xf32>
    %161 = vector.broadcast %160 : vector<1x156xf32> to vector<16x156xf32>
    %162 = arith.mulf %159, %161 : vector<16x156xf32>
    %163 = arith.addf %158, %162 : vector<16x156xf32>
    %164 = vector.extract_strided_slice %133 {offsets = [9, 0], sizes = [16, 156], strides = [1, 1]} : vector<32x156xf32> to vector<16x156xf32>
    %c68 = arith.constant 68 : index
    %c0_67 = arith.constant 0 : index
    %165 = vector.load %arg1[%c68, %c0_67] : memref<121x156xf32, #tpu.memory_space<vmem>>, vector<1x156xf32>
    %166 = vector.broadcast %165 : vector<1x156xf32> to vector<16x156xf32>
    %167 = arith.mulf %164, %166 : vector<16x156xf32>
    %168 = arith.addf %163, %167 : vector<16x156xf32>
    %169 = vector.extract_strided_slice %133 {offsets = [10, 0], sizes = [16, 156], strides = [1, 1]} : vector<32x156xf32> to vector<16x156xf32>
    %c79 = arith.constant 79 : index
    %c0_68 = arith.constant 0 : index
    %170 = vector.load %arg1[%c79, %c0_68] : memref<121x156xf32, #tpu.memory_space<vmem>>, vector<1x156xf32>
    %171 = vector.broadcast %170 : vector<1x156xf32> to vector<16x156xf32>
    %172 = arith.mulf %169, %171 : vector<16x156xf32>
    %173 = arith.addf %168, %172 : vector<16x156xf32>
    %174 = vector.extract_strided_slice %133 {offsets = [11, 0], sizes = [16, 156], strides = [1, 1]} : vector<32x156xf32> to vector<16x156xf32>
    %c90 = arith.constant 90 : index
    %c0_69 = arith.constant 0 : index
    %175 = vector.load %arg1[%c90, %c0_69] : memref<121x156xf32, #tpu.memory_space<vmem>>, vector<1x156xf32>
    %176 = vector.broadcast %175 : vector<1x156xf32> to vector<16x156xf32>
    %177 = arith.mulf %174, %176 : vector<16x156xf32>
    %178 = arith.addf %173, %177 : vector<16x156xf32>
    %179 = vector.extract_strided_slice %133 {offsets = [12, 0], sizes = [16, 156], strides = [1, 1]} : vector<32x156xf32> to vector<16x156xf32>
    %c101 = arith.constant 101 : index
    %c0_70 = arith.constant 0 : index
    %180 = vector.load %arg1[%c101, %c0_70] : memref<121x156xf32, #tpu.memory_space<vmem>>, vector<1x156xf32>
    %181 = vector.broadcast %180 : vector<1x156xf32> to vector<16x156xf32>
    %182 = arith.mulf %179, %181 : vector<16x156xf32>
    %183 = arith.addf %178, %182 : vector<16x156xf32>
    %184 = vector.extract_strided_slice %133 {offsets = [13, 0], sizes = [16, 156], strides = [1, 1]} : vector<32x156xf32> to vector<16x156xf32>
    %c112 = arith.constant 112 : index
    %c0_71 = arith.constant 0 : index
    %185 = vector.load %arg1[%c112, %c0_71] : memref<121x156xf32, #tpu.memory_space<vmem>>, vector<1x156xf32>
    %186 = vector.broadcast %185 : vector<1x156xf32> to vector<16x156xf32>
    %187 = arith.mulf %184, %186 : vector<16x156xf32>
    %188 = arith.addf %183, %187 : vector<16x156xf32>
    %c0_72 = arith.constant 0 : index
    %c3 = arith.constant 3 : index
    %189 = vector.load %arg5[%c0_72, %c3] : memref<32x166xf32, #tpu.memory_space<vmem>>, vector<32x156xf32>
    %190 = vector.extract_strided_slice %189 {offsets = [3, 0], sizes = [16, 156], strides = [1, 1]} : vector<32x156xf32> to vector<16x156xf32>
    %c3_73 = arith.constant 3 : index
    %c0_74 = arith.constant 0 : index
    %191 = vector.load %arg1[%c3_73, %c0_74] : memref<121x156xf32, #tpu.memory_space<vmem>>, vector<1x156xf32>
    %192 = vector.broadcast %191 : vector<1x156xf32> to vector<16x156xf32>
    %193 = arith.mulf %190, %192 : vector<16x156xf32>
    %194 = arith.addf %188, %193 : vector<16x156xf32>
    %195 = vector.extract_strided_slice %189 {offsets = [4, 0], sizes = [16, 156], strides = [1, 1]} : vector<32x156xf32> to vector<16x156xf32>
    %c14 = arith.constant 14 : index
    %c0_75 = arith.constant 0 : index
    %196 = vector.load %arg1[%c14, %c0_75] : memref<121x156xf32, #tpu.memory_space<vmem>>, vector<1x156xf32>
    %197 = vector.broadcast %196 : vector<1x156xf32> to vector<16x156xf32>
    %198 = arith.mulf %195, %197 : vector<16x156xf32>
    %199 = arith.addf %194, %198 : vector<16x156xf32>
    %200 = vector.extract_strided_slice %189 {offsets = [5, 0], sizes = [16, 156], strides = [1, 1]} : vector<32x156xf32> to vector<16x156xf32>
    %c25 = arith.constant 25 : index
    %c0_76 = arith.constant 0 : index
    %201 = vector.load %arg1[%c25, %c0_76] : memref<121x156xf32, #tpu.memory_space<vmem>>, vector<1x156xf32>
    %202 = vector.broadcast %201 : vector<1x156xf32> to vector<16x156xf32>
    %203 = arith.mulf %200, %202 : vector<16x156xf32>
    %204 = arith.addf %199, %203 : vector<16x156xf32>
    %205 = vector.extract_strided_slice %189 {offsets = [6, 0], sizes = [16, 156], strides = [1, 1]} : vector<32x156xf32> to vector<16x156xf32>
    %c36 = arith.constant 36 : index
    %c0_77 = arith.constant 0 : index
    %206 = vector.load %arg1[%c36, %c0_77] : memref<121x156xf32, #tpu.memory_space<vmem>>, vector<1x156xf32>
    %207 = vector.broadcast %206 : vector<1x156xf32> to vector<16x156xf32>
    %208 = arith.mulf %205, %207 : vector<16x156xf32>
    %209 = arith.addf %204, %208 : vector<16x156xf32>
    %210 = vector.extract_strided_slice %189 {offsets = [7, 0], sizes = [16, 156], strides = [1, 1]} : vector<32x156xf32> to vector<16x156xf32>
    %c47 = arith.constant 47 : index
    %c0_78 = arith.constant 0 : index
    %211 = vector.load %arg1[%c47, %c0_78] : memref<121x156xf32, #tpu.memory_space<vmem>>, vector<1x156xf32>
    %212 = vector.broadcast %211 : vector<1x156xf32> to vector<16x156xf32>
    %213 = arith.mulf %210, %212 : vector<16x156xf32>
    %214 = arith.addf %209, %213 : vector<16x156xf32>
    %215 = vector.extract_strided_slice %189 {offsets = [8, 0], sizes = [16, 156], strides = [1, 1]} : vector<32x156xf32> to vector<16x156xf32>
    %c58 = arith.constant 58 : index
    %c0_79 = arith.constant 0 : index
    %216 = vector.load %arg1[%c58, %c0_79] : memref<121x156xf32, #tpu.memory_space<vmem>>, vector<1x156xf32>
    %217 = vector.broadcast %216 : vector<1x156xf32> to vector<16x156xf32>
    %218 = arith.mulf %215, %217 : vector<16x156xf32>
    %219 = arith.addf %214, %218 : vector<16x156xf32>
    %220 = vector.extract_strided_slice %189 {offsets = [9, 0], sizes = [16, 156], strides = [1, 1]} : vector<32x156xf32> to vector<16x156xf32>
    %c69 = arith.constant 69 : index
    %c0_80 = arith.constant 0 : index
    %221 = vector.load %arg1[%c69, %c0_80] : memref<121x156xf32, #tpu.memory_space<vmem>>, vector<1x156xf32>
    %222 = vector.broadcast %221 : vector<1x156xf32> to vector<16x156xf32>
    %223 = arith.mulf %220, %222 : vector<16x156xf32>
    %224 = arith.addf %219, %223 : vector<16x156xf32>
    %225 = vector.extract_strided_slice %189 {offsets = [10, 0], sizes = [16, 156], strides = [1, 1]} : vector<32x156xf32> to vector<16x156xf32>
    %c80 = arith.constant 80 : index
    %c0_81 = arith.constant 0 : index
    %226 = vector.load %arg1[%c80, %c0_81] : memref<121x156xf32, #tpu.memory_space<vmem>>, vector<1x156xf32>
    %227 = vector.broadcast %226 : vector<1x156xf32> to vector<16x156xf32>
    %228 = arith.mulf %225, %227 : vector<16x156xf32>
    %229 = arith.addf %224, %228 : vector<16x156xf32>
    %230 = vector.extract_strided_slice %189 {offsets = [11, 0], sizes = [16, 156], strides = [1, 1]} : vector<32x156xf32> to vector<16x156xf32>
    %c91 = arith.constant 91 : index
    %c0_82 = arith.constant 0 : index
    %231 = vector.load %arg1[%c91, %c0_82] : memref<121x156xf32, #tpu.memory_space<vmem>>, vector<1x156xf32>
    %232 = vector.broadcast %231 : vector<1x156xf32> to vector<16x156xf32>
    %233 = arith.mulf %230, %232 : vector<16x156xf32>
    %234 = arith.addf %229, %233 : vector<16x156xf32>
    %235 = vector.extract_strided_slice %189 {offsets = [12, 0], sizes = [16, 156], strides = [1, 1]} : vector<32x156xf32> to vector<16x156xf32>
    %c102 = arith.constant 102 : index
    %c0_83 = arith.constant 0 : index
    %236 = vector.load %arg1[%c102, %c0_83] : memref<121x156xf32, #tpu.memory_space<vmem>>, vector<1x156xf32>
    %237 = vector.broadcast %236 : vector<1x156xf32> to vector<16x156xf32>
    %238 = arith.mulf %235, %237 : vector<16x156xf32>
    %239 = arith.addf %234, %238 : vector<16x156xf32>
    %240 = vector.extract_strided_slice %189 {offsets = [13, 0], sizes = [16, 156], strides = [1, 1]} : vector<32x156xf32> to vector<16x156xf32>
    %c113 = arith.constant 113 : index
    %c0_84 = arith.constant 0 : index
    %241 = vector.load %arg1[%c113, %c0_84] : memref<121x156xf32, #tpu.memory_space<vmem>>, vector<1x156xf32>
    %242 = vector.broadcast %241 : vector<1x156xf32> to vector<16x156xf32>
    %243 = arith.mulf %240, %242 : vector<16x156xf32>
    %244 = arith.addf %239, %243 : vector<16x156xf32>
    %c0_85 = arith.constant 0 : index
    %c4 = arith.constant 4 : index
    %245 = vector.load %arg5[%c0_85, %c4] : memref<32x166xf32, #tpu.memory_space<vmem>>, vector<32x156xf32>
    %246 = vector.extract_strided_slice %245 {offsets = [3, 0], sizes = [16, 156], strides = [1, 1]} : vector<32x156xf32> to vector<16x156xf32>
    %c4_86 = arith.constant 4 : index
    %c0_87 = arith.constant 0 : index
    %247 = vector.load %arg1[%c4_86, %c0_87] : memref<121x156xf32, #tpu.memory_space<vmem>>, vector<1x156xf32>
    %248 = vector.broadcast %247 : vector<1x156xf32> to vector<16x156xf32>
    %249 = arith.mulf %246, %248 : vector<16x156xf32>
    %250 = arith.addf %244, %249 : vector<16x156xf32>
    %251 = vector.extract_strided_slice %245 {offsets = [4, 0], sizes = [16, 156], strides = [1, 1]} : vector<32x156xf32> to vector<16x156xf32>
    %c15 = arith.constant 15 : index
    %c0_88 = arith.constant 0 : index
    %252 = vector.load %arg1[%c15, %c0_88] : memref<121x156xf32, #tpu.memory_space<vmem>>, vector<1x156xf32>
    %253 = vector.broadcast %252 : vector<1x156xf32> to vector<16x156xf32>
    %254 = arith.mulf %251, %253 : vector<16x156xf32>
    %255 = arith.addf %250, %254 : vector<16x156xf32>
    %256 = vector.extract_strided_slice %245 {offsets = [5, 0], sizes = [16, 156], strides = [1, 1]} : vector<32x156xf32> to vector<16x156xf32>
    %c26 = arith.constant 26 : index
    %c0_89 = arith.constant 0 : index
    %257 = vector.load %arg1[%c26, %c0_89] : memref<121x156xf32, #tpu.memory_space<vmem>>, vector<1x156xf32>
    %258 = vector.broadcast %257 : vector<1x156xf32> to vector<16x156xf32>
    %259 = arith.mulf %256, %258 : vector<16x156xf32>
    %260 = arith.addf %255, %259 : vector<16x156xf32>
    %261 = vector.extract_strided_slice %245 {offsets = [6, 0], sizes = [16, 156], strides = [1, 1]} : vector<32x156xf32> to vector<16x156xf32>
    %c37 = arith.constant 37 : index
    %c0_90 = arith.constant 0 : index
    %262 = vector.load %arg1[%c37, %c0_90] : memref<121x156xf32, #tpu.memory_space<vmem>>, vector<1x156xf32>
    %263 = vector.broadcast %262 : vector<1x156xf32> to vector<16x156xf32>
    %264 = arith.mulf %261, %263 : vector<16x156xf32>
    %265 = arith.addf %260, %264 : vector<16x156xf32>
    %266 = vector.extract_strided_slice %245 {offsets = [7, 0], sizes = [16, 156], strides = [1, 1]} : vector<32x156xf32> to vector<16x156xf32>
    %c48 = arith.constant 48 : index
    %c0_91 = arith.constant 0 : index
    %267 = vector.load %arg1[%c48, %c0_91] : memref<121x156xf32, #tpu.memory_space<vmem>>, vector<1x156xf32>
    %268 = vector.broadcast %267 : vector<1x156xf32> to vector<16x156xf32>
    %269 = arith.mulf %266, %268 : vector<16x156xf32>
    %270 = arith.addf %265, %269 : vector<16x156xf32>
    %271 = vector.extract_strided_slice %245 {offsets = [8, 0], sizes = [16, 156], strides = [1, 1]} : vector<32x156xf32> to vector<16x156xf32>
    %c59 = arith.constant 59 : index
    %c0_92 = arith.constant 0 : index
    %272 = vector.load %arg1[%c59, %c0_92] : memref<121x156xf32, #tpu.memory_space<vmem>>, vector<1x156xf32>
    %273 = vector.broadcast %272 : vector<1x156xf32> to vector<16x156xf32>
    %274 = arith.mulf %271, %273 : vector<16x156xf32>
    %275 = arith.addf %270, %274 : vector<16x156xf32>
    %276 = vector.extract_strided_slice %245 {offsets = [9, 0], sizes = [16, 156], strides = [1, 1]} : vector<32x156xf32> to vector<16x156xf32>
    %c70 = arith.constant 70 : index
    %c0_93 = arith.constant 0 : index
    %277 = vector.load %arg1[%c70, %c0_93] : memref<121x156xf32, #tpu.memory_space<vmem>>, vector<1x156xf32>
    %278 = vector.broadcast %277 : vector<1x156xf32> to vector<16x156xf32>
    %279 = arith.mulf %276, %278 : vector<16x156xf32>
    %280 = arith.addf %275, %279 : vector<16x156xf32>
    %281 = vector.extract_strided_slice %245 {offsets = [10, 0], sizes = [16, 156], strides = [1, 1]} : vector<32x156xf32> to vector<16x156xf32>
    %c81 = arith.constant 81 : index
    %c0_94 = arith.constant 0 : index
    %282 = vector.load %arg1[%c81, %c0_94] : memref<121x156xf32, #tpu.memory_space<vmem>>, vector<1x156xf32>
    %283 = vector.broadcast %282 : vector<1x156xf32> to vector<16x156xf32>
    %284 = arith.mulf %281, %283 : vector<16x156xf32>
    %285 = arith.addf %280, %284 : vector<16x156xf32>
    %286 = vector.extract_strided_slice %245 {offsets = [11, 0], sizes = [16, 156], strides = [1, 1]} : vector<32x156xf32> to vector<16x156xf32>
    %c92 = arith.constant 92 : index
    %c0_95 = arith.constant 0 : index
    %287 = vector.load %arg1[%c92, %c0_95] : memref<121x156xf32, #tpu.memory_space<vmem>>, vector<1x156xf32>
    %288 = vector.broadcast %287 : vector<1x156xf32> to vector<16x156xf32>
    %289 = arith.mulf %286, %288 : vector<16x156xf32>
    %290 = arith.addf %285, %289 : vector<16x156xf32>
    %291 = vector.extract_strided_slice %245 {offsets = [12, 0], sizes = [16, 156], strides = [1, 1]} : vector<32x156xf32> to vector<16x156xf32>
    %c103 = arith.constant 103 : index
    %c0_96 = arith.constant 0 : index
    %292 = vector.load %arg1[%c103, %c0_96] : memref<121x156xf32, #tpu.memory_space<vmem>>, vector<1x156xf32>
    %293 = vector.broadcast %292 : vector<1x156xf32> to vector<16x156xf32>
    %294 = arith.mulf %291, %293 : vector<16x156xf32>
    %295 = arith.addf %290, %294 : vector<16x156xf32>
    %296 = vector.extract_strided_slice %245 {offsets = [13, 0], sizes = [16, 156], strides = [1, 1]} : vector<32x156xf32> to vector<16x156xf32>
    %c114 = arith.constant 114 : index
    %c0_97 = arith.constant 0 : index
    %297 = vector.load %arg1[%c114, %c0_97] : memref<121x156xf32, #tpu.memory_space<vmem>>, vector<1x156xf32>
    %298 = vector.broadcast %297 : vector<1x156xf32> to vector<16x156xf32>
    %299 = arith.mulf %296, %298 : vector<16x156xf32>
    %300 = arith.addf %295, %299 : vector<16x156xf32>
    %c0_98 = arith.constant 0 : index
    %c5_99 = arith.constant 5 : index
    %301 = vector.load %arg5[%c0_98, %c5_99] : memref<32x166xf32, #tpu.memory_space<vmem>>, vector<32x156xf32>
    %302 = vector.extract_strided_slice %301 {offsets = [3, 0], sizes = [16, 156], strides = [1, 1]} : vector<32x156xf32> to vector<16x156xf32>
    %c5_100 = arith.constant 5 : index
    %c0_101 = arith.constant 0 : index
    %303 = vector.load %arg1[%c5_100, %c0_101] : memref<121x156xf32, #tpu.memory_space<vmem>>, vector<1x156xf32>
    %304 = vector.broadcast %303 : vector<1x156xf32> to vector<16x156xf32>
    %305 = arith.mulf %302, %304 : vector<16x156xf32>
    %306 = arith.addf %300, %305 : vector<16x156xf32>
    %307 = vector.extract_strided_slice %301 {offsets = [4, 0], sizes = [16, 156], strides = [1, 1]} : vector<32x156xf32> to vector<16x156xf32>
    %c16 = arith.constant 16 : index
    %c0_102 = arith.constant 0 : index
    %308 = vector.load %arg1[%c16, %c0_102] : memref<121x156xf32, #tpu.memory_space<vmem>>, vector<1x156xf32>
    %309 = vector.broadcast %308 : vector<1x156xf32> to vector<16x156xf32>
    %310 = arith.mulf %307, %309 : vector<16x156xf32>
    %311 = arith.addf %306, %310 : vector<16x156xf32>
    %312 = vector.extract_strided_slice %301 {offsets = [5, 0], sizes = [16, 156], strides = [1, 1]} : vector<32x156xf32> to vector<16x156xf32>
    %c27 = arith.constant 27 : index
    %c0_103 = arith.constant 0 : index
    %313 = vector.load %arg1[%c27, %c0_103] : memref<121x156xf32, #tpu.memory_space<vmem>>, vector<1x156xf32>
    %314 = vector.broadcast %313 : vector<1x156xf32> to vector<16x156xf32>
    %315 = arith.mulf %312, %314 : vector<16x156xf32>
    %316 = arith.addf %311, %315 : vector<16x156xf32>
    %317 = vector.extract_strided_slice %301 {offsets = [6, 0], sizes = [16, 156], strides = [1, 1]} : vector<32x156xf32> to vector<16x156xf32>
    %c38 = arith.constant 38 : index
    %c0_104 = arith.constant 0 : index
    %318 = vector.load %arg1[%c38, %c0_104] : memref<121x156xf32, #tpu.memory_space<vmem>>, vector<1x156xf32>
    %319 = vector.broadcast %318 : vector<1x156xf32> to vector<16x156xf32>
    %320 = arith.mulf %317, %319 : vector<16x156xf32>
    %321 = arith.addf %316, %320 : vector<16x156xf32>
    %322 = vector.extract_strided_slice %301 {offsets = [7, 0], sizes = [16, 156], strides = [1, 1]} : vector<32x156xf32> to vector<16x156xf32>
    %c49 = arith.constant 49 : index
    %c0_105 = arith.constant 0 : index
    %323 = vector.load %arg1[%c49, %c0_105] : memref<121x156xf32, #tpu.memory_space<vmem>>, vector<1x156xf32>
    %324 = vector.broadcast %323 : vector<1x156xf32> to vector<16x156xf32>
    %325 = arith.mulf %322, %324 : vector<16x156xf32>
    %326 = arith.addf %321, %325 : vector<16x156xf32>
    %327 = vector.extract_strided_slice %301 {offsets = [8, 0], sizes = [16, 156], strides = [1, 1]} : vector<32x156xf32> to vector<16x156xf32>
    %c60 = arith.constant 60 : index
    %c0_106 = arith.constant 0 : index
    %328 = vector.load %arg1[%c60, %c0_106] : memref<121x156xf32, #tpu.memory_space<vmem>>, vector<1x156xf32>
    %329 = vector.broadcast %328 : vector<1x156xf32> to vector<16x156xf32>
    %330 = arith.mulf %327, %329 : vector<16x156xf32>
    %331 = arith.addf %326, %330 : vector<16x156xf32>
    %332 = vector.extract_strided_slice %301 {offsets = [9, 0], sizes = [16, 156], strides = [1, 1]} : vector<32x156xf32> to vector<16x156xf32>
    %c71 = arith.constant 71 : index
    %c0_107 = arith.constant 0 : index
    %333 = vector.load %arg1[%c71, %c0_107] : memref<121x156xf32, #tpu.memory_space<vmem>>, vector<1x156xf32>
    %334 = vector.broadcast %333 : vector<1x156xf32> to vector<16x156xf32>
    %335 = arith.mulf %332, %334 : vector<16x156xf32>
    %336 = arith.addf %331, %335 : vector<16x156xf32>
    %337 = vector.extract_strided_slice %301 {offsets = [10, 0], sizes = [16, 156], strides = [1, 1]} : vector<32x156xf32> to vector<16x156xf32>
    %c82 = arith.constant 82 : index
    %c0_108 = arith.constant 0 : index
    %338 = vector.load %arg1[%c82, %c0_108] : memref<121x156xf32, #tpu.memory_space<vmem>>, vector<1x156xf32>
    %339 = vector.broadcast %338 : vector<1x156xf32> to vector<16x156xf32>
    %340 = arith.mulf %337, %339 : vector<16x156xf32>
    %341 = arith.addf %336, %340 : vector<16x156xf32>
    %342 = vector.extract_strided_slice %301 {offsets = [11, 0], sizes = [16, 156], strides = [1, 1]} : vector<32x156xf32> to vector<16x156xf32>
    %c93 = arith.constant 93 : index
    %c0_109 = arith.constant 0 : index
    %343 = vector.load %arg1[%c93, %c0_109] : memref<121x156xf32, #tpu.memory_space<vmem>>, vector<1x156xf32>
    %344 = vector.broadcast %343 : vector<1x156xf32> to vector<16x156xf32>
    %345 = arith.mulf %342, %344 : vector<16x156xf32>
    %346 = arith.addf %341, %345 : vector<16x156xf32>
    %347 = vector.extract_strided_slice %301 {offsets = [12, 0], sizes = [16, 156], strides = [1, 1]} : vector<32x156xf32> to vector<16x156xf32>
    %c104 = arith.constant 104 : index
    %c0_110 = arith.constant 0 : index
    %348 = vector.load %arg1[%c104, %c0_110] : memref<121x156xf32, #tpu.memory_space<vmem>>, vector<1x156xf32>
    %349 = vector.broadcast %348 : vector<1x156xf32> to vector<16x156xf32>
    %350 = arith.mulf %347, %349 : vector<16x156xf32>
    %351 = arith.addf %346, %350 : vector<16x156xf32>
    %352 = vector.extract_strided_slice %301 {offsets = [13, 0], sizes = [16, 156], strides = [1, 1]} : vector<32x156xf32> to vector<16x156xf32>
    %c115 = arith.constant 115 : index
    %c0_111 = arith.constant 0 : index
    %353 = vector.load %arg1[%c115, %c0_111] : memref<121x156xf32, #tpu.memory_space<vmem>>, vector<1x156xf32>
    %354 = vector.broadcast %353 : vector<1x156xf32> to vector<16x156xf32>
    %355 = arith.mulf %352, %354 : vector<16x156xf32>
    %356 = arith.addf %351, %355 : vector<16x156xf32>
    %c0_112 = arith.constant 0 : index
    %c6 = arith.constant 6 : index
    %357 = vector.load %arg5[%c0_112, %c6] : memref<32x166xf32, #tpu.memory_space<vmem>>, vector<32x156xf32>
    %358 = vector.extract_strided_slice %357 {offsets = [3, 0], sizes = [16, 156], strides = [1, 1]} : vector<32x156xf32> to vector<16x156xf32>
    %c6_113 = arith.constant 6 : index
    %c0_114 = arith.constant 0 : index
    %359 = vector.load %arg1[%c6_113, %c0_114] : memref<121x156xf32, #tpu.memory_space<vmem>>, vector<1x156xf32>
    %360 = vector.broadcast %359 : vector<1x156xf32> to vector<16x156xf32>
    %361 = arith.mulf %358, %360 : vector<16x156xf32>
    %362 = arith.addf %356, %361 : vector<16x156xf32>
    %363 = vector.extract_strided_slice %357 {offsets = [4, 0], sizes = [16, 156], strides = [1, 1]} : vector<32x156xf32> to vector<16x156xf32>
    %c17 = arith.constant 17 : index
    %c0_115 = arith.constant 0 : index
    %364 = vector.load %arg1[%c17, %c0_115] : memref<121x156xf32, #tpu.memory_space<vmem>>, vector<1x156xf32>
    %365 = vector.broadcast %364 : vector<1x156xf32> to vector<16x156xf32>
    %366 = arith.mulf %363, %365 : vector<16x156xf32>
    %367 = arith.addf %362, %366 : vector<16x156xf32>
    %368 = vector.extract_strided_slice %357 {offsets = [5, 0], sizes = [16, 156], strides = [1, 1]} : vector<32x156xf32> to vector<16x156xf32>
    %c28 = arith.constant 28 : index
    %c0_116 = arith.constant 0 : index
    %369 = vector.load %arg1[%c28, %c0_116] : memref<121x156xf32, #tpu.memory_space<vmem>>, vector<1x156xf32>
    %370 = vector.broadcast %369 : vector<1x156xf32> to vector<16x156xf32>
    %371 = arith.mulf %368, %370 : vector<16x156xf32>
    %372 = arith.addf %367, %371 : vector<16x156xf32>
    %373 = vector.extract_strided_slice %357 {offsets = [6, 0], sizes = [16, 156], strides = [1, 1]} : vector<32x156xf32> to vector<16x156xf32>
    %c39 = arith.constant 39 : index
    %c0_117 = arith.constant 0 : index
    %374 = vector.load %arg1[%c39, %c0_117] : memref<121x156xf32, #tpu.memory_space<vmem>>, vector<1x156xf32>
    %375 = vector.broadcast %374 : vector<1x156xf32> to vector<16x156xf32>
    %376 = arith.mulf %373, %375 : vector<16x156xf32>
    %377 = arith.addf %372, %376 : vector<16x156xf32>
    %378 = vector.extract_strided_slice %357 {offsets = [7, 0], sizes = [16, 156], strides = [1, 1]} : vector<32x156xf32> to vector<16x156xf32>
    %c50 = arith.constant 50 : index
    %c0_118 = arith.constant 0 : index
    %379 = vector.load %arg1[%c50, %c0_118] : memref<121x156xf32, #tpu.memory_space<vmem>>, vector<1x156xf32>
    %380 = vector.broadcast %379 : vector<1x156xf32> to vector<16x156xf32>
    %381 = arith.mulf %378, %380 : vector<16x156xf32>
    %382 = arith.addf %377, %381 : vector<16x156xf32>
    %383 = vector.extract_strided_slice %357 {offsets = [8, 0], sizes = [16, 156], strides = [1, 1]} : vector<32x156xf32> to vector<16x156xf32>
    %c61 = arith.constant 61 : index
    %c0_119 = arith.constant 0 : index
    %384 = vector.load %arg1[%c61, %c0_119] : memref<121x156xf32, #tpu.memory_space<vmem>>, vector<1x156xf32>
    %385 = vector.broadcast %384 : vector<1x156xf32> to vector<16x156xf32>
    %386 = arith.mulf %383, %385 : vector<16x156xf32>
    %387 = arith.addf %382, %386 : vector<16x156xf32>
    %388 = vector.extract_strided_slice %357 {offsets = [9, 0], sizes = [16, 156], strides = [1, 1]} : vector<32x156xf32> to vector<16x156xf32>
    %c72 = arith.constant 72 : index
    %c0_120 = arith.constant 0 : index
    %389 = vector.load %arg1[%c72, %c0_120] : memref<121x156xf32, #tpu.memory_space<vmem>>, vector<1x156xf32>
    %390 = vector.broadcast %389 : vector<1x156xf32> to vector<16x156xf32>
    %391 = arith.mulf %388, %390 : vector<16x156xf32>
    %392 = arith.addf %387, %391 : vector<16x156xf32>
    %393 = vector.extract_strided_slice %357 {offsets = [10, 0], sizes = [16, 156], strides = [1, 1]} : vector<32x156xf32> to vector<16x156xf32>
    %c83_121 = arith.constant 83 : index
    %c0_122 = arith.constant 0 : index
    %394 = vector.load %arg1[%c83_121, %c0_122] : memref<121x156xf32, #tpu.memory_space<vmem>>, vector<1x156xf32>
    %395 = vector.broadcast %394 : vector<1x156xf32> to vector<16x156xf32>
    %396 = arith.mulf %393, %395 : vector<16x156xf32>
    %397 = arith.addf %392, %396 : vector<16x156xf32>
    %398 = vector.extract_strided_slice %357 {offsets = [11, 0], sizes = [16, 156], strides = [1, 1]} : vector<32x156xf32> to vector<16x156xf32>
    %c94 = arith.constant 94 : index
    %c0_123 = arith.constant 0 : index
    %399 = vector.load %arg1[%c94, %c0_123] : memref<121x156xf32, #tpu.memory_space<vmem>>, vector<1x156xf32>
    %400 = vector.broadcast %399 : vector<1x156xf32> to vector<16x156xf32>
    %401 = arith.mulf %398, %400 : vector<16x156xf32>
    %402 = arith.addf %397, %401 : vector<16x156xf32>
    %403 = vector.extract_strided_slice %357 {offsets = [12, 0], sizes = [16, 156], strides = [1, 1]} : vector<32x156xf32> to vector<16x156xf32>
    %c105 = arith.constant 105 : index
    %c0_124 = arith.constant 0 : index
    %404 = vector.load %arg1[%c105, %c0_124] : memref<121x156xf32, #tpu.memory_space<vmem>>, vector<1x156xf32>
    %405 = vector.broadcast %404 : vector<1x156xf32> to vector<16x156xf32>
    %406 = arith.mulf %403, %405 : vector<16x156xf32>
    %407 = arith.addf %402, %406 : vector<16x156xf32>
    %408 = vector.extract_strided_slice %357 {offsets = [13, 0], sizes = [16, 156], strides = [1, 1]} : vector<32x156xf32> to vector<16x156xf32>
    %c116 = arith.constant 116 : index
    %c0_125 = arith.constant 0 : index
    %409 = vector.load %arg1[%c116, %c0_125] : memref<121x156xf32, #tpu.memory_space<vmem>>, vector<1x156xf32>
    %410 = vector.broadcast %409 : vector<1x156xf32> to vector<16x156xf32>
    %411 = arith.mulf %408, %410 : vector<16x156xf32>
    %412 = arith.addf %407, %411 : vector<16x156xf32>
    %c0_126 = arith.constant 0 : index
    %c7 = arith.constant 7 : index
    %413 = vector.load %arg5[%c0_126, %c7] : memref<32x166xf32, #tpu.memory_space<vmem>>, vector<32x156xf32>
    %414 = vector.extract_strided_slice %413 {offsets = [3, 0], sizes = [16, 156], strides = [1, 1]} : vector<32x156xf32> to vector<16x156xf32>
    %c7_127 = arith.constant 7 : index
    %c0_128 = arith.constant 0 : index
    %415 = vector.load %arg1[%c7_127, %c0_128] : memref<121x156xf32, #tpu.memory_space<vmem>>, vector<1x156xf32>
    %416 = vector.broadcast %415 : vector<1x156xf32> to vector<16x156xf32>
    %417 = arith.mulf %414, %416 : vector<16x156xf32>
    %418 = arith.addf %412, %417 : vector<16x156xf32>
    %419 = vector.extract_strided_slice %413 {offsets = [4, 0], sizes = [16, 156], strides = [1, 1]} : vector<32x156xf32> to vector<16x156xf32>
    %c18 = arith.constant 18 : index
    %c0_129 = arith.constant 0 : index
    %420 = vector.load %arg1[%c18, %c0_129] : memref<121x156xf32, #tpu.memory_space<vmem>>, vector<1x156xf32>
    %421 = vector.broadcast %420 : vector<1x156xf32> to vector<16x156xf32>
    %422 = arith.mulf %419, %421 : vector<16x156xf32>
    %423 = arith.addf %418, %422 : vector<16x156xf32>
    %424 = vector.extract_strided_slice %413 {offsets = [5, 0], sizes = [16, 156], strides = [1, 1]} : vector<32x156xf32> to vector<16x156xf32>
    %c29 = arith.constant 29 : index
    %c0_130 = arith.constant 0 : index
    %425 = vector.load %arg1[%c29, %c0_130] : memref<121x156xf32, #tpu.memory_space<vmem>>, vector<1x156xf32>
    %426 = vector.broadcast %425 : vector<1x156xf32> to vector<16x156xf32>
    %427 = arith.mulf %424, %426 : vector<16x156xf32>
    %428 = arith.addf %423, %427 : vector<16x156xf32>
    %429 = vector.extract_strided_slice %413 {offsets = [6, 0], sizes = [16, 156], strides = [1, 1]} : vector<32x156xf32> to vector<16x156xf32>
    %c40 = arith.constant 40 : index
    %c0_131 = arith.constant 0 : index
    %430 = vector.load %arg1[%c40, %c0_131] : memref<121x156xf32, #tpu.memory_space<vmem>>, vector<1x156xf32>
    %431 = vector.broadcast %430 : vector<1x156xf32> to vector<16x156xf32>
    %432 = arith.mulf %429, %431 : vector<16x156xf32>
    %433 = arith.addf %428, %432 : vector<16x156xf32>
    %434 = vector.extract_strided_slice %413 {offsets = [7, 0], sizes = [16, 156], strides = [1, 1]} : vector<32x156xf32> to vector<16x156xf32>
    %c51 = arith.constant 51 : index
    %c0_132 = arith.constant 0 : index
    %435 = vector.load %arg1[%c51, %c0_132] : memref<121x156xf32, #tpu.memory_space<vmem>>, vector<1x156xf32>
    %436 = vector.broadcast %435 : vector<1x156xf32> to vector<16x156xf32>
    %437 = arith.mulf %434, %436 : vector<16x156xf32>
    %438 = arith.addf %433, %437 : vector<16x156xf32>
    %439 = vector.extract_strided_slice %413 {offsets = [8, 0], sizes = [16, 156], strides = [1, 1]} : vector<32x156xf32> to vector<16x156xf32>
    %c62 = arith.constant 62 : index
    %c0_133 = arith.constant 0 : index
    %440 = vector.load %arg1[%c62, %c0_133] : memref<121x156xf32, #tpu.memory_space<vmem>>, vector<1x156xf32>
    %441 = vector.broadcast %440 : vector<1x156xf32> to vector<16x156xf32>
    %442 = arith.mulf %439, %441 : vector<16x156xf32>
    %443 = arith.addf %438, %442 : vector<16x156xf32>
    %444 = vector.extract_strided_slice %413 {offsets = [9, 0], sizes = [16, 156], strides = [1, 1]} : vector<32x156xf32> to vector<16x156xf32>
    %c73 = arith.constant 73 : index
    %c0_134 = arith.constant 0 : index
    %445 = vector.load %arg1[%c73, %c0_134] : memref<121x156xf32, #tpu.memory_space<vmem>>, vector<1x156xf32>
    %446 = vector.broadcast %445 : vector<1x156xf32> to vector<16x156xf32>
    %447 = arith.mulf %444, %446 : vector<16x156xf32>
    %448 = arith.addf %443, %447 : vector<16x156xf32>
    %449 = vector.extract_strided_slice %413 {offsets = [10, 0], sizes = [16, 156], strides = [1, 1]} : vector<32x156xf32> to vector<16x156xf32>
    %c84 = arith.constant 84 : index
    %c0_135 = arith.constant 0 : index
    %450 = vector.load %arg1[%c84, %c0_135] : memref<121x156xf32, #tpu.memory_space<vmem>>, vector<1x156xf32>
    %451 = vector.broadcast %450 : vector<1x156xf32> to vector<16x156xf32>
    %452 = arith.mulf %449, %451 : vector<16x156xf32>
    %453 = arith.addf %448, %452 : vector<16x156xf32>
    %454 = vector.extract_strided_slice %413 {offsets = [11, 0], sizes = [16, 156], strides = [1, 1]} : vector<32x156xf32> to vector<16x156xf32>
    %c95 = arith.constant 95 : index
    %c0_136 = arith.constant 0 : index
    %455 = vector.load %arg1[%c95, %c0_136] : memref<121x156xf32, #tpu.memory_space<vmem>>, vector<1x156xf32>
    %456 = vector.broadcast %455 : vector<1x156xf32> to vector<16x156xf32>
    %457 = arith.mulf %454, %456 : vector<16x156xf32>
    %458 = arith.addf %453, %457 : vector<16x156xf32>
    %459 = vector.extract_strided_slice %413 {offsets = [12, 0], sizes = [16, 156], strides = [1, 1]} : vector<32x156xf32> to vector<16x156xf32>
    %c106 = arith.constant 106 : index
    %c0_137 = arith.constant 0 : index
    %460 = vector.load %arg1[%c106, %c0_137] : memref<121x156xf32, #tpu.memory_space<vmem>>, vector<1x156xf32>
    %461 = vector.broadcast %460 : vector<1x156xf32> to vector<16x156xf32>
    %462 = arith.mulf %459, %461 : vector<16x156xf32>
    %463 = arith.addf %458, %462 : vector<16x156xf32>
    %464 = vector.extract_strided_slice %413 {offsets = [13, 0], sizes = [16, 156], strides = [1, 1]} : vector<32x156xf32> to vector<16x156xf32>
    %c117 = arith.constant 117 : index
    %c0_138 = arith.constant 0 : index
    %465 = vector.load %arg1[%c117, %c0_138] : memref<121x156xf32, #tpu.memory_space<vmem>>, vector<1x156xf32>
    %466 = vector.broadcast %465 : vector<1x156xf32> to vector<16x156xf32>
    %467 = arith.mulf %464, %466 : vector<16x156xf32>
    %468 = arith.addf %463, %467 : vector<16x156xf32>
    %c0_139 = arith.constant 0 : index
    %c8_140 = arith.constant 8 : index
    %469 = vector.load %arg5[%c0_139, %c8_140] : memref<32x166xf32, #tpu.memory_space<vmem>>, vector<32x156xf32>
    %470 = vector.extract_strided_slice %469 {offsets = [3, 0], sizes = [16, 156], strides = [1, 1]} : vector<32x156xf32> to vector<16x156xf32>
    %c8_141 = arith.constant 8 : index
    %c0_142 = arith.constant 0 : index
    %471 = vector.load %arg1[%c8_141, %c0_142] : memref<121x156xf32, #tpu.memory_space<vmem>>, vector<1x156xf32>
    %472 = vector.broadcast %471 : vector<1x156xf32> to vector<16x156xf32>
    %473 = arith.mulf %470, %472 : vector<16x156xf32>
    %474 = arith.addf %468, %473 : vector<16x156xf32>
    %475 = vector.extract_strided_slice %469 {offsets = [4, 0], sizes = [16, 156], strides = [1, 1]} : vector<32x156xf32> to vector<16x156xf32>
    %c19 = arith.constant 19 : index
    %c0_143 = arith.constant 0 : index
    %476 = vector.load %arg1[%c19, %c0_143] : memref<121x156xf32, #tpu.memory_space<vmem>>, vector<1x156xf32>
    %477 = vector.broadcast %476 : vector<1x156xf32> to vector<16x156xf32>
    %478 = arith.mulf %475, %477 : vector<16x156xf32>
    %479 = arith.addf %474, %478 : vector<16x156xf32>
    %480 = vector.extract_strided_slice %469 {offsets = [5, 0], sizes = [16, 156], strides = [1, 1]} : vector<32x156xf32> to vector<16x156xf32>
    %c30 = arith.constant 30 : index
    %c0_144 = arith.constant 0 : index
    %481 = vector.load %arg1[%c30, %c0_144] : memref<121x156xf32, #tpu.memory_space<vmem>>, vector<1x156xf32>
    %482 = vector.broadcast %481 : vector<1x156xf32> to vector<16x156xf32>
    %483 = arith.mulf %480, %482 : vector<16x156xf32>
    %484 = arith.addf %479, %483 : vector<16x156xf32>
    %485 = vector.extract_strided_slice %469 {offsets = [6, 0], sizes = [16, 156], strides = [1, 1]} : vector<32x156xf32> to vector<16x156xf32>
    %c41 = arith.constant 41 : index
    %c0_145 = arith.constant 0 : index
    %486 = vector.load %arg1[%c41, %c0_145] : memref<121x156xf32, #tpu.memory_space<vmem>>, vector<1x156xf32>
    %487 = vector.broadcast %486 : vector<1x156xf32> to vector<16x156xf32>
    %488 = arith.mulf %485, %487 : vector<16x156xf32>
    %489 = arith.addf %484, %488 : vector<16x156xf32>
    %490 = vector.extract_strided_slice %469 {offsets = [7, 0], sizes = [16, 156], strides = [1, 1]} : vector<32x156xf32> to vector<16x156xf32>
    %c52 = arith.constant 52 : index
    %c0_146 = arith.constant 0 : index
    %491 = vector.load %arg1[%c52, %c0_146] : memref<121x156xf32, #tpu.memory_space<vmem>>, vector<1x156xf32>
    %492 = vector.broadcast %491 : vector<1x156xf32> to vector<16x156xf32>
    %493 = arith.mulf %490, %492 : vector<16x156xf32>
    %494 = arith.addf %489, %493 : vector<16x156xf32>
    %495 = vector.extract_strided_slice %469 {offsets = [8, 0], sizes = [16, 156], strides = [1, 1]} : vector<32x156xf32> to vector<16x156xf32>
    %c63 = arith.constant 63 : index
    %c0_147 = arith.constant 0 : index
    %496 = vector.load %arg1[%c63, %c0_147] : memref<121x156xf32, #tpu.memory_space<vmem>>, vector<1x156xf32>
    %497 = vector.broadcast %496 : vector<1x156xf32> to vector<16x156xf32>
    %498 = arith.mulf %495, %497 : vector<16x156xf32>
    %499 = arith.addf %494, %498 : vector<16x156xf32>
    %500 = vector.extract_strided_slice %469 {offsets = [9, 0], sizes = [16, 156], strides = [1, 1]} : vector<32x156xf32> to vector<16x156xf32>
    %c74 = arith.constant 74 : index
    %c0_148 = arith.constant 0 : index
    %501 = vector.load %arg1[%c74, %c0_148] : memref<121x156xf32, #tpu.memory_space<vmem>>, vector<1x156xf32>
    %502 = vector.broadcast %501 : vector<1x156xf32> to vector<16x156xf32>
    %503 = arith.mulf %500, %502 : vector<16x156xf32>
    %504 = arith.addf %499, %503 : vector<16x156xf32>
    %505 = vector.extract_strided_slice %469 {offsets = [10, 0], sizes = [16, 156], strides = [1, 1]} : vector<32x156xf32> to vector<16x156xf32>
    %c85 = arith.constant 85 : index
    %c0_149 = arith.constant 0 : index
    %506 = vector.load %arg1[%c85, %c0_149] : memref<121x156xf32, #tpu.memory_space<vmem>>, vector<1x156xf32>
    %507 = vector.broadcast %506 : vector<1x156xf32> to vector<16x156xf32>
    %508 = arith.mulf %505, %507 : vector<16x156xf32>
    %509 = arith.addf %504, %508 : vector<16x156xf32>
    %510 = vector.extract_strided_slice %469 {offsets = [11, 0], sizes = [16, 156], strides = [1, 1]} : vector<32x156xf32> to vector<16x156xf32>
    %c96 = arith.constant 96 : index
    %c0_150 = arith.constant 0 : index
    %511 = vector.load %arg1[%c96, %c0_150] : memref<121x156xf32, #tpu.memory_space<vmem>>, vector<1x156xf32>
    %512 = vector.broadcast %511 : vector<1x156xf32> to vector<16x156xf32>
    %513 = arith.mulf %510, %512 : vector<16x156xf32>
    %514 = arith.addf %509, %513 : vector<16x156xf32>
    %515 = vector.extract_strided_slice %469 {offsets = [12, 0], sizes = [16, 156], strides = [1, 1]} : vector<32x156xf32> to vector<16x156xf32>
    %c107 = arith.constant 107 : index
    %c0_151 = arith.constant 0 : index
    %516 = vector.load %arg1[%c107, %c0_151] : memref<121x156xf32, #tpu.memory_space<vmem>>, vector<1x156xf32>
    %517 = vector.broadcast %516 : vector<1x156xf32> to vector<16x156xf32>
    %518 = arith.mulf %515, %517 : vector<16x156xf32>
    %519 = arith.addf %514, %518 : vector<16x156xf32>
    %520 = vector.extract_strided_slice %469 {offsets = [13, 0], sizes = [16, 156], strides = [1, 1]} : vector<32x156xf32> to vector<16x156xf32>
    %c118 = arith.constant 118 : index
    %c0_152 = arith.constant 0 : index
    %521 = vector.load %arg1[%c118, %c0_152] : memref<121x156xf32, #tpu.memory_space<vmem>>, vector<1x156xf32>
    %522 = vector.broadcast %521 : vector<1x156xf32> to vector<16x156xf32>
    %523 = arith.mulf %520, %522 : vector<16x156xf32>
    %524 = arith.addf %519, %523 : vector<16x156xf32>
    %c0_153 = arith.constant 0 : index
    %c9 = arith.constant 9 : index
    %525 = vector.load %arg5[%c0_153, %c9] : memref<32x166xf32, #tpu.memory_space<vmem>>, vector<32x156xf32>
    %526 = vector.extract_strided_slice %525 {offsets = [3, 0], sizes = [16, 156], strides = [1, 1]} : vector<32x156xf32> to vector<16x156xf32>
    %c9_154 = arith.constant 9 : index
    %c0_155 = arith.constant 0 : index
    %527 = vector.load %arg1[%c9_154, %c0_155] : memref<121x156xf32, #tpu.memory_space<vmem>>, vector<1x156xf32>
    %528 = vector.broadcast %527 : vector<1x156xf32> to vector<16x156xf32>
    %529 = arith.mulf %526, %528 : vector<16x156xf32>
    %530 = arith.addf %524, %529 : vector<16x156xf32>
    %531 = vector.extract_strided_slice %525 {offsets = [4, 0], sizes = [16, 156], strides = [1, 1]} : vector<32x156xf32> to vector<16x156xf32>
    %c20 = arith.constant 20 : index
    %c0_156 = arith.constant 0 : index
    %532 = vector.load %arg1[%c20, %c0_156] : memref<121x156xf32, #tpu.memory_space<vmem>>, vector<1x156xf32>
    %533 = vector.broadcast %532 : vector<1x156xf32> to vector<16x156xf32>
    %534 = arith.mulf %531, %533 : vector<16x156xf32>
    %535 = arith.addf %530, %534 : vector<16x156xf32>
    %536 = vector.extract_strided_slice %525 {offsets = [5, 0], sizes = [16, 156], strides = [1, 1]} : vector<32x156xf32> to vector<16x156xf32>
    %c31_157 = arith.constant 31 : index
    %c0_158 = arith.constant 0 : index
    %537 = vector.load %arg1[%c31_157, %c0_158] : memref<121x156xf32, #tpu.memory_space<vmem>>, vector<1x156xf32>
    %538 = vector.broadcast %537 : vector<1x156xf32> to vector<16x156xf32>
    %539 = arith.mulf %536, %538 : vector<16x156xf32>
    %540 = arith.addf %535, %539 : vector<16x156xf32>
    %541 = vector.extract_strided_slice %525 {offsets = [6, 0], sizes = [16, 156], strides = [1, 1]} : vector<32x156xf32> to vector<16x156xf32>
    %c42 = arith.constant 42 : index
    %c0_159 = arith.constant 0 : index
    %542 = vector.load %arg1[%c42, %c0_159] : memref<121x156xf32, #tpu.memory_space<vmem>>, vector<1x156xf32>
    %543 = vector.broadcast %542 : vector<1x156xf32> to vector<16x156xf32>
    %544 = arith.mulf %541, %543 : vector<16x156xf32>
    %545 = arith.addf %540, %544 : vector<16x156xf32>
    %546 = vector.extract_strided_slice %525 {offsets = [7, 0], sizes = [16, 156], strides = [1, 1]} : vector<32x156xf32> to vector<16x156xf32>
    %c53 = arith.constant 53 : index
    %c0_160 = arith.constant 0 : index
    %547 = vector.load %arg1[%c53, %c0_160] : memref<121x156xf32, #tpu.memory_space<vmem>>, vector<1x156xf32>
    %548 = vector.broadcast %547 : vector<1x156xf32> to vector<16x156xf32>
    %549 = arith.mulf %546, %548 : vector<16x156xf32>
    %550 = arith.addf %545, %549 : vector<16x156xf32>
    %551 = vector.extract_strided_slice %525 {offsets = [8, 0], sizes = [16, 156], strides = [1, 1]} : vector<32x156xf32> to vector<16x156xf32>
    %c64 = arith.constant 64 : index
    %c0_161 = arith.constant 0 : index
    %552 = vector.load %arg1[%c64, %c0_161] : memref<121x156xf32, #tpu.memory_space<vmem>>, vector<1x156xf32>
    %553 = vector.broadcast %552 : vector<1x156xf32> to vector<16x156xf32>
    %554 = arith.mulf %551, %553 : vector<16x156xf32>
    %555 = arith.addf %550, %554 : vector<16x156xf32>
    %556 = vector.extract_strided_slice %525 {offsets = [9, 0], sizes = [16, 156], strides = [1, 1]} : vector<32x156xf32> to vector<16x156xf32>
    %c75 = arith.constant 75 : index
    %c0_162 = arith.constant 0 : index
    %557 = vector.load %arg1[%c75, %c0_162] : memref<121x156xf32, #tpu.memory_space<vmem>>, vector<1x156xf32>
    %558 = vector.broadcast %557 : vector<1x156xf32> to vector<16x156xf32>
    %559 = arith.mulf %556, %558 : vector<16x156xf32>
    %560 = arith.addf %555, %559 : vector<16x156xf32>
    %561 = vector.extract_strided_slice %525 {offsets = [10, 0], sizes = [16, 156], strides = [1, 1]} : vector<32x156xf32> to vector<16x156xf32>
    %c86 = arith.constant 86 : index
    %c0_163 = arith.constant 0 : index
    %562 = vector.load %arg1[%c86, %c0_163] : memref<121x156xf32, #tpu.memory_space<vmem>>, vector<1x156xf32>
    %563 = vector.broadcast %562 : vector<1x156xf32> to vector<16x156xf32>
    %564 = arith.mulf %561, %563 : vector<16x156xf32>
    %565 = arith.addf %560, %564 : vector<16x156xf32>
    %566 = vector.extract_strided_slice %525 {offsets = [11, 0], sizes = [16, 156], strides = [1, 1]} : vector<32x156xf32> to vector<16x156xf32>
    %c97 = arith.constant 97 : index
    %c0_164 = arith.constant 0 : index
    %567 = vector.load %arg1[%c97, %c0_164] : memref<121x156xf32, #tpu.memory_space<vmem>>, vector<1x156xf32>
    %568 = vector.broadcast %567 : vector<1x156xf32> to vector<16x156xf32>
    %569 = arith.mulf %566, %568 : vector<16x156xf32>
    %570 = arith.addf %565, %569 : vector<16x156xf32>
    %571 = vector.extract_strided_slice %525 {offsets = [12, 0], sizes = [16, 156], strides = [1, 1]} : vector<32x156xf32> to vector<16x156xf32>
    %c108 = arith.constant 108 : index
    %c0_165 = arith.constant 0 : index
    %572 = vector.load %arg1[%c108, %c0_165] : memref<121x156xf32, #tpu.memory_space<vmem>>, vector<1x156xf32>
    %573 = vector.broadcast %572 : vector<1x156xf32> to vector<16x156xf32>
    %574 = arith.mulf %571, %573 : vector<16x156xf32>
    %575 = arith.addf %570, %574 : vector<16x156xf32>
    %576 = vector.extract_strided_slice %525 {offsets = [13, 0], sizes = [16, 156], strides = [1, 1]} : vector<32x156xf32> to vector<16x156xf32>
    %c119 = arith.constant 119 : index
    %c0_166 = arith.constant 0 : index
    %577 = vector.load %arg1[%c119, %c0_166] : memref<121x156xf32, #tpu.memory_space<vmem>>, vector<1x156xf32>
    %578 = vector.broadcast %577 : vector<1x156xf32> to vector<16x156xf32>
    %579 = arith.mulf %576, %578 : vector<16x156xf32>
    %580 = arith.addf %575, %579 : vector<16x156xf32>
    %c0_167 = arith.constant 0 : index
    %c10 = arith.constant 10 : index
    %581 = vector.load %arg5[%c0_167, %c10] : memref<32x166xf32, #tpu.memory_space<vmem>>, vector<32x156xf32>
    %582 = vector.extract_strided_slice %581 {offsets = [3, 0], sizes = [16, 156], strides = [1, 1]} : vector<32x156xf32> to vector<16x156xf32>
    %c10_168 = arith.constant 10 : index
    %c0_169 = arith.constant 0 : index
    %583 = vector.load %arg1[%c10_168, %c0_169] : memref<121x156xf32, #tpu.memory_space<vmem>>, vector<1x156xf32>
    %584 = vector.broadcast %583 : vector<1x156xf32> to vector<16x156xf32>
    %585 = arith.mulf %582, %584 : vector<16x156xf32>
    %586 = arith.addf %580, %585 : vector<16x156xf32>
    %587 = vector.extract_strided_slice %581 {offsets = [4, 0], sizes = [16, 156], strides = [1, 1]} : vector<32x156xf32> to vector<16x156xf32>
    %c21 = arith.constant 21 : index
    %c0_170 = arith.constant 0 : index
    %588 = vector.load %arg1[%c21, %c0_170] : memref<121x156xf32, #tpu.memory_space<vmem>>, vector<1x156xf32>
    %589 = vector.broadcast %588 : vector<1x156xf32> to vector<16x156xf32>
    %590 = arith.mulf %587, %589 : vector<16x156xf32>
    %591 = arith.addf %586, %590 : vector<16x156xf32>
    %592 = vector.extract_strided_slice %581 {offsets = [5, 0], sizes = [16, 156], strides = [1, 1]} : vector<32x156xf32> to vector<16x156xf32>
    %c32 = arith.constant 32 : index
    %c0_171 = arith.constant 0 : index
    %593 = vector.load %arg1[%c32, %c0_171] : memref<121x156xf32, #tpu.memory_space<vmem>>, vector<1x156xf32>
    %594 = vector.broadcast %593 : vector<1x156xf32> to vector<16x156xf32>
    %595 = arith.mulf %592, %594 : vector<16x156xf32>
    %596 = arith.addf %591, %595 : vector<16x156xf32>
    %597 = vector.extract_strided_slice %581 {offsets = [6, 0], sizes = [16, 156], strides = [1, 1]} : vector<32x156xf32> to vector<16x156xf32>
    %c43 = arith.constant 43 : index
    %c0_172 = arith.constant 0 : index
    %598 = vector.load %arg1[%c43, %c0_172] : memref<121x156xf32, #tpu.memory_space<vmem>>, vector<1x156xf32>
    %599 = vector.broadcast %598 : vector<1x156xf32> to vector<16x156xf32>
    %600 = arith.mulf %597, %599 : vector<16x156xf32>
    %601 = arith.addf %596, %600 : vector<16x156xf32>
    %602 = vector.extract_strided_slice %581 {offsets = [7, 0], sizes = [16, 156], strides = [1, 1]} : vector<32x156xf32> to vector<16x156xf32>
    %c54 = arith.constant 54 : index
    %c0_173 = arith.constant 0 : index
    %603 = vector.load %arg1[%c54, %c0_173] : memref<121x156xf32, #tpu.memory_space<vmem>>, vector<1x156xf32>
    %604 = vector.broadcast %603 : vector<1x156xf32> to vector<16x156xf32>
    %605 = arith.mulf %602, %604 : vector<16x156xf32>
    %606 = arith.addf %601, %605 : vector<16x156xf32>
    %607 = vector.extract_strided_slice %581 {offsets = [8, 0], sizes = [16, 156], strides = [1, 1]} : vector<32x156xf32> to vector<16x156xf32>
    %c65 = arith.constant 65 : index
    %c0_174 = arith.constant 0 : index
    %608 = vector.load %arg1[%c65, %c0_174] : memref<121x156xf32, #tpu.memory_space<vmem>>, vector<1x156xf32>
    %609 = vector.broadcast %608 : vector<1x156xf32> to vector<16x156xf32>
    %610 = arith.mulf %607, %609 : vector<16x156xf32>
    %611 = arith.addf %606, %610 : vector<16x156xf32>
    %612 = vector.extract_strided_slice %581 {offsets = [9, 0], sizes = [16, 156], strides = [1, 1]} : vector<32x156xf32> to vector<16x156xf32>
    %c76 = arith.constant 76 : index
    %c0_175 = arith.constant 0 : index
    %613 = vector.load %arg1[%c76, %c0_175] : memref<121x156xf32, #tpu.memory_space<vmem>>, vector<1x156xf32>
    %614 = vector.broadcast %613 : vector<1x156xf32> to vector<16x156xf32>
    %615 = arith.mulf %612, %614 : vector<16x156xf32>
    %616 = arith.addf %611, %615 : vector<16x156xf32>
    %617 = vector.extract_strided_slice %581 {offsets = [10, 0], sizes = [16, 156], strides = [1, 1]} : vector<32x156xf32> to vector<16x156xf32>
    %c87 = arith.constant 87 : index
    %c0_176 = arith.constant 0 : index
    %618 = vector.load %arg1[%c87, %c0_176] : memref<121x156xf32, #tpu.memory_space<vmem>>, vector<1x156xf32>
    %619 = vector.broadcast %618 : vector<1x156xf32> to vector<16x156xf32>
    %620 = arith.mulf %617, %619 : vector<16x156xf32>
    %621 = arith.addf %616, %620 : vector<16x156xf32>
    %622 = vector.extract_strided_slice %581 {offsets = [11, 0], sizes = [16, 156], strides = [1, 1]} : vector<32x156xf32> to vector<16x156xf32>
    %c98 = arith.constant 98 : index
    %c0_177 = arith.constant 0 : index
    %623 = vector.load %arg1[%c98, %c0_177] : memref<121x156xf32, #tpu.memory_space<vmem>>, vector<1x156xf32>
    %624 = vector.broadcast %623 : vector<1x156xf32> to vector<16x156xf32>
    %625 = arith.mulf %622, %624 : vector<16x156xf32>
    %626 = arith.addf %621, %625 : vector<16x156xf32>
    %627 = vector.extract_strided_slice %581 {offsets = [12, 0], sizes = [16, 156], strides = [1, 1]} : vector<32x156xf32> to vector<16x156xf32>
    %c109_178 = arith.constant 109 : index
    %c0_179 = arith.constant 0 : index
    %628 = vector.load %arg1[%c109_178, %c0_179] : memref<121x156xf32, #tpu.memory_space<vmem>>, vector<1x156xf32>
    %629 = vector.broadcast %628 : vector<1x156xf32> to vector<16x156xf32>
    %630 = arith.mulf %627, %629 : vector<16x156xf32>
    %631 = arith.addf %626, %630 : vector<16x156xf32>
    %632 = vector.extract_strided_slice %581 {offsets = [13, 0], sizes = [16, 156], strides = [1, 1]} : vector<32x156xf32> to vector<16x156xf32>
    %c120 = arith.constant 120 : index
    %c0_180 = arith.constant 0 : index
    %633 = vector.load %arg1[%c120, %c0_180] : memref<121x156xf32, #tpu.memory_space<vmem>>, vector<1x156xf32>
    %634 = vector.broadcast %633 : vector<1x156xf32> to vector<16x156xf32>
    %635 = arith.mulf %632, %634 : vector<16x156xf32>
    %636 = arith.addf %631, %635 : vector<16x156xf32>
    %c0_181 = arith.constant 0 : index
    %c0_182 = arith.constant 0 : index
    %637 = vector.load %arg2[%c0_181, %c0_182] : memref<1x156xf32, #tpu.memory_space<vmem>>, vector<1x156xf32>
    %638 = vector.broadcast %637 : vector<1x156xf32> to vector<16x156xf32>
    %639 = arith.addf %636, %638 : vector<16x156xf32>
    %c0_183 = arith.constant 0 : index
    %c0_184 = arith.constant 0 : index
    %640 = vector.load %arg4[%c0_183, %c0_184] : memref<16x156xf32, #tpu.memory_space<vmem>>, vector<16x156xf32>
    tpu.vector_store %arg4[%c0_183, %c0_184], %639 {strides = array<i32>} : memref<16x156xf32, #tpu.memory_space<vmem>>, vector<16x156xf32>,
    return
  }
  func.func @transform_0(%arg0: i32) -> (i32, i32) {
    %c0_i32 = arith.constant 0 : i32
    %c0_i32_0 = arith.constant 0 : i32
    %c0_i32_1 = arith.constant 0 : i32
    return %c0_i32, %c0_i32_0 : i32, i32
  }
  func.func @transform_1(%arg0: i32) -> (i32, i32) {
    %c0_i32 = arith.constant 0 : i32
    %c0_i32_0 = arith.constant 0 : i32
    %c0_i32_1 = arith.constant 0 : i32
    return %c0_i32, %c0_i32_0 : i32, i32
  }
  func.func @transform_2(%arg0: i32) -> (i32, i32, i32, i32) {
    %c0_i32 = arith.constant 0 : i32
    %c0_i32_0 = arith.constant 0 : i32
    %c0_i32_1 = arith.constant 0 : i32
    %c0_i32_2 = arith.constant 0 : i32
    %c0_i32_3 = arith.constant 0 : i32
    return %c0_i32, %c0_i32_0, %c0_i32_1, %c0_i32_2 : i32, i32, i32, i32
  }
  func.func @transform_3(%arg0: i32) -> (i32, i32) {
    %c0_i32 = arith.constant 0 : i32
    %c0_i32_0 = arith.constant 0 : i32
    %c0_i32_1 = arith.constant 0 : i32
    return %c0_i32, %c0_i32_0 : i32, i32
  }
}

</mosaic_0001>

<bundles_post_ra>
// kernel: tpu_custom_call.1
= control target key start
LH: loop header
LB: loop body
LE: loop exit
PB: predicated region body
PF: predicated region fallthrough
CT: control target
= control target key end

     0   :  { %s7989_s16 = smov 31   ;;  %s7990_s17 = smov 5   ;;  %v7991_v4 = vmov 0.0   ;;  %s13917_s0 = inlined_call_operand.vmem [shape: f32[121,156], index: 0, kind: input, shape index: {}]   ;;  %s13918_s1 = inlined_call_operand.vmem [shape: f32[1,156], index: 1, kind: input, shape index: {}]   ;;  %s13919_s2 = inlined_call_operand.vmem [shape: f32[2,3,16,16], index: 2, kind: input, shape index: {}]   ;;  %s13920_s3 = inlined_call_operand.hbm [shape: f32[16,156], index: 3, kind: output, shape index: {}]  }
   0x1   :  { %v7755_v0 = vld [vmem:[%s13919_s2 + $0x10] sm:$0xff]  ;;  %v24_v1 = vld [vmem:[%s13919_s2] sm:$0xff]  ;;  %v7756_v2 = vld [vmem:[%s13919_s2 + $0x18] sm:$0xff]  ;;  %15 = vst [vmem:[#allocation2] sm:$0xff] %v7991_v4 }
   0x2   :  { %42 = vrot.lane.b32.xlu1 %v7755_v0, %s7989_s16  ;;  %28 = vrot.lane.b32.xlu0 %v24_v1, %s7990_s17  ;;  %v25_v3 = vld [vmem:[%s13919_s2 + $0x8] sm:$0xff]  ;;  %18 = vst [vmem:[#allocation2 + $0x10] sm:$0xff] %v7991_v4  ;;  %20 = vst [vmem:[#allocation2 + $0x20] sm:$0xff] %v7991_v4  ;;  %v7757_v6 = vld [vmem:[%s13919_s2 + $0x20] sm:$0xff] }
   0x3   :  { %v7758_v5 = vld [vmem:[%s13919_s2 + $0x28] sm:$0xff] }
   0x6   :  { %44 = vrot.lane.b32.xlu1 %v7756_v2, %s7989_s16  ;;  %30 = vrot.lane.b32.xlu0 %v25_v3, %s7990_s17 }
   0x7   :  { %8 = vsyncpa [#allocation4], 0  ;;  %s7992_s26 = smov 57   ;;  %v117_v7 = vlaneseq  ;;  %v7760_v8 = vld [vmem:[%s13919_s2 + $0x38] sm:$0xff]  ;;  %v7759_v9 = vld [vmem:[%s13919_s2 + $0x30] sm:$0xff]  ;;  %vm16_vm0 = vcmask 310272  }
   0x8   :  { %17 = vst.msk [vmem:[#allocation2 + $0x8] sm:$0xff] %vm16_vm0, %v7991_v4  ;;  %21 = vst.msk [vmem:[#allocation2 + $0x28] sm:$0xff] %vm16_vm0, %v7991_v4  ;;  %s7993_s4 = smov 83   ;;  %v7762_v11 = vld [vmem:[%s13919_s2 + $0x48] sm:$0xff]  ;;  %v7761_v12 = vld [vmem:[%s13919_s2 + $0x40] sm:$0xff]  ;;  %s7994_s9 = smov 109  }
   0x9   :  { %23 = vst.msk [vmem:[#allocation2 + $0x38] sm:$0xff] %vm16_vm0, %v7991_v4  ;;  %19 = vst.msk [vmem:[#allocation2 + $0x18] sm:$0xff] %vm16_vm0, %v7991_v4  ;;  %v118_v10 = vshrl.u32 %v117_v7, 7  ;;  %v7764_v15 = vld [vmem:[%s13919_s2 + $0x58] sm:$0xff]  ;;  %v7763_v16 = vld [vmem:[%s13919_s2 + $0x50] sm:$0xff]  ;;  %s7995_s16 = smov 7  }
   0xa   :  { %58 = vrot.lane.b32.xlu1 %v7758_v5, %s7992_s26  ;;  %56 = vrot.lane.b32.xlu0 %v7757_v6, %s7992_s26  ;;  %v7775_v17 = vld [vmem:[%s13917_s0 + $0x1] ss:$8 sm:$0x3]  ;;  %v7776_v20 = vld [vmem:[%s13917_s0 + $0x14] ss:$8 sm:$0x3] }
   0xb   :  { %v8069_v13 = vsub.s32 1, %v118_v10  ;;  %v8071_v14 = vsub.s32 0, %v118_v10  ;;  %s7996_s20 = smov 1   ;;  %v7777_v23 = vld [vmem:[%s13917_s0 + $0x27] ss:$8 sm:$0x3] }
   0xc   :  { %v7778_v26 = vld [vmem:[%s13917_s0 + $0x42] ss:$8 sm:$0x3]  ;;  %v7779_v29 = vld [vmem:[%s13917_s0 + $0x55] ss:$8 sm:$0x3] }
   0xd   :  { %14254 = vst [vmem:[#allocation6_spill] sm:$0xff] %v8071_v14  ;;  %v596_v18 = vrot.slane %v7775_v17, %v8069_v13  ;;  %v592_v19 = vrot.slane %v7775_v17, %v8071_v14  ;;  %v655_v21 = vrot.slane %v7776_v20, %v8069_v13  ;;  %v651_v22 = vrot.slane %v7776_v20, %v8071_v14  ;;  %v7780_v32 = vld [vmem:[%s13917_s0 + $0x70] ss:$8 sm:$0x3]  ;;  %s7997_s30 = smov 127   ;;  %s7998_s14 = smov 2  }
   0xe   :  { %72 = vrot.lane.b32.xlu1 %v7760_v8, %s7993_s4  ;;  %70 = vrot.lane.b32.xlu0 %v7759_v9, %s7993_s4  ;;  %v722_v24 = vrot.slane %v7777_v23, %v8069_v13  ;;  %v718_v25 = vrot.slane %v7777_v23, %v8071_v14  ;;  %v789_v27 = vrot.slane %v7778_v26, %v8069_v13  ;;  %v7781_v35 = vld [vmem:[%s13917_s0 + $0x83] ss:$8 sm:$0x3]  ;;  %vm34_vm1 = vcmask 171048   ;;  %s7999_s15 = smov 126   ;;  %s8000_s12 = smov 3  }
   0xf   :  { %v785_v28 = vrot.slane %v7778_v26, %v8071_v14  ;;  %v856_v30 = vrot.slane %v7779_v29, %v8069_v13  ;;  %v852_v31 = vrot.slane %v7779_v29, %v8071_v14  ;;  %v923_v33 = vrot.slane %v7780_v32, %v8069_v13  ;;  %v8130_v50 = vld [vmem:[#allocation2 + $0x8] sm:$0xff]  ;;  %s8001_s13 = smov 125   ;;  %s8002_s10 = smov 4  }
  0x10   :  { %v919_v34 = vrot.slane %v7780_v32, %v8071_v14  ;;  %v982_v36 = vrot.slane %v7781_v35, %v8069_v13  ;;  %v978_v37 = vrot.slane %v7781_v35, %v8071_v14  ;;  %vm48_vm2 = vcmask 384248   ;;  %s8003_s11 = smov 124   ;;  %s8004_s8 = smov 123  }
  0x11   :  { %vm62_vm3 = vcmask 597448   ;;  %vm76_vm4 = vcmask 810648   ;;  %vm90_vm5 = vcmask 1023848   ;;  %vm104_vm6 = vcmask 187448   ;;  %s8005_s4 = smov 6   ;;  %s8006_s5 = smov 122  }
  0x12   :  { %86 = vrot.lane.b32.xlu1 %v7762_v11, %s7994_s9  ;;  %84 = vrot.lane.b32.xlu0 %v7761_v12, %s7994_s9  ;;  %vm601_vm7 = vcmask 7168   ;;  %vm164_vm8 = vcmask 1046528   ;;  %vm212_vm9 = vcmask 1045504   ;;  %vm260_vm10 = vcmask 1044480   ;;  %s8007_s29 = smov 121   ;;  %s8008_s24 = smov 8  }
  0x13   :  { %vm308_vm11 = vcmask 1043456   ;;  %vm352_vm12 = vcmask 1042432   ;;  %vm396_vm13 = vcmask 1041408   ;;  %vm444_vm14 = vcmask 1040384   ;;  %s8009_s25 = smov 120   ;;  %s8010_s21 = smov 9  }
  0x14   :  { %vm1312_vm15 = vcmask 15360   ;;  %vm2023_vm0 = vcmask 23552   ;;  %s8011_s22 = smov 119  }
  0x16   :  { %100 = vrot.lane.b32.xlu1 %v7764_v15, %s7995_s16  ;;  %98 = vrot.lane.b32.xlu0 %v7763_v16, %s7995_s16 }
  0x1a   :  { %599 = vrot.lane.b32.xlu1 %v596_v18, %s7996_s20  ;;  %597 = vrot.lane.b32.xlu0 %v592_v19, %s7996_s20 }
  0x1e   :  { %658 = vrot.lane.b32.xlu1 %v655_v21, %s7996_s20  ;;  %656 = vrot.lane.b32.xlu0 %v651_v22, %s7996_s20 }
  0x22   :  { %725 = vrot.lane.b32.xlu1 %v722_v24, %s7996_s20  ;;  %723 = vrot.lane.b32.xlu0 %v718_v25, %s7996_s20 }
  0x26   :  { %792 = vrot.lane.b32.xlu1 %v789_v27, %s7996_s20  ;;  %790 = vrot.lane.b32.xlu0 %v785_v28, %s7996_s20 }
  0x2a   :  { %859 = vrot.lane.b32.xlu1 %v856_v30, %s7996_s20  ;;  %857 = vrot.lane.b32.xlu0 %v852_v31, %s7996_s20 }
  0x2e   :  { %926 = vrot.lane.b32.xlu1 %v923_v33, %s7996_s20  ;;  %924 = vrot.lane.b32.xlu0 %v919_v34, %s7996_s20 }
  0x32   :  { %985 = vrot.lane.b32.xlu1 %v982_v36, %s7996_s20  ;;  %983 = vrot.lane.b32.xlu0 %v978_v37, %s7996_s20 }
  0x74   :  { %v43_v38 = vpop.permute.xlu1 %42  ;;  %v29_v39 = vpop.permute.xlu0 %28 }
  0x75   :  { %35 = vst.msk [vmem:[#allocation2 + $0x10] sm:$0xff] %vm34_vm1, %v29_v39 }
  0x76   :  { %49 = vst.msk [vmem:[#allocation2 + $0x10] sm:$0xff] %vm48_vm2, %v43_v38 }
  0x78   :  { %v45_v40 = vpop.permute.xlu1 %44  ;;  %v31_v41 = vpop.permute.xlu0 %30 }
  0x79   :  { %36 = vst.msk [vmem:[#allocation2 + $0x20] sm:$0xff] %vm34_vm1, %v31_v41  ;;  %vm2734_vm1 = vcmask 31744  }
  0x7a   :  { %50 = vst.msk [vmem:[#allocation2 + $0x20] sm:$0xff] %vm48_vm2, %v45_v40  ;;  %vm3445_vm2 = vcmask 39936  }
  0x7c   :  { %v59_v42 = vpop.permute.xlu1 %58  ;;  %v57_v43 = vpop.permute.xlu0 %56 }
  0x7d   :  { %64 = vst.msk [vmem:[#allocation2 + $0x20] sm:$0xff] %vm62_vm3, %v59_v42  ;;  %63 = vst.msk [vmem:[#allocation2 + $0x10] sm:$0xff] %vm62_vm3, %v57_v43  ;;  %vm4156_vm3 = vcmask 48128  }
  0x80   :  { %v73_v44 = vpop.permute.xlu1 %72  ;;  %v71_v45 = vpop.permute.xlu0 %70 }
  0x81   :  { %78 = vst.msk [vmem:[#allocation2 + $0x20] sm:$0xff] %vm76_vm4, %v73_v44  ;;  %77 = vst.msk [vmem:[#allocation2 + $0x10] sm:$0xff] %vm76_vm4, %v71_v45  ;;  %vm4867_vm4 = vcmask 56320  }
  0x84   :  { %v87_v46 = vpop.permute.xlu1 %86  ;;  %v85_v47 = vpop.permute.xlu0 %84 }
  0x85   :  { %92 = vst.msk [vmem:[#allocation2 + $0x20] sm:$0xff] %vm90_vm5, %v87_v46  ;;  %91 = vst.msk [vmem:[#allocation2 + $0x10] sm:$0xff] %vm90_vm5, %v85_v47  ;;  %vm5578_vm5 = vcmask 64512  }
  0x88   :  { %v101_v48 = vpop.permute.xlu1 %100  ;;  %v99_v49 = vpop.permute.xlu0 %98 }
  0x89   :  { %106 = vst.msk [vmem:[#allocation2 + $0x28] sm:$0xff] %vm104_vm6, %v101_v48  ;;  %105 = vst.msk [vmem:[#allocation2 + $0x18] sm:$0xff] %vm104_vm6, %v99_v49  ;;  %vm6289_vm6 = vcmask 72704  }
  0x8c   :  { %v600_v51 = vpop.permute.xlu1 %599  ;;  %v598_v52 = vpop.permute.xlu0 %597  ;;  %v8133_v55 = vld [vmem:[#allocation2 + $0x10] sm:$0xff]  ;;  %v8144_v62 = vld [vmem:[#allocation2 + $0x20] sm:$0xff] }
  0x8d   :  { %v605_v53 = vmul.f32 0.0, %v598_v52  ;;  %v602_v54 = vsel %vm601_vm7, %v598_v52, %v600_v51  ;;  %v607_v60 = vmul.f32 %v598_v52, %v8133_v55  ;;  %v609_v3 = vmul.f32 %v598_v52, %v8144_v62 }
  0x8e   :  { %v606_v56 = vmul.f32 %v602_v54, %v8130_v50 }
  0x8f   :  { %617 = vrot.lane.b32.xlu0 %v605_v53, %s7997_s30 }
  0x90   :  { %v8137_v57 = vld [vmem:[#allocation2 + $0x18] sm:$0xff]  ;;  %v659_v58 = vpop.permute.xlu1 %658  ;;  %v8139_v59 = vpop.permute.xlu0 %656  ;;  %619 = vrot.lane.b32.xlu1 %v606_v56, %s7997_s30  ;;  %v8146_v63 = vld [vmem:[#allocation2 + $0x28] sm:$0xff] }
  0x91   :  { %v608_v61 = vmul.f32 %v602_v54, %v8137_v57  ;;  %v660_v0 = vsel %vm601_vm7, %v8139_v59, %v659_v58  ;;  %v8157_v4 = vmul.f32 %v8139_v59, %v8144_v62  ;;  %v610_v5 = vmul.f32 %v602_v54, %v8146_v63 }
  0x92   :  { %v8161_v6 = vmul.f32 %v660_v0, %v8146_v63  ;;  %v663_v46 = vmul.f32 0.0, %v8139_v59  ;;  %v665_v47 = vmul.f32 %v8139_v59, %v8133_v55  ;;  %v664_v48 = vmul.f32 %v660_v0, %v8130_v50 }
  0x93   :  { %621 = vrot.lane.b32.xlu0 %v607_v60, %s7997_s30  ;;  %v681_v10 = vrot.slane %v8157_v4, 1  ;;  %v666_v49 = vmul.f32 %v660_v0, %v8137_v57 }
  0x94   :  { %v726_v1 = vpop.permute.xlu1 %725  ;;  %v8151_v2 = vpop.permute.xlu0 %723  ;;  %623 = vrot.lane.b32.xlu1 %v608_v61, %s7997_s30  ;;  %v683_v12 = vrot.slane %v8161_v6, 1  ;;  %v675_v53 = vrot.slane %v663_v46, 1  ;;  %v676_v54 = vrot.slane %v665_v47, 1  ;;  %v678_v56 = vrot.slane %v664_v48, 1 }
  0x95   :  { %v8166_v7 = vsel %vm601_vm7, %v8151_v2, %v726_v1  ;;  %v8174_v11 = vmul.f32 %v8151_v2, %v8144_v62  ;;  %v679_v58 = vrot.slane %v666_v49, 1  ;;  %v730_v60 = vmul.f32 0.0, %v8151_v2 }
  0x96   :  { %v8179_v15 = vmul.f32 %v8166_v7, %v8146_v63  ;;  %v677_v59 = vsel %vm164_vm8, %v675_v53, %v676_v54  ;;  %v732_v61 = vmul.f32 %v8151_v2, %v8133_v55  ;;  %v731_v1 = vmul.f32 %v8166_v7, %v8130_v50 }
  0x97   :  { %625 = vrot.lane.b32.xlu0 %v609_v3, %s7997_s30  ;;  %v748_v19 = vrot.slane %v8174_v11, 2  ;;  %v680_v0 = vsel %vm164_vm8, %v678_v56, %v679_v58  ;;  %v733_v3 = vmul.f32 %v8166_v7, %v8137_v57  ;;  %v684_v2 = vsel %vm164_vm8, %v679_v58, %v683_v12 }
  0x98   :  { %v793_v8 = vpop.permute.xlu1 %792  ;;  %v8168_v9 = vpop.permute.xlu0 %790  ;;  %627 = vrot.lane.b32.xlu1 %v610_v5, %s7997_s30  ;;  %v750_v21 = vrot.slane %v8179_v15, 2  ;;  %v682_v5 = vsel %vm164_vm8, %v676_v54, %v681_v10 }
  0x99   :  { %v8186_v16 = vsel %vm601_vm7, %v8168_v9, %v793_v8  ;;  %v8196_v20 = vmul.f32 %v8168_v9, %v8144_v62  ;;  %v742_v8 = vrot.slane %v730_v60, 2  ;;  %v799_v4 = vmul.f32 %v8168_v9, %v8133_v55 }
  0x9a   :  { %v8201_v22 = vmul.f32 %v8186_v16, %v8146_v63  ;;  %v798_v6 = vmul.f32 %v8186_v16, %v8130_v50 }
  0x9b   :  { %693 = vrot.lane.b32.xlu0 %v681_v10, %s7997_s30  ;;  %v815_v26 = vrot.slane %v8196_v20, 3  ;;  %v810_v47 = vrot.slane %v799_v4, 3 }
  0x9c   :  { %v860_v17 = vpop.permute.xlu1 %859  ;;  %v8188_v18 = vpop.permute.xlu0 %857  ;;  %695 = vrot.lane.b32.xlu1 %v683_v12, %s7997_s30  ;;  %v817_v28 = vrot.slane %v8201_v22, 3  ;;  %v800_v12 = vmul.f32 %v8186_v16, %v8137_v57  ;;  %v812_v48 = vrot.slane %v798_v6, 3 }
  0x9d   :  { %v8208_v23 = vsel %vm601_vm7, %v8188_v18, %v860_v17  ;;  %v8216_v27 = vmul.f32 %v8188_v18, %v8144_v62  ;;  %v743_v17 = vrot.slane %v732_v61, 2  ;;  %v864_v53 = vmul.f32 0.0, %v8188_v18 }
  0x9e   :  { %v8221_v29 = vmul.f32 %v8208_v23, %v8146_v63  ;;  %v813_v49 = vrot.slane %v800_v12, 3  ;;  %v866_v11 = vmul.f32 %v8188_v18, %v8133_v55  ;;  %v865_v15 = vmul.f32 %v8208_v23, %v8130_v50 }
  0x9f   :  { %760 = vrot.lane.b32.xlu0 %v748_v19, %s7997_s30  ;;  %v882_v31 = vrot.slane %v8216_v27, 4  ;;  %v744_v7 = vsel %vm212_vm9, %v742_v8, %v743_v17  ;;  %v816_v54 = vsel %vm260_vm10, %v810_v47, %v815_v26  ;;  %v876_v56 = vrot.slane %v864_v53, 4 }
  0xa0   :  { %v927_v24 = vpop.permute.xlu1 %926  ;;  %v925_v25 = vpop.permute.xlu0 %924  ;;  %762 = vrot.lane.b32.xlu1 %v750_v21, %s7997_s30  ;;  %v884_v33 = vrot.slane %v8221_v29, 4  ;;  %v877_v58 = vrot.slane %v866_v11, 4  ;;  %v818_v18 = vsel %vm260_vm10, %v813_v49, %v817_v28 }
  0xa1   :  { %v928_v30 = vsel %vm601_vm7, %v925_v25, %v927_v24  ;;  %v8232_v32 = vmul.f32 %v925_v25, %v8133_v55  ;;  %v8248_v38 = vmul.f32 %v925_v25, %v8144_v62  ;;  %v745_v24 = vrot.slane %v731_v1, 2 }
  0xa2   :  { %v8236_v34 = vmul.f32 %v928_v30, %v8137_v57  ;;  %v8252_v40 = vmul.f32 %v928_v30, %v8146_v63  ;;  %v746_v25 = vrot.slane %v733_v3, 2  ;;  %v797_v30 = vmul.f32 0.0, %v8168_v9 }
  0xa3   :  { %827 = vrot.lane.b32.xlu0 %v815_v26, %s7997_s30  ;;  %v939_v37 = vrot.slane %v8232_v32, 5  ;;  %v941_v42 = vrot.slane %v8248_v38, 5  ;;  %v883_v26 = vsel %vm308_vm11, %v877_v58, %v882_v31  ;;  %v7782_v38 = vld [vmem:[%s13917_s0 + $0x96] ss:$8 sm:$0x3] }
  0xa4   :  { %829 = vrot.lane.b32.xlu1 %v817_v28, %s7997_s30  ;;  %v986_v35 = vpop.permute.xlu1 %985  ;;  %v8241_v36 = vpop.permute.xlu0 %983  ;;  %v940_v39 = vrot.slane %v8236_v34, 5  ;;  %v943_v44 = vrot.slane %v8252_v40, 5  ;;  %v747_v10 = vsel %vm212_vm9, %v745_v24, %v746_v25  ;;  %v809_v46 = vrot.slane %v797_v30, 3 }
  0xa5   :  { %v8259_v41 = vsel %vm601_vm7, %v8241_v36, %v986_v35  ;;  %v8267_v43 = vmul.f32 %v8241_v36, %v8133_v55  ;;  %v749_v35 = vsel %vm212_vm9, %v743_v17, %v748_v19  ;;  %v751_v9 = vsel %vm212_vm9, %v746_v25, %v750_v21 }
  0xa6   :  { %v8272_v45 = vmul.f32 %v8259_v41, %v8137_v57  ;;  %v811_v16 = vsel %vm260_vm10, %v809_v46, %v810_v47  ;;  %v814_v19 = vsel %vm260_vm10, %v812_v48, %v813_v49  ;;  %v867_v21 = vmul.f32 %v8208_v23, %v8137_v57 }
  0xa7   :  { %894 = vrot.lane.b32.xlu0 %v882_v31, %s7997_s30  ;;  %v1002_v51 = vrot.slane %v8267_v43, 6  ;;  %v878_v23 = vsel %vm308_vm11, %v876_v56, %v877_v58  ;;  %v992_v22 = vmul.f32 %v8241_v36, %v8144_v62  ;;  %v993_v61 = vmul.f32 %v8259_v41, %v8146_v63 }
  0xa8   :  { %896 = vrot.lane.b32.xlu1 %v884_v33, %s7997_s30  ;;  %v1003_v52 = vrot.slane %v8272_v45, 6  ;;  %v880_v60 = vrot.slane %v867_v21, 4  ;;  %v942_v27 = vsel %vm352_vm12, %v939_v37, %v941_v42  ;;  %v994_v1 = vmul.f32 0.0, %v8241_v36 }
  0xa9   :  { %v1004_v31 = vrot.slane %v992_v22, 6  ;;  %v944_v29 = vsel %vm352_vm12, %v940_v39, %v943_v44 }
  0xaa   :  { %v885_v28 = vsel %vm308_vm11, %v880_v60, %v884_v33  ;;  %v1006_v33 = vrot.slane %v993_v61, 6  ;;  %v1008_v36 = vrot.slane %v994_v1, 6 }
  0xab   :  { %945 = vrot.lane.b32.xlu0 %v939_v37, %s7997_s30  ;;  %v1005_v32 = vsel %vm396_vm13, %v1002_v51, %v1004_v31 }
  0xac   :  { %947 = vrot.lane.b32.xlu1 %v940_v39, %s7997_s30  ;;  %v1007_v34 = vsel %vm396_vm13, %v1003_v52, %v1006_v33  ;;  %v1009_v39 = vsel %vm396_vm13, %v1004_v31, %v1008_v36 }
  0xaf   :  { %953 = vrot.lane.b32.xlu0 %v941_v42, %s7997_s30  ;;  %v1049_v42 = vrot.slane %v7782_v38, %v8069_v13 }
  0xb0   :  { %955 = vrot.lane.b32.xlu1 %v943_v44, %s7997_s30 }
  0xb3   :  { %1012 = vrot.lane.b32.xlu0 %v1002_v51, %s7997_s30 }
  0xb4   :  { %1014 = vrot.lane.b32.xlu1 %v1003_v52, %s7997_s30 }
  0xb7   :  { %685 = vrot.lane.b32.xlu0 %v677_v59, %s7997_s30  ;;  %v879_v59 = vrot.slane %v865_v15, 4 }
  0xb8   :  { %687 = vrot.lane.b32.xlu1 %v680_v0, %s7997_s30  ;;  %v8366_v0 = vld [vmem:[#allocation2 + $0x38] sm:$0xff] }
  0xb9   :  { %v881_v20 = vsel %vm308_vm11, %v879_v59, %v880_v60  ;;  %v995_v3 = vmul.f32 %v8259_v41, %v8366_v0  ;;  %v1045_v41 = vrot.slane %v7782_v38, %v8071_v14 }
  0xbb   :  { %689 = vrot.lane.b32.xlu0 %v682_v5, %s7997_s30  ;;  %v1010_v37 = vrot.slane %v995_v3, 6 }
  0xbc   :  { %691 = vrot.lane.b32.xlu1 %v684_v2, %s7997_s30 }
  0xbd   :  { %v1011_v40 = vsel %vm396_vm13, %v1006_v33, %v1010_v37 }
  0xbf   :  { %752 = vrot.lane.b32.xlu0 %v744_v7, %s7997_s30 }
  0xc0   :  { %754 = vrot.lane.b32.xlu1 %v747_v10, %s7997_s30 }
  0xc3   :  { %756 = vrot.lane.b32.xlu0 %v749_v35, %s7997_s30 }
  0xc4   :  { %758 = vrot.lane.b32.xlu1 %v751_v9, %s7997_s30 }
  0xc7   :  { %819 = vrot.lane.b32.xlu0 %v811_v16, %s7997_s30 }
  0xc8   :  { %821 = vrot.lane.b32.xlu1 %v814_v19, %s7997_s30 }
  0xcb   :  { %823 = vrot.lane.b32.xlu0 %v816_v54, %s7997_s30 }
  0xcc   :  { %825 = vrot.lane.b32.xlu1 %v818_v18, %s7997_s30 }
  0xcf   :  { %886 = vrot.lane.b32.xlu0 %v878_v23, %s7997_s30 }
  0xd0   :  { %888 = vrot.lane.b32.xlu1 %v881_v20, %s7997_s30 }
  0xd3   :  { %890 = vrot.lane.b32.xlu0 %v883_v26, %s7997_s30 }
  0xd4   :  { %892 = vrot.lane.b32.xlu1 %v885_v28, %s7997_s30 }
  0xd7   :  { %949 = vrot.lane.b32.xlu0 %v942_v27, %s7997_s30 }
  0xd8   :  { %951 = vrot.lane.b32.xlu1 %v944_v29, %s7997_s30 }
  0xdb   :  { %1016 = vrot.lane.b32.xlu0 %v1005_v32, %s7997_s30 }
  0xdc   :  { %1018 = vrot.lane.b32.xlu1 %v1007_v34, %s7997_s30 }
  0xdf   :  { %1020 = vrot.lane.b32.xlu0 %v1009_v39, %s7997_s30 }
  0xe0   :  { %1022 = vrot.lane.b32.xlu1 %v1011_v40, %s7997_s30 }
  0xe3   :  { %1050 = vrot.lane.b32.xlu0 %v1045_v41, %s7996_s20 }
  0xe4   :  { %1052 = vrot.lane.b32.xlu1 %v1049_v42, %s7996_s20 }
 0x101   :  { %v8402_v43 = vpop.permute.xlu0 %617 }
 0x102   :  { %14255 = vst [vmem:[#allocation7_spill] sm:$0xff] %v8402_v43  ;;  %v8404_v44 = vpop.permute.xlu1 %619 }
 0x103   :  { %14256 = vst [vmem:[#allocation8_spill] sm:$0xff] %v8404_v44 }
 0x105   :  { %v8406_v45 = vpop.permute.xlu0 %621 }
 0x106   :  { %14257 = vst [vmem:[#allocation9_spill] sm:$0xff] %v8406_v45  ;;  %v8408_v51 = vpop.permute.xlu1 %623 }
 0x107   :  { %14258 = vst [vmem:[#allocation10_spill] sm:$0xff] %v8408_v51  ;;  %v7797_v51 = vld [vmem:[%s13917_s0 + $0x3] ss:$8 sm:$0x3] }
 0x109   :  { %v8410_v52 = vpop.permute.xlu0 %625 }
 0x10a   :  { %v8412_v5 = vpop.permute.xlu1 %627 }
 0x10d   :  { %v8414_v8 = vpop.permute.xlu0 %693 }
 0x10e   :  { %v8416_v17 = vpop.permute.xlu1 %695 }
 0x111   :  { %v8418_v2 = vpop.permute.xlu0 %760 }
 0x112   :  { %v8420_v24 = vpop.permute.xlu1 %762 }
 0x115   :  { %v8422_v25 = vpop.permute.xlu0 %827 }
 0x116   :  { %v8424_v7 = vpop.permute.xlu1 %829 }
 0x119   :  { %v8426_v30 = vpop.permute.xlu0 %894 }
 0x11a   :  { %v8428_v4 = vpop.permute.xlu1 %896 }
 0x11d   :  { %v8430_v10 = vpop.permute.xlu0 %945 }
 0x11e   :  { %14259 = vst [vmem:[#allocation11_spill] sm:$0xff] %v8430_v10  ;;  %v8432_v6 = vpop.permute.xlu1 %947 }
 0x11f   :  { %14260 = vst [vmem:[#allocation12_spill] sm:$0xff] %v8432_v6 }
 0x121   :  { %v8434_v12 = vpop.permute.xlu0 %953 }
 0x122   :  { %v8436_v35 = vpop.permute.xlu1 %955 }
 0x125   :  { %v8438_v46 = vpop.permute.xlu0 %1012 }
 0x126   :  { %14261 = vst [vmem:[#allocation13_spill] sm:$0xff] %v8438_v46  ;;  %v8440_v47 = vpop.permute.xlu1 %1014 }
 0x127   :  { %14262 = vst [vmem:[#allocation14_spill] sm:$0xff] %v8440_v47 }
 0x129   :  { %v8442_v9 = vpop.permute.xlu0 %685 }
 0x12a   :  { %14263 = vst [vmem:[#allocation15_spill] sm:$0xff] %v8442_v9  ;;  %v8444_v48 = vpop.permute.xlu1 %687  ;;  %v7796_v9 = vld [vmem:[%s13917_s0 + $0xe0] ss:$8 sm:$0x3] }
 0x12b   :  { %14264 = vst [vmem:[#allocation16_spill] sm:$0xff] %v8444_v48 }
 0x12d   :  { %v8446_v49 = vpop.permute.xlu0 %689 }
 0x12e   :  { %14265 = vst [vmem:[#allocation17_spill] sm:$0xff] %v8446_v49  ;;  %v8448_v16 = vpop.permute.xlu1 %691 }
 0x12f   :  { %14266 = vst [vmem:[#allocation18_spill] sm:$0xff] %v8448_v16 }
 0x131   :  { %v8450_v53 = vpop.permute.xlu0 %752 }
 0x132   :  { %14267 = vst [vmem:[#allocation19_spill] sm:$0xff] %v8450_v53  ;;  %v8452_v11 = vpop.permute.xlu1 %754 }
 0x133   :  { %14268 = vst [vmem:[#allocation20_spill] sm:$0xff] %v8452_v11 }
 0x135   :  { %v8454_v19 = vpop.permute.xlu0 %756 }
 0x136   :  { %14269 = vst [vmem:[#allocation21_spill] sm:$0xff] %v8454_v19  ;;  %v8456_v15 = vpop.permute.xlu1 %758 }
 0x137   :  { %14270 = vst [vmem:[#allocation22_spill] sm:$0xff] %v8456_v15 }
 0x139   :  { %v8458_v21 = vpop.permute.xlu0 %819 }
 0x13a   :  { %14271 = vst [vmem:[#allocation23_spill] sm:$0xff] %v8458_v21  ;;  %v8460_v54 = vpop.permute.xlu1 %821 }
 0x13b   :  { %14272 = vst [vmem:[#allocation24_spill] sm:$0xff] %v8460_v54 }
 0x13d   :  { %v8462_v56 = vpop.permute.xlu0 %823 }
 0x13e   :  { %14273 = vst [vmem:[#allocation25_spill] sm:$0xff] %v8462_v56  ;;  %v8464_v58 = vpop.permute.xlu1 %825 }
 0x13f   :  { %14274 = vst [vmem:[#allocation26_spill] sm:$0xff] %v8464_v58 }
 0x141   :  { %v8466_v18 = vpop.permute.xlu0 %886 }
 0x142   :  { %14275 = vst [vmem:[#allocation27_spill] sm:$0xff] %v8466_v18  ;;  %v8468_v59 = vpop.permute.xlu1 %888 }
 0x143   :  { %14276 = vst [vmem:[#allocation28_spill] sm:$0xff] %v8468_v59 }
 0x145   :  { %v8470_v60 = vpop.permute.xlu0 %890 }
 0x146   :  { %14277 = vst [vmem:[#allocation29_spill] sm:$0xff] %v8470_v60  ;;  %v8472_v23 = vpop.permute.xlu1 %892 }
 0x147   :  { %14278 = vst [vmem:[#allocation30_spill] sm:$0xff] %v8472_v23 }
 0x149   :  { %v8474_v20 = vpop.permute.xlu0 %949 }
 0x14a   :  { %14279 = vst [vmem:[#allocation31_spill] sm:$0xff] %v8474_v20  ;;  %v8476_v26 = vpop.permute.xlu1 %951 }
 0x14b   :  { %14280 = vst [vmem:[#allocation32_spill] sm:$0xff] %v8476_v26 }
 0x14d   :  { %v8478_v22 = vpop.permute.xlu0 %1016 }
 0x14e   :  { %14281 = vst [vmem:[#allocation33_spill] sm:$0xff] %v8478_v22  ;;  %v8480_v28 = vpop.permute.xlu1 %1018 }
 0x14f   :  { %14282 = vst [vmem:[#allocation34_spill] sm:$0xff] %v8480_v28 }
 0x151   :  { %v8482_v61 = vpop.permute.xlu0 %1020 }
 0x152   :  { %v8484_v27 = vpop.permute.xlu1 %1022 }
 0x155   :  { %v1051_v31 = vpop.permute.xlu0 %1050 }
 0x156   :  { %v1053_v1 = vpop.permute.xlu1 %1052  ;;  %v1057_v29 = vmul.f32 %v1051_v31, %v8133_v55  ;;  %v1059_v33 = vmul.f32 %v1051_v31, %v8144_v62  ;;  %v1061_v38 = vmul.f32 0.0, %v1051_v31 }
 0x157   :  { %v1054_v3 = vsel %vm601_vm7, %v1051_v31, %v1053_v1  ;;  %v7783_v31 = vld [vmem:[%s13917_s0 + $0xb1] ss:$8 sm:$0x3] }
 0x158   :  { %v1058_v32 = vmul.f32 %v1054_v3, %v8137_v57  ;;  %v1060_v36 = vmul.f32 %v1054_v3, %v8146_v63  ;;  %v1069_v34 = vrot.slane %v1057_v29, 7  ;;  %v1071_v37 = vrot.slane %v1059_v33, 7 }
 0x159   :  { %v1062_v40 = vmul.f32 %v1054_v3, %v8366_v0  ;;  %v1075_v22 = vrot.slane %v1061_v38, 7  ;;  %v1112_v33 = vrot.slane %v7783_v31, %v8071_v14 }
 0x15a   :  { %1079 = vrot.lane.b32.xlu0 %v1069_v34, %s7997_s30  ;;  %v1070_v39 = vrot.slane %v1058_v32, 7  ;;  %v1073_v41 = vrot.slane %v1060_v36, 7  ;;  %v1072_v42 = vsel %vm444_vm14, %v1069_v34, %v1071_v37  ;;  %v1116_v32 = vrot.slane %v7783_v31, %v8069_v13 }
 0x15b   :  { %v1077_v1 = vrot.slane %v1062_v40, 7  ;;  %v1076_v29 = vsel %vm444_vm14, %v1071_v37, %v1075_v22 }
 0x15c   :  { %1081 = vrot.lane.b32.xlu1 %v1070_v39, %s7997_s30  ;;  %v1074_v28 = vsel %vm444_vm14, %v1070_v39, %v1073_v41 }
 0x15d   :  { %v1078_v3 = vsel %vm444_vm14, %v1073_v41, %v1077_v1 }
 0x15e   :  { %1083 = vrot.lane.b32.xlu0 %v1072_v42, %s7997_s30 }
 0x160   :  { %1085 = vrot.lane.b32.xlu1 %v1074_v28, %s7997_s30 }
 0x162   :  { %1087 = vrot.lane.b32.xlu0 %v1076_v29, %s7997_s30 }
 0x164   :  { %1089 = vrot.lane.b32.xlu1 %v1078_v3, %s7997_s30 }
 0x166   :  { %1117 = vrot.lane.b32.xlu0 %v1112_v33, %s7996_s20  ;;  %v7784_v33 = vld [vmem:[%s13917_s0 + $0xc4] ss:$8 sm:$0x3] }
 0x168   :  { %1119 = vrot.lane.b32.xlu1 %v1116_v32, %s7996_s20  ;;  %v1169_v32 = vrot.slane %v7784_v33, %v8071_v14 }
 0x1cc   :  { %v8509_v36 = vpop.permute.xlu0 %1079 }
 0x1cd   :  { %14283 = vst [vmem:[#allocation35_spill] sm:$0xff] %v8509_v36 }
 0x1ce   :  { %v8511_v34 = vpop.permute.xlu1 %1081 }
 0x1cf   :  { %14284 = vst [vmem:[#allocation36_spill] sm:$0xff] %v8511_v34 }
 0x1d0   :  { %v8513_v28 = vpop.permute.xlu0 %1083 }
 0x1d1   :  { %14285 = vst [vmem:[#allocation37_spill] sm:$0xff] %v8513_v28 }
 0x1d2   :  { %v8515_v22 = vpop.permute.xlu1 %1085 }
 0x1d3   :  { %14286 = vst [vmem:[#allocation38_spill] sm:$0xff] %v8515_v22 }
 0x1d4   :  { %v8517_v37 = vpop.permute.xlu0 %1087 }
 0x1d6   :  { %v8519_v38 = vpop.permute.xlu1 %1089 }
 0x1d8   :  { %v1118_v39 = vpop.permute.xlu0 %1117 }
 0x1d9   :  { %v1124_v40 = vmul.f32 %v1118_v39, %v8133_v55  ;;  %v1126_v31 = vmul.f32 %v1118_v39, %v8144_v62  ;;  %v1128_v3 = vmul.f32 0.0, %v1118_v39 }
 0x1da   :  { %v1120_v41 = vpop.permute.xlu1 %1119 }
 0x1db   :  { %v1121_v42 = vsel %vm601_vm7, %v1118_v39, %v1120_v41  ;;  %1136 = vrot.lane.b32.xlu0 %v1124_v40, %s7997_s30  ;;  %v1173_v41 = vrot.slane %v7784_v33, %v8069_v13 }
 0x1dc   :  { %v1125_v1 = vmul.f32 %v1121_v42, %v8137_v57  ;;  %v1127_v29 = vmul.f32 %v1121_v42, %v8146_v63  ;;  %v1129_v40 = vmul.f32 %v1121_v42, %v8366_v0 }
 0x1de   :  { %1138 = vrot.lane.b32.xlu1 %v1125_v1, %s7997_s30 }
 0x1df   :  { %1140 = vrot.lane.b32.xlu0 %v1126_v31, %s7997_s30 }
 0x1e2   :  { %1142 = vrot.lane.b32.xlu1 %v1127_v29, %s7997_s30 }
 0x1e3   :  { %1144 = vrot.lane.b32.xlu0 %v1128_v3, %s7997_s30 }
 0x1e6   :  { %1146 = vrot.lane.b32.xlu1 %v1129_v40, %s7997_s30 }
 0x1e7   :  { %1174 = vrot.lane.b32.xlu0 %v1169_v32, %s7996_s20 }
 0x1ea   :  { %1176 = vrot.lane.b32.xlu1 %v1173_v41, %s7996_s20 }
 0x24d   :  { %v8540_v1 = vpop.permute.xlu0 %1136 }
 0x24e   :  { %14287 = vst [vmem:[#allocation39_spill] sm:$0xff] %v8540_v1 }
 0x250   :  { %v8542_v31 = vpop.permute.xlu1 %1138 }
 0x251   :  { %14288 = vst [vmem:[#allocation40_spill] sm:$0xff] %v8542_v31  ;;  %v8544_v39 = vpop.permute.xlu0 %1140 }
 0x252   :  { %14289 = vst [vmem:[#allocation41_spill] sm:$0xff] %v8544_v39 }
 0x254   :  { %v8546_v29 = vpop.permute.xlu1 %1142 }
 0x255   :  { %14290 = vst [vmem:[#allocation42_spill] sm:$0xff] %v8546_v29  ;;  %v8548_v3 = vpop.permute.xlu0 %1144 }
 0x258   :  { %v8550_v28 = vpop.permute.xlu1 %1146 }
 0x259   :  { %v1175_v42 = vpop.permute.xlu0 %1174 }
 0x25a   :  { %v1181_v40 = vmul.f32 %v1175_v42, %v8133_v55  ;;  %v1183_v33 = vmul.f32 %v1175_v42, %v8144_v62  ;;  %v1185_v32 = vmul.f32 0.0, %v1175_v42 }
 0x25c   :  { %v1177_v22 = vpop.permute.xlu1 %1176  ;;  %v1193_v41 = vrot.slane %v1181_v40, 1  ;;  %v1194_v36 = vrot.slane %v1183_v33, 1  ;;  %v1199_v31 = vrot.slane %v1185_v32, 1 }
 0x25d   :  { %v1178_v1 = vsel %vm601_vm7, %v1175_v42, %v1177_v22  ;;  %v7785_v22 = vld [vmem:[%s13917_s0 + $0xd7] ss:$8 sm:$0x3] }
 0x25e   :  { %v1182_v39 = vmul.f32 %v1178_v1, %v8137_v57  ;;  %v1184_v29 = vmul.f32 %v1178_v1, %v8146_v63  ;;  %v1186_v34 = vmul.f32 %v1178_v1, %v8366_v0  ;;  %v1195_v46 = vsel %vm164_vm8, %v1193_v41, %v1194_v36 }
 0x25f   :  { %1203 = vrot.lane.b32.xlu0 %v1195_v46, %s7997_s30  ;;  %v1200_v60 = vsel %vm164_vm8, %v1194_v36, %v1199_v31  ;;  %v1236_v46 = vrot.slane %v7785_v22, %v8071_v14 }
 0x260   :  { %v1196_v47 = vrot.slane %v1182_v39, 1  ;;  %v1197_v20 = vrot.slane %v1184_v29, 1  ;;  %v1201_v26 = vrot.slane %v1186_v34, 1 }
 0x262   :  { %v1198_v40 = vsel %vm164_vm8, %v1196_v47, %v1197_v20  ;;  %v1202_v1 = vsel %vm164_vm8, %v1197_v20, %v1201_v26  ;;  %v1240_v47 = vrot.slane %v7785_v22, %v8069_v13 }
 0x263   :  { %1207 = vrot.lane.b32.xlu0 %v1200_v60, %s7997_s30  ;;  %1205 = vrot.lane.b32.xlu1 %v1198_v40, %s7997_s30 }
 0x267   :  { %1211 = vrot.lane.b32.xlu0 %v1199_v31, %s7997_s30  ;;  %1209 = vrot.lane.b32.xlu1 %v1202_v1, %s7997_s30 }
 0x26b   :  { %1241 = vrot.lane.b32.xlu0 %v1236_v46, %s7996_s20  ;;  %1213 = vrot.lane.b32.xlu1 %v1201_v26, %s7997_s30 }
 0x26f   :  { %1243 = vrot.lane.b32.xlu1 %v1240_v47, %s7996_s20 }
 0x2d1   :  { %v8575_v60 = vpop.permute.xlu0 %1203 }
 0x2d2   :  { %14291 = vst [vmem:[#allocation43_spill] sm:$0xff] %v8575_v60 }
 0x2d5   :  { %v8577_v36 = vpop.permute.xlu0 %1207  ;;  %v8579_v34 = vpop.permute.xlu1 %1205 }
 0x2d6   :  { %14292 = vst [vmem:[#allocation44_spill] sm:$0xff] %v8577_v36  ;;  %14293 = vst [vmem:[#allocation45_spill] sm:$0xff] %v8579_v34 }
 0x2d9   :  { %v8581_v20 = vpop.permute.xlu0 %1211  ;;  %v8583_v31 = vpop.permute.xlu1 %1209 }
 0x2da   :  { %14294 = vst [vmem:[#allocation46_spill] sm:$0xff] %v8583_v31 }
 0x2dd   :  { %v1242_v39 = vpop.permute.xlu0 %1241  ;;  %v8585_v29 = vpop.permute.xlu1 %1213 }
 0x2de   :  { %v1248_v42 = vmul.f32 %v1242_v39, %v8133_v55  ;;  %v1250_v26 = vmul.f32 %v1242_v39, %v8144_v62  ;;  %v1252_v33 = vmul.f32 0.0, %v1242_v39 }
 0x2e0   :  { %v1260_v32 = vrot.slane %v1248_v42, 2  ;;  %v1261_v41 = vrot.slane %v1250_v26, 2  ;;  %v1266_v46 = vrot.slane %v1252_v33, 2  ;;  %v7786_v26 = vld [vmem:[%s13917_s0 + $0x2] ss:$8 sm:$0x3] }
 0x2e1   :  { %v1244_v40 = vpop.permute.xlu1 %1243 }
 0x2e2   :  { %v1245_v22 = vsel %vm601_vm7, %v1242_v39, %v1244_v40  ;;  %v1262_v1 = vsel %vm212_vm9, %v1260_v32, %v1261_v41  ;;  %v1267_v23 = vsel %vm212_vm9, %v1261_v41, %v1266_v46  ;;  %v1303_v32 = vrot.slane %v7786_v26, %v8071_v14 }
 0x2e3   :  { %v1249_v47 = vmul.f32 %v1245_v22, %v8137_v57  ;;  %v1251_v36 = vmul.f32 %v1245_v22, %v8146_v63  ;;  %v1253_v31 = vmul.f32 %v1245_v22, %v8366_v0  ;;  %1270 = vrot.lane.b32.xlu0 %v1262_v1, %s7997_s30  ;;  %vm629_vm7 = vcmask 1039360  }
 0x2e5   :  { %v1263_v60 = vrot.slane %v1249_v47, 2  ;;  %v1264_v34 = vrot.slane %v1251_v36, 2  ;;  %v1268_v42 = vrot.slane %v1253_v31, 2 }
 0x2e7   :  { %1274 = vrot.lane.b32.xlu0 %v1267_v23, %s7997_s30  ;;  %v1265_v39 = vsel %vm212_vm9, %v1263_v60, %v1264_v34  ;;  %v1269_v33 = vsel %vm212_vm9, %v1264_v34, %v1268_v42  ;;  %v1307_v23 = vrot.slane %v7786_v26, %v8069_v13  ;;  %v7787_v26 = vld [vmem:[%s13917_s0 + $0x15] ss:$8 sm:$0x3] }
 0x2e8   :  { %1272 = vrot.lane.b32.xlu1 %v1265_v39, %s7997_s30 }
 0x2eb   :  { %1278 = vrot.lane.b32.xlu0 %v1266_v46, %s7997_s30 }
 0x2ec   :  { %1276 = vrot.lane.b32.xlu1 %v1269_v33, %s7997_s30 }
 0x2ef   :  { %1308 = vrot.lane.b32.xlu0 %v1303_v32, %s7998_s14 }
 0x2f0   :  { %1280 = vrot.lane.b32.xlu1 %v1268_v42, %s7997_s30 }
 0x2f4   :  { %1310 = vrot.lane.b32.xlu1 %v1307_v23, %s7998_s14  ;;  %v1362_v23 = vrot.slane %v7787_v26, %v8071_v14 }
 0x355   :  { %v8610_v60 = vpop.permute.xlu0 %1270 }
 0x356   :  { %14295 = vst [vmem:[#allocation47_spill] sm:$0xff] %v8610_v60 }
 0x359   :  { %v8612_v36 = vpop.permute.xlu0 %1274 }
 0x35a   :  { %14296 = vst [vmem:[#allocation48_spill] sm:$0xff] %v8612_v36  ;;  %v8614_v31 = vpop.permute.xlu1 %1272 }
 0x35b   :  { %14297 = vst [vmem:[#allocation49_spill] sm:$0xff] %v8614_v31 }
 0x35d   :  { %v8616_v34 = vpop.permute.xlu0 %1278 }
 0x35e   :  { %v8618_v41 = vpop.permute.xlu1 %1276 }
 0x35f   :  { %14298 = vst [vmem:[#allocation50_spill] sm:$0xff] %v8618_v41 }
 0x361   :  { %v1309_v40 = vpop.permute.xlu0 %1308 }
 0x362   :  { %v8620_v22 = vpop.permute.xlu1 %1280  ;;  %v1316_v1 = vmul.f32 0.0, %v1309_v40  ;;  %v1318_v47 = vmul.f32 %v1309_v40, %v8133_v55  ;;  %v1320_v33 = vmul.f32 %v1309_v40, %v8144_v62 }
 0x364   :  { %1328 = vrot.lane.b32.xlu0 %v1316_v1, %s7999_s15 }
 0x366   :  { %v1311_v46 = vpop.permute.xlu1 %1310 }
 0x367   :  { %v1313_v42 = vsel %vm1312_vm15, %v1309_v40, %v1311_v46  ;;  %v1366_v46 = vrot.slane %v7787_v26, %v8069_v13 }
 0x368   :  { %v1317_v39 = vmul.f32 %v1313_v42, %v8130_v50  ;;  %1332 = vrot.lane.b32.xlu0 %v1318_v47, %s7999_s15  ;;  %v1319_v32 = vmul.f32 %v1313_v42, %v8137_v57  ;;  %v1321_v1 = vmul.f32 %v1313_v42, %v8146_v63 }
 0x36a   :  { %1330 = vrot.lane.b32.xlu1 %v1317_v39, %s7999_s15 }
 0x36c   :  { %1336 = vrot.lane.b32.xlu0 %v1320_v33, %s7999_s15 }
 0x36e   :  { %1334 = vrot.lane.b32.xlu1 %v1319_v32, %s7999_s15 }
 0x370   :  { %1367 = vrot.lane.b32.xlu0 %v1362_v23, %s7998_s14 }
 0x372   :  { %1338 = vrot.lane.b32.xlu1 %v1321_v1, %s7999_s15 }
 0x376   :  { %1369 = vrot.lane.b32.xlu1 %v1366_v46, %s7998_s14 }
 0x3d6   :  { %v8641_v47 = vpop.permute.xlu0 %1328 }
 0x3d7   :  { %14299 = vst [vmem:[#allocation51_spill] sm:$0xff] %v8641_v47 }
 0x3da   :  { %v8643_v40 = vpop.permute.xlu0 %1332 }
 0x3db   :  { %14300 = vst [vmem:[#allocation52_spill] sm:$0xff] %v8643_v40 }
 0x3dc   :  { %v8645_v39 = vpop.permute.xlu1 %1330 }
 0x3dd   :  { %14301 = vst [vmem:[#allocation53_spill] sm:$0xff] %v8645_v39 }
 0x3de   :  { %v8647_v33 = vpop.permute.xlu0 %1336 }
 0x3e0   :  { %v8649_v36 = vpop.permute.xlu1 %1334 }
 0x3e1   :  { %14302 = vst [vmem:[#allocation54_spill] sm:$0xff] %v8649_v36 }
 0x3e2   :  { %v1368_v32 = vpop.permute.xlu0 %1367 }
 0x3e3   :  { %v1374_v42 = vmul.f32 0.0, %v1368_v32  ;;  %v1376_v23 = vmul.f32 %v1368_v32, %v8133_v55  ;;  %v1378_v1 = vmul.f32 %v1368_v32, %v8144_v62 }
 0x3e4   :  { %v8653_v41 = vpop.permute.xlu1 %1338 }
 0x3e5   :  { %v1386_v26 = vrot.slane %v1374_v42, 1  ;;  %v1387_v46 = vrot.slane %v1376_v23, 1  ;;  %v1392_v60 = vrot.slane %v1378_v1, 1  ;;  %v7788_v42 = vld [vmem:[%s13917_s0 + $0x30] ss:$8 sm:$0x3] }
 0x3e7   :  { %v1388_v47 = vsel %vm164_vm8, %v1386_v26, %v1387_v46  ;;  %v1393_v6 = vsel %vm164_vm8, %v1387_v46, %v1392_v60 }
 0x3e8   :  { %1396 = vrot.lane.b32.xlu0 %v1388_v47, %s7999_s15  ;;  %v1370_v40 = vpop.permute.xlu1 %1369 }
 0x3e9   :  { %v1371_v39 = vsel %vm1312_vm15, %v1368_v32, %v1370_v40  ;;  %v1429_v40 = vrot.slane %v7788_v42, %v8071_v14  ;;  %v8686_v32 = vld [vmem:[#allocation2] sm:$0xff] }
 0x3ea   :  { %v1375_v36 = vmul.f32 %v1371_v39, %v8130_v50  ;;  %v1377_v31 = vmul.f32 %v1371_v39, %v8137_v57  ;;  %v1379_v10 = vmul.f32 %v1371_v39, %v8146_v63 }
 0x3ec   :  { %v1389_v56 = vrot.slane %v1375_v36, 1  ;;  %v1390_v58 = vrot.slane %v1377_v31, 1  ;;  %1400 = vrot.lane.b32.xlu0 %v1393_v6, %s7999_s15  ;;  %v1394_v47 = vrot.slane %v1379_v10, 1  ;;  %v1433_v6 = vrot.slane %v7788_v42, %v8069_v13 }
 0x3ee   :  { %v1391_v23 = vsel %vm164_vm8, %v1389_v56, %v1390_v58  ;;  %v1395_v39 = vsel %vm164_vm8, %v1390_v58, %v1394_v47 }
 0x3ef   :  { %1398 = vrot.lane.b32.xlu1 %v1391_v23, %s7999_s15 }
 0x3f0   :  { %1404 = vrot.lane.b32.xlu0 %v1392_v60, %s7999_s15 }
 0x3f3   :  { %1402 = vrot.lane.b32.xlu1 %v1395_v39, %s7999_s15 }
 0x3f4   :  { %1434 = vrot.lane.b32.xlu0 %v1429_v40, %s7998_s14 }
 0x3f7   :  { %1406 = vrot.lane.b32.xlu1 %v1394_v47, %s7999_s15 }
 0x3fb   :  { %1436 = vrot.lane.b32.xlu1 %v1433_v6, %s7998_s14 }
 0x45a   :  { %v8676_v10 = vpop.permute.xlu0 %1396 }
 0x45b   :  { %14303 = vst [vmem:[#allocation55_spill] sm:$0xff] %v8676_v10 }
 0x45e   :  { %v8678_v56 = vpop.permute.xlu0 %1400 }
 0x45f   :  { %14304 = vst [vmem:[#allocation56_spill] sm:$0xff] %v8678_v56 }
 0x461   :  { %v8680_v36 = vpop.permute.xlu1 %1398 }
 0x462   :  { %14305 = vst [vmem:[#allocation57_spill] sm:$0xff] %v8680_v36  ;;  %v8682_v60 = vpop.permute.xlu0 %1404 }
 0x465   :  { %v8684_v31 = vpop.permute.xlu1 %1402 }
 0x466   :  { %14306 = vst [vmem:[#allocation58_spill] sm:$0xff] %v8684_v31  ;;  %v1435_v58 = vpop.permute.xlu0 %1434 }
 0x467   :  { %v1441_v1 = vmul.f32 %v8686_v32, %v1435_v58  ;;  %v1443_v26 = vmul.f32 %v1435_v58, %v8133_v55  ;;  %v1445_v46 = vmul.f32 %v1435_v58, %v8144_v62 }
 0x469   :  { %v8691_v42 = vpop.permute.xlu1 %1406  ;;  %v1453_v47 = vrot.slane %v1441_v1, 2  ;;  %v1454_v23 = vrot.slane %v1443_v26, 2  ;;  %v1459_v39 = vrot.slane %v1445_v46, 2  ;;  %v7789_v46 = vld [vmem:[%s13917_s0 + $0x43] ss:$8 sm:$0x3] }
 0x46b   :  { %v1455_v40 = vsel %vm212_vm9, %v1453_v47, %v1454_v23  ;;  %v1460_v18 = vsel %vm212_vm9, %v1454_v23, %v1459_v39 }
 0x46c   :  { %1463 = vrot.lane.b32.xlu0 %v1455_v40, %s7999_s15 }
 0x46d   :  { %v1437_v6 = vpop.permute.xlu1 %1436 }
 0x46e   :  { %v1438_v56 = vsel %vm1312_vm15, %v1435_v58, %v1437_v6  ;;  %v1496_v58 = vrot.slane %v7789_v46, %v8071_v14 }
 0x46f   :  { %v1442_v31 = vmul.f32 %v1438_v56, %v8130_v50  ;;  %v1444_v10 = vmul.f32 %v1438_v56, %v8137_v57  ;;  %v1446_v36 = vmul.f32 %v1438_v56, %v8146_v63 }
 0x470   :  { %1467 = vrot.lane.b32.xlu0 %v1460_v18, %s7999_s15  ;;  %v1500_v18 = vrot.slane %v7789_v46, %v8069_v13 }
 0x471   :  { %v1456_v1 = vrot.slane %v1442_v31, 2  ;;  %v1457_v26 = vrot.slane %v1444_v10, 2  ;;  %v1461_v47 = vrot.slane %v1446_v36, 2 }
 0x473   :  { %v1458_v40 = vsel %vm212_vm9, %v1456_v1, %v1457_v26  ;;  %v1462_v56 = vsel %vm212_vm9, %v1457_v26, %v1461_v47 }
 0x474   :  { %1471 = vrot.lane.b32.xlu0 %v1459_v39, %s7999_s15  ;;  %1465 = vrot.lane.b32.xlu1 %v1458_v40, %s7999_s15 }
 0x478   :  { %1501 = vrot.lane.b32.xlu0 %v1496_v58, %s7998_s14  ;;  %1469 = vrot.lane.b32.xlu1 %v1462_v56, %s7999_s15 }
 0x47c   :  { %1473 = vrot.lane.b32.xlu1 %v1461_v47, %s7999_s15 }
 0x480   :  { %1503 = vrot.lane.b32.xlu1 %v1500_v18, %s7998_s14 }
 0x4de   :  { %v8714_v10 = vpop.permute.xlu0 %1463 }
 0x4df   :  { %14307 = vst [vmem:[#allocation59_spill] sm:$0xff] %v8714_v10 }
 0x4e2   :  { %v8716_v36 = vpop.permute.xlu0 %1467 }
 0x4e3   :  { %14308 = vst [vmem:[#allocation60_spill] sm:$0xff] %v8716_v36 }
 0x4e6   :  { %v8718_v31 = vpop.permute.xlu0 %1471  ;;  %v8720_v23 = vpop.permute.xlu1 %1465 }
 0x4e7   :  { %14309 = vst [vmem:[#allocation61_spill] sm:$0xff] %v8720_v23 }
 0x4ea   :  { %v1502_v39 = vpop.permute.xlu0 %1501  ;;  %v8722_v6 = vpop.permute.xlu1 %1469 }
 0x4eb   :  { %14310 = vst [vmem:[#allocation62_spill] sm:$0xff] %v8722_v6  ;;  %v1508_v1 = vmul.f32 %v8686_v32, %v1502_v39  ;;  %v1510_v26 = vmul.f32 %v1502_v39, %v8133_v55  ;;  %v1512_v47 = vmul.f32 %v1502_v39, %v8144_v62 }
 0x4ed   :  { %v1520_v46 = vrot.slane %v1508_v1, 3  ;;  %v1521_v40 = vrot.slane %v1510_v26, 3  ;;  %v1526_v18 = vrot.slane %v1512_v47, 3  ;;  %v7790_v1 = vld [vmem:[%s13917_s0 + $0x56] ss:$8 sm:$0x3] }
 0x4ee   :  { %v8727_v58 = vpop.permute.xlu1 %1473 }
 0x4ef   :  { %v1522_v56 = vsel %vm260_vm10, %v1520_v46, %v1521_v40  ;;  %v1527_v6 = vsel %vm260_vm10, %v1521_v40, %v1526_v18 }
 0x4f0   :  { %1530 = vrot.lane.b32.xlu0 %v1522_v56, %s7999_s15 }
 0x4f2   :  { %v1504_v36 = vpop.permute.xlu1 %1503 }
 0x4f3   :  { %v1505_v10 = vsel %vm1312_vm15, %v1502_v39, %v1504_v36  ;;  %v1563_v39 = vrot.slane %v7790_v1, %v8071_v14 }
 0x4f4   :  { %v1509_v23 = vmul.f32 %v1505_v10, %v8130_v50  ;;  %v1511_v59 = vmul.f32 %v1505_v10, %v8137_v57  ;;  %v1513_v19 = vmul.f32 %v1505_v10, %v8146_v63  ;;  %1534 = vrot.lane.b32.xlu0 %v1527_v6, %s7999_s15 }
 0x4f6   :  { %v1523_v26 = vrot.slane %v1509_v23, 3  ;;  %v1524_v47 = vrot.slane %v1511_v59, 3  ;;  %v1528_v46 = vrot.slane %v1513_v19, 3  ;;  %v1567_v23 = vrot.slane %v7790_v1, %v8069_v13 }
 0x4f8   :  { %1538 = vrot.lane.b32.xlu0 %v1526_v18, %s7999_s15  ;;  %v1525_v36 = vsel %vm260_vm10, %v1523_v26, %v1524_v47  ;;  %v1529_v10 = vsel %vm260_vm10, %v1524_v47, %v1528_v46 }
 0x4f9   :  { %1532 = vrot.lane.b32.xlu1 %v1525_v36, %s7999_s15 }
 0x4fc   :  { %1568 = vrot.lane.b32.xlu0 %v1563_v39, %s7998_s14 }
 0x4fd   :  { %1536 = vrot.lane.b32.xlu1 %v1529_v10, %s7999_s15 }
 0x501   :  { %1540 = vrot.lane.b32.xlu1 %v1528_v46, %s7999_s15 }
 0x505   :  { %1570 = vrot.lane.b32.xlu1 %v1567_v23, %s7998_s14 }
 0x562   :  { %v8750_v19 = vpop.permute.xlu0 %1530 }
 0x563   :  { %14311 = vst [vmem:[#allocation63_spill] sm:$0xff] %v8750_v19 }
 0x566   :  { %v8752_v59 = vpop.permute.xlu0 %1534 }
 0x567   :  { %14312 = vst [vmem:[#allocation64_spill] sm:$0xff] %v8752_v59 }
 0x56a   :  { %v8754_v6 = vpop.permute.xlu0 %1538 }
 0x56b   :  { %v8756_v40 = vpop.permute.xlu1 %1532 }
 0x56c   :  { %14313 = vst [vmem:[#allocation65_spill] sm:$0xff] %v8756_v40 }
 0x56e   :  { %v1569_v56 = vpop.permute.xlu0 %1568 }
 0x56f   :  { %v8758_v18 = vpop.permute.xlu1 %1536  ;;  %v1575_v26 = vmul.f32 %v8686_v32, %v1569_v56  ;;  %v1577_v47 = vmul.f32 %v1569_v56, %v8133_v55  ;;  %v1579_v46 = vmul.f32 %v1569_v56, %v8144_v62 }
 0x570   :  { %14314 = vst [vmem:[#allocation66_spill] sm:$0xff] %v8758_v18 }
 0x571   :  { %v1587_v1 = vrot.slane %v1575_v26, 4  ;;  %v1588_v36 = vrot.slane %v1577_v47, 4  ;;  %v1593_v23 = vrot.slane %v1579_v46, 4  ;;  %v7791_v47 = vld [vmem:[%s13917_s0 + $0x71] ss:$8 sm:$0x3] }
 0x573   :  { %v8763_v39 = vpop.permute.xlu1 %1540  ;;  %v1589_v10 = vsel %vm308_vm11, %v1587_v1, %v1588_v36  ;;  %v1594_v19 = vsel %vm308_vm11, %v1588_v36, %v1593_v23  ;;  %v1630_v36 = vrot.slane %v7791_v47, %v8071_v14 }
 0x574   :  { %1597 = vrot.lane.b32.xlu0 %v1589_v10, %s7999_s15 }
 0x577   :  { %v1571_v59 = vpop.permute.xlu1 %1570 }
 0x578   :  { %v1572_v18 = vsel %vm1312_vm15, %v1569_v56, %v1571_v59  ;;  %1601 = vrot.lane.b32.xlu0 %v1594_v19, %s7999_s15 }
 0x579   :  { %v1576_v55 = vmul.f32 %v1572_v18, %v8130_v50  ;;  %v1578_v62 = vmul.f32 %v1572_v18, %v8137_v57  ;;  %v1580_v26 = vmul.f32 %v1572_v18, %v8146_v63  ;;  %v1634_v57 = vrot.slane %v7791_v47, %v8069_v13 }
 0x57b   :  { %v1590_v46 = vrot.slane %v1576_v55, 4  ;;  %v1591_v1 = vrot.slane %v1578_v62, 4  ;;  %v1595_v10 = vrot.slane %v1580_v26, 4  ;;  %v8794_v55 = vld [vmem:[#allocation2 + $0x10] sm:$0xff]  ;;  %v8797_v26 = vld [vmem:[#allocation2 + $0x20] sm:$0xff] }
 0x57c   :  { %1605 = vrot.lane.b32.xlu0 %v1593_v23, %s7999_s15 }
 0x57d   :  { %v1592_v59 = vsel %vm308_vm11, %v1590_v46, %v1591_v1  ;;  %v1596_v50 = vsel %vm308_vm11, %v1591_v1, %v1595_v10 }
 0x57e   :  { %1599 = vrot.lane.b32.xlu1 %v1592_v59, %s7999_s15 }
 0x580   :  { %1635 = vrot.lane.b32.xlu0 %v1630_v36, %s7998_s14 }
 0x582   :  { %1603 = vrot.lane.b32.xlu1 %v1596_v50, %s7999_s15 }
 0x586   :  { %1607 = vrot.lane.b32.xlu1 %v1595_v10, %s7999_s15 }
 0x58a   :  { %1637 = vrot.lane.b32.xlu1 %v1634_v57, %s7998_s14  ;;  %v7792_v57 = vld [vmem:[%s13917_s0 + $0x84] ss:$8 sm:$0x3] }
 0x5e6   :  { %v8786_v63 = vpop.permute.xlu0 %1597 }
 0x5e7   :  { %14315 = vst [vmem:[#allocation67_spill] sm:$0xff] %v8786_v63  ;;  %v8811_v63 = vld [vmem:[#allocation2 + $0x18] sm:$0xff] }
 0x5ea   :  { %v8788_v19 = vpop.permute.xlu0 %1601 }
 0x5eb   :  { %14316 = vst [vmem:[#allocation68_spill] sm:$0xff] %v8788_v19 }
 0x5ee   :  { %v8790_v56 = vpop.permute.xlu0 %1605 }
 0x5f0   :  { %v8792_v18 = vpop.permute.xlu1 %1599 }
 0x5f1   :  { %14317 = vst [vmem:[#allocation69_spill] sm:$0xff] %v8792_v18 }
 0x5f2   :  { %v1636_v23 = vpop.permute.xlu0 %1635 }
 0x5f3   :  { %v1642_v62 = vmul.f32 %v8794_v55, %v1636_v23  ;;  %v1644_v46 = vmul.f32 %v8797_v26, %v1636_v23 }
 0x5f4   :  { %v8800_v47 = vpop.permute.xlu1 %1603 }
 0x5f5   :  { %14318 = vst [vmem:[#allocation70_spill] sm:$0xff] %v8800_v47  ;;  %v1650_v1 = vrot.slane %v1642_v62, 5  ;;  %v1652_v36 = vrot.slane %v1644_v46, 5  ;;  %v8814_v46 = vld [vmem:[#allocation2 + $0x28] sm:$0xff] }
 0x5f7   :  { %1656 = vrot.lane.b32.xlu0 %v1650_v1, %s7999_s15  ;;  %v1653_v59 = vsel %vm352_vm12, %v1650_v1, %v1652_v36  ;;  %v1689_v1 = vrot.slane %v7792_v57, %v8071_v14 }
 0x5f8   :  { %v8803_v10 = vpop.permute.xlu1 %1607 }
 0x5fb   :  { %1660 = vrot.lane.b32.xlu0 %v1653_v59, %s7999_s15 }
 0x5fc   :  { %v1638_v50 = vpop.permute.xlu1 %1637 }
 0x5fd   :  { %v1639_v19 = vsel %vm1312_vm15, %v1636_v23, %v1638_v50  ;;  %v1693_v50 = vrot.slane %v7792_v57, %v8069_v13 }
 0x5fe   :  { %v1643_v62 = vmul.f32 %v8811_v63, %v1639_v19  ;;  %v1645_v47 = vmul.f32 %v8814_v46, %v1639_v19 }
 0x5ff   :  { %1664 = vrot.lane.b32.xlu0 %v1652_v36, %s7999_s15 }
 0x600   :  { %v1651_v59 = vrot.slane %v1643_v62, 5  ;;  %v1654_v18 = vrot.slane %v1645_v47, 5 }
 0x602   :  { %1658 = vrot.lane.b32.xlu1 %v1651_v59, %s7999_s15  ;;  %v1655_v23 = vsel %vm352_vm12, %v1651_v59, %v1654_v18 }
 0x603   :  { %1694 = vrot.lane.b32.xlu0 %v1689_v1, %s7998_s14 }
 0x606   :  { %1662 = vrot.lane.b32.xlu1 %v1655_v23, %s7999_s15 }
 0x60a   :  { %1666 = vrot.lane.b32.xlu1 %v1654_v18, %s7999_s15 }
 0x60e   :  { %1696 = vrot.lane.b32.xlu1 %v1693_v50, %s7998_s14 }
 0x669   :  { %v8826_v19 = vpop.permute.xlu0 %1656 }
 0x66a   :  { %14319 = vst [vmem:[#allocation71_spill] sm:$0xff] %v8826_v19 }
 0x66d   :  { %v8828_v36 = vpop.permute.xlu0 %1660 }
 0x66e   :  { %14320 = vst [vmem:[#allocation72_spill] sm:$0xff] %v8828_v36 }
 0x671   :  { %v8830_v62 = vpop.permute.xlu0 %1664 }
 0x672   :  { %14321 = vst [vmem:[#allocation73_spill] sm:$0xff] %v8830_v62 }
 0x674   :  { %v8832_v47 = vpop.permute.xlu1 %1658 }
 0x675   :  { %14322 = vst [vmem:[#allocation74_spill] sm:$0xff] %v8832_v47  ;;  %v1695_v40 = vpop.permute.xlu0 %1694  ;;  %v7793_v47 = vld [vmem:[%s13917_s0 + $0x97] ss:$8 sm:$0x3] }
 0x676   :  { %v1701_v1 = vmul.f32 %v8794_v55, %v1695_v40  ;;  %v1703_v59 = vmul.f32 %v8797_v26, %v1695_v40  ;;  %v1705_v57 = vmul.f32 %v8686_v32, %v1695_v40 }
 0x678   :  { %v8836_v23 = vpop.permute.xlu1 %1662  ;;  %v1713_v18 = vrot.slane %v1701_v1, 6  ;;  %v1715_v15 = vrot.slane %v1703_v59, 6  ;;  %v1719_v19 = vrot.slane %v1705_v57, 6 }
 0x679   :  { %14323 = vst [vmem:[#allocation75_spill] sm:$0xff] %v8836_v23 }
 0x67a   :  { %1723 = vrot.lane.b32.xlu0 %v1713_v18, %s7999_s15  ;;  %v1716_v36 = vsel %vm396_vm13, %v1713_v18, %v1715_v15  ;;  %v1720_v1 = vsel %vm396_vm13, %v1715_v15, %v1719_v19  ;;  %v1756_v18 = vrot.slane %v7793_v47, %v8071_v14 }
 0x67c   :  { %v8840_v50 = vpop.permute.xlu1 %1666 }
 0x67e   :  { %1727 = vrot.lane.b32.xlu0 %v1716_v36, %s7999_s15 }
 0x680   :  { %v1697_v21 = vpop.permute.xlu1 %1696 }
 0x681   :  { %v1698_v23 = vsel %vm1312_vm15, %v1695_v40, %v1697_v21  ;;  %v1760_v40 = vrot.slane %v7793_v47, %v8069_v13 }
 0x682   :  { %v1702_v59 = vmul.f32 %v8811_v63, %v1698_v23  ;;  %v1704_v54 = vmul.f32 %v8814_v46, %v1698_v23  ;;  %1731 = vrot.lane.b32.xlu0 %v1720_v1, %s7999_s15  ;;  %v1706_v36 = vmul.f32 %v1698_v23, %v8366_v0 }
 0x684   :  { %v1714_v57 = vrot.slane %v1702_v59, 6  ;;  %v1717_v49 = vrot.slane %v1704_v54, 6  ;;  %v1721_v16 = vrot.slane %v1706_v36, 6 }
 0x686   :  { %1761 = vrot.lane.b32.xlu0 %v1756_v18, %s7998_s14  ;;  %1725 = vrot.lane.b32.xlu1 %v1714_v57, %s7999_s15  ;;  %v1718_v21 = vsel %vm396_vm13, %v1714_v57, %v1717_v49  ;;  %v1722_v15 = vsel %vm396_vm13, %v1717_v49, %v1721_v16 }
 0x68a   :  { %1729 = vrot.lane.b32.xlu1 %v1718_v21, %s7999_s15 }
 0x68e   :  { %1733 = vrot.lane.b32.xlu1 %v1722_v15, %s7999_s15 }
 0x692   :  { %1763 = vrot.lane.b32.xlu1 %v1760_v40, %s7998_s14 }
 0x6ec   :  { %v8862_v19 = vpop.permute.xlu0 %1723 }
 0x6ed   :  { %14324 = vst [vmem:[#allocation76_spill] sm:$0xff] %v8862_v19 }
 0x6f0   :  { %v8864_v54 = vpop.permute.xlu0 %1727 }
 0x6f1   :  { %14325 = vst [vmem:[#allocation77_spill] sm:$0xff] %v8864_v54  ;;  %v7794_v54 = vld [vmem:[%s13917_s0 + $0xb2] ss:$8 sm:$0x3] }
 0x6f4   :  { %v8866_v23 = vpop.permute.xlu0 %1731 }
 0x6f5   :  { %14326 = vst [vmem:[#allocation78_spill] sm:$0xff] %v8866_v23 }
 0x6f8   :  { %v1762_v1 = vpop.permute.xlu0 %1761  ;;  %v8868_v59 = vpop.permute.xlu1 %1725 }
 0x6f9   :  { %14327 = vst [vmem:[#allocation79_spill] sm:$0xff] %v8868_v59  ;;  %v1768_v18 = vmul.f32 %v8794_v55, %v1762_v1  ;;  %v1770_v57 = vmul.f32 %v8797_v26, %v1762_v1  ;;  %v1772_v47 = vmul.f32 %v8686_v32, %v1762_v1 }
 0x6fb   :  { %v1780_v49 = vrot.slane %v1768_v18, 7  ;;  %v1782_v36 = vrot.slane %v1770_v57, 7  ;;  %v1786_v40 = vrot.slane %v1772_v47, 7 }
 0x6fc   :  { %v8872_v16 = vpop.permute.xlu1 %1729 }
 0x6fd   :  { %14328 = vst [vmem:[#allocation80_spill] sm:$0xff] %v8872_v16  ;;  %1790 = vrot.lane.b32.xlu0 %v1780_v49, %s7999_s15  ;;  %v1783_v15 = vsel %vm444_vm14, %v1780_v49, %v1782_v36  ;;  %v1787_v18 = vsel %vm444_vm14, %v1782_v36, %v1786_v40  ;;  %v1823_v16 = vrot.slane %v7794_v54, %v8071_v14 }
 0x700   :  { %v8876_v21 = vpop.permute.xlu1 %1733 }
 0x701   :  { %14329 = vst [vmem:[#allocation81_spill] sm:$0xff] %v8876_v21  ;;  %1794 = vrot.lane.b32.xlu0 %v1783_v15, %s7999_s15 }
 0x704   :  { %v1764_v19 = vpop.permute.xlu1 %1763 }
 0x705   :  { %v1765_v57 = vsel %vm1312_vm15, %v1762_v1, %v1764_v19  ;;  %1798 = vrot.lane.b32.xlu0 %v1787_v18, %s7999_s15  ;;  %v1827_v1 = vrot.slane %v7794_v54, %v8069_v13 }
 0x706   :  { %v1769_v59 = vmul.f32 %v8811_v63, %v1765_v57  ;;  %v1771_v49 = vmul.f32 %v8814_v46, %v1765_v57  ;;  %v1773_v15 = vmul.f32 %v1765_v57, %v8366_v0 }
 0x708   :  { %v1781_v47 = vrot.slane %v1769_v59, 7  ;;  %v1784_v53 = vrot.slane %v1771_v49, 7  ;;  %v1788_v11 = vrot.slane %v1773_v15, 7 }
 0x709   :  { %1828 = vrot.lane.b32.xlu0 %v1823_v16, %s7998_s14 }
 0x70a   :  { %1792 = vrot.lane.b32.xlu1 %v1781_v47, %s7999_s15  ;;  %v1785_v36 = vsel %vm444_vm14, %v1781_v47, %v1784_v53  ;;  %v1789_v19 = vsel %vm444_vm14, %v1784_v53, %v1788_v11  ;;  %v7795_v47 = vld [vmem:[%s13917_s0 + $0xc5] ss:$8 sm:$0x3] }
 0x70e   :  { %1796 = vrot.lane.b32.xlu1 %v1785_v36, %s7999_s15  ;;  %v1880_v36 = vrot.slane %v7795_v47, %v8071_v14 }
 0x712   :  { %1800 = vrot.lane.b32.xlu1 %v1789_v19, %s7999_s15 }
 0x716   :  { %1830 = vrot.lane.b32.xlu1 %v1827_v1, %s7998_s14 }
 0x76f   :  { %v8898_v59 = vpop.permute.xlu0 %1790 }
 0x770   :  { %14330 = vst [vmem:[#allocation82_spill] sm:$0xff] %v8898_v59 }
 0x773   :  { %v8900_v40 = vpop.permute.xlu0 %1794 }
 0x774   :  { %14331 = vst [vmem:[#allocation83_spill] sm:$0xff] %v8900_v40 }
 0x777   :  { %v8902_v16 = vpop.permute.xlu0 %1798 }
 0x778   :  { %14332 = vst [vmem:[#allocation84_spill] sm:$0xff] %v8902_v16 }
 0x77b   :  { %v1829_v18 = vpop.permute.xlu0 %1828 }
 0x77c   :  { %v8904_v57 = vpop.permute.xlu1 %1792  ;;  %v1835_v49 = vmul.f32 %v8794_v55, %v1829_v18  ;;  %v1837_v11 = vmul.f32 %v8797_v26, %v1829_v18  ;;  %v1839_v54 = vmul.f32 %v8686_v32, %v1829_v18 }
 0x77d   :  { %14333 = vst [vmem:[#allocation85_spill] sm:$0xff] %v8904_v57 }
 0x77e   :  { %1847 = vrot.lane.b32.xlu0 %v1835_v49, %s7999_s15 }
 0x780   :  { %v8908_v53 = vpop.permute.xlu1 %1796 }
 0x781   :  { %14334 = vst [vmem:[#allocation86_spill] sm:$0xff] %v8908_v53 }
 0x782   :  { %1851 = vrot.lane.b32.xlu0 %v1837_v11, %s7999_s15 }
 0x784   :  { %v8916_v15 = vpop.permute.xlu1 %1800 }
 0x785   :  { %14335 = vst [vmem:[#allocation87_spill] sm:$0xff] %v8916_v15 }
 0x786   :  { %1855 = vrot.lane.b32.xlu0 %v1839_v54, %s7999_s15  ;;  %v1884_v54 = vrot.slane %v7795_v47, %v8069_v13 }
 0x788   :  { %v1831_v19 = vpop.permute.xlu1 %1830 }
 0x789   :  { %v1832_v1 = vsel %vm1312_vm15, %v1829_v18, %v1831_v19 }
 0x78a   :  { %v1836_v49 = vmul.f32 %v8811_v63, %v1832_v1  ;;  %1885 = vrot.lane.b32.xlu0 %v1880_v36, %s7998_s14  ;;  %v1838_v11 = vmul.f32 %v8814_v46, %v1832_v1  ;;  %v1840_v40 = vmul.f32 %v1832_v1, %v8366_v0 }
 0x78c   :  { %1849 = vrot.lane.b32.xlu1 %v1836_v49, %s7999_s15 }
 0x790   :  { %1853 = vrot.lane.b32.xlu1 %v1838_v11, %s7999_s15 }
 0x794   :  { %1857 = vrot.lane.b32.xlu1 %v1840_v40, %s7999_s15 }
 0x798   :  { %1887 = vrot.lane.b32.xlu1 %v1884_v54, %s7998_s14 }
 0x7f0   :  { %v8930_v53 = vpop.permute.xlu0 %1847 }
 0x7f1   :  { %14336 = vst [vmem:[#allocation88_spill] sm:$0xff] %v8930_v53 }
 0x7f4   :  { %v8932_v18 = vpop.permute.xlu0 %1851 }
 0x7f5   :  { %14337 = vst [vmem:[#allocation89_spill] sm:$0xff] %v8932_v18 }
 0x7f8   :  { %v8934_v19 = vpop.permute.xlu0 %1855 }
 0x7f9   :  { %14338 = vst [vmem:[#allocation90_spill] sm:$0xff] %v8934_v19 }
 0x7fc   :  { %v1886_v36 = vpop.permute.xlu0 %1885 }
 0x7fd   :  { %v1892_v49 = vmul.f32 %v8794_v55, %v1886_v36  ;;  %v1894_v59 = vmul.f32 %v8797_v26, %v1886_v36  ;;  %v1896_v11 = vmul.f32 %v8686_v32, %v1886_v36 }
 0x7fe   :  { %v8939_v0 = vpop.permute.xlu1 %1849 }
 0x7ff   :  { %14339 = vst [vmem:[#allocation91_spill] sm:$0xff] %v8939_v0  ;;  %v1904_v40 = vrot.slane %v1892_v49, 1  ;;  %v1905_v1 = vrot.slane %v1894_v59, 1  ;;  %v1910_v54 = vrot.slane %v1896_v11, 1  ;;  %v1947_v49 = vrot.slane %v7796_v9, %v8071_v14 }
 0x801   :  { %v1906_v47 = vsel %vm164_vm8, %v1904_v40, %v1905_v1  ;;  %v1911_v18 = vsel %vm164_vm8, %v1905_v1, %v1910_v54  ;;  %v8957_v1 = vld [vmem:[#allocation2 + $0x38] sm:$0xff] }
 0x802   :  { %1914 = vrot.lane.b32.xlu0 %v1906_v47, %s7999_s15  ;;  %v8943_v53 = vpop.permute.xlu1 %1853 }
 0x803   :  { %14340 = vst [vmem:[#allocation92_spill] sm:$0xff] %v8943_v53 }
 0x806   :  { %1918 = vrot.lane.b32.xlu0 %v1911_v18, %s7999_s15  ;;  %v8947_v57 = vpop.permute.xlu1 %1857 }
 0x807   :  { %14341 = vst [vmem:[#allocation93_spill] sm:$0xff] %v8947_v57 }
 0x80a   :  { %1922 = vrot.lane.b32.xlu0 %v1910_v54, %s7999_s15  ;;  %v1888_v59 = vpop.permute.xlu1 %1887 }
 0x80b   :  { %v1889_v11 = vsel %vm1312_vm15, %v1886_v36, %v1888_v59  ;;  %v1951_v36 = vrot.slane %v7796_v9, %v8069_v13 }
 0x80c   :  { %v1893_v40 = vmul.f32 %v8811_v63, %v1889_v11  ;;  %v1895_v47 = vmul.f32 %v8814_v46, %v1889_v11  ;;  %v1897_v18 = vmul.f32 %v8957_v1, %v1889_v11 }
 0x80e   :  { %v1907_v53 = vrot.slane %v1893_v40, 1  ;;  %v1908_v0 = vrot.slane %v1895_v47, 1  ;;  %1952 = vrot.lane.b32.xlu0 %v1947_v49, %s7998_s14  ;;  %v1912_v48 = vrot.slane %v1897_v18, 1 }
 0x810   :  { %v1909_v54 = vsel %vm164_vm8, %v1907_v53, %v1908_v0  ;;  %v1913_v45 = vsel %vm164_vm8, %v1908_v0, %v1912_v48 }
 0x811   :  { %1916 = vrot.lane.b32.xlu1 %v1909_v54, %s7999_s15 }
 0x815   :  { %1920 = vrot.lane.b32.xlu1 %v1913_v45, %s7999_s15 }
 0x819   :  { %1924 = vrot.lane.b32.xlu1 %v1912_v48, %s7999_s15 }
 0x81d   :  { %1954 = vrot.lane.b32.xlu1 %v1951_v36, %s7998_s14 }
 0x874   :  { %v8968_v59 = vpop.permute.xlu0 %1914 }
 0x875   :  { %14342 = vst [vmem:[#allocation94_spill] sm:$0xff] %v8968_v59 }
 0x878   :  { %v8970_v11 = vpop.permute.xlu0 %1918 }
 0x879   :  { %14343 = vst [vmem:[#allocation95_spill] sm:$0xff] %v8970_v11 }
 0x87c   :  { %v8972_v49 = vpop.permute.xlu0 %1922 }
 0x87d   :  { %14344 = vst [vmem:[#allocation96_spill] sm:$0xff] %v8972_v49 }
 0x880   :  { %v1953_v40 = vpop.permute.xlu0 %1952 }
 0x881   :  { %v1959_v53 = vmul.f32 %v8794_v55, %v1953_v40  ;;  %v1961_v47 = vmul.f32 %v8797_v26, %v1953_v40  ;;  %v1963_v0 = vmul.f32 %v8686_v32, %v1953_v40 }
 0x883   :  { %v8977_v45 = vpop.permute.xlu1 %1916  ;;  %v1971_v48 = vrot.slane %v1959_v53, 2  ;;  %v1972_v18 = vrot.slane %v1961_v47, 2  ;;  %v1977_v54 = vrot.slane %v1963_v0, 2  ;;  %v2014_v53 = vrot.slane %v7797_v51, %v8071_v14 }
 0x884   :  { %14345 = vst [vmem:[#allocation97_spill] sm:$0xff] %v8977_v45 }
 0x885   :  { %v1973_v9 = vsel %vm212_vm9, %v1971_v48, %v1972_v18  ;;  %v1978_v11 = vsel %vm212_vm9, %v1972_v18, %v1977_v54 }
 0x886   :  { %1981 = vrot.lane.b32.xlu0 %v1973_v9, %s7999_s15 }
 0x887   :  { %v8981_v36 = vpop.permute.xlu1 %1920 }
 0x888   :  { %14346 = vst [vmem:[#allocation98_spill] sm:$0xff] %v8981_v36 }
 0x88a   :  { %1985 = vrot.lane.b32.xlu0 %v1978_v11, %s7999_s15 }
 0x88b   :  { %v8985_v59 = vpop.permute.xlu1 %1924 }
 0x88c   :  { %14347 = vst [vmem:[#allocation99_spill] sm:$0xff] %v8985_v59 }
 0x88e   :  { %1989 = vrot.lane.b32.xlu0 %v1977_v54, %s7999_s15 }
 0x88f   :  { %v1955_v47 = vpop.permute.xlu1 %1954 }
 0x890   :  { %v1956_v0 = vsel %vm1312_vm15, %v1953_v40, %v1955_v47  ;;  %v2018_v40 = vrot.slane %v7797_v51, %v8069_v13  ;;  %vm1340_vm15 = vcmask 1031168  }
 0x891   :  { %v1960_v48 = vmul.f32 %v8811_v63, %v1956_v0  ;;  %v1962_v9 = vmul.f32 %v8814_v46, %v1956_v0  ;;  %v1964_v18 = vmul.f32 %v8957_v1, %v1956_v0 }
 0x892   :  { %2019 = vrot.lane.b32.xlu0 %v2014_v53, %s8000_s12 }
 0x893   :  { %v1974_v11 = vrot.slane %v1960_v48, 2  ;;  %v1975_v36 = vrot.slane %v1962_v9, 2  ;;  %v1979_v45 = vrot.slane %v1964_v18, 2 }
 0x895   :  { %v1976_v43 = vsel %vm212_vm9, %v1974_v11, %v1975_v36  ;;  %v1980_v54 = vsel %vm212_vm9, %v1975_v36, %v1979_v45  ;;  %v7798_v36 = vld [vmem:[%s13917_s0 + $0x16] ss:$8 sm:$0x3] }
 0x896   :  { %1983 = vrot.lane.b32.xlu1 %v1976_v43, %s7999_s15  ;;  %v2073_v11 = vrot.slane %v7798_v36, %v8071_v14 }
 0x89a   :  { %1987 = vrot.lane.b32.xlu1 %v1980_v54, %s7999_s15 }
 0x89e   :  { %1991 = vrot.lane.b32.xlu1 %v1979_v45, %s7999_s15 }
 0x8a2   :  { %2021 = vrot.lane.b32.xlu1 %v2018_v40, %s8000_s12 }
 0x8f8   :  { %v9004_v47 = vpop.permute.xlu0 %1981 }
 0x8f9   :  { %14348 = vst [vmem:[#allocation100_spill] sm:$0xff] %v9004_v47  ;;  %v2077_v47 = vrot.slane %v7798_v36, %v8069_v13 }
 0x8fc   :  { %v9006_v53 = vpop.permute.xlu0 %1985 }
 0x8fd   :  { %14349 = vst [vmem:[#allocation101_spill] sm:$0xff] %v9006_v53 }
 0x900   :  { %v9008_v0 = vpop.permute.xlu0 %1989 }
 0x901   :  { %14350 = vst [vmem:[#allocation102_spill] sm:$0xff] %v9008_v0 }
 0x904   :  { %v2020_v48 = vpop.permute.xlu0 %2019 }
 0x905   :  { %v2027_v9 = vmul.f32 %v8686_v32, %v2020_v48  ;;  %v2029_v45 = vmul.f32 %v8794_v55, %v2020_v48  ;;  %v2031_v18 = vmul.f32 %v8797_v26, %v2020_v48 }
 0x907   :  { %2039 = vrot.lane.b32.xlu0 %v2027_v9, %s8001_s13 }
 0x908   :  { %v9012_v43 = vpop.permute.xlu1 %1983 }
 0x909   :  { %14351 = vst [vmem:[#allocation103_spill] sm:$0xff] %v9012_v43 }
 0x90b   :  { %2043 = vrot.lane.b32.xlu0 %v2029_v45, %s8001_s13  ;;  %v9028_v45 = vld [vmem:[#allocation2 + $0x8] sm:$0xff] }
 0x90c   :  { %v9016_v51 = vpop.permute.xlu1 %1987 }
 0x90d   :  { %14352 = vst [vmem:[#allocation104_spill] sm:$0xff] %v9016_v51 }
 0x90f   :  { %2047 = vrot.lane.b32.xlu0 %v2031_v18, %s8001_s13 }
 0x910   :  { %v9024_v54 = vpop.permute.xlu1 %1991 }
 0x911   :  { %14353 = vst [vmem:[#allocation105_spill] sm:$0xff] %v9024_v54 }
 0x913   :  { %2078 = vrot.lane.b32.xlu0 %v2073_v11, %s8000_s12 }
 0x914   :  { %v2022_v40 = vpop.permute.xlu1 %2021 }
 0x915   :  { %v2024_v9 = vsel %vm2023_vm0, %v2020_v48, %v2022_v40 }
 0x916   :  { %v2028_v53 = vmul.f32 %v9028_v45, %v2024_v9  ;;  %v2030_v51 = vmul.f32 %v8811_v63, %v2024_v9  ;;  %v2032_v18 = vmul.f32 %v8814_v46, %v2024_v9 }
 0x918   :  { %2041 = vrot.lane.b32.xlu1 %v2028_v53, %s8001_s13 }
 0x91c   :  { %2045 = vrot.lane.b32.xlu1 %v2030_v51, %s8001_s13 }
 0x920   :  { %2049 = vrot.lane.b32.xlu1 %v2032_v18, %s8001_s13 }
 0x924   :  { %2080 = vrot.lane.b32.xlu1 %v2077_v47, %s8000_s12 }
 0x979   :  { %v9038_v11 = vpop.permute.xlu0 %2039 }
 0x97a   :  { %14354 = vst [vmem:[#allocation106_spill] sm:$0xff] %v9038_v11 }
 0x97d   :  { %v9040_v48 = vpop.permute.xlu0 %2043 }
 0x97e   :  { %14355 = vst [vmem:[#allocation107_spill] sm:$0xff] %v9040_v48 }
 0x981   :  { %v9042_v40 = vpop.permute.xlu0 %2047 }
 0x982   :  { %14356 = vst [vmem:[#allocation108_spill] sm:$0xff] %v9042_v40  ;;  %v7799_v40 = vld [vmem:[%s13917_s0 + $0x31] ss:$8 sm:$0x3] }
 0x985   :  { %v2079_v43 = vpop.permute.xlu0 %2078 }
 0x986   :  { %v2085_v53 = vmul.f32 %v8686_v32, %v2079_v43  ;;  %v2087_v44 = vmul.f32 %v8794_v55, %v2079_v43  ;;  %v2089_v51 = vmul.f32 %v8797_v26, %v2079_v43 }
 0x988   :  { %v2097_v9 = vrot.slane %v2085_v53, 1  ;;  %v2098_v0 = vrot.slane %v2087_v44, 1  ;;  %v2103_v47 = vrot.slane %v2089_v51, 1  ;;  %v2140_v44 = vrot.slane %v7799_v40, %v8071_v14 }
 0x98a   :  { %v9047_v18 = vpop.permute.xlu1 %2041  ;;  %v2099_v36 = vsel %vm164_vm8, %v2097_v9, %v2098_v0  ;;  %v2104_v48 = vsel %vm164_vm8, %v2098_v0, %v2103_v47 }
 0x98b   :  { %14357 = vst [vmem:[#allocation109_spill] sm:$0xff] %v9047_v18  ;;  %2107 = vrot.lane.b32.xlu0 %v2099_v36, %s8001_s13 }
 0x98e   :  { %v9051_v11 = vpop.permute.xlu1 %2045 }
 0x98f   :  { %14358 = vst [vmem:[#allocation110_spill] sm:$0xff] %v9051_v11  ;;  %2111 = vrot.lane.b32.xlu0 %v2104_v48, %s8001_s13 }
 0x992   :  { %v9058_v54 = vpop.permute.xlu1 %2049 }
 0x993   :  { %14359 = vst [vmem:[#allocation111_spill] sm:$0xff] %v9058_v54  ;;  %2115 = vrot.lane.b32.xlu0 %v2103_v47, %s8001_s13 }
 0x996   :  { %v2081_v53 = vpop.permute.xlu1 %2080 }
 0x997   :  { %v2082_v51 = vsel %vm2023_vm0, %v2079_v43, %v2081_v53  ;;  %2145 = vrot.lane.b32.xlu0 %v2140_v44, %s8000_s12  ;;  %v2144_v43 = vrot.slane %v7799_v40, %v8069_v13 }
 0x998   :  { %v2086_v9 = vmul.f32 %v9028_v45, %v2082_v51  ;;  %v2088_v0 = vmul.f32 %v8811_v63, %v2082_v51  ;;  %v2090_v48 = vmul.f32 %v8814_v46, %v2082_v51 }
 0x99a   :  { %v2100_v36 = vrot.slane %v2086_v9, 1  ;;  %v2101_v11 = vrot.slane %v2088_v0, 1  ;;  %v2105_v18 = vrot.slane %v2090_v48, 1 }
 0x99c   :  { %v2102_v54 = vsel %vm164_vm8, %v2100_v36, %v2101_v11  ;;  %v2106_v47 = vsel %vm164_vm8, %v2101_v11, %v2105_v18 }
 0x99d   :  { %2109 = vrot.lane.b32.xlu1 %v2102_v54, %s8001_s13 }
 0x9a1   :  { %2113 = vrot.lane.b32.xlu1 %v2106_v47, %s8001_s13 }
 0x9a5   :  { %2117 = vrot.lane.b32.xlu1 %v2105_v18, %s8001_s13 }
 0x9a9   :  { %2147 = vrot.lane.b32.xlu1 %v2144_v43, %s8000_s12 }
 0x9fd   :  { %v9074_v44 = vpop.permute.xlu0 %2107 }
 0x9fe   :  { %14360 = vst [vmem:[#allocation112_spill] sm:$0xff] %v9074_v44  ;;  %v7800_v44 = vld [vmem:[%s13917_s0 + $0x44] ss:$8 sm:$0x3] }
 0xa01   :  { %v9076_v53 = vpop.permute.xlu0 %2111 }
 0xa02   :  { %14361 = vst [vmem:[#allocation113_spill] sm:$0xff] %v9076_v53 }
 0xa05   :  { %v9078_v51 = vpop.permute.xlu0 %2115 }
 0xa06   :  { %14362 = vst [vmem:[#allocation114_spill] sm:$0xff] %v9078_v51 }
 0xa09   :  { %v2146_v9 = vpop.permute.xlu0 %2145 }
 0xa0a   :  { %v2152_v0 = vmul.f32 %v8686_v32, %v2146_v9  ;;  %v2154_v54 = vmul.f32 %v8794_v55, %v2146_v9  ;;  %v2156_v11 = vmul.f32 %v8797_v26, %v2146_v9 }
 0xa0c   :  { %v2164_v48 = vrot.slane %v2152_v0, 2  ;;  %v2165_v36 = vrot.slane %v2154_v54, 2  ;;  %v2170_v40 = vrot.slane %v2156_v11, 2  ;;  %v2207_v54 = vrot.slane %v7800_v44, %v8071_v14 }
 0xa0e   :  { %v2166_v18 = vsel %vm212_vm9, %v2164_v48, %v2165_v36  ;;  %v2171_v43 = vsel %vm212_vm9, %v2165_v36, %v2170_v40 }
 0xa0f   :  { %2174 = vrot.lane.b32.xlu0 %v2166_v18, %s8001_s13  ;;  %v9085_v47 = vpop.permute.xlu1 %2109 }
 0xa10   :  { %14363 = vst [vmem:[#allocation115_spill] sm:$0xff] %v9085_v47 }
 0xa13   :  { %2178 = vrot.lane.b32.xlu0 %v2171_v43, %s8001_s13  ;;  %v9089_v53 = vpop.permute.xlu1 %2113 }
 0xa14   :  { %14364 = vst [vmem:[#allocation116_spill] sm:$0xff] %v9089_v53 }
 0xa17   :  { %2182 = vrot.lane.b32.xlu0 %v2170_v40, %s8001_s13  ;;  %v9095_v0 = vpop.permute.xlu1 %2117 }
 0xa18   :  { %14365 = vst [vmem:[#allocation117_spill] sm:$0xff] %v9095_v0 }
 0xa1b   :  { %2212 = vrot.lane.b32.xlu0 %v2207_v54, %s8000_s12  ;;  %v2148_v11 = vpop.permute.xlu1 %2147 }
 0xa1c   :  { %v2149_v48 = vsel %vm2023_vm0, %v2146_v9, %v2148_v11  ;;  %v2211_v9 = vrot.slane %v7800_v44, %v8069_v13 }
 0xa1d   :  { %v2153_v36 = vmul.f32 %v9028_v45, %v2149_v48  ;;  %v2155_v18 = vmul.f32 %v8811_v63, %v2149_v48  ;;  %v2157_v43 = vmul.f32 %v8814_v46, %v2149_v48 }
 0xa1f   :  { %v2167_v53 = vrot.slane %v2153_v36, 2  ;;  %v2168_v47 = vrot.slane %v2155_v18, 2  ;;  %v2172_v51 = vrot.slane %v2157_v43, 2 }
 0xa21   :  { %v2169_v40 = vsel %vm212_vm9, %v2167_v53, %v2168_v47  ;;  %v2173_v0 = vsel %vm212_vm9, %v2168_v47, %v2172_v51 }
 0xa22   :  { %2176 = vrot.lane.b32.xlu1 %v2169_v40, %s8001_s13 }
 0xa26   :  { %2180 = vrot.lane.b32.xlu1 %v2173_v0, %s8001_s13 }
 0xa2a   :  { %2184 = vrot.lane.b32.xlu1 %v2172_v51, %s8001_s13 }
 0xa2e   :  { %2214 = vrot.lane.b32.xlu1 %v2211_v9, %s8000_s12 }
 0xa81   :  { %v9110_v54 = vpop.permute.xlu0 %2174 }
 0xa82   :  { %14366 = vst [vmem:[#allocation118_spill] sm:$0xff] %v9110_v54  ;;  %v7801_v54 = vld [vmem:[%s13917_s0 + $0x57] ss:$8 sm:$0x3] }
 0xa85   :  { %v9112_v11 = vpop.permute.xlu0 %2178 }
 0xa86   :  { %14367 = vst [vmem:[#allocation119_spill] sm:$0xff] %v9112_v11 }
 0xa89   :  { %v9114_v48 = vpop.permute.xlu0 %2182 }
 0xa8a   :  { %14368 = vst [vmem:[#allocation120_spill] sm:$0xff] %v9114_v48 }
 0xa8d   :  { %v2213_v36 = vpop.permute.xlu0 %2212 }
 0xa8e   :  { %v2219_v53 = vmul.f32 %v8686_v32, %v2213_v36  ;;  %v2221_v18 = vmul.f32 %v8794_v55, %v2213_v36  ;;  %v2223_v47 = vmul.f32 %v8797_v26, %v2213_v36 }
 0xa90   :  { %v2231_v0 = vrot.slane %v2219_v53, 3  ;;  %v2232_v43 = vrot.slane %v2221_v18, 3  ;;  %v2237_v44 = vrot.slane %v2223_v47, 3  ;;  %v2274_v53 = vrot.slane %v7801_v54, %v8071_v14 }
 0xa92   :  { %v2233_v51 = vsel %vm260_vm10, %v2231_v0, %v2232_v43  ;;  %v2238_v9 = vsel %vm260_vm10, %v2232_v43, %v2237_v44 }
 0xa93   :  { %2241 = vrot.lane.b32.xlu0 %v2233_v51, %s8001_s13 }
 0xa94   :  { %v9121_v40 = vpop.permute.xlu1 %2176 }
 0xa95   :  { %14369 = vst [vmem:[#allocation121_spill] sm:$0xff] %v9121_v40 }
 0xa97   :  { %2245 = vrot.lane.b32.xlu0 %v2238_v9, %s8001_s13 }
 0xa98   :  { %v9125_v11 = vpop.permute.xlu1 %2180 }
 0xa99   :  { %14370 = vst [vmem:[#allocation122_spill] sm:$0xff] %v9125_v11 }
 0xa9b   :  { %2249 = vrot.lane.b32.xlu0 %v2237_v44, %s8001_s13 }
 0xa9c   :  { %v9132_v18 = vpop.permute.xlu1 %2184 }
 0xa9d   :  { %14371 = vst [vmem:[#allocation123_spill] sm:$0xff] %v9132_v18 }
 0xa9f   :  { %2279 = vrot.lane.b32.xlu0 %v2274_v53, %s8000_s12 }
 0xaa0   :  { %v2215_v47 = vpop.permute.xlu1 %2214 }
 0xaa1   :  { %v2216_v0 = vsel %vm2023_vm0, %v2213_v36, %v2215_v47  ;;  %v2278_v36 = vrot.slane %v7801_v54, %v8069_v13 }
 0xaa2   :  { %v2220_v43 = vmul.f32 %v9028_v45, %v2216_v0  ;;  %v2222_v51 = vmul.f32 %v8811_v63, %v2216_v0  ;;  %v2224_v9 = vmul.f32 %v8814_v46, %v2216_v0 }
 0xaa4   :  { %v2234_v11 = vrot.slane %v2220_v43, 3  ;;  %v2235_v40 = vrot.slane %v2222_v51, 3  ;;  %v2239_v48 = vrot.slane %v2224_v9, 3 }
 0xaa6   :  { %v2236_v44 = vsel %vm260_vm10, %v2234_v11, %v2235_v40  ;;  %v2240_v18 = vsel %vm260_vm10, %v2235_v40, %v2239_v48 }
 0xaa7   :  { %2243 = vrot.lane.b32.xlu1 %v2236_v44, %s8001_s13 }
 0xaab   :  { %2247 = vrot.lane.b32.xlu1 %v2240_v18, %s8001_s13 }
 0xaaf   :  { %2251 = vrot.lane.b32.xlu1 %v2239_v48, %s8001_s13 }
 0xab3   :  { %2281 = vrot.lane.b32.xlu1 %v2278_v36, %s8000_s12 }
 0xb05   :  { %v9146_v53 = vpop.permute.xlu0 %2241 }
 0xb06   :  { %14372 = vst [vmem:[#allocation124_spill] sm:$0xff] %v9146_v53 }
 0xb09   :  { %v9148_v47 = vpop.permute.xlu0 %2245 }
 0xb0a   :  { %14373 = vst [vmem:[#allocation125_spill] sm:$0xff] %v9148_v47 }
 0xb0d   :  { %v9150_v0 = vpop.permute.xlu0 %2249 }
 0xb0e   :  { %14374 = vst [vmem:[#allocation126_spill] sm:$0xff] %v9150_v0 }
 0xb11   :  { %v2280_v43 = vpop.permute.xlu0 %2279 }
 0xb12   :  { %v2286_v11 = vmul.f32 %v8686_v32, %v2280_v43  ;;  %v2288_v51 = vmul.f32 %v8794_v55, %v2280_v43  ;;  %v2290_v40 = vmul.f32 %v8797_v26, %v2280_v43  ;;  %v7802_v32 = vld [vmem:[%s13917_s0 + $0x72] ss:$8 sm:$0x3] }
 0xb14   :  { %v2298_v18 = vrot.slane %v2286_v11, 4  ;;  %v2299_v9 = vrot.slane %v2288_v51, 4  ;;  %v2304_v54 = vrot.slane %v2290_v40, 4  ;;  %v2341_v11 = vrot.slane %v7802_v32, %v8071_v14 }
 0xb16   :  { %v2300_v48 = vsel %vm308_vm11, %v2298_v18, %v2299_v9  ;;  %v2305_v36 = vsel %vm308_vm11, %v2299_v9, %v2304_v54 }
 0xb17   :  { %2308 = vrot.lane.b32.xlu0 %v2300_v48, %s8001_s13 }
 0xb19   :  { %v9157_v44 = vpop.permute.xlu1 %2243 }
 0xb1a   :  { %14375 = vst [vmem:[#allocation127_spill] sm:$0xff] %v9157_v44 }
 0xb1b   :  { %2312 = vrot.lane.b32.xlu0 %v2305_v36, %s8001_s13 }
 0xb1d   :  { %v9164_v47 = vpop.permute.xlu1 %2247 }
 0xb1e   :  { %14376 = vst [vmem:[#allocation128_spill] sm:$0xff] %v9164_v47 }
 0xb1f   :  { %2316 = vrot.lane.b32.xlu0 %v2304_v54, %s8001_s13 }
 0xb21   :  { %v9168_v51 = vpop.permute.xlu1 %2251 }
 0xb22   :  { %14377 = vst [vmem:[#allocation129_spill] sm:$0xff] %v9168_v51 }
 0xb23   :  { %2346 = vrot.lane.b32.xlu0 %v2341_v11, %s8000_s12 }
 0xb25   :  { %v2282_v40 = vpop.permute.xlu1 %2281 }
 0xb26   :  { %v2283_v18 = vsel %vm2023_vm0, %v2280_v43, %v2282_v40  ;;  %v2345_v43 = vrot.slane %v7802_v32, %v8069_v13  ;;  %v7803_v32 = vld [vmem:[%s13917_s0 + $0x85] ss:$8 sm:$0x3] }
 0xb27   :  { %v2287_v9 = vmul.f32 %v9028_v45, %v2283_v18  ;;  %v2289_v48 = vmul.f32 %v8811_v63, %v2283_v18  ;;  %v2291_v36 = vmul.f32 %v8814_v46, %v2283_v18 }
 0xb29   :  { %v2301_v53 = vrot.slane %v2287_v9, 4  ;;  %v2302_v44 = vrot.slane %v2289_v48, 4  ;;  %v2306_v47 = vrot.slane %v2291_v36, 4 }
 0xb2b   :  { %v2303_v54 = vsel %vm308_vm11, %v2301_v53, %v2302_v44  ;;  %v2307_v0 = vsel %vm308_vm11, %v2302_v44, %v2306_v47 }
 0xb2c   :  { %2310 = vrot.lane.b32.xlu1 %v2303_v54, %s8001_s13 }
 0xb30   :  { %2314 = vrot.lane.b32.xlu1 %v2307_v0, %s8001_s13 }
 0xb34   :  { %2318 = vrot.lane.b32.xlu1 %v2306_v47, %s8001_s13 }
 0xb38   :  { %2348 = vrot.lane.b32.xlu1 %v2345_v43, %s8000_s12  ;;  %v2400_v43 = vrot.slane %v7803_v32, %v8071_v14 }
 0xb89   :  { %v9182_v11 = vpop.permute.xlu0 %2308 }
 0xb8a   :  { %14378 = vst [vmem:[#allocation130_spill] sm:$0xff] %v9182_v11 }
 0xb8d   :  { %v9184_v40 = vpop.permute.xlu0 %2312 }
 0xb8e   :  { %14379 = vst [vmem:[#allocation131_spill] sm:$0xff] %v9184_v40 }
 0xb91   :  { %v9186_v18 = vpop.permute.xlu0 %2316 }
 0xb92   :  { %14380 = vst [vmem:[#allocation132_spill] sm:$0xff] %v9186_v18 }
 0xb95   :  { %v2347_v9 = vpop.permute.xlu0 %2346 }
 0xb96   :  { %v2353_v53 = vmul.f32 %v8794_v55, %v2347_v9  ;;  %v2355_v48 = vmul.f32 %v8797_v26, %v2347_v9 }
 0xb98   :  { %v2361_v44 = vrot.slane %v2353_v53, 5  ;;  %v2363_v36 = vrot.slane %v2355_v48, 5 }
 0xb9a   :  { %2367 = vrot.lane.b32.xlu0 %v2361_v44, %s8001_s13  ;;  %v2364_v47 = vsel %vm352_vm12, %v2361_v44, %v2363_v36 }
 0xb9e   :  { %2371 = vrot.lane.b32.xlu0 %v2364_v47, %s8001_s13  ;;  %v9193_v0 = vpop.permute.xlu1 %2310 }
 0xb9f   :  { %14381 = vst [vmem:[#allocation133_spill] sm:$0xff] %v9193_v0 }
 0xba2   :  { %2375 = vrot.lane.b32.xlu0 %v2363_v36, %s8001_s13  ;;  %v9199_v54 = vpop.permute.xlu1 %2314 }
 0xba3   :  { %14382 = vst [vmem:[#allocation134_spill] sm:$0xff] %v9199_v54 }
 0xba6   :  { %2405 = vrot.lane.b32.xlu0 %v2400_v43, %s8000_s12  ;;  %v9203_v53 = vpop.permute.xlu1 %2318  ;;  %v2404_v43 = vrot.slane %v7803_v32, %v8069_v13 }
 0xba7   :  { %14383 = vst [vmem:[#allocation135_spill] sm:$0xff] %v9203_v53 }
 0xbaa   :  { %v2349_v48 = vpop.permute.xlu1 %2348 }
 0xbab   :  { %v2350_v44 = vsel %vm2023_vm0, %v2347_v9, %v2349_v48 }
 0xbac   :  { %v2354_v47 = vmul.f32 %v8811_v63, %v2350_v44  ;;  %v2356_v40 = vmul.f32 %v8814_v46, %v2350_v44 }
 0xbae   :  { %v2362_v11 = vrot.slane %v2354_v47, 5  ;;  %v2365_v0 = vrot.slane %v2356_v40, 5 }
 0xbb0   :  { %2369 = vrot.lane.b32.xlu1 %v2362_v11, %s8001_s13  ;;  %v2366_v36 = vsel %vm352_vm12, %v2362_v11, %v2365_v0 }
 0xbb4   :  { %2373 = vrot.lane.b32.xlu1 %v2366_v36, %s8001_s13  ;;  %v9222_v36 = vld [vmem:[#allocation2] sm:$0xff] }
 0xbb8   :  { %2377 = vrot.lane.b32.xlu1 %v2365_v0, %s8001_s13 }
 0xbbc   :  { %2407 = vrot.lane.b32.xlu1 %v2404_v43, %s8000_s12 }
 0xc0c   :  { %v9214_v54 = vpop.permute.xlu0 %2367 }
 0xc0d   :  { %14384 = vst [vmem:[#allocation136_spill] sm:$0xff] %v9214_v54  ;;  %v7804_v54 = vld [vmem:[%s13917_s0 + $0xa0] ss:$8 sm:$0x3] }
 0xc10   :  { %v9216_v9 = vpop.permute.xlu0 %2371 }
 0xc11   :  { %14385 = vst [vmem:[#allocation137_spill] sm:$0xff] %v9216_v9 }
 0xc14   :  { %v9218_v48 = vpop.permute.xlu0 %2375 }
 0xc15   :  { %14386 = vst [vmem:[#allocation138_spill] sm:$0xff] %v9218_v48 }
 0xc18   :  { %v2406_v44 = vpop.permute.xlu0 %2405 }
 0xc19   :  { %v2412_v40 = vmul.f32 %v8794_v55, %v2406_v44  ;;  %v2414_v47 = vmul.f32 %v8797_v26, %v2406_v44  ;;  %v2416_v0 = vmul.f32 %v9222_v36, %v2406_v44 }
 0xc1b   :  { %v2424_v11 = vrot.slane %v2412_v40, 6  ;;  %v2426_v18 = vrot.slane %v2414_v47, 6  ;;  %v2430_v43 = vrot.slane %v2416_v0, 6  ;;  %v2467_v47 = vrot.slane %v7804_v54, %v8071_v14 }
 0xc1d   :  { %2434 = vrot.lane.b32.xlu0 %v2424_v11, %s8001_s13  ;;  %v2427_v32 = vsel %vm396_vm13, %v2424_v11, %v2426_v18  ;;  %v2431_v40 = vsel %vm396_vm13, %v2426_v18, %v2430_v43 }
 0xc21   :  { %2438 = vrot.lane.b32.xlu0 %v2427_v32, %s8001_s13 }
 0xc22   :  { %v9228_v9 = vpop.permute.xlu1 %2369 }
 0xc23   :  { %14387 = vst [vmem:[#allocation139_spill] sm:$0xff] %v9228_v9 }
 0xc25   :  { %2442 = vrot.lane.b32.xlu0 %v2431_v40, %s8001_s13 }
 0xc26   :  { %v9236_v48 = vpop.permute.xlu1 %2373 }
 0xc27   :  { %14388 = vst [vmem:[#allocation140_spill] sm:$0xff] %v9236_v48 }
 0xc29   :  { %2472 = vrot.lane.b32.xlu0 %v2467_v47, %s8000_s12 }
 0xc2a   :  { %v9239_v11 = vpop.permute.xlu1 %2377 }
 0xc2b   :  { %14389 = vst [vmem:[#allocation141_spill] sm:$0xff] %v9239_v11 }
 0xc2e   :  { %v2408_v0 = vpop.permute.xlu1 %2407 }
 0xc2f   :  { %v2409_v32 = vsel %vm2023_vm0, %v2406_v44, %v2408_v0  ;;  %v2471_v44 = vrot.slane %v7804_v54, %v8069_v13 }
 0xc30   :  { %v2413_v9 = vmul.f32 %v8811_v63, %v2409_v32  ;;  %v2415_v53 = vmul.f32 %v8814_v46, %v2409_v32  ;;  %v2417_v18 = vmul.f32 %v8957_v1, %v2409_v32 }
 0xc32   :  { %v2425_v51 = vrot.slane %v2413_v9, 6  ;;  %v2428_v43 = vrot.slane %v2415_v53, 6  ;;  %v2432_v40 = vrot.slane %v2417_v18, 6 }
 0xc34   :  { %2436 = vrot.lane.b32.xlu1 %v2425_v51, %s8001_s13  ;;  %v2429_v48 = vsel %vm396_vm13, %v2425_v51, %v2428_v43  ;;  %v2433_v47 = vsel %vm396_vm13, %v2428_v43, %v2432_v40 }
 0xc38   :  { %2440 = vrot.lane.b32.xlu1 %v2429_v48, %s8001_s13 }
 0xc3c   :  { %2444 = vrot.lane.b32.xlu1 %v2433_v47, %s8001_s13  ;;  %v7805_v47 = vld [vmem:[%s13917_s0 + $0xb3] ss:$8 sm:$0x3] }
 0xc40   :  { %2474 = vrot.lane.b32.xlu1 %v2471_v44, %s8000_s12 }
 0xc8f   :  { %v9252_v0 = vpop.permute.xlu0 %2434 }
 0xc90   :  { %14390 = vst [vmem:[#allocation142_spill] sm:$0xff] %v9252_v0 }
 0xc93   :  { %v9254_v9 = vpop.permute.xlu0 %2438 }
 0xc94   :  { %14391 = vst [vmem:[#allocation143_spill] sm:$0xff] %v9254_v9 }
 0xc97   :  { %v9256_v53 = vpop.permute.xlu0 %2442 }
 0xc98   :  { %14392 = vst [vmem:[#allocation144_spill] sm:$0xff] %v9256_v53 }
 0xc9b   :  { %v2473_v32 = vpop.permute.xlu0 %2472 }
 0xc9c   :  { %v2479_v18 = vmul.f32 %v8794_v55, %v2473_v32  ;;  %v2481_v51 = vmul.f32 %v8797_v26, %v2473_v32  ;;  %v2483_v43 = vmul.f32 %v9222_v36, %v2473_v32 }
 0xc9e   :  { %v2491_v48 = vrot.slane %v2479_v18, 7  ;;  %v2493_v11 = vrot.slane %v2481_v51, 7  ;;  %v2497_v40 = vrot.slane %v2483_v43, 7  ;;  %v2534_v18 = vrot.slane %v7805_v47, %v8071_v14 }
 0xca0   :  { %2501 = vrot.lane.b32.xlu0 %v2491_v48, %s8001_s13  ;;  %v2494_v54 = vsel %vm444_vm14, %v2491_v48, %v2493_v11  ;;  %v2498_v9 = vsel %vm444_vm14, %v2493_v11, %v2497_v40 }
 0xca4   :  { %2505 = vrot.lane.b32.xlu0 %v2494_v54, %s8001_s13 }
 0xca6   :  { %v9267_v44 = vpop.permute.xlu1 %2436 }
 0xca7   :  { %14393 = vst [vmem:[#allocation145_spill] sm:$0xff] %v9267_v44 }
 0xca8   :  { %2509 = vrot.lane.b32.xlu0 %v2498_v9, %s8001_s13 }
 0xcaa   :  { %v9272_v51 = vpop.permute.xlu1 %2440 }
 0xcab   :  { %14394 = vst [vmem:[#allocation146_spill] sm:$0xff] %v9272_v51 }
 0xcac   :  { %2539 = vrot.lane.b32.xlu0 %v2534_v18, %s8000_s12 }
 0xcae   :  { %v9275_v48 = vpop.permute.xlu1 %2444 }
 0xcaf   :  { %14395 = vst [vmem:[#allocation147_spill] sm:$0xff] %v9275_v48 }
 0xcb2   :  { %v2475_v43 = vpop.permute.xlu1 %2474 }
 0xcb3   :  { %v2476_v54 = vsel %vm2023_vm0, %v2473_v32, %v2475_v43  ;;  %v2538_v32 = vrot.slane %v7805_v47, %v8069_v13  ;;  %v7806_v47 = vld [vmem:[%s13917_s0 + $0xc6] ss:$8 sm:$0x3] }
 0xcb4   :  { %v2480_v0 = vmul.f32 %v8811_v63, %v2476_v54  ;;  %v2482_v53 = vmul.f32 %v8814_v46, %v2476_v54  ;;  %v2484_v11 = vmul.f32 %v8957_v1, %v2476_v54 }
 0xcb6   :  { %v2492_v44 = vrot.slane %v2480_v0, 7  ;;  %v2495_v40 = vrot.slane %v2482_v53, 7  ;;  %v2499_v9 = vrot.slane %v2484_v11, 7 }
 0xcb8   :  { %2503 = vrot.lane.b32.xlu1 %v2492_v44, %s8001_s13  ;;  %v2496_v51 = vsel %vm444_vm14, %v2492_v44, %v2495_v40  ;;  %v2500_v18 = vsel %vm444_vm14, %v2495_v40, %v2499_v9  ;;  %v2591_v40 = vrot.slane %v7806_v47, %v8071_v14 }
 0xcbc   :  { %2507 = vrot.lane.b32.xlu1 %v2496_v51, %s8001_s13 }
 0xcc0   :  { %2511 = vrot.lane.b32.xlu1 %v2500_v18, %s8001_s13 }
 0xcc4   :  { %2541 = vrot.lane.b32.xlu1 %v2538_v32, %s8000_s12 }
 0xd12   :  { %v9288_v43 = vpop.permute.xlu0 %2501 }
 0xd13   :  { %14396 = vst [vmem:[#allocation148_spill] sm:$0xff] %v9288_v43 }
 0xd16   :  { %v9290_v0 = vpop.permute.xlu0 %2505 }
 0xd17   :  { %14397 = vst [vmem:[#allocation149_spill] sm:$0xff] %v9290_v0 }
 0xd1a   :  { %v9292_v53 = vpop.permute.xlu0 %2509 }
 0xd1b   :  { %14398 = vst [vmem:[#allocation150_spill] sm:$0xff] %v9292_v53 }
 0xd1e   :  { %v2540_v54 = vpop.permute.xlu0 %2539 }
 0xd1f   :  { %v2546_v11 = vmul.f32 %v8794_v55, %v2540_v54  ;;  %v2548_v44 = vmul.f32 %v8797_v26, %v2540_v54  ;;  %v2550_v51 = vmul.f32 %v9222_v36, %v2540_v54 }
 0xd21   :  { %2558 = vrot.lane.b32.xlu0 %v2546_v11, %s8001_s13 }
 0xd25   :  { %2562 = vrot.lane.b32.xlu0 %v2548_v44, %s8001_s13 }
 0xd29   :  { %2566 = vrot.lane.b32.xlu0 %v2550_v51, %s8001_s13 }
 0xd2a   :  { %v9304_v9 = vpop.permute.xlu1 %2503 }
 0xd2b   :  { %14399 = vst [vmem:[#allocation151_spill] sm:$0xff] %v9304_v9 }
 0xd2d   :  { %2596 = vrot.lane.b32.xlu0 %v2591_v40, %s8000_s12  ;;  %v2595_v40 = vrot.slane %v7806_v47, %v8069_v13 }
 0xd2e   :  { %v9307_v18 = vpop.permute.xlu1 %2507 }
 0xd2f   :  { %14400 = vst [vmem:[#allocation152_spill] sm:$0xff] %v9307_v18 }
 0xd32   :  { %v9309_v32 = vpop.permute.xlu1 %2511 }
 0xd33   :  { %14401 = vst [vmem:[#allocation153_spill] sm:$0xff] %v9309_v32 }
 0xd36   :  { %v2542_v11 = vpop.permute.xlu1 %2541 }
 0xd37   :  { %v2543_v44 = vsel %vm2023_vm0, %v2540_v54, %v2542_v11 }
 0xd38   :  { %v2547_v0 = vmul.f32 %v8811_v63, %v2543_v44  ;;  %v2549_v43 = vmul.f32 %v8814_v46, %v2543_v44  ;;  %v2551_v51 = vmul.f32 %v8957_v1, %v2543_v44 }
 0xd3a   :  { %2560 = vrot.lane.b32.xlu1 %v2547_v0, %s8001_s13 }
 0xd3e   :  { %2564 = vrot.lane.b32.xlu1 %v2549_v43, %s8001_s13 }
 0xd42   :  { %2568 = vrot.lane.b32.xlu1 %v2551_v51, %s8001_s13 }
 0xd46   :  { %2598 = vrot.lane.b32.xlu1 %v2595_v40, %s8000_s12 }
 0xd93   :  { %v9320_v18 = vpop.permute.xlu0 %2558 }
 0xd94   :  { %14402 = vst [vmem:[#allocation154_spill] sm:$0xff] %v9320_v18 }
 0xd97   :  { %v9322_v9 = vpop.permute.xlu0 %2562 }
 0xd98   :  { %14403 = vst [vmem:[#allocation155_spill] sm:$0xff] %v9322_v9  ;;  %v7807_v9 = vld [vmem:[%s13917_s0 + $0xe1] ss:$8 sm:$0x3] }
 0xd9b   :  { %v9324_v54 = vpop.permute.xlu0 %2566 }
 0xd9c   :  { %14404 = vst [vmem:[#allocation156_spill] sm:$0xff] %v9324_v54 }
 0xd9f   :  { %v2597_v11 = vpop.permute.xlu0 %2596 }
 0xda0   :  { %v2603_v0 = vmul.f32 %v8794_v55, %v2597_v11  ;;  %v2605_v53 = vmul.f32 %v8797_v26, %v2597_v11  ;;  %v2607_v43 = vmul.f32 %v9222_v36, %v2597_v11  ;;  %v2658_v26 = vrot.slane %v7807_v9, %v8071_v14 }
 0xda2   :  { %v2615_v44 = vrot.slane %v2603_v0, 1  ;;  %v2616_v32 = vrot.slane %v2605_v53, 1  ;;  %v2621_v47 = vrot.slane %v2607_v43, 1 }
 0xda4   :  { %v2617_v51 = vsel %vm164_vm8, %v2615_v44, %v2616_v32  ;;  %v2622_v40 = vsel %vm164_vm8, %v2616_v32, %v2621_v47 }
 0xda5   :  { %2625 = vrot.lane.b32.xlu0 %v2617_v51, %s8001_s13 }
 0xda9   :  { %2629 = vrot.lane.b32.xlu0 %v2622_v40, %s8001_s13 }
 0xdac   :  { %v9336_v55 = vpop.permute.xlu1 %2560 }
 0xdad   :  { %14405 = vst [vmem:[#allocation157_spill] sm:$0xff] %v9336_v55  ;;  %2633 = vrot.lane.b32.xlu0 %v2621_v47, %s8001_s13 }
 0xdb0   :  { %v9340_v53 = vpop.permute.xlu1 %2564 }
 0xdb1   :  { %14406 = vst [vmem:[#allocation158_spill] sm:$0xff] %v9340_v53  ;;  %2663 = vrot.lane.b32.xlu0 %v2658_v26, %s8000_s12  ;;  %v9389_v53 = vld [vmem:[#allocation2 + $0x28] sm:$0xff] }
 0xdb4   :  { %v9343_v0 = vpop.permute.xlu1 %2568 }
 0xdb5   :  { %14407 = vst [vmem:[#allocation159_spill] sm:$0xff] %v9343_v0 }
 0xdb8   :  { %v2599_v43 = vpop.permute.xlu1 %2598 }
 0xdb9   :  { %v2600_v32 = vsel %vm2023_vm0, %v2597_v11, %v2599_v43  ;;  %v2662_v11 = vrot.slane %v7807_v9, %v8069_v13 }
 0xdba   :  { %v2604_v44 = vmul.f32 %v8811_v63, %v2600_v32  ;;  %v2606_v51 = vmul.f32 %v8814_v46, %v2600_v32  ;;  %v2608_v40 = vmul.f32 %v8957_v1, %v2600_v32 }
 0xdbc   :  { %v2618_v18 = vrot.slane %v2604_v44, 1  ;;  %v2619_v55 = vrot.slane %v2606_v51, 1  ;;  %v2623_v47 = vrot.slane %v2608_v40, 1 }
 0xdbe   :  { %v2620_v54 = vsel %vm164_vm8, %v2618_v18, %v2619_v55  ;;  %v2624_v26 = vsel %vm164_vm8, %v2619_v55, %v2623_v47  ;;  %v9362_v18 = vld [vmem:[#allocation2 + $0x10] sm:$0xff]  ;;  %v9365_v55 = vld [vmem:[#allocation2 + $0x20] sm:$0xff] }
 0xdbf   :  { %2627 = vrot.lane.b32.xlu1 %v2620_v54, %s8001_s13 }
 0xdc3   :  { %2631 = vrot.lane.b32.xlu1 %v2624_v26, %s8001_s13 }
 0xdc7   :  { %2635 = vrot.lane.b32.xlu1 %v2623_v47, %s8001_s13 }
 0xdcb   :  { %2665 = vrot.lane.b32.xlu1 %v2662_v11, %s8000_s12 }
 0xe17   :  { %v9356_v63 = vpop.permute.xlu0 %2625 }
 0xe18   :  { %14408 = vst [vmem:[#allocation160_spill] sm:$0xff] %v9356_v63 }
 0xe1b   :  { %v9358_v46 = vpop.permute.xlu0 %2629 }
 0xe1c   :  { %14409 = vst [vmem:[#allocation161_spill] sm:$0xff] %v9358_v46  ;;  %v7808_v46 = vld [vmem:[%s13917_s0 + $0x4] ss:$8 sm:$0x3] }
 0xe1f   :  { %v9360_v43 = vpop.permute.xlu0 %2633 }
 0xe20   :  { %14410 = vst [vmem:[#allocation162_spill] sm:$0xff] %v9360_v43 }
 0xe23   :  { %v2664_v32 = vpop.permute.xlu0 %2663 }
 0xe24   :  { %v2670_v54 = vmul.f32 %v9362_v18, %v2664_v32  ;;  %v2672_v44 = vmul.f32 %v9365_v55, %v2664_v32  ;;  %v2674_v51 = vmul.f32 %v9222_v36, %v2664_v32 }
 0xe26   :  { %v2682_v9 = vrot.slane %v2670_v54, 2  ;;  %v2683_v40 = vrot.slane %v2672_v44, 2  ;;  %v2688_v26 = vrot.slane %v2674_v51, 2  ;;  %v2725_v54 = vrot.slane %v7808_v46, %v8071_v14 }
 0xe28   :  { %v2684_v47 = vsel %vm212_vm9, %v2682_v9, %v2683_v40  ;;  %v2689_v11 = vsel %vm212_vm9, %v2683_v40, %v2688_v26 }
 0xe29   :  { %2692 = vrot.lane.b32.xlu0 %v2684_v47, %s8001_s13  ;;  %v9386_v47 = vld [vmem:[#allocation2 + $0x18] sm:$0xff] }
 0xe2d   :  { %2696 = vrot.lane.b32.xlu0 %v2689_v11, %s8001_s13 }
 0xe31   :  { %2700 = vrot.lane.b32.xlu0 %v2688_v26, %s8001_s13  ;;  %v9377_v63 = vpop.permute.xlu1 %2627 }
 0xe32   :  { %14411 = vst [vmem:[#allocation163_spill] sm:$0xff] %v9377_v63 }
 0xe35   :  { %2730 = vrot.lane.b32.xlu0 %v2725_v54, %s8002_s10  ;;  %v9381_v44 = vpop.permute.xlu1 %2631 }
 0xe36   :  { %14412 = vst [vmem:[#allocation164_spill] sm:$0xff] %v9381_v44 }
 0xe39   :  { %v9383_v51 = vpop.permute.xlu1 %2635 }
 0xe3a   :  { %14413 = vst [vmem:[#allocation165_spill] sm:$0xff] %v9383_v51 }
 0xe3d   :  { %v2666_v9 = vpop.permute.xlu1 %2665 }
 0xe3e   :  { %v2667_v40 = vsel %vm2023_vm0, %v2664_v32, %v2666_v9  ;;  %v2729_v32 = vrot.slane %v7808_v46, %v8069_v13  ;;  %v7809_v46 = vld [vmem:[%s13917_s0 + $0x17] ss:$8 sm:$0x3]  ;;  %vm2051_vm0 = vcmask 1022976  }
 0xe3f   :  { %v2671_v11 = vmul.f32 %v9386_v47, %v2667_v40  ;;  %v2673_v26 = vmul.f32 %v9389_v53, %v2667_v40  ;;  %v2675_v63 = vmul.f32 %v8957_v1, %v2667_v40 }
 0xe41   :  { %v2685_v43 = vrot.slane %v2671_v11, 2  ;;  %v2686_v0 = vrot.slane %v2673_v26, 2  ;;  %v2690_v54 = vrot.slane %v2675_v63, 2 }
 0xe43   :  { %v2687_v44 = vsel %vm212_vm9, %v2685_v43, %v2686_v0  ;;  %v2691_v51 = vsel %vm212_vm9, %v2686_v0, %v2690_v54 }
 0xe44   :  { %2694 = vrot.lane.b32.xlu1 %v2687_v44, %s8001_s13 }
 0xe48   :  { %2698 = vrot.lane.b32.xlu1 %v2691_v51, %s8001_s13  ;;  %v2784_v51 = vrot.slane %v7809_v46, %v8071_v14 }
 0xe4c   :  { %2702 = vrot.lane.b32.xlu1 %v2690_v54, %s8001_s13 }
 0xe50   :  { %2732 = vrot.lane.b32.xlu1 %v2729_v32, %s8002_s10 }
 0xe9b   :  { %v9400_v9 = vpop.permute.xlu0 %2692 }
 0xe9c   :  { %14414 = vst [vmem:[#allocation166_spill] sm:$0xff] %v9400_v9 }
 0xe9f   :  { %v9402_v1 = vpop.permute.xlu0 %2696 }
 0xea0   :  { %14415 = vst [vmem:[#allocation167_spill] sm:$0xff] %v9402_v1  ;;  %v2788_v1 = vrot.slane %v7809_v46, %v8069_v13 }
 0xea3   :  { %v9404_v40 = vpop.permute.xlu0 %2700 }
 0xea4   :  { %14416 = vst [vmem:[#allocation168_spill] sm:$0xff] %v9404_v40 }
 0xea7   :  { %v2731_v63 = vpop.permute.xlu0 %2730 }
 0xea8   :  { %v2738_v43 = vmul.f32 %v9222_v36, %v2731_v63  ;;  %v2740_v0 = vmul.f32 %v9362_v18, %v2731_v63  ;;  %v2742_v44 = vmul.f32 %v9365_v55, %v2731_v63 }
 0xeaa   :  { %2750 = vrot.lane.b32.xlu0 %v2738_v43, %s8003_s11 }
 0xeae   :  { %2754 = vrot.lane.b32.xlu0 %v2740_v0, %s8003_s11 }
 0xeb2   :  { %2758 = vrot.lane.b32.xlu0 %v2742_v44, %s8003_s11 }
 0xeb6   :  { %2789 = vrot.lane.b32.xlu0 %v2784_v51, %s8002_s10  ;;  %v9417_v11 = vpop.permute.xlu1 %2694 }
 0xeb7   :  { %14417 = vst [vmem:[#allocation169_spill] sm:$0xff] %v9417_v11 }
 0xeba   :  { %v9419_v26 = vpop.permute.xlu1 %2698 }
 0xebb   :  { %14418 = vst [vmem:[#allocation170_spill] sm:$0xff] %v9419_v26 }
 0xebe   :  { %v9421_v54 = vpop.permute.xlu1 %2702 }
 0xebf   :  { %14419 = vst [vmem:[#allocation171_spill] sm:$0xff] %v9421_v54 }
 0xec2   :  { %v2733_v32 = vpop.permute.xlu1 %2732 }
 0xec3   :  { %v2735_v43 = vsel %vm2734_vm1, %v2731_v63, %v2733_v32 }
 0xec4   :  { %v2739_v0 = vmul.f32 %v9028_v45, %v2735_v43  ;;  %v2741_v44 = vmul.f32 %v9386_v47, %v2735_v43  ;;  %v2743_v51 = vmul.f32 %v9389_v53, %v2735_v43 }
 0xec6   :  { %2752 = vrot.lane.b32.xlu1 %v2739_v0, %s8003_s11 }
 0xeca   :  { %2756 = vrot.lane.b32.xlu1 %v2741_v44, %s8003_s11 }
 0xece   :  { %2760 = vrot.lane.b32.xlu1 %v2743_v51, %s8003_s11 }
 0xed2   :  { %2791 = vrot.lane.b32.xlu1 %v2788_v1, %s8002_s10 }
 0xf1c   :  { %v9432_v26 = vpop.permute.xlu0 %2750 }
 0xf1d   :  { %14420 = vst [vmem:[#allocation172_spill] sm:$0xff] %v9432_v26 }
 0xf20   :  { %v9434_v9 = vpop.permute.xlu0 %2754 }
 0xf21   :  { %14421 = vst [vmem:[#allocation173_spill] sm:$0xff] %v9434_v9  ;;  %v7810_v9 = vld [vmem:[%s13917_s0 + $0x32] ss:$8 sm:$0x3] }
 0xf22   :  { %v2851_v26 = vrot.slane %v7810_v9, %v8071_v14 }
 0xf24   :  { %v9436_v63 = vpop.permute.xlu0 %2758 }
 0xf25   :  { %14422 = vst [vmem:[#allocation174_spill] sm:$0xff] %v9436_v63 }
 0xf28   :  { %v2790_v32 = vpop.permute.xlu0 %2789 }
 0xf29   :  { %v2796_v0 = vmul.f32 %v9222_v36, %v2790_v32  ;;  %v2798_v11 = vmul.f32 %v9362_v18, %v2790_v32  ;;  %v2800_v44 = vmul.f32 %v9365_v55, %v2790_v32 }
 0xf2b   :  { %v2808_v43 = vrot.slane %v2796_v0, 1  ;;  %v2809_v40 = vrot.slane %v2798_v11, 1  ;;  %v2814_v46 = vrot.slane %v2800_v44, 1 }
 0xf2d   :  { %v2810_v51 = vsel %vm164_vm8, %v2808_v43, %v2809_v40  ;;  %v2815_v1 = vsel %vm164_vm8, %v2809_v40, %v2814_v46 }
 0xf2e   :  { %2818 = vrot.lane.b32.xlu0 %v2810_v51, %s8003_s11 }
 0xf32   :  { %2822 = vrot.lane.b32.xlu0 %v2815_v1, %s8003_s11 }
 0xf36   :  { %2826 = vrot.lane.b32.xlu0 %v2814_v46, %s8003_s11 }
 0xf38   :  { %v9450_v63 = vpop.permute.xlu1 %2752 }
 0xf39   :  { %14423 = vst [vmem:[#allocation175_spill] sm:$0xff] %v9450_v63 }
 0xf3a   :  { %2856 = vrot.lane.b32.xlu0 %v2851_v26, %s8002_s10 }
 0xf3c   :  { %v9453_v11 = vpop.permute.xlu1 %2756 }
 0xf3d   :  { %14424 = vst [vmem:[#allocation176_spill] sm:$0xff] %v9453_v11 }
 0xf40   :  { %v9455_v0 = vpop.permute.xlu1 %2760 }
 0xf41   :  { %14425 = vst [vmem:[#allocation177_spill] sm:$0xff] %v9455_v0 }
 0xf44   :  { %v2792_v44 = vpop.permute.xlu1 %2791 }
 0xf45   :  { %v2793_v40 = vsel %vm2734_vm1, %v2790_v32, %v2792_v44  ;;  %v2855_v32 = vrot.slane %v7810_v9, %v8069_v13 }
 0xf46   :  { %v2797_v43 = vmul.f32 %v9028_v45, %v2793_v40  ;;  %v2799_v51 = vmul.f32 %v9386_v47, %v2793_v40  ;;  %v2801_v1 = vmul.f32 %v9389_v53, %v2793_v40 }
 0xf48   :  { %v2811_v46 = vrot.slane %v2797_v43, 1  ;;  %v2812_v54 = vrot.slane %v2799_v51, 1  ;;  %v2816_v48 = vrot.slane %v2801_v1, 1 }
 0xf4a   :  { %v2813_v63 = vsel %vm164_vm8, %v2811_v46, %v2812_v54  ;;  %v2817_v26 = vsel %vm164_vm8, %v2812_v54, %v2816_v48 }
 0xf4b   :  { %2820 = vrot.lane.b32.xlu1 %v2813_v63, %s8003_s11 }
 0xf4f   :  { %2824 = vrot.lane.b32.xlu1 %v2817_v26, %s8003_s11 }
 0xf53   :  { %2828 = vrot.lane.b32.xlu1 %v2816_v48, %s8003_s11 }
 0xf57   :  { %2858 = vrot.lane.b32.xlu1 %v2855_v32, %s8002_s10 }
 0xfa0   :  { %v9468_v44 = vpop.permute.xlu0 %2818 }
 0xfa1   :  { %14426 = vst [vmem:[#allocation178_spill] sm:$0xff] %v9468_v44 }
 0xfa4   :  { %v9470_v40 = vpop.permute.xlu0 %2822 }
 0xfa5   :  { %14427 = vst [vmem:[#allocation179_spill] sm:$0xff] %v9470_v40  ;;  %v7811_v40 = vld [vmem:[%s13917_s0 + $0x45] ss:$8 sm:$0x3] }
 0xfa6   :  { %v2918_v44 = vrot.slane %v7811_v40, %v8071_v14 }
 0xfa8   :  { %v9472_v43 = vpop.permute.xlu0 %2826 }
 0xfa9   :  { %14428 = vst [vmem:[#allocation180_spill] sm:$0xff] %v9472_v43 }
 0xfac   :  { %v2857_v51 = vpop.permute.xlu0 %2856 }
 0xfad   :  { %v2863_v1 = vmul.f32 %v9222_v36, %v2857_v51  ;;  %v2865_v63 = vmul.f32 %v9362_v18, %v2857_v51  ;;  %v2867_v54 = vmul.f32 %v9365_v55, %v2857_v51 }
 0xfaf   :  { %v2875_v46 = vrot.slane %v2863_v1, 2  ;;  %v2876_v26 = vrot.slane %v2865_v63, 2  ;;  %v2881_v9 = vrot.slane %v2867_v54, 2 }
 0xfb1   :  { %v2877_v48 = vsel %vm212_vm9, %v2875_v46, %v2876_v26  ;;  %v2882_v32 = vsel %vm212_vm9, %v2876_v26, %v2881_v9 }
 0xfb2   :  { %2885 = vrot.lane.b32.xlu0 %v2877_v48, %s8003_s11 }
 0xfb6   :  { %2889 = vrot.lane.b32.xlu0 %v2882_v32, %s8003_s11 }
 0xfba   :  { %2893 = vrot.lane.b32.xlu0 %v2881_v9, %s8003_s11 }
 0xfbd   :  { %v9486_v11 = vpop.permute.xlu1 %2820 }
 0xfbe   :  { %14429 = vst [vmem:[#allocation181_spill] sm:$0xff] %v9486_v11  ;;  %2923 = vrot.lane.b32.xlu0 %v2918_v44, %s8002_s10 }
 0xfc1   :  { %v9489_v1 = vpop.permute.xlu1 %2824 }
 0xfc2   :  { %14430 = vst [vmem:[#allocation182_spill] sm:$0xff] %v9489_v1 }
 0xfc5   :  { %v9491_v63 = vpop.permute.xlu1 %2828 }
 0xfc6   :  { %14431 = vst [vmem:[#allocation183_spill] sm:$0xff] %v9491_v63 }
 0xfc9   :  { %v2859_v54 = vpop.permute.xlu1 %2858 }
 0xfca   :  { %v2860_v46 = vsel %vm2734_vm1, %v2857_v51, %v2859_v54  ;;  %v2922_v51 = vrot.slane %v7811_v40, %v8069_v13 }
 0xfcb   :  { %v2864_v26 = vmul.f32 %v9028_v45, %v2860_v46  ;;  %v2866_v48 = vmul.f32 %v9386_v47, %v2860_v46  ;;  %v2868_v32 = vmul.f32 %v9389_v53, %v2860_v46 }
 0xfcd   :  { %v2878_v9 = vrot.slane %v2864_v26, 2  ;;  %v2879_v43 = vrot.slane %v2866_v48, 2  ;;  %v2883_v0 = vrot.slane %v2868_v32, 2 }
 0xfcf   :  { %v2880_v11 = vsel %vm212_vm9, %v2878_v9, %v2879_v43  ;;  %v2884_v44 = vsel %vm212_vm9, %v2879_v43, %v2883_v0 }
 0xfd0   :  { %2887 = vrot.lane.b32.xlu1 %v2880_v11, %s8003_s11 }
 0xfd4   :  { %2891 = vrot.lane.b32.xlu1 %v2884_v44, %s8003_s11 }
 0xfd8   :  { %2895 = vrot.lane.b32.xlu1 %v2883_v0, %s8003_s11 }
 0xfdc   :  { %2925 = vrot.lane.b32.xlu1 %v2922_v51, %s8002_s10 }
0x1024   :  { %v9504_v54 = vpop.permute.xlu0 %2885 }
0x1025   :  { %14432 = vst [vmem:[#allocation184_spill] sm:$0xff] %v9504_v54 }
0x1028   :  { %v9506_v46 = vpop.permute.xlu0 %2889 }
0x1029   :  { %14433 = vst [vmem:[#allocation185_spill] sm:$0xff] %v9506_v46  ;;  %v7812_v46 = vld [vmem:[%s13917_s0 + $0x60] ss:$8 sm:$0x3] }
0x102a   :  { %v2985_v54 = vrot.slane %v7812_v46, %v8071_v14 }
0x102c   :  { %v9508_v26 = vpop.permute.xlu0 %2893 }
0x102d   :  { %14434 = vst [vmem:[#allocation186_spill] sm:$0xff] %v9508_v26 }
0x1030   :  { %v2924_v48 = vpop.permute.xlu0 %2923 }
0x1031   :  { %v2930_v32 = vmul.f32 %v9222_v36, %v2924_v48  ;;  %v2932_v11 = vmul.f32 %v9362_v18, %v2924_v48  ;;  %v2934_v43 = vmul.f32 %v9365_v55, %v2924_v48 }
0x1033   :  { %v2942_v9 = vrot.slane %v2930_v32, 3  ;;  %v2943_v44 = vrot.slane %v2932_v11, 3  ;;  %v2948_v40 = vrot.slane %v2934_v43, 3 }
0x1035   :  { %v2944_v0 = vsel %vm260_vm10, %v2942_v9, %v2943_v44  ;;  %v2949_v51 = vsel %vm260_vm10, %v2943_v44, %v2948_v40 }
0x1036   :  { %2952 = vrot.lane.b32.xlu0 %v2944_v0, %s8003_s11 }
0x103a   :  { %2956 = vrot.lane.b32.xlu0 %v2949_v51, %s8003_s11 }
0x103e   :  { %2960 = vrot.lane.b32.xlu0 %v2948_v40, %s8003_s11 }
0x1042   :  { %2990 = vrot.lane.b32.xlu0 %v2985_v54, %s8002_s10  ;;  %v9523_v32 = vpop.permute.xlu1 %2887 }
0x1043   :  { %14435 = vst [vmem:[#allocation187_spill] sm:$0xff] %v9523_v32 }
0x1046   :  { %v9525_v11 = vpop.permute.xlu1 %2891 }
0x1047   :  { %14436 = vst [vmem:[#allocation188_spill] sm:$0xff] %v9525_v11 }
0x104a   :  { %v9527_v43 = vpop.permute.xlu1 %2895 }
0x104b   :  { %14437 = vst [vmem:[#allocation189_spill] sm:$0xff] %v9527_v43 }
0x104e   :  { %v2926_v9 = vpop.permute.xlu1 %2925 }
0x104f   :  { %v2927_v44 = vsel %vm2734_vm1, %v2924_v48, %v2926_v9  ;;  %v2989_v48 = vrot.slane %v7812_v46, %v8069_v13 }
0x1050   :  { %v2931_v0 = vmul.f32 %v9028_v45, %v2927_v44  ;;  %v2933_v51 = vmul.f32 %v9386_v47, %v2927_v44  ;;  %v2935_v1 = vmul.f32 %v9389_v53, %v2927_v44 }
0x1052   :  { %v2945_v40 = vrot.slane %v2931_v0, 3  ;;  %v2946_v26 = vrot.slane %v2933_v51, 3  ;;  %v2950_v63 = vrot.slane %v2935_v1, 3 }
0x1054   :  { %v2947_v54 = vsel %vm260_vm10, %v2945_v40, %v2946_v26  ;;  %v2951_v11 = vsel %vm260_vm10, %v2946_v26, %v2950_v63 }
0x1055   :  { %2954 = vrot.lane.b32.xlu1 %v2947_v54, %s8003_s11 }
0x1059   :  { %2958 = vrot.lane.b32.xlu1 %v2951_v11, %s8003_s11 }
0x105d   :  { %2962 = vrot.lane.b32.xlu1 %v2950_v63, %s8003_s11 }
0x1061   :  { %2992 = vrot.lane.b32.xlu1 %v2989_v48, %s8002_s10  ;;  %v7813_v48 = vld [vmem:[%s13917_s0 + $0x73] ss:$8 sm:$0x3] }
0x10a8   :  { %v9540_v45 = vpop.permute.xlu0 %2952 }
0x10a9   :  { %14438 = vst [vmem:[#allocation190_spill] sm:$0xff] %v9540_v45 }
0x10ac   :  { %v9542_v9 = vpop.permute.xlu0 %2956 }
0x10ad   :  { %14439 = vst [vmem:[#allocation191_spill] sm:$0xff] %v9542_v9  ;;  %v3052_v9 = vrot.slane %v7813_v48, %v8071_v14 }
0x10b0   :  { %v9544_v44 = vpop.permute.xlu0 %2960 }
0x10b1   :  { %14440 = vst [vmem:[#allocation192_spill] sm:$0xff] %v9544_v44 }
0x10b4   :  { %v2991_v1 = vpop.permute.xlu0 %2990 }
0x10b5   :  { %v2997_v0 = vmul.f32 %v9222_v36, %v2991_v1  ;;  %v2999_v51 = vmul.f32 %v9362_v18, %v2991_v1  ;;  %v3001_v26 = vmul.f32 %v9365_v55, %v2991_v1 }
0x10b7   :  { %v3009_v11 = vrot.slane %v2997_v0, 4  ;;  %v3010_v40 = vrot.slane %v2999_v51, 4  ;;  %v3015_v46 = vrot.slane %v3001_v26, 4 }
0x10b9   :  { %v3011_v63 = vsel %vm308_vm11, %v3009_v11, %v3010_v40  ;;  %v3016_v54 = vsel %vm308_vm11, %v3010_v40, %v3015_v46 }
0x10ba   :  { %3019 = vrot.lane.b32.xlu0 %v3011_v63, %s8003_s11  ;;  %v9566_v63 = vld [vmem:[#allocation2 + $0x8] sm:$0xff] }
0x10be   :  { %3023 = vrot.lane.b32.xlu0 %v3016_v54, %s8003_s11 }
0x10c2   :  { %3027 = vrot.lane.b32.xlu0 %v3015_v46, %s8003_s11 }
0x10c6   :  { %3057 = vrot.lane.b32.xlu0 %v3052_v9, %s8002_s10 }
0x10c7   :  { %v9559_v0 = vpop.permute.xlu1 %2954 }
0x10c8   :  { %14441 = vst [vmem:[#allocation193_spill] sm:$0xff] %v9559_v0 }
0x10cb   :  { %v9561_v51 = vpop.permute.xlu1 %2958 }
0x10cc   :  { %14442 = vst [vmem:[#allocation194_spill] sm:$0xff] %v9561_v51 }
0x10cf   :  { %v9563_v26 = vpop.permute.xlu1 %2962 }
0x10d0   :  { %14443 = vst [vmem:[#allocation195_spill] sm:$0xff] %v9563_v26 }
0x10d3   :  { %v2993_v11 = vpop.permute.xlu1 %2992 }
0x10d4   :  { %v2994_v40 = vsel %vm2734_vm1, %v2991_v1, %v2993_v11  ;;  %v3056_v1 = vrot.slane %v7813_v48, %v8069_v13  ;;  %v7814_v48 = vld [vmem:[%s13917_s0 + $0x86] ss:$8 sm:$0x3] }
0x10d5   :  { %v2998_v54 = vmul.f32 %v9566_v63, %v2994_v40  ;;  %v3000_v45 = vmul.f32 %v9386_v47, %v2994_v40  ;;  %v3002_v46 = vmul.f32 %v9389_v53, %v2994_v40 }
0x10d7   :  { %v3012_v32 = vrot.slane %v2998_v54, 4  ;;  %v3013_v44 = vrot.slane %v3000_v45, 4  ;;  %v3017_v9 = vrot.slane %v3002_v46, 4 }
0x10d9   :  { %v3014_v0 = vsel %vm308_vm11, %v3012_v32, %v3013_v44  ;;  %v3018_v51 = vsel %vm308_vm11, %v3013_v44, %v3017_v9 }
0x10da   :  { %3021 = vrot.lane.b32.xlu1 %v3014_v0, %s8003_s11 }
0x10de   :  { %3025 = vrot.lane.b32.xlu1 %v3018_v51, %s8003_s11 }
0x10e2   :  { %3029 = vrot.lane.b32.xlu1 %v3017_v9, %s8003_s11  ;;  %v3111_v9 = vrot.slane %v7814_v48, %v8071_v14 }
0x10e6   :  { %3059 = vrot.lane.b32.xlu1 %v3056_v1, %s8002_s10 }
0x112c   :  { %v9578_v11 = vpop.permute.xlu0 %3019 }
0x112d   :  { %14444 = vst [vmem:[#allocation196_spill] sm:$0xff] %v9578_v11 }
0x1130   :  { %v9580_v40 = vpop.permute.xlu0 %3023 }
0x1131   :  { %14445 = vst [vmem:[#allocation197_spill] sm:$0xff] %v9580_v40 }
0x1134   :  { %v9582_v45 = vpop.permute.xlu0 %3027 }
0x1135   :  { %14446 = vst [vmem:[#allocation198_spill] sm:$0xff] %v9582_v45 }
0x1138   :  { %v3058_v54 = vpop.permute.xlu0 %3057 }
0x1139   :  { %v3064_v32 = vmul.f32 %v9362_v18, %v3058_v54  ;;  %v3066_v0 = vmul.f32 %v9365_v55, %v3058_v54 }
0x113b   :  { %v3072_v44 = vrot.slane %v3064_v32, 5  ;;  %v3074_v46 = vrot.slane %v3066_v0, 5 }
0x113d   :  { %3078 = vrot.lane.b32.xlu0 %v3072_v44, %s8003_s11  ;;  %v3075_v51 = vsel %vm352_vm12, %v3072_v44, %v3074_v46 }
0x1141   :  { %3082 = vrot.lane.b32.xlu0 %v3075_v51, %s8003_s11 }
0x1145   :  { %3086 = vrot.lane.b32.xlu0 %v3074_v46, %s8003_s11 }
0x1149   :  { %3116 = vrot.lane.b32.xlu0 %v3111_v9, %s8002_s10  ;;  %v3115_v9 = vrot.slane %v7814_v48, %v8069_v13 }
0x114c   :  { %v9595_v1 = vpop.permute.xlu1 %3021 }
0x114d   :  { %14447 = vst [vmem:[#allocation199_spill] sm:$0xff] %v9595_v1 }
0x1150   :  { %v9597_v32 = vpop.permute.xlu1 %3025 }
0x1151   :  { %14448 = vst [vmem:[#allocation200_spill] sm:$0xff] %v9597_v32 }
0x1154   :  { %v9599_v0 = vpop.permute.xlu1 %3029 }
0x1155   :  { %14449 = vst [vmem:[#allocation201_spill] sm:$0xff] %v9599_v0 }
0x1158   :  { %v3060_v40 = vpop.permute.xlu1 %3059 }
0x1159   :  { %v3061_v44 = vsel %vm2734_vm1, %v3058_v54, %v3060_v40 }
0x115a   :  { %v3065_v51 = vmul.f32 %v9386_v47, %v3061_v44  ;;  %v3067_v11 = vmul.f32 %v9389_v53, %v3061_v44 }
0x115c   :  { %v3073_v45 = vrot.slane %v3065_v51, 5  ;;  %v3076_v26 = vrot.slane %v3067_v11, 5 }
0x115e   :  { %3080 = vrot.lane.b32.xlu1 %v3073_v45, %s8003_s11  ;;  %v3077_v46 = vsel %vm352_vm12, %v3073_v45, %v3076_v26 }
0x1162   :  { %3084 = vrot.lane.b32.xlu1 %v3077_v46, %s8003_s11 }
0x1166   :  { %3088 = vrot.lane.b32.xlu1 %v3076_v26, %s8003_s11 }
0x116a   :  { %3118 = vrot.lane.b32.xlu1 %v3115_v9, %s8002_s10  ;;  %v7815_v9 = vld [vmem:[%s13917_s0 + $0xa1] ss:$8 sm:$0x3] }
0x11af   :  { %v9610_v32 = vpop.permute.xlu0 %3078 }
0x11b0   :  { %14450 = vst [vmem:[#allocation202_spill] sm:$0xff] %v9610_v32 }
0x11b3   :  { %v9612_v40 = vpop.permute.xlu0 %3082 }
0x11b4   :  { %14451 = vst [vmem:[#allocation203_spill] sm:$0xff] %v9612_v40 }
0x11b7   :  { %v9614_v54 = vpop.permute.xlu0 %3086 }
0x11b8   :  { %14452 = vst [vmem:[#allocation204_spill] sm:$0xff] %v9614_v54 }
0x11bb   :  { %v3117_v44 = vpop.permute.xlu0 %3116 }
0x11bc   :  { %v3123_v11 = vmul.f32 %v9362_v18, %v3117_v44  ;;  %v3125_v51 = vmul.f32 %v9365_v55, %v3117_v44  ;;  %v3127_v46 = vmul.f32 %v9222_v36, %v3117_v44 }
0x11be   :  { %v3135_v45 = vrot.slane %v3123_v11, 6  ;;  %v3137_v1 = vrot.slane %v3125_v51, 6  ;;  %v3141_v48 = vrot.slane %v3127_v46, 6  ;;  %v3178_v11 = vrot.slane %v7815_v9, %v8071_v14 }
0x11c0   :  { %3145 = vrot.lane.b32.xlu0 %v3135_v45, %s8003_s11  ;;  %v3138_v26 = vsel %vm396_vm13, %v3135_v45, %v3137_v1  ;;  %v3142_v40 = vsel %vm396_vm13, %v3137_v1, %v3141_v48  ;;  %v9638_v48 = vld [vmem:[#allocation2 + $0x38] sm:$0xff] }
0x11c4   :  { %3149 = vrot.lane.b32.xlu0 %v3138_v26, %s8003_s11 }
0x11c8   :  { %3153 = vrot.lane.b32.xlu0 %v3142_v40, %s8003_s11 }
0x11cc   :  { %3183 = vrot.lane.b32.xlu0 %v3178_v11, %s8002_s10 }
0x11d0   :  { %v9629_v51 = vpop.permute.xlu1 %3080 }
0x11d1   :  { %14453 = vst [vmem:[#allocation205_spill] sm:$0xff] %v9629_v51 }
0x11d4   :  { %v9631_v32 = vpop.permute.xlu1 %3084 }
0x11d5   :  { %14454 = vst [vmem:[#allocation206_spill] sm:$0xff] %v9631_v32 }
0x11d8   :  { %v9633_v45 = vpop.permute.xlu1 %3088 }
0x11d9   :  { %14455 = vst [vmem:[#allocation207_spill] sm:$0xff] %v9633_v45 }
0x11dc   :  { %v3119_v46 = vpop.permute.xlu1 %3118 }
0x11dd   :  { %v3120_v26 = vsel %vm2734_vm1, %v3117_v44, %v3119_v46  ;;  %v3182_v44 = vrot.slane %v7815_v9, %v8069_v13 }
0x11de   :  { %v3124_v54 = vmul.f32 %v9386_v47, %v3120_v26  ;;  %v3126_v0 = vmul.f32 %v9389_v53, %v3120_v26  ;;  %v3128_v40 = vmul.f32 %v9638_v48, %v3120_v26 }
0x11e0   :  { %v3136_v1 = vrot.slane %v3124_v54, 6  ;;  %v3139_v43 = vrot.slane %v3126_v0, 6  ;;  %v3143_v11 = vrot.slane %v3128_v40, 6 }
0x11e2   :  { %3147 = vrot.lane.b32.xlu1 %v3136_v1, %s8003_s11  ;;  %v3140_v32 = vsel %vm396_vm13, %v3136_v1, %v3139_v43  ;;  %v3144_v51 = vsel %vm396_vm13, %v3139_v43, %v3143_v11  ;;  %v7816_v11 = vld [vmem:[%s13917_s0 + $0xb4] ss:$8 sm:$0x3] }
0x11e6   :  { %3151 = vrot.lane.b32.xlu1 %v3140_v32, %s8003_s11 }
0x11ea   :  { %3155 = vrot.lane.b32.xlu1 %v3144_v51, %s8003_s11 }
0x11ee   :  { %3185 = vrot.lane.b32.xlu1 %v3182_v44, %s8002_s10 }
0x1232   :  { %v9648_v54 = vpop.permute.xlu0 %3145 }
0x1233   :  { %14456 = vst [vmem:[#allocation208_spill] sm:$0xff] %v9648_v54 }
0x1236   :  { %v9650_v46 = vpop.permute.xlu0 %3149 }
0x1237   :  { %14457 = vst [vmem:[#allocation209_spill] sm:$0xff] %v9650_v46 }
0x123a   :  { %v9652_v0 = vpop.permute.xlu0 %3153 }
0x123b   :  { %14458 = vst [vmem:[#allocation210_spill] sm:$0xff] %v9652_v0 }
0x123e   :  { %v3184_v26 = vpop.permute.xlu0 %3183 }
0x123f   :  { %v3190_v40 = vmul.f32 %v9362_v18, %v3184_v26  ;;  %v3192_v1 = vmul.f32 %v9365_v55, %v3184_v26  ;;  %v3194_v43 = vmul.f32 %v9222_v36, %v3184_v26 }
0x1241   :  { %v3202_v32 = vrot.slane %v3190_v40, 7  ;;  %v3204_v45 = vrot.slane %v3192_v1, 7  ;;  %v3208_v51 = vrot.slane %v3194_v43, 7  ;;  %v3245_v40 = vrot.slane %v7816_v11, %v8071_v14 }
0x1243   :  { %3212 = vrot.lane.b32.xlu0 %v3202_v32, %s8003_s11  ;;  %v3205_v9 = vsel %vm444_vm14, %v3202_v32, %v3204_v45  ;;  %v3209_v44 = vsel %vm444_vm14, %v3204_v45, %v3208_v51 }
0x1247   :  { %3216 = vrot.lane.b32.xlu0 %v3205_v9, %s8003_s11 }
0x124b   :  { %3220 = vrot.lane.b32.xlu0 %v3209_v44, %s8003_s11 }
0x124f   :  { %3250 = vrot.lane.b32.xlu0 %v3245_v40, %s8002_s10 }
0x1254   :  { %v9667_v1 = vpop.permute.xlu1 %3147 }
0x1255   :  { %14459 = vst [vmem:[#allocation211_spill] sm:$0xff] %v9667_v1 }
0x1258   :  { %v9669_v46 = vpop.permute.xlu1 %3151 }
0x1259   :  { %14460 = vst [vmem:[#allocation212_spill] sm:$0xff] %v9669_v46 }
0x125c   :  { %v9671_v32 = vpop.permute.xlu1 %3155 }
0x125d   :  { %14461 = vst [vmem:[#allocation213_spill] sm:$0xff] %v9671_v32 }
0x1260   :  { %v3186_v43 = vpop.permute.xlu1 %3185 }
0x1261   :  { %v3187_v9 = vsel %vm2734_vm1, %v3184_v26, %v3186_v43  ;;  %v3249_v26 = vrot.slane %v7816_v11, %v8069_v13  ;;  %v7817_v11 = vld [vmem:[%s13917_s0 + $0xc7] ss:$8 sm:$0x3] }
0x1262   :  { %v3191_v54 = vmul.f32 %v9386_v47, %v3187_v9  ;;  %v3193_v0 = vmul.f32 %v9389_v53, %v3187_v9  ;;  %v3195_v51 = vmul.f32 %v9638_v48, %v3187_v9 }
0x1264   :  { %v3203_v45 = vrot.slane %v3191_v54, 7  ;;  %v3206_v44 = vrot.slane %v3193_v0, 7  ;;  %v3210_v40 = vrot.slane %v3195_v51, 7 }
0x1266   :  { %3214 = vrot.lane.b32.xlu1 %v3203_v45, %s8003_s11  ;;  %v3207_v1 = vsel %vm444_vm14, %v3203_v45, %v3206_v44  ;;  %v3211_v46 = vsel %vm444_vm14, %v3206_v44, %v3210_v40  ;;  %v3302_v45 = vrot.slane %v7817_v11, %v8071_v14 }
0x126a   :  { %3218 = vrot.lane.b32.xlu1 %v3207_v1, %s8003_s11 }
0x126e   :  { %3222 = vrot.lane.b32.xlu1 %v3211_v46, %s8003_s11 }
0x1272   :  { %3252 = vrot.lane.b32.xlu1 %v3249_v26, %s8002_s10 }
0x12b5   :  { %v9684_v43 = vpop.permute.xlu0 %3212 }
0x12b6   :  { %14462 = vst [vmem:[#allocation214_spill] sm:$0xff] %v9684_v43 }
0x12b9   :  { %v9686_v54 = vpop.permute.xlu0 %3216 }
0x12ba   :  { %14463 = vst [vmem:[#allocation215_spill] sm:$0xff] %v9686_v54 }
0x12bd   :  { %v9688_v0 = vpop.permute.xlu0 %3220 }
0x12be   :  { %14464 = vst [vmem:[#allocation216_spill] sm:$0xff] %v9688_v0 }
0x12c1   :  { %v3251_v9 = vpop.permute.xlu0 %3250 }
0x12c2   :  { %v3257_v51 = vmul.f32 %v9362_v18, %v3251_v9  ;;  %v3259_v1 = vmul.f32 %v9365_v55, %v3251_v9  ;;  %v3261_v46 = vmul.f32 %v9222_v36, %v3251_v9 }
0x12c4   :  { %3269 = vrot.lane.b32.xlu0 %v3257_v51, %s8003_s11 }
0x12c8   :  { %3273 = vrot.lane.b32.xlu0 %v3259_v1, %s8003_s11 }
0x12cc   :  { %3277 = vrot.lane.b32.xlu0 %v3261_v46, %s8003_s11 }
0x12d0   :  { %3307 = vrot.lane.b32.xlu0 %v3302_v45, %s8002_s10  ;;  %v3306_v45 = vrot.slane %v7817_v11, %v8069_v13 }
0x12d8   :  { %v9701_v44 = vpop.permute.xlu1 %3214 }
0x12d9   :  { %14465 = vst [vmem:[#allocation217_spill] sm:$0xff] %v9701_v44 }
0x12dc   :  { %v9703_v40 = vpop.permute.xlu1 %3218 }
0x12dd   :  { %14466 = vst [vmem:[#allocation218_spill] sm:$0xff] %v9703_v40 }
0x12e0   :  { %v9705_v26 = vpop.permute.xlu1 %3222 }
0x12e1   :  { %14467 = vst [vmem:[#allocation219_spill] sm:$0xff] %v9705_v26 }
0x12e4   :  { %v3253_v51 = vpop.permute.xlu1 %3252 }
0x12e5   :  { %v3254_v1 = vsel %vm2734_vm1, %v3251_v9, %v3253_v51 }
0x12e6   :  { %v3258_v54 = vmul.f32 %v9386_v47, %v3254_v1  ;;  %v3260_v43 = vmul.f32 %v9389_v53, %v3254_v1  ;;  %v3262_v46 = vmul.f32 %v9638_v48, %v3254_v1 }
0x12e8   :  { %3271 = vrot.lane.b32.xlu1 %v3258_v54, %s8003_s11 }
0x12ec   :  { %3275 = vrot.lane.b32.xlu1 %v3260_v43, %s8003_s11 }
0x12f0   :  { %3279 = vrot.lane.b32.xlu1 %v3262_v46, %s8003_s11 }
0x12f4   :  { %3309 = vrot.lane.b32.xlu1 %v3306_v45, %s8002_s10 }
0x1336   :  { %v9716_v40 = vpop.permute.xlu0 %3269 }
0x1337   :  { %14468 = vst [vmem:[#allocation220_spill] sm:$0xff] %v9716_v40 }
0x133a   :  { %v9718_v44 = vpop.permute.xlu0 %3273 }
0x133b   :  { %14469 = vst [vmem:[#allocation221_spill] sm:$0xff] %v9718_v44  ;;  %v7818_v44 = vld [vmem:[%s13917_s0 + $0xe2] ss:$8 sm:$0x3] }
0x133c   :  { %v3369_v40 = vrot.slane %v7818_v44, %v8071_v14 }
0x133e   :  { %v9720_v9 = vpop.permute.xlu0 %3277 }
0x133f   :  { %14470 = vst [vmem:[#allocation222_spill] sm:$0xff] %v9720_v9 }
0x1342   :  { %v3308_v51 = vpop.permute.xlu0 %3307 }
0x1343   :  { %v3314_v54 = vmul.f32 %v9362_v18, %v3308_v51  ;;  %v3316_v0 = vmul.f32 %v9365_v55, %v3308_v51  ;;  %v3318_v43 = vmul.f32 %v9222_v36, %v3308_v51 }
0x1345   :  { %v3326_v1 = vrot.slane %v3314_v54, 1  ;;  %v3327_v26 = vrot.slane %v3316_v0, 1  ;;  %v3332_v11 = vrot.slane %v3318_v43, 1 }
0x1347   :  { %v3328_v46 = vsel %vm164_vm8, %v3326_v1, %v3327_v26  ;;  %v3333_v45 = vsel %vm164_vm8, %v3327_v26, %v3332_v11 }
0x1348   :  { %3336 = vrot.lane.b32.xlu0 %v3328_v46, %s8003_s11 }
0x134c   :  { %3340 = vrot.lane.b32.xlu0 %v3333_v45, %s8003_s11 }
0x1350   :  { %3344 = vrot.lane.b32.xlu0 %v3332_v11, %s8003_s11 }
0x1354   :  { %3374 = vrot.lane.b32.xlu0 %v3369_v40, %s8002_s10 }
0x135a   :  { %v9735_v0 = vpop.permute.xlu1 %3271 }
0x135b   :  { %14471 = vst [vmem:[#allocation223_spill] sm:$0xff] %v9735_v0 }
0x135e   :  { %v9737_v54 = vpop.permute.xlu1 %3275 }
0x135f   :  { %14472 = vst [vmem:[#allocation224_spill] sm:$0xff] %v9737_v54 }
0x1362   :  { %v9739_v43 = vpop.permute.xlu1 %3279 }
0x1363   :  { %14473 = vst [vmem:[#allocation225_spill] sm:$0xff] %v9739_v43 }
0x1366   :  { %v3310_v1 = vpop.permute.xlu1 %3309 }
0x1367   :  { %v3311_v26 = vsel %vm2734_vm1, %v3308_v51, %v3310_v1  ;;  %v3373_v51 = vrot.slane %v7818_v44, %v8069_v13 }
0x1368   :  { %v3315_v46 = vmul.f32 %v9386_v47, %v3311_v26  ;;  %v3317_v45 = vmul.f32 %v9389_v53, %v3311_v26  ;;  %v3319_v9 = vmul.f32 %v9638_v48, %v3311_v26 }
0x136a   :  { %v3329_v11 = vrot.slane %v3315_v46, 1  ;;  %v3330_v32 = vrot.slane %v3317_v45, 1  ;;  %v3334_v49 = vrot.slane %v3319_v9, 1 }
0x136c   :  { %v3331_v40 = vsel %vm164_vm8, %v3329_v11, %v3330_v32  ;;  %v3335_v54 = vsel %vm164_vm8, %v3330_v32, %v3334_v49 }
0x136d   :  { %3338 = vrot.lane.b32.xlu1 %v3331_v40, %s8003_s11 }
0x1371   :  { %3342 = vrot.lane.b32.xlu1 %v3335_v54, %s8003_s11 }
0x1375   :  { %3346 = vrot.lane.b32.xlu1 %v3334_v49, %s8003_s11 }
0x1379   :  { %3376 = vrot.lane.b32.xlu1 %v3373_v51, %s8002_s10 }
0x13ba   :  { %v9752_v1 = vpop.permute.xlu0 %3336 }
0x13bb   :  { %14474 = vst [vmem:[#allocation226_spill] sm:$0xff] %v9752_v1 }
0x13be   :  { %v9754_v26 = vpop.permute.xlu0 %3340 }
0x13bf   :  { %14475 = vst [vmem:[#allocation227_spill] sm:$0xff] %v9754_v26  ;;  %v7819_v26 = vld [vmem:[%s13917_s0 + $0x5] ss:$8 sm:$0x3] }
0x13c0   :  { %v3436_v1 = vrot.slane %v7819_v26, %v8071_v14 }
0x13c2   :  { %v9756_v46 = vpop.permute.xlu0 %3344 }
0x13c3   :  { %14476 = vst [vmem:[#allocation228_spill] sm:$0xff] %v9756_v46 }
0x13c6   :  { %v3375_v9 = vpop.permute.xlu0 %3374 }
0x13c7   :  { %v3381_v45 = vmul.f32 %v9362_v18, %v3375_v9  ;;  %v3383_v11 = vmul.f32 %v9365_v55, %v3375_v9  ;;  %v3385_v32 = vmul.f32 %v9222_v36, %v3375_v9 }
0x13c9   :  { %v3393_v54 = vrot.slane %v3381_v45, 2  ;;  %v3394_v40 = vrot.slane %v3383_v11, 2  ;;  %v3399_v44 = vrot.slane %v3385_v32, 2 }
0x13cb   :  { %v3395_v49 = vsel %vm212_vm9, %v3393_v54, %v3394_v40  ;;  %v3400_v51 = vsel %vm212_vm9, %v3394_v40, %v3399_v44 }
0x13cc   :  { %3403 = vrot.lane.b32.xlu0 %v3395_v49, %s8003_s11 }
0x13d0   :  { %3407 = vrot.lane.b32.xlu0 %v3400_v51, %s8003_s11 }
0x13d4   :  { %3411 = vrot.lane.b32.xlu0 %v3399_v44, %s8003_s11 }
0x13d8   :  { %3441 = vrot.lane.b32.xlu0 %v3436_v1, %s7990_s17 }
0x13df   :  { %v9771_v36 = vpop.permute.xlu1 %3338 }
0x13e0   :  { %14477 = vst [vmem:[#allocation229_spill] sm:$0xff] %v9771_v36 }
0x13e3   :  { %v9773_v45 = vpop.permute.xlu1 %3342 }
0x13e4   :  { %14478 = vst [vmem:[#allocation230_spill] sm:$0xff] %v9773_v45 }
0x13e7   :  { %v9775_v11 = vpop.permute.xlu1 %3346 }
0x13e8   :  { %14479 = vst [vmem:[#allocation231_spill] sm:$0xff] %v9775_v11 }
0x13eb   :  { %v3377_v32 = vpop.permute.xlu1 %3376 }
0x13ec   :  { %v3378_v54 = vsel %vm2734_vm1, %v3375_v9, %v3377_v32  ;;  %v3440_v9 = vrot.slane %v7819_v26, %v8069_v13  ;;  %v7820_v26 = vld [vmem:[%s13917_s0 + $0x20] ss:$8 sm:$0x3]  ;;  %vm2762_vm1 = vcmask 1014784  }
0x13ed   :  { %v3382_v40 = vmul.f32 %v9386_v47, %v3378_v54  ;;  %v3384_v49 = vmul.f32 %v9389_v53, %v3378_v54  ;;  %v3386_v51 = vmul.f32 %v9638_v48, %v3378_v54 }
0x13ef   :  { %v3396_v44 = vrot.slane %v3382_v40, 2  ;;  %v3397_v0 = vrot.slane %v3384_v49, 2  ;;  %v3401_v46 = vrot.slane %v3386_v51, 2  ;;  %v9794_v51 = vld [vmem:[#allocation2] sm:$0xff] }
0x13f1   :  { %v3398_v1 = vsel %vm212_vm9, %v3396_v44, %v3397_v0  ;;  %v3402_v45 = vsel %vm212_vm9, %v3397_v0, %v3401_v46 }
0x13f2   :  { %3405 = vrot.lane.b32.xlu1 %v3398_v1, %s8003_s11 }
0x13f6   :  { %3409 = vrot.lane.b32.xlu1 %v3402_v45, %s8003_s11  ;;  %v3495_v45 = vrot.slane %v7820_v26, %v8071_v14 }
0x13fa   :  { %3413 = vrot.lane.b32.xlu1 %v3401_v46, %s8003_s11  ;;  %s8012_s11 = smov 10  }
0x13fe   :  { %3443 = vrot.lane.b32.xlu1 %v3440_v9, %s7990_s17 }
0x143e   :  { %v9788_v32 = vpop.permute.xlu0 %3403 }
0x143f   :  { %14480 = vst [vmem:[#allocation232_spill] sm:$0xff] %v9788_v32 }
0x1442   :  { %v9790_v54 = vpop.permute.xlu0 %3407 }
0x1443   :  { %14481 = vst [vmem:[#allocation233_spill] sm:$0xff] %v9790_v54 }
0x1446   :  { %v9792_v40 = vpop.permute.xlu0 %3411 }
0x1447   :  { %14482 = vst [vmem:[#allocation234_spill] sm:$0xff] %v9792_v40 }
0x144a   :  { %v3442_v49 = vpop.permute.xlu0 %3441 }
0x144b   :  { %v3449_v44 = vmul.f32 %v9794_v51, %v3442_v49  ;;  %v3451_v0 = vmul.f32 %v9362_v18, %v3442_v49  ;;  %v3453_v46 = vmul.f32 %v9365_v55, %v3442_v49 }
0x144d   :  { %3461 = vrot.lane.b32.xlu0 %v3449_v44, %s8004_s8 }
0x1451   :  { %3465 = vrot.lane.b32.xlu0 %v3451_v0, %s8004_s8 }
0x1455   :  { %3469 = vrot.lane.b32.xlu0 %v3453_v46, %s8004_s8 }
0x1459   :  { %3500 = vrot.lane.b32.xlu0 %v3495_v45, %s7990_s17 }
0x1464   :  { %v9807_v1 = vpop.permute.xlu1 %3405 }
0x1465   :  { %14483 = vst [vmem:[#allocation235_spill] sm:$0xff] %v9807_v1 }
0x1468   :  { %v9809_v9 = vpop.permute.xlu1 %3409 }
0x1469   :  { %14484 = vst [vmem:[#allocation236_spill] sm:$0xff] %v9809_v9  ;;  %v3499_v9 = vrot.slane %v7820_v26, %v8069_v13 }
0x146c   :  { %v9811_v44 = vpop.permute.xlu1 %3413 }
0x146d   :  { %14485 = vst [vmem:[#allocation237_spill] sm:$0xff] %v9811_v44 }
0x1470   :  { %v3444_v0 = vpop.permute.xlu1 %3443 }
0x1471   :  { %v3446_v54 = vsel %vm3445_vm2, %v3442_v49, %v3444_v0 }
0x1472   :  { %v3450_v32 = vmul.f32 %v9566_v63, %v3446_v54  ;;  %v3452_v46 = vmul.f32 %v9386_v47, %v3446_v54  ;;  %v3454_v45 = vmul.f32 %v9389_v53, %v3446_v54 }
0x1474   :  { %3463 = vrot.lane.b32.xlu1 %v3450_v32, %s8004_s8 }
0x1478   :  { %3467 = vrot.lane.b32.xlu1 %v3452_v46, %s8004_s8 }
0x147c   :  { %3471 = vrot.lane.b32.xlu1 %v3454_v45, %s8004_s8 }
0x1480   :  { %3502 = vrot.lane.b32.xlu1 %v3499_v9, %s7990_s17 }
0x14bf   :  { %v9822_v1 = vpop.permute.xlu0 %3461 }
0x14c0   :  { %14486 = vst [vmem:[#allocation238_spill] sm:$0xff] %v9822_v1 }
0x14c3   :  { %v9824_v36 = vpop.permute.xlu0 %3465 }
0x14c4   :  { %14487 = vst [vmem:[#allocation239_spill] sm:$0xff] %v9824_v36  ;;  %v7821_v36 = vld [vmem:[%s13917_s0 + $0x33] ss:$8 sm:$0x3] }
0x14c5   :  { %v3562_v1 = vrot.slane %v7821_v36, %v8071_v14 }
0x14c7   :  { %v9826_v49 = vpop.permute.xlu0 %3469 }
0x14c8   :  { %14488 = vst [vmem:[#allocation240_spill] sm:$0xff] %v9826_v49 }
0x14cb   :  { %v3501_v0 = vpop.permute.xlu0 %3500 }
0x14cc   :  { %v3507_v32 = vmul.f32 %v9794_v51, %v3501_v0  ;;  %v3509_v40 = vmul.f32 %v9362_v18, %v3501_v0  ;;  %v3511_v46 = vmul.f32 %v9365_v55, %v3501_v0 }
0x14ce   :  { %v3519_v54 = vrot.slane %v3507_v32, 1  ;;  %v3520_v44 = vrot.slane %v3509_v40, 1  ;;  %v3525_v26 = vrot.slane %v3511_v46, 1 }
0x14d0   :  { %v3521_v45 = vsel %vm164_vm8, %v3519_v54, %v3520_v44  ;;  %v3526_v9 = vsel %vm164_vm8, %v3520_v44, %v3525_v26 }
0x14d1   :  { %3529 = vrot.lane.b32.xlu0 %v3521_v45, %s8004_s8 }
0x14d5   :  { %3533 = vrot.lane.b32.xlu0 %v3526_v9, %s8004_s8 }
0x14d9   :  { %3537 = vrot.lane.b32.xlu0 %v3525_v26, %s8004_s8 }
0x14dd   :  { %3567 = vrot.lane.b32.xlu0 %v3562_v1, %s7990_s17 }
0x14e6   :  { %v9841_v40 = vpop.permute.xlu1 %3463 }
0x14e7   :  { %14489 = vst [vmem:[#allocation241_spill] sm:$0xff] %v9841_v40 }
0x14ea   :  { %v9843_v32 = vpop.permute.xlu1 %3467 }
0x14eb   :  { %14490 = vst [vmem:[#allocation242_spill] sm:$0xff] %v9843_v32 }
0x14ee   :  { %v9845_v46 = vpop.permute.xlu1 %3471 }
0x14ef   :  { %14491 = vst [vmem:[#allocation243_spill] sm:$0xff] %v9845_v46 }
0x14f2   :  { %v3503_v54 = vpop.permute.xlu1 %3502 }
0x14f3   :  { %v3504_v44 = vsel %vm3445_vm2, %v3501_v0, %v3503_v54  ;;  %v3566_v0 = vrot.slane %v7821_v36, %v8069_v13 }
0x14f4   :  { %v3508_v45 = vmul.f32 %v9566_v63, %v3504_v44  ;;  %v3510_v9 = vmul.f32 %v9386_v47, %v3504_v44  ;;  %v3512_v49 = vmul.f32 %v9389_v53, %v3504_v44 }
0x14f6   :  { %v3522_v26 = vrot.slane %v3508_v45, 1  ;;  %v3523_v11 = vrot.slane %v3510_v9, 1  ;;  %v3527_v43 = vrot.slane %v3512_v49, 1 }
0x14f8   :  { %v3524_v1 = vsel %vm164_vm8, %v3522_v26, %v3523_v11  ;;  %v3528_v32 = vsel %vm164_vm8, %v3523_v11, %v3527_v43 }
0x14f9   :  { %3531 = vrot.lane.b32.xlu1 %v3524_v1, %s8004_s8 }
0x14fd   :  { %3535 = vrot.lane.b32.xlu1 %v3528_v32, %s8004_s8 }
0x1501   :  { %3539 = vrot.lane.b32.xlu1 %v3527_v43, %s8004_s8 }
0x1505   :  { %3569 = vrot.lane.b32.xlu1 %v3566_v0, %s7990_s17 }
0x1543   :  { %v9858_v54 = vpop.permute.xlu0 %3529 }
0x1544   :  { %14492 = vst [vmem:[#allocation244_spill] sm:$0xff] %v9858_v54 }
0x1547   :  { %v9860_v44 = vpop.permute.xlu0 %3533 }
0x1548   :  { %14493 = vst [vmem:[#allocation245_spill] sm:$0xff] %v9860_v44  ;;  %v7822_v44 = vld [vmem:[%s13917_s0 + $0x46] ss:$8 sm:$0x3] }
0x1549   :  { %v3629_v54 = vrot.slane %v7822_v44, %v8071_v14 }
0x154b   :  { %v9862_v45 = vpop.permute.xlu0 %3537 }
0x154c   :  { %14494 = vst [vmem:[#allocation246_spill] sm:$0xff] %v9862_v45 }
0x154f   :  { %v3568_v49 = vpop.permute.xlu0 %3567 }
0x1550   :  { %v3574_v9 = vmul.f32 %v9794_v51, %v3568_v49  ;;  %v3576_v26 = vmul.f32 %v9362_v18, %v3568_v49  ;;  %v3578_v11 = vmul.f32 %v9365_v55, %v3568_v49 }
0x1552   :  { %v3586_v32 = vrot.slane %v3574_v9, 2  ;;  %v3587_v1 = vrot.slane %v3576_v26, 2  ;;  %v3592_v36 = vrot.slane %v3578_v11, 2 }
0x1554   :  { %v3588_v43 = vsel %vm212_vm9, %v3586_v32, %v3587_v1  ;;  %v3593_v0 = vsel %vm212_vm9, %v3587_v1, %v3592_v36 }
0x1555   :  { %3596 = vrot.lane.b32.xlu0 %v3588_v43, %s8004_s8 }
0x1559   :  { %3600 = vrot.lane.b32.xlu0 %v3593_v0, %s8004_s8 }
0x155d   :  { %3604 = vrot.lane.b32.xlu0 %v3592_v36, %s8004_s8 }
0x1561   :  { %3634 = vrot.lane.b32.xlu0 %v3629_v54, %s7990_s17 }
0x156b   :  { %v9877_v9 = vpop.permute.xlu1 %3531 }
0x156c   :  { %14495 = vst [vmem:[#allocation247_spill] sm:$0xff] %v9877_v9 }
0x156f   :  { %v9879_v26 = vpop.permute.xlu1 %3535 }
0x1570   :  { %14496 = vst [vmem:[#allocation248_spill] sm:$0xff] %v9879_v26 }
0x1573   :  { %v9881_v11 = vpop.permute.xlu1 %3539 }
0x1574   :  { %14497 = vst [vmem:[#allocation249_spill] sm:$0xff] %v9881_v11 }
0x1577   :  { %v3570_v32 = vpop.permute.xlu1 %3569 }
0x1578   :  { %v3571_v1 = vsel %vm3445_vm2, %v3568_v49, %v3570_v32  ;;  %v3633_v49 = vrot.slane %v7822_v44, %v8069_v13 }
0x1579   :  { %v3575_v43 = vmul.f32 %v9566_v63, %v3571_v1  ;;  %v3577_v0 = vmul.f32 %v9386_v47, %v3571_v1  ;;  %v3579_v40 = vmul.f32 %v9389_v53, %v3571_v1 }
0x157b   :  { %v3589_v36 = vrot.slane %v3575_v43, 2  ;;  %v3590_v45 = vrot.slane %v3577_v0, 2  ;;  %v3594_v46 = vrot.slane %v3579_v40, 2 }
0x157d   :  { %v3591_v54 = vsel %vm212_vm9, %v3589_v36, %v3590_v45  ;;  %v3595_v26 = vsel %vm212_vm9, %v3590_v45, %v3594_v46 }
0x157e   :  { %3598 = vrot.lane.b32.xlu1 %v3591_v54, %s8004_s8 }
0x1582   :  { %3602 = vrot.lane.b32.xlu1 %v3595_v26, %s8004_s8 }
0x1586   :  { %3606 = vrot.lane.b32.xlu1 %v3594_v46, %s8004_s8 }
0x158a   :  { %3636 = vrot.lane.b32.xlu1 %v3633_v49, %s7990_s17 }
0x15c7   :  { %v9894_v32 = vpop.permute.xlu0 %3596 }
0x15c8   :  { %14498 = vst [vmem:[#allocation250_spill] sm:$0xff] %v9894_v32 }
0x15cb   :  { %v9896_v1 = vpop.permute.xlu0 %3600 }
0x15cc   :  { %14499 = vst [vmem:[#allocation251_spill] sm:$0xff] %v9896_v1  ;;  %v7823_v1 = vld [vmem:[%s13917_s0 + $0x61] ss:$8 sm:$0x3] }
0x15cf   :  { %v9898_v43 = vpop.permute.xlu0 %3604 }
0x15d0   :  { %14500 = vst [vmem:[#allocation252_spill] sm:$0xff] %v9898_v43 }
0x15d3   :  { %v3635_v40 = vpop.permute.xlu0 %3634 }
0x15d4   :  { %v3641_v0 = vmul.f32 %v9794_v51, %v3635_v40  ;;  %v3643_v36 = vmul.f32 %v9362_v18, %v3635_v40  ;;  %v3645_v45 = vmul.f32 %v9365_v55, %v3635_v40  ;;  %v3696_v18 = vrot.slane %v7823_v1, %v8071_v14 }
0x15d6   :  { %v3653_v26 = vrot.slane %v3641_v0, 3  ;;  %v3654_v54 = vrot.slane %v3643_v36, 3  ;;  %v3659_v44 = vrot.slane %v3645_v45, 3 }
0x15d8   :  { %v3655_v46 = vsel %vm260_vm10, %v3653_v26, %v3654_v54  ;;  %v3660_v49 = vsel %vm260_vm10, %v3654_v54, %v3659_v44 }
0x15d9   :  { %3663 = vrot.lane.b32.xlu0 %v3655_v46, %s8004_s8 }
0x15dd   :  { %3667 = vrot.lane.b32.xlu0 %v3660_v49, %s8004_s8 }
0x15e1   :  { %3671 = vrot.lane.b32.xlu0 %v3659_v44, %s8004_s8 }
0x15e5   :  { %3701 = vrot.lane.b32.xlu0 %v3696_v18, %s7990_s17 }
0x15f0   :  { %v9913_v55 = vpop.permute.xlu1 %3598 }
0x15f1   :  { %14501 = vst [vmem:[#allocation253_spill] sm:$0xff] %v9913_v55 }
0x15f4   :  { %v9915_v0 = vpop.permute.xlu1 %3602 }
0x15f5   :  { %14502 = vst [vmem:[#allocation254_spill] sm:$0xff] %v9915_v0 }
0x15f8   :  { %v9917_v36 = vpop.permute.xlu1 %3606 }
0x15f9   :  { %14503 = vst [vmem:[#allocation255_spill] sm:$0xff] %v9917_v36 }
0x15fc   :  { %v3637_v45 = vpop.permute.xlu1 %3636 }
0x15fd   :  { %v3638_v26 = vsel %vm3445_vm2, %v3635_v40, %v3637_v45  ;;  %v3700_v40 = vrot.slane %v7823_v1, %v8069_v13 }
0x15fe   :  { %v3642_v54 = vmul.f32 %v9566_v63, %v3638_v26  ;;  %v3644_v46 = vmul.f32 %v9386_v47, %v3638_v26  ;;  %v3646_v49 = vmul.f32 %v9389_v53, %v3638_v26 }
0x1600   :  { %v3656_v44 = vrot.slane %v3642_v54, 3  ;;  %v3657_v32 = vrot.slane %v3644_v46, 3  ;;  %v3661_v9 = vrot.slane %v3646_v49, 3  ;;  %v9937_v46 = vld [vmem:[#allocation2 + $0x10] sm:$0xff] }
0x1602   :  { %v3658_v18 = vsel %vm260_vm10, %v3656_v44, %v3657_v32  ;;  %v3662_v0 = vsel %vm260_vm10, %v3657_v32, %v3661_v9 }
0x1603   :  { %3665 = vrot.lane.b32.xlu1 %v3658_v18, %s8004_s8 }
0x1607   :  { %3669 = vrot.lane.b32.xlu1 %v3662_v0, %s8004_s8  ;;  %v9940_v0 = vld [vmem:[#allocation2 + $0x20] sm:$0xff] }
0x160b   :  { %3673 = vrot.lane.b32.xlu1 %v3661_v9, %s8004_s8 }
0x160f   :  { %3703 = vrot.lane.b32.xlu1 %v3700_v40, %s7990_s17 }
0x164b   :  { %v9930_v47 = vpop.permute.xlu0 %3663 }
0x164c   :  { %14504 = vst [vmem:[#allocation256_spill] sm:$0xff] %v9930_v47 }
0x164f   :  { %v9932_v53 = vpop.permute.xlu0 %3667 }
0x1650   :  { %14505 = vst [vmem:[#allocation257_spill] sm:$0xff] %v9932_v53  ;;  %v7824_v53 = vld [vmem:[%s13917_s0 + $0x74] ss:$8 sm:$0x3] }
0x1651   :  { %v3763_v47 = vrot.slane %v7824_v53, %v8071_v14 }
0x1653   :  { %v9934_v45 = vpop.permute.xlu0 %3671 }
0x1654   :  { %14506 = vst [vmem:[#allocation258_spill] sm:$0xff] %v9934_v45 }
0x1657   :  { %v3702_v26 = vpop.permute.xlu0 %3701 }
0x1658   :  { %v3708_v54 = vmul.f32 %v9794_v51, %v3702_v26  ;;  %v3710_v32 = vmul.f32 %v9937_v46, %v3702_v26  ;;  %v3712_v9 = vmul.f32 %v9940_v0, %v3702_v26 }
0x165a   :  { %v3720_v1 = vrot.slane %v3708_v54, 4  ;;  %v3721_v49 = vrot.slane %v3710_v32, 4  ;;  %v3726_v18 = vrot.slane %v3712_v9, 4 }
0x165c   :  { %v3722_v44 = vsel %vm308_vm11, %v3720_v1, %v3721_v49  ;;  %v3727_v40 = vsel %vm308_vm11, %v3721_v49, %v3726_v18 }
0x165d   :  { %3730 = vrot.lane.b32.xlu0 %v3722_v44, %s8004_s8 }
0x1661   :  { %3734 = vrot.lane.b32.xlu0 %v3727_v40, %s8004_s8  ;;  %v9961_v40 = vld [vmem:[#allocation2 + $0x18] sm:$0xff] }
0x1665   :  { %3738 = vrot.lane.b32.xlu0 %v3726_v18, %s8004_s8  ;;  %v9964_v18 = vld [vmem:[#allocation2 + $0x28] sm:$0xff] }
0x1669   :  { %3768 = vrot.lane.b32.xlu0 %v3763_v47, %s7990_s17 }
0x1675   :  { %v9953_v54 = vpop.permute.xlu1 %3665 }
0x1676   :  { %14507 = vst [vmem:[#allocation259_spill] sm:$0xff] %v9953_v54 }
0x1679   :  { %v9955_v32 = vpop.permute.xlu1 %3669 }
0x167a   :  { %14508 = vst [vmem:[#allocation260_spill] sm:$0xff] %v9955_v32 }
0x167d   :  { %v9957_v9 = vpop.permute.xlu1 %3673 }
0x167e   :  { %14509 = vst [vmem:[#allocation261_spill] sm:$0xff] %v9957_v9 }
0x1681   :  { %v3704_v1 = vpop.permute.xlu1 %3703 }
0x1682   :  { %v3705_v49 = vsel %vm3445_vm2, %v3702_v26, %v3704_v1 }
0x1683   :  { %v3709_v44 = vmul.f32 %v9566_v63, %v3705_v49  ;;  %v3711_v55 = vmul.f32 %v9961_v40, %v3705_v49  ;;  %v3713_v45 = vmul.f32 %v9964_v18, %v3705_v49  ;;  %v3767_v63 = vrot.slane %v7824_v53, %v8069_v13  ;;  %v7825_v53 = vld [vmem:[%s13917_s0 + $0x87] ss:$8 sm:$0x3] }
0x1685   :  { %v3723_v47 = vrot.slane %v3709_v44, 4  ;;  %v3724_v43 = vrot.slane %v3711_v55, 4  ;;  %v3728_v54 = vrot.slane %v3713_v45, 4 }
0x1687   :  { %v3725_v32 = vsel %vm308_vm11, %v3723_v47, %v3724_v43  ;;  %v3729_v9 = vsel %vm308_vm11, %v3724_v43, %v3728_v54 }
0x1688   :  { %3732 = vrot.lane.b32.xlu1 %v3725_v32, %s8004_s8 }
0x168c   :  { %3736 = vrot.lane.b32.xlu1 %v3729_v9, %s8004_s8  ;;  %v3822_v9 = vrot.slane %v7825_v53, %v8071_v14 }
0x1690   :  { %3740 = vrot.lane.b32.xlu1 %v3728_v54, %s8004_s8 }
0x1694   :  { %3770 = vrot.lane.b32.xlu1 %v3767_v63, %s7990_s17 }
0x16cf   :  { %v9974_v26 = vpop.permute.xlu0 %3730 }
0x16d0   :  { %14510 = vst [vmem:[#allocation262_spill] sm:$0xff] %v9974_v26 }
0x16d3   :  { %v9976_v1 = vpop.permute.xlu0 %3734 }
0x16d4   :  { %14511 = vst [vmem:[#allocation263_spill] sm:$0xff] %v9976_v1 }
0x16d7   :  { %v9978_v55 = vpop.permute.xlu0 %3738 }
0x16d8   :  { %14512 = vst [vmem:[#allocation264_spill] sm:$0xff] %v9978_v55 }
0x16db   :  { %v3769_v45 = vpop.permute.xlu0 %3768 }
0x16dc   :  { %v3775_v49 = vmul.f32 %v9937_v46, %v3769_v45  ;;  %v3777_v32 = vmul.f32 %v9940_v0, %v3769_v45 }
0x16de   :  { %v3783_v43 = vrot.slane %v3775_v49, 5  ;;  %v3785_v44 = vrot.slane %v3777_v32, 5 }
0x16e0   :  { %3789 = vrot.lane.b32.xlu0 %v3783_v43, %s8004_s8  ;;  %v3786_v54 = vsel %vm352_vm12, %v3783_v43, %v3785_v44 }
0x16e4   :  { %3793 = vrot.lane.b32.xlu0 %v3786_v54, %s8004_s8 }
0x16e8   :  { %3797 = vrot.lane.b32.xlu0 %v3785_v44, %s8004_s8 }
0x16ec   :  { %3827 = vrot.lane.b32.xlu0 %v3822_v9, %s7990_s17  ;;  %v3826_v9 = vrot.slane %v7825_v53, %v8069_v13 }
0x16fa   :  { %v9991_v47 = vpop.permute.xlu1 %3732 }
0x16fb   :  { %14513 = vst [vmem:[#allocation265_spill] sm:$0xff] %v9991_v47 }
0x16fe   :  { %v9993_v63 = vpop.permute.xlu1 %3736 }
0x16ff   :  { %14514 = vst [vmem:[#allocation266_spill] sm:$0xff] %v9993_v63 }
0x1702   :  { %v9995_v49 = vpop.permute.xlu1 %3740 }
0x1703   :  { %14515 = vst [vmem:[#allocation267_spill] sm:$0xff] %v9995_v49 }
0x1706   :  { %v3771_v32 = vpop.permute.xlu1 %3770 }
0x1707   :  { %v3772_v43 = vsel %vm3445_vm2, %v3769_v45, %v3771_v32 }
0x1708   :  { %v3776_v54 = vmul.f32 %v9961_v40, %v3772_v43  ;;  %v3778_v1 = vmul.f32 %v9964_v18, %v3772_v43 }
0x170a   :  { %v3784_v26 = vrot.slane %v3776_v54, 5  ;;  %v3787_v55 = vrot.slane %v3778_v1, 5 }
0x170c   :  { %3791 = vrot.lane.b32.xlu1 %v3784_v26, %s8004_s8  ;;  %v3788_v44 = vsel %vm352_vm12, %v3784_v26, %v3787_v55 }
0x1710   :  { %3795 = vrot.lane.b32.xlu1 %v3788_v44, %s8004_s8 }
0x1714   :  { %3799 = vrot.lane.b32.xlu1 %v3787_v55, %s8004_s8 }
0x1718   :  { %3829 = vrot.lane.b32.xlu1 %v3826_v9, %s7990_s17  ;;  %v7826_v9 = vld [vmem:[%s13917_s0 + $0xa2] ss:$8 sm:$0x3] }
0x1752   :  { %v10006_v63 = vpop.permute.xlu0 %3789 }
0x1753   :  { %14516 = vst [vmem:[#allocation268_spill] sm:$0xff] %v10006_v63 }
0x1756   :  { %v10008_v45 = vpop.permute.xlu0 %3793 }
0x1757   :  { %14517 = vst [vmem:[#allocation269_spill] sm:$0xff] %v10008_v45 }
0x175a   :  { %v10010_v32 = vpop.permute.xlu0 %3797 }
0x175b   :  { %14518 = vst [vmem:[#allocation270_spill] sm:$0xff] %v10010_v32 }
0x175e   :  { %v3828_v43 = vpop.permute.xlu0 %3827 }
0x175f   :  { %v3834_v1 = vmul.f32 %v9937_v46, %v3828_v43  ;;  %v3836_v54 = vmul.f32 %v9940_v0, %v3828_v43  ;;  %v3838_v44 = vmul.f32 %v9794_v51, %v3828_v43 }
0x1761   :  { %v3846_v26 = vrot.slane %v3834_v1, 6  ;;  %v3848_v47 = vrot.slane %v3836_v54, 6  ;;  %v3852_v53 = vrot.slane %v3838_v44, 6  ;;  %v3889_v1 = vrot.slane %v7826_v9, %v8071_v14 }
0x1763   :  { %3856 = vrot.lane.b32.xlu0 %v3846_v26, %s8004_s8  ;;  %v3849_v55 = vsel %vm396_vm13, %v3846_v26, %v3848_v47  ;;  %v3853_v45 = vsel %vm396_vm13, %v3848_v47, %v3852_v53 }
0x1767   :  { %3860 = vrot.lane.b32.xlu0 %v3849_v55, %s8004_s8 }
0x176b   :  { %3864 = vrot.lane.b32.xlu0 %v3853_v45, %s8004_s8 }
0x176f   :  { %3894 = vrot.lane.b32.xlu0 %v3889_v1, %s7990_s17 }
0x177e   :  { %v10025_v54 = vpop.permute.xlu1 %3791 }
0x177f   :  { %14519 = vst [vmem:[#allocation271_spill] sm:$0xff] %v10025_v54 }
0x1782   :  { %v10027_v63 = vpop.permute.xlu1 %3795 }
0x1783   :  { %14520 = vst [vmem:[#allocation272_spill] sm:$0xff] %v10027_v63 }
0x1786   :  { %v10029_v26 = vpop.permute.xlu1 %3799 }
0x1787   :  { %14521 = vst [vmem:[#allocation273_spill] sm:$0xff] %v10029_v26 }
0x178a   :  { %v3830_v44 = vpop.permute.xlu1 %3829 }
0x178b   :  { %v3831_v55 = vsel %vm3445_vm2, %v3828_v43, %v3830_v44  ;;  %v3893_v43 = vrot.slane %v7826_v9, %v8069_v13 }
0x178c   :  { %v3835_v32 = vmul.f32 %v9961_v40, %v3831_v55  ;;  %v3837_v49 = vmul.f32 %v9964_v18, %v3831_v55  ;;  %v3839_v45 = vmul.f32 %v9638_v48, %v3831_v55 }
0x178e   :  { %v3847_v47 = vrot.slane %v3835_v32, 6  ;;  %v3850_v53 = vrot.slane %v3837_v49, 6  ;;  %v3854_v1 = vrot.slane %v3839_v45, 6 }
0x1790   :  { %3858 = vrot.lane.b32.xlu1 %v3847_v47, %s8004_s8  ;;  %v3851_v54 = vsel %vm396_vm13, %v3847_v47, %v3850_v53  ;;  %v3855_v63 = vsel %vm396_vm13, %v3850_v53, %v3854_v1  ;;  %v7827_v1 = vld [vmem:[%s13917_s0 + $0xb5] ss:$8 sm:$0x3] }
0x1794   :  { %3862 = vrot.lane.b32.xlu1 %v3851_v54, %s8004_s8 }
0x1798   :  { %3866 = vrot.lane.b32.xlu1 %v3855_v63, %s8004_s8 }
0x179c   :  { %3896 = vrot.lane.b32.xlu1 %v3893_v43, %s7990_s17 }
0x17d5   :  { %v10042_v44 = vpop.permute.xlu0 %3856 }
0x17d6   :  { %14522 = vst [vmem:[#allocation274_spill] sm:$0xff] %v10042_v44 }
0x17d9   :  { %v10044_v32 = vpop.permute.xlu0 %3860 }
0x17da   :  { %14523 = vst [vmem:[#allocation275_spill] sm:$0xff] %v10044_v32 }
0x17dd   :  { %v10046_v49 = vpop.permute.xlu0 %3864 }
0x17de   :  { %14524 = vst [vmem:[#allocation276_spill] sm:$0xff] %v10046_v49 }
0x17e1   :  { %v3895_v55 = vpop.permute.xlu0 %3894 }
0x17e2   :  { %v3901_v45 = vmul.f32 %v9937_v46, %v3895_v55  ;;  %v3903_v47 = vmul.f32 %v9940_v0, %v3895_v55  ;;  %v3905_v53 = vmul.f32 %v9794_v51, %v3895_v55 }
0x17e4   :  { %v3913_v54 = vrot.slane %v3901_v45, 7  ;;  %v3915_v26 = vrot.slane %v3903_v47, 7  ;;  %v3919_v9 = vrot.slane %v3905_v53, 7  ;;  %v3956_v45 = vrot.slane %v7827_v1, %v8071_v14 }
0x17e6   :  { %3923 = vrot.lane.b32.xlu0 %v3913_v54, %s8004_s8  ;;  %v3916_v63 = vsel %vm444_vm14, %v3913_v54, %v3915_v26  ;;  %v3920_v43 = vsel %vm444_vm14, %v3915_v26, %v3919_v9 }
0x17ea   :  { %3927 = vrot.lane.b32.xlu0 %v3916_v63, %s8004_s8 }
0x17ee   :  { %3931 = vrot.lane.b32.xlu0 %v3920_v43, %s8004_s8 }
0x17f2   :  { %3961 = vrot.lane.b32.xlu0 %v3956_v45, %s7990_s17 }
0x1802   :  { %v10061_v47 = vpop.permute.xlu1 %3858 }
0x1803   :  { %14525 = vst [vmem:[#allocation277_spill] sm:$0xff] %v10061_v47 }
0x1806   :  { %v10063_v32 = vpop.permute.xlu1 %3862 }
0x1807   :  { %14526 = vst [vmem:[#allocation278_spill] sm:$0xff] %v10063_v32 }
0x180a   :  { %v10065_v54 = vpop.permute.xlu1 %3866 }
0x180b   :  { %14527 = vst [vmem:[#allocation279_spill] sm:$0xff] %v10065_v54 }
0x180e   :  { %v3897_v53 = vpop.permute.xlu1 %3896 }
0x180f   :  { %v3898_v63 = vsel %vm3445_vm2, %v3895_v55, %v3897_v53  ;;  %v3960_v55 = vrot.slane %v7827_v1, %v8069_v13  ;;  %v7828_v1 = vld [vmem:[%s13917_s0 + $0xd0] ss:$8 sm:$0x3] }
0x1810   :  { %v3902_v44 = vmul.f32 %v9961_v40, %v3898_v63  ;;  %v3904_v49 = vmul.f32 %v9964_v18, %v3898_v63  ;;  %v3906_v9 = vmul.f32 %v9638_v48, %v3898_v63 }
0x1812   :  { %v3914_v26 = vrot.slane %v3902_v44, 7  ;;  %v3917_v43 = vrot.slane %v3904_v49, 7  ;;  %v3921_v45 = vrot.slane %v3906_v9, 7 }
0x1814   :  { %3925 = vrot.lane.b32.xlu1 %v3914_v26, %s8004_s8  ;;  %v3918_v47 = vsel %vm444_vm14, %v3914_v26, %v3917_v43  ;;  %v3922_v32 = vsel %vm444_vm14, %v3917_v43, %v3921_v45  ;;  %v4013_v26 = vrot.slane %v7828_v1, %v8071_v14 }
0x1818   :  { %3929 = vrot.lane.b32.xlu1 %v3918_v47, %s8004_s8 }
0x181c   :  { %3933 = vrot.lane.b32.xlu1 %v3922_v32, %s8004_s8 }
0x1820   :  { %3963 = vrot.lane.b32.xlu1 %v3960_v55, %s7990_s17 }
0x1858   :  { %v10078_v53 = vpop.permute.xlu0 %3923 }
0x1859   :  { %14528 = vst [vmem:[#allocation280_spill] sm:$0xff] %v10078_v53 }
0x185c   :  { %v10080_v44 = vpop.permute.xlu0 %3927 }
0x185d   :  { %14529 = vst [vmem:[#allocation281_spill] sm:$0xff] %v10080_v44 }
0x1860   :  { %v10082_v49 = vpop.permute.xlu0 %3931 }
0x1861   :  { %14530 = vst [vmem:[#allocation282_spill] sm:$0xff] %v10082_v49 }
0x1864   :  { %v3962_v63 = vpop.permute.xlu0 %3961 }
0x1865   :  { %v3968_v9 = vmul.f32 %v9937_v46, %v3962_v63  ;;  %v3970_v47 = vmul.f32 %v9940_v0, %v3962_v63  ;;  %v3972_v32 = vmul.f32 %v9794_v51, %v3962_v63 }
0x1867   :  { %3980 = vrot.lane.b32.xlu0 %v3968_v9, %s8004_s8 }
0x186b   :  { %3984 = vrot.lane.b32.xlu0 %v3970_v47, %s8004_s8 }
0x186f   :  { %3988 = vrot.lane.b32.xlu0 %v3972_v32, %s8004_s8 }
0x1873   :  { %4018 = vrot.lane.b32.xlu0 %v4013_v26, %s7990_s17  ;;  %v4017_v26 = vrot.slane %v7828_v1, %v8069_v13 }
0x1886   :  { %v10095_v43 = vpop.permute.xlu1 %3925 }
0x1887   :  { %14531 = vst [vmem:[#allocation283_spill] sm:$0xff] %v10095_v43 }
0x188a   :  { %v10097_v45 = vpop.permute.xlu1 %3929 }
0x188b   :  { %14532 = vst [vmem:[#allocation284_spill] sm:$0xff] %v10097_v45 }
0x188e   :  { %v10099_v55 = vpop.permute.xlu1 %3933 }
0x188f   :  { %14533 = vst [vmem:[#allocation285_spill] sm:$0xff] %v10099_v55 }
0x1892   :  { %v3964_v9 = vpop.permute.xlu1 %3963 }
0x1893   :  { %v3965_v47 = vsel %vm3445_vm2, %v3962_v63, %v3964_v9 }
0x1894   :  { %v3969_v44 = vmul.f32 %v9961_v40, %v3965_v47  ;;  %v3971_v53 = vmul.f32 %v9964_v18, %v3965_v47  ;;  %v3973_v32 = vmul.f32 %v9638_v48, %v3965_v47 }
0x1896   :  { %3982 = vrot.lane.b32.xlu1 %v3969_v44, %s8004_s8 }
0x189a   :  { %3986 = vrot.lane.b32.xlu1 %v3971_v53, %s8004_s8 }
0x189e   :  { %3990 = vrot.lane.b32.xlu1 %v3973_v32, %s8004_s8 }
0x18a2   :  { %4020 = vrot.lane.b32.xlu1 %v4017_v26, %s7990_s17 }
0x18d9   :  { %v10110_v45 = vpop.permute.xlu0 %3980 }
0x18da   :  { %14534 = vst [vmem:[#allocation286_spill] sm:$0xff] %v10110_v45 }
0x18dd   :  { %v10112_v43 = vpop.permute.xlu0 %3984 }
0x18de   :  { %14535 = vst [vmem:[#allocation287_spill] sm:$0xff] %v10112_v43  ;;  %v7829_v43 = vld [vmem:[%s13917_s0 + $0xe3] ss:$8 sm:$0x3] }
0x18df   :  { %v4080_v45 = vrot.slane %v7829_v43, %v8071_v14 }
0x18e1   :  { %v10114_v63 = vpop.permute.xlu0 %3988 }
0x18e2   :  { %14536 = vst [vmem:[#allocation288_spill] sm:$0xff] %v10114_v63 }
0x18e5   :  { %v4019_v9 = vpop.permute.xlu0 %4018 }
0x18e6   :  { %v4025_v44 = vmul.f32 %v9937_v46, %v4019_v9  ;;  %v4027_v49 = vmul.f32 %v9940_v0, %v4019_v9  ;;  %v4029_v53 = vmul.f32 %v9794_v51, %v4019_v9 }
0x18e8   :  { %v4037_v47 = vrot.slane %v4025_v44, 1  ;;  %v4038_v55 = vrot.slane %v4027_v49, 1  ;;  %v4043_v1 = vrot.slane %v4029_v53, 1 }
0x18ea   :  { %v4039_v32 = vsel %vm164_vm8, %v4037_v47, %v4038_v55  ;;  %v4044_v26 = vsel %vm164_vm8, %v4038_v55, %v4043_v1 }
0x18eb   :  { %4047 = vrot.lane.b32.xlu0 %v4039_v32, %s8004_s8 }
0x18ef   :  { %4051 = vrot.lane.b32.xlu0 %v4044_v26, %s8004_s8 }
0x18f3   :  { %4055 = vrot.lane.b32.xlu0 %v4043_v1, %s8004_s8 }
0x18f7   :  { %4085 = vrot.lane.b32.xlu0 %v4080_v45, %s7990_s17 }
0x1908   :  { %v10129_v49 = vpop.permute.xlu1 %3982 }
0x1909   :  { %14537 = vst [vmem:[#allocation289_spill] sm:$0xff] %v10129_v49 }
0x190c   :  { %v10131_v44 = vpop.permute.xlu1 %3986 }
0x190d   :  { %14538 = vst [vmem:[#allocation290_spill] sm:$0xff] %v10131_v44 }
0x1910   :  { %v10133_v53 = vpop.permute.xlu1 %3990 }
0x1911   :  { %14539 = vst [vmem:[#allocation291_spill] sm:$0xff] %v10133_v53 }
0x1914   :  { %v4021_v47 = vpop.permute.xlu1 %4020 }
0x1915   :  { %v4022_v55 = vsel %vm3445_vm2, %v4019_v9, %v4021_v47  ;;  %v4084_v9 = vrot.slane %v7829_v43, %v8069_v13 }
0x1916   :  { %v4026_v32 = vmul.f32 %v9961_v40, %v4022_v55  ;;  %v4028_v26 = vmul.f32 %v9964_v18, %v4022_v55  ;;  %v4030_v63 = vmul.f32 %v9638_v48, %v4022_v55 }
0x1918   :  { %v4040_v1 = vrot.slane %v4026_v32, 1  ;;  %v4041_v54 = vrot.slane %v4028_v26, 1  ;;  %v4045_v36 = vrot.slane %v4030_v63, 1 }
0x191a   :  { %v4042_v45 = vsel %vm164_vm8, %v4040_v1, %v4041_v54  ;;  %v4046_v44 = vsel %vm164_vm8, %v4041_v54, %v4045_v36 }
0x191b   :  { %4049 = vrot.lane.b32.xlu1 %v4042_v45, %s8004_s8 }
0x191f   :  { %4053 = vrot.lane.b32.xlu1 %v4046_v44, %s8004_s8 }
0x1923   :  { %4057 = vrot.lane.b32.xlu1 %v4045_v36, %s8004_s8 }
0x1927   :  { %4087 = vrot.lane.b32.xlu1 %v4084_v9, %s7990_s17 }
0x195d   :  { %v10146_v47 = vpop.permute.xlu0 %4047 }
0x195e   :  { %14540 = vst [vmem:[#allocation292_spill] sm:$0xff] %v10146_v47 }
0x1961   :  { %v10148_v55 = vpop.permute.xlu0 %4051 }
0x1962   :  { %14541 = vst [vmem:[#allocation293_spill] sm:$0xff] %v10148_v55  ;;  %v7830_v55 = vld [vmem:[%s13917_s0 + $0x6] ss:$8 sm:$0x3] }
0x1963   :  { %v4147_v47 = vrot.slane %v7830_v55, %v8071_v14 }
0x1965   :  { %v10150_v32 = vpop.permute.xlu0 %4055 }
0x1966   :  { %14542 = vst [vmem:[#allocation294_spill] sm:$0xff] %v10150_v32 }
0x1969   :  { %v4086_v63 = vpop.permute.xlu0 %4085 }
0x196a   :  { %v4092_v26 = vmul.f32 %v9937_v46, %v4086_v63  ;;  %v4094_v1 = vmul.f32 %v9940_v0, %v4086_v63  ;;  %v4096_v54 = vmul.f32 %v9794_v51, %v4086_v63 }
0x196c   :  { %v4104_v44 = vrot.slane %v4092_v26, 2  ;;  %v4105_v45 = vrot.slane %v4094_v1, 2  ;;  %v4110_v43 = vrot.slane %v4096_v54, 2 }
0x196e   :  { %v4106_v36 = vsel %vm212_vm9, %v4104_v44, %v4105_v45  ;;  %v4111_v9 = vsel %vm212_vm9, %v4105_v45, %v4110_v43 }
0x196f   :  { %4114 = vrot.lane.b32.xlu0 %v4106_v36, %s8004_s8 }
0x1973   :  { %4118 = vrot.lane.b32.xlu0 %v4111_v9, %s8004_s8 }
0x1977   :  { %4122 = vrot.lane.b32.xlu0 %v4110_v43, %s8004_s8 }
0x197b   :  { %4152 = vrot.lane.b32.xlu0 %v4147_v47, %s8005_s4 }
0x198d   :  { %v10165_v26 = vpop.permute.xlu1 %4049 }
0x198e   :  { %14543 = vst [vmem:[#allocation295_spill] sm:$0xff] %v10165_v26 }
0x1991   :  { %v10167_v1 = vpop.permute.xlu1 %4053 }
0x1992   :  { %14544 = vst [vmem:[#allocation296_spill] sm:$0xff] %v10167_v1 }
0x1995   :  { %v10169_v54 = vpop.permute.xlu1 %4057 }
0x1996   :  { %14545 = vst [vmem:[#allocation297_spill] sm:$0xff] %v10169_v54 }
0x1999   :  { %v4088_v44 = vpop.permute.xlu1 %4087 }
0x199a   :  { %v4089_v45 = vsel %vm3445_vm2, %v4086_v63, %v4088_v44  ;;  %v4151_v63 = vrot.slane %v7830_v55, %v8069_v13  ;;  %vm3473_vm2 = vcmask 1006592  }
0x199b   :  { %v4093_v36 = vmul.f32 %v9961_v40, %v4089_v45  ;;  %v4095_v9 = vmul.f32 %v9964_v18, %v4089_v45  ;;  %v4097_v43 = vmul.f32 %v9638_v48, %v4089_v45 }
0x199d   :  { %v4107_v49 = vrot.slane %v4093_v36, 2  ;;  %v4108_v32 = vrot.slane %v4095_v9, 2  ;;  %v4112_v53 = vrot.slane %v4097_v43, 2 }
0x199f   :  { %v4109_v47 = vsel %vm212_vm9, %v4107_v49, %v4108_v32  ;;  %v4113_v1 = vsel %vm212_vm9, %v4108_v32, %v4112_v53 }
0x19a0   :  { %4116 = vrot.lane.b32.xlu1 %v4109_v47, %s8004_s8 }
0x19a4   :  { %4120 = vrot.lane.b32.xlu1 %v4113_v1, %s8004_s8 }
0x19a8   :  { %4124 = vrot.lane.b32.xlu1 %v4112_v53, %s8004_s8  ;;  %v7831_v53 = vld [vmem:[%s13917_s0 + $0x21] ss:$8 sm:$0x3] }
0x19a9   :  { %v4206_v1 = vrot.slane %v7831_v53, %v8071_v14 }
0x19ac   :  { %4154 = vrot.lane.b32.xlu1 %v4151_v63, %s8005_s4 }
0x19e1   :  { %v10182_v44 = vpop.permute.xlu0 %4114 }
0x19e2   :  { %14546 = vst [vmem:[#allocation298_spill] sm:$0xff] %v10182_v44 }
0x19e5   :  { %v10184_v48 = vpop.permute.xlu0 %4118 }
0x19e6   :  { %14547 = vst [vmem:[#allocation299_spill] sm:$0xff] %v10184_v48 }
0x19e9   :  { %v10186_v45 = vpop.permute.xlu0 %4122 }
0x19ea   :  { %14548 = vst [vmem:[#allocation300_spill] sm:$0xff] %v10186_v45 }
0x19ed   :  { %v4153_v36 = vpop.permute.xlu0 %4152 }
0x19ee   :  { %v4160_v49 = vmul.f32 %v9794_v51, %v4153_v36  ;;  %v4162_v32 = vmul.f32 %v9937_v46, %v4153_v36  ;;  %v4164_v55 = vmul.f32 %v9940_v0, %v4153_v36 }
0x19f0   :  { %4172 = vrot.lane.b32.xlu0 %v4160_v49, %s8006_s5 }
0x19f4   :  { %4176 = vrot.lane.b32.xlu0 %v4162_v32, %s8006_s5  ;;  %v10206_v32 = vld [vmem:[#allocation2 + $0x8] sm:$0xff] }
0x19f8   :  { %4180 = vrot.lane.b32.xlu0 %v4164_v55, %s8006_s5 }
0x19fc   :  { %4211 = vrot.lane.b32.xlu0 %v4206_v1, %s8005_s4 }
0x1a12   :  { %v10199_v9 = vpop.permute.xlu1 %4116 }
0x1a13   :  { %14549 = vst [vmem:[#allocation301_spill] sm:$0xff] %v10199_v9 }
0x1a16   :  { %v10201_v43 = vpop.permute.xlu1 %4120 }
0x1a17   :  { %14550 = vst [vmem:[#allocation302_spill] sm:$0xff] %v10201_v43  ;;  %v4210_v43 = vrot.slane %v7831_v53, %v8069_v13 }
0x1a1a   :  { %v10203_v47 = vpop.permute.xlu1 %4124 }
0x1a1b   :  { %14551 = vst [vmem:[#allocation303_spill] sm:$0xff] %v10203_v47 }
0x1a1e   :  { %v4155_v63 = vpop.permute.xlu1 %4154 }
0x1a1f   :  { %v4157_v49 = vsel %vm4156_vm3, %v4153_v36, %v4155_v63 }
0x1a20   :  { %v4161_v48 = vmul.f32 %v10206_v32, %v4157_v49  ;;  %v4163_v55 = vmul.f32 %v9961_v40, %v4157_v49  ;;  %v4165_v1 = vmul.f32 %v9964_v18, %v4157_v49 }
0x1a22   :  { %4174 = vrot.lane.b32.xlu1 %v4161_v48, %s8006_s5 }
0x1a26   :  { %4178 = vrot.lane.b32.xlu1 %v4163_v55, %s8006_s5 }
0x1a2a   :  { %4182 = vrot.lane.b32.xlu1 %v4165_v1, %s8006_s5 }
0x1a2e   :  { %4213 = vrot.lane.b32.xlu1 %v4210_v43, %s8005_s4 }
0x1a62   :  { %v10216_v44 = vpop.permute.xlu0 %4172 }
0x1a63   :  { %14552 = vst [vmem:[#allocation304_spill] sm:$0xff] %v10216_v44 }
0x1a66   :  { %v10218_v36 = vpop.permute.xlu0 %4176 }
0x1a67   :  { %14553 = vst [vmem:[#allocation305_spill] sm:$0xff] %v10218_v36  ;;  %v7832_v36 = vld [vmem:[%s13917_s0 + $0x34] ss:$8 sm:$0x3] }
0x1a68   :  { %v4273_v44 = vrot.slane %v7832_v36, %v8071_v14 }
0x1a6a   :  { %v10220_v63 = vpop.permute.xlu0 %4180 }
0x1a6b   :  { %14554 = vst [vmem:[#allocation306_spill] sm:$0xff] %v10220_v63 }
0x1a6e   :  { %v4212_v9 = vpop.permute.xlu0 %4211 }
0x1a6f   :  { %v4218_v48 = vmul.f32 %v9794_v51, %v4212_v9  ;;  %v4220_v26 = vmul.f32 %v9937_v46, %v4212_v9  ;;  %v4222_v55 = vmul.f32 %v9940_v0, %v4212_v9 }
0x1a71   :  { %v4230_v49 = vrot.slane %v4218_v48, 1  ;;  %v4231_v45 = vrot.slane %v4220_v26, 1  ;;  %v4236_v53 = vrot.slane %v4222_v55, 1 }
0x1a73   :  { %v4232_v1 = vsel %vm164_vm8, %v4230_v49, %v4231_v45  ;;  %v4237_v43 = vsel %vm164_vm8, %v4231_v45, %v4236_v53 }
0x1a74   :  { %4240 = vrot.lane.b32.xlu0 %v4232_v1, %s8006_s5 }
0x1a78   :  { %4244 = vrot.lane.b32.xlu0 %v4237_v43, %s8006_s5 }
0x1a7c   :  { %4248 = vrot.lane.b32.xlu0 %v4236_v53, %s8006_s5 }
0x1a80   :  { %4278 = vrot.lane.b32.xlu0 %v4273_v44, %s8005_s4 }
0x1a94   :  { %v10235_v26 = vpop.permute.xlu1 %4174 }
0x1a95   :  { %14555 = vst [vmem:[#allocation307_spill] sm:$0xff] %v10235_v26 }
0x1a98   :  { %v10237_v48 = vpop.permute.xlu1 %4178 }
0x1a99   :  { %14556 = vst [vmem:[#allocation308_spill] sm:$0xff] %v10237_v48 }
0x1a9c   :  { %v10239_v55 = vpop.permute.xlu1 %4182 }
0x1a9d   :  { %14557 = vst [vmem:[#allocation309_spill] sm:$0xff] %v10239_v55 }
0x1aa0   :  { %v4214_v49 = vpop.permute.xlu1 %4213 }
0x1aa1   :  { %v4215_v45 = vsel %vm4156_vm3, %v4212_v9, %v4214_v49  ;;  %v4277_v9 = vrot.slane %v7832_v36, %v8069_v13 }
0x1aa2   :  { %v4219_v1 = vmul.f32 %v10206_v32, %v4215_v45  ;;  %v4221_v43 = vmul.f32 %v9961_v40, %v4215_v45  ;;  %v4223_v63 = vmul.f32 %v9964_v18, %v4215_v45 }
0x1aa4   :  { %v4233_v53 = vrot.slane %v4219_v1, 1  ;;  %v4234_v47 = vrot.slane %v4221_v43, 1  ;;  %v4238_v54 = vrot.slane %v4223_v63, 1 }
0x1aa6   :  { %v4235_v44 = vsel %vm164_vm8, %v4233_v53, %v4234_v47  ;;  %v4239_v48 = vsel %vm164_vm8, %v4234_v47, %v4238_v54 }
0x1aa7   :  { %4242 = vrot.lane.b32.xlu1 %v4235_v44, %s8006_s5 }
0x1aab   :  { %4246 = vrot.lane.b32.xlu1 %v4239_v48, %s8006_s5 }
0x1aaf   :  { %4250 = vrot.lane.b32.xlu1 %v4238_v54, %s8006_s5 }
0x1ab3   :  { %4280 = vrot.lane.b32.xlu1 %v4277_v9, %s8005_s4 }
0x1ae6   :  { %v10252_v49 = vpop.permute.xlu0 %4240 }
0x1ae7   :  { %14558 = vst [vmem:[#allocation310_spill] sm:$0xff] %v10252_v49 }
0x1aea   :  { %v10254_v45 = vpop.permute.xlu0 %4244 }
0x1aeb   :  { %14559 = vst [vmem:[#allocation311_spill] sm:$0xff] %v10254_v45  ;;  %v7833_v45 = vld [vmem:[%s13917_s0 + $0x47] ss:$8 sm:$0x3] }
0x1aec   :  { %v4340_v49 = vrot.slane %v7833_v45, %v8071_v14 }
0x1aee   :  { %v10256_v1 = vpop.permute.xlu0 %4248 }
0x1aef   :  { %14560 = vst [vmem:[#allocation312_spill] sm:$0xff] %v10256_v1 }
0x1af2   :  { %v4279_v63 = vpop.permute.xlu0 %4278 }
0x1af3   :  { %v4285_v43 = vmul.f32 %v9794_v51, %v4279_v63  ;;  %v4287_v53 = vmul.f32 %v9937_v46, %v4279_v63  ;;  %v4289_v47 = vmul.f32 %v9940_v0, %v4279_v63 }
0x1af5   :  { %v4297_v48 = vrot.slane %v4285_v43, 2  ;;  %v4298_v44 = vrot.slane %v4287_v53, 2  ;;  %v4303_v36 = vrot.slane %v4289_v47, 2 }
0x1af7   :  { %v4299_v54 = vsel %vm212_vm9, %v4297_v48, %v4298_v44  ;;  %v4304_v9 = vsel %vm212_vm9, %v4298_v44, %v4303_v36 }
0x1af8   :  { %4307 = vrot.lane.b32.xlu0 %v4299_v54, %s8006_s5 }
0x1afc   :  { %4311 = vrot.lane.b32.xlu0 %v4304_v9, %s8006_s5 }
0x1b00   :  { %4315 = vrot.lane.b32.xlu0 %v4303_v36, %s8006_s5 }
0x1b04   :  { %4345 = vrot.lane.b32.xlu0 %v4340_v49, %s8005_s4 }
0x1b19   :  { %v10271_v43 = vpop.permute.xlu1 %4242 }
0x1b1a   :  { %14561 = vst [vmem:[#allocation313_spill] sm:$0xff] %v10271_v43 }
0x1b1d   :  { %v10273_v53 = vpop.permute.xlu1 %4246 }
0x1b1e   :  { %14562 = vst [vmem:[#allocation314_spill] sm:$0xff] %v10273_v53 }
0x1b21   :  { %v10275_v47 = vpop.permute.xlu1 %4250 }
0x1b22   :  { %14563 = vst [vmem:[#allocation315_spill] sm:$0xff] %v10275_v47 }
0x1b25   :  { %v4281_v48 = vpop.permute.xlu1 %4280 }
0x1b26   :  { %v4282_v44 = vsel %vm4156_vm3, %v4279_v63, %v4281_v48  ;;  %v4344_v63 = vrot.slane %v7833_v45, %v8069_v13 }
0x1b27   :  { %v4286_v54 = vmul.f32 %v10206_v32, %v4282_v44  ;;  %v4288_v9 = vmul.f32 %v9961_v40, %v4282_v44  ;;  %v4290_v26 = vmul.f32 %v9964_v18, %v4282_v44 }
0x1b29   :  { %v4300_v36 = vrot.slane %v4286_v54, 2  ;;  %v4301_v1 = vrot.slane %v4288_v9, 2  ;;  %v4305_v55 = vrot.slane %v4290_v26, 2 }
0x1b2b   :  { %v4302_v49 = vsel %vm212_vm9, %v4300_v36, %v4301_v1  ;;  %v4306_v53 = vsel %vm212_vm9, %v4301_v1, %v4305_v55 }
0x1b2c   :  { %4309 = vrot.lane.b32.xlu1 %v4302_v49, %s8006_s5 }
0x1b30   :  { %4313 = vrot.lane.b32.xlu1 %v4306_v53, %s8006_s5 }
0x1b34   :  { %4317 = vrot.lane.b32.xlu1 %v4305_v55, %s8006_s5 }
0x1b38   :  { %4347 = vrot.lane.b32.xlu1 %v4344_v63, %s8005_s4 }
0x1b6a   :  { %v10288_v48 = vpop.permute.xlu0 %4307 }
0x1b6b   :  { %14564 = vst [vmem:[#allocation316_spill] sm:$0xff] %v10288_v48 }
0x1b6e   :  { %v10290_v44 = vpop.permute.xlu0 %4311 }
0x1b6f   :  { %14565 = vst [vmem:[#allocation317_spill] sm:$0xff] %v10290_v44  ;;  %v7834_v44 = vld [vmem:[%s13917_s0 + $0x62] ss:$8 sm:$0x3] }
0x1b70   :  { %v4407_v48 = vrot.slane %v7834_v44, %v8071_v14 }
0x1b72   :  { %v10292_v54 = vpop.permute.xlu0 %4315 }
0x1b73   :  { %14566 = vst [vmem:[#allocation318_spill] sm:$0xff] %v10292_v54 }
0x1b76   :  { %v4346_v26 = vpop.permute.xlu0 %4345 }
0x1b77   :  { %v4352_v9 = vmul.f32 %v9794_v51, %v4346_v26  ;;  %v4354_v36 = vmul.f32 %v9937_v46, %v4346_v26  ;;  %v4356_v1 = vmul.f32 %v9940_v0, %v4346_v26 }
0x1b79   :  { %v4364_v53 = vrot.slane %v4352_v9, 3  ;;  %v4365_v49 = vrot.slane %v4354_v36, 3  ;;  %v4370_v45 = vrot.slane %v4356_v1, 3 }
0x1b7b   :  { %v4366_v55 = vsel %vm260_vm10, %v4364_v53, %v4365_v49  ;;  %v4371_v63 = vsel %vm260_vm10, %v4365_v49, %v4370_v45 }
0x1b7c   :  { %4374 = vrot.lane.b32.xlu0 %v4366_v55, %s8006_s5 }
0x1b80   :  { %4378 = vrot.lane.b32.xlu0 %v4371_v63, %s8006_s5 }
0x1b84   :  { %4382 = vrot.lane.b32.xlu0 %v4370_v45, %s8006_s5 }
0x1b88   :  { %4412 = vrot.lane.b32.xlu0 %v4407_v48, %s8005_s4 }
0x1b9e   :  { %v10307_v9 = vpop.permute.xlu1 %4309 }
0x1b9f   :  { %14567 = vst [vmem:[#allocation319_spill] sm:$0xff] %v10307_v9 }
0x1ba2   :  { %v10309_v36 = vpop.permute.xlu1 %4313 }
0x1ba3   :  { %14568 = vst [vmem:[#allocation320_spill] sm:$0xff] %v10309_v36 }
0x1ba6   :  { %v10311_v1 = vpop.permute.xlu1 %4317 }
0x1ba7   :  { %14569 = vst [vmem:[#allocation321_spill] sm:$0xff] %v10311_v1 }
0x1baa   :  { %v4348_v53 = vpop.permute.xlu1 %4347 }
0x1bab   :  { %v4349_v49 = vsel %vm4156_vm3, %v4346_v26, %v4348_v53  ;;  %v4411_v26 = vrot.slane %v7834_v44, %v8069_v13 }
0x1bac   :  { %v4353_v55 = vmul.f32 %v10206_v32, %v4349_v49  ;;  %v4355_v63 = vmul.f32 %v9961_v40, %v4349_v49  ;;  %v4357_v43 = vmul.f32 %v9964_v18, %v4349_v49 }
0x1bae   :  { %v4367_v45 = vrot.slane %v4353_v55, 3  ;;  %v4368_v54 = vrot.slane %v4355_v63, 3  ;;  %v4372_v47 = vrot.slane %v4357_v43, 3 }
0x1bb0   :  { %v4369_v48 = vsel %vm260_vm10, %v4367_v45, %v4368_v54  ;;  %v4373_v36 = vsel %vm260_vm10, %v4368_v54, %v4372_v47 }
0x1bb1   :  { %4376 = vrot.lane.b32.xlu1 %v4369_v48, %s8006_s5 }
0x1bb5   :  { %4380 = vrot.lane.b32.xlu1 %v4373_v36, %s8006_s5 }
0x1bb9   :  { %4384 = vrot.lane.b32.xlu1 %v4372_v47, %s8006_s5 }
0x1bbd   :  { %4414 = vrot.lane.b32.xlu1 %v4411_v26, %s8005_s4 }
0x1bee   :  { %v10324_v53 = vpop.permute.xlu0 %4374 }
0x1bef   :  { %14570 = vst [vmem:[#allocation322_spill] sm:$0xff] %v10324_v53 }
0x1bf2   :  { %v10326_v49 = vpop.permute.xlu0 %4378 }
0x1bf3   :  { %14571 = vst [vmem:[#allocation323_spill] sm:$0xff] %v10326_v49  ;;  %v7835_v49 = vld [vmem:[%s13917_s0 + $0x75] ss:$8 sm:$0x3] }
0x1bf6   :  { %v10328_v55 = vpop.permute.xlu0 %4382 }
0x1bf7   :  { %14572 = vst [vmem:[#allocation324_spill] sm:$0xff] %v10328_v55 }
0x1bfa   :  { %v4413_v43 = vpop.permute.xlu0 %4412 }
0x1bfb   :  { %v4419_v63 = vmul.f32 %v9794_v51, %v4413_v43  ;;  %v4421_v45 = vmul.f32 %v9937_v46, %v4413_v43  ;;  %v4423_v54 = vmul.f32 %v9940_v0, %v4413_v43  ;;  %v4474_v51 = vrot.slane %v7835_v49, %v8071_v14 }
0x1bfd   :  { %v4431_v36 = vrot.slane %v4419_v63, 4  ;;  %v4432_v48 = vrot.slane %v4421_v45, 4  ;;  %v4437_v44 = vrot.slane %v4423_v54, 4 }
0x1bff   :  { %v4433_v47 = vsel %vm308_vm11, %v4431_v36, %v4432_v48  ;;  %v4438_v26 = vsel %vm308_vm11, %v4432_v48, %v4437_v44 }
0x1c00   :  { %4441 = vrot.lane.b32.xlu0 %v4433_v47, %s8006_s5 }
0x1c04   :  { %4445 = vrot.lane.b32.xlu0 %v4438_v26, %s8006_s5 }
0x1c08   :  { %4449 = vrot.lane.b32.xlu0 %v4437_v44, %s8006_s5 }
0x1c0c   :  { %4479 = vrot.lane.b32.xlu0 %v4474_v51, %s8005_s4 }
0x1c23   :  { %v10343_v63 = vpop.permute.xlu1 %4376 }
0x1c24   :  { %14573 = vst [vmem:[#allocation325_spill] sm:$0xff] %v10343_v63 }
0x1c27   :  { %v10345_v45 = vpop.permute.xlu1 %4380 }
0x1c28   :  { %14574 = vst [vmem:[#allocation326_spill] sm:$0xff] %v10345_v45 }
0x1c2b   :  { %v10347_v54 = vpop.permute.xlu1 %4384 }
0x1c2c   :  { %14575 = vst [vmem:[#allocation327_spill] sm:$0xff] %v10347_v54 }
0x1c2f   :  { %v4415_v36 = vpop.permute.xlu1 %4414 }
0x1c30   :  { %v4416_v48 = vsel %vm4156_vm3, %v4413_v43, %v4415_v36  ;;  %v4478_v43 = vrot.slane %v7835_v49, %v8069_v13  ;;  %v7836_v49 = vld [vmem:[%s13917_s0 + $0x90] ss:$8 sm:$0x3] }
0x1c31   :  { %v4420_v47 = vmul.f32 %v10206_v32, %v4416_v48  ;;  %v4422_v26 = vmul.f32 %v9961_v40, %v4416_v48  ;;  %v4424_v53 = vmul.f32 %v9964_v18, %v4416_v48 }
0x1c33   :  { %v4434_v44 = vrot.slane %v4420_v47, 4  ;;  %v4435_v9 = vrot.slane %v4422_v26, 4  ;;  %v4439_v55 = vrot.slane %v4424_v53, 4 }
0x1c35   :  { %v4436_v51 = vsel %vm308_vm11, %v4434_v44, %v4435_v9  ;;  %v4440_v45 = vsel %vm308_vm11, %v4435_v9, %v4439_v55 }
0x1c36   :  { %4443 = vrot.lane.b32.xlu1 %v4436_v51, %s8006_s5 }
0x1c3a   :  { %4447 = vrot.lane.b32.xlu1 %v4440_v45, %s8006_s5  ;;  %v4533_v45 = vrot.slane %v7836_v49, %v8071_v14 }
0x1c3e   :  { %4451 = vrot.lane.b32.xlu1 %v4439_v55, %s8006_s5 }
0x1c42   :  { %4481 = vrot.lane.b32.xlu1 %v4478_v43, %s8005_s4 }
0x1c72   :  { %v10360_v36 = vpop.permute.xlu0 %4441 }
0x1c73   :  { %14576 = vst [vmem:[#allocation328_spill] sm:$0xff] %v10360_v36 }
0x1c76   :  { %v10362_v48 = vpop.permute.xlu0 %4445 }
0x1c77   :  { %14577 = vst [vmem:[#allocation329_spill] sm:$0xff] %v10362_v48 }
0x1c7a   :  { %v10364_v47 = vpop.permute.xlu0 %4449 }
0x1c7b   :  { %14578 = vst [vmem:[#allocation330_spill] sm:$0xff] %v10364_v47 }
0x1c7e   :  { %v4480_v53 = vpop.permute.xlu0 %4479 }
0x1c7f   :  { %v4486_v26 = vmul.f32 %v9937_v46, %v4480_v53  ;;  %v4488_v44 = vmul.f32 %v9940_v0, %v4480_v53 }
0x1c81   :  { %v4494_v9 = vrot.slane %v4486_v26, 5  ;;  %v4496_v51 = vrot.slane %v4488_v44, 5 }
0x1c83   :  { %4500 = vrot.lane.b32.xlu0 %v4494_v9, %s8006_s5  ;;  %v4497_v55 = vsel %vm352_vm12, %v4494_v9, %v4496_v51 }
0x1c87   :  { %4504 = vrot.lane.b32.xlu0 %v4497_v55, %s8006_s5 }
0x1c8b   :  { %4508 = vrot.lane.b32.xlu0 %v4496_v51, %s8006_s5 }
0x1c8f   :  { %4538 = vrot.lane.b32.xlu0 %v4533_v45, %s8005_s4  ;;  %v4537_v45 = vrot.slane %v7836_v49, %v8069_v13 }
0x1ca8   :  { %v10377_v43 = vpop.permute.xlu1 %4443 }
0x1ca9   :  { %14579 = vst [vmem:[#allocation331_spill] sm:$0xff] %v10377_v43 }
0x1cac   :  { %v10379_v26 = vpop.permute.xlu1 %4447 }
0x1cad   :  { %14580 = vst [vmem:[#allocation332_spill] sm:$0xff] %v10379_v26 }
0x1cb0   :  { %v10381_v44 = vpop.permute.xlu1 %4451 }
0x1cb1   :  { %14581 = vst [vmem:[#allocation333_spill] sm:$0xff] %v10381_v44 }
0x1cb4   :  { %v4482_v48 = vpop.permute.xlu1 %4481 }
0x1cb5   :  { %v4483_v9 = vsel %vm4156_vm3, %v4480_v53, %v4482_v48 }
0x1cb6   :  { %v4487_v55 = vmul.f32 %v9961_v40, %v4483_v9  ;;  %v4489_v36 = vmul.f32 %v9964_v18, %v4483_v9 }
0x1cb8   :  { %v4495_v63 = vrot.slane %v4487_v55, 5  ;;  %v4498_v47 = vrot.slane %v4489_v36, 5 }
0x1cba   :  { %4502 = vrot.lane.b32.xlu1 %v4495_v63, %s8006_s5  ;;  %v4499_v51 = vsel %vm352_vm12, %v4495_v63, %v4498_v47 }
0x1cbe   :  { %4506 = vrot.lane.b32.xlu1 %v4499_v51, %s8006_s5  ;;  %v10400_v51 = vld [vmem:[#allocation2] sm:$0xff] }
0x1cc2   :  { %4510 = vrot.lane.b32.xlu1 %v4498_v47, %s8006_s5 }
0x1cc6   :  { %4540 = vrot.lane.b32.xlu1 %v4537_v45, %s8005_s4 }
0x1cf5   :  { %v10392_v26 = vpop.permute.xlu0 %4500 }
0x1cf6   :  { %14582 = vst [vmem:[#allocation334_spill] sm:$0xff] %v10392_v26 }
0x1cf9   :  { %v10394_v48 = vpop.permute.xlu0 %4504 }
0x1cfa   :  { %14583 = vst [vmem:[#allocation335_spill] sm:$0xff] %v10394_v48  ;;  %v7837_v48 = vld [vmem:[%s13917_s0 + $0xa3] ss:$8 sm:$0x3] }
0x1cfd   :  { %v10396_v53 = vpop.permute.xlu0 %4508 }
0x1cfe   :  { %14584 = vst [vmem:[#allocation336_spill] sm:$0xff] %v10396_v53 }
0x1d01   :  { %v4539_v9 = vpop.permute.xlu0 %4538 }
0x1d02   :  { %v4545_v36 = vmul.f32 %v9937_v46, %v4539_v9  ;;  %v4547_v55 = vmul.f32 %v9940_v0, %v4539_v9  ;;  %v4549_v47 = vmul.f32 %v10400_v51, %v4539_v9 }
0x1d04   :  { %v4557_v63 = vrot.slane %v4545_v36, 6  ;;  %v4559_v43 = vrot.slane %v4547_v55, 6  ;;  %v4563_v45 = vrot.slane %v4549_v47, 6  ;;  %v4600_v36 = vrot.slane %v7837_v48, %v8071_v14 }
0x1d06   :  { %4567 = vrot.lane.b32.xlu0 %v4557_v63, %s8006_s5  ;;  %v4560_v49 = vsel %vm396_vm13, %v4557_v63, %v4559_v43  ;;  %v4564_v26 = vsel %vm396_vm13, %v4559_v43, %v4563_v45  ;;  %v10422_v45 = vld [vmem:[#allocation2 + $0x38] sm:$0xff] }
0x1d0a   :  { %4571 = vrot.lane.b32.xlu0 %v4560_v49, %s8006_s5 }
0x1d0e   :  { %4575 = vrot.lane.b32.xlu0 %v4564_v26, %s8006_s5 }
0x1d12   :  { %4605 = vrot.lane.b32.xlu0 %v4600_v36, %s8005_s4 }
0x1d2c   :  { %v10413_v55 = vpop.permute.xlu1 %4502 }
0x1d2d   :  { %14585 = vst [vmem:[#allocation337_spill] sm:$0xff] %v10413_v55 }
0x1d30   :  { %v10415_v53 = vpop.permute.xlu1 %4506 }
0x1d31   :  { %14586 = vst [vmem:[#allocation338_spill] sm:$0xff] %v10415_v53 }
0x1d34   :  { %v10417_v63 = vpop.permute.xlu1 %4510 }
0x1d35   :  { %14587 = vst [vmem:[#allocation339_spill] sm:$0xff] %v10417_v63 }
0x1d38   :  { %v4541_v47 = vpop.permute.xlu1 %4540 }
0x1d39   :  { %v4542_v49 = vsel %vm4156_vm3, %v4539_v9, %v4541_v47  ;;  %v4604_v9 = vrot.slane %v7837_v48, %v8069_v13 }
0x1d3a   :  { %v4546_v44 = vmul.f32 %v9961_v40, %v4542_v49  ;;  %v4548_v54 = vmul.f32 %v9964_v18, %v4542_v49  ;;  %v4550_v26 = vmul.f32 %v10422_v45, %v4542_v49 }
0x1d3c   :  { %v4558_v43 = vrot.slane %v4546_v44, 6  ;;  %v4561_v1 = vrot.slane %v4548_v54, 6  ;;  %v4565_v36 = vrot.slane %v4550_v26, 6 }
0x1d3e   :  { %4569 = vrot.lane.b32.xlu1 %v4558_v43, %s8006_s5  ;;  %v4562_v53 = vsel %vm396_vm13, %v4558_v43, %v4561_v1  ;;  %v4566_v55 = vsel %vm396_vm13, %v4561_v1, %v4565_v36  ;;  %v7838_v36 = vld [vmem:[%s13917_s0 + $0xb6] ss:$8 sm:$0x3] }
0x1d42   :  { %4573 = vrot.lane.b32.xlu1 %v4562_v53, %s8006_s5 }
0x1d46   :  { %4577 = vrot.lane.b32.xlu1 %v4566_v55, %s8006_s5 }
0x1d4a   :  { %4607 = vrot.lane.b32.xlu1 %v4604_v9, %s8005_s4 }
0x1d78   :  { %v10432_v44 = vpop.permute.xlu0 %4567 }
0x1d79   :  { %14588 = vst [vmem:[#allocation340_spill] sm:$0xff] %v10432_v44 }
0x1d7c   :  { %v10434_v47 = vpop.permute.xlu0 %4571 }
0x1d7d   :  { %14589 = vst [vmem:[#allocation341_spill] sm:$0xff] %v10434_v47 }
0x1d80   :  { %v10436_v54 = vpop.permute.xlu0 %4575 }
0x1d81   :  { %14590 = vst [vmem:[#allocation342_spill] sm:$0xff] %v10436_v54 }
0x1d84   :  { %v4606_v49 = vpop.permute.xlu0 %4605 }
0x1d85   :  { %v4612_v26 = vmul.f32 %v9937_v46, %v4606_v49  ;;  %v4614_v43 = vmul.f32 %v9940_v0, %v4606_v49  ;;  %v4616_v1 = vmul.f32 %v10400_v51, %v4606_v49 }
0x1d87   :  { %v4624_v53 = vrot.slane %v4612_v26, 7  ;;  %v4626_v63 = vrot.slane %v4614_v43, 7  ;;  %v4630_v55 = vrot.slane %v4616_v1, 7  ;;  %v4667_v26 = vrot.slane %v7838_v36, %v8071_v14 }
0x1d89   :  { %4634 = vrot.lane.b32.xlu0 %v4624_v53, %s8006_s5  ;;  %v4627_v48 = vsel %vm444_vm14, %v4624_v53, %v4626_v63  ;;  %v4631_v9 = vsel %vm444_vm14, %v4626_v63, %v4630_v55 }
0x1d8d   :  { %4638 = vrot.lane.b32.xlu0 %v4627_v48, %s8006_s5 }
0x1d91   :  { %4642 = vrot.lane.b32.xlu0 %v4631_v9, %s8006_s5 }
0x1d95   :  { %4672 = vrot.lane.b32.xlu0 %v4667_v26, %s8005_s4 }
0x1db0   :  { %v10451_v43 = vpop.permute.xlu1 %4569 }
0x1db1   :  { %14591 = vst [vmem:[#allocation343_spill] sm:$0xff] %v10451_v43 }
0x1db4   :  { %v10453_v47 = vpop.permute.xlu1 %4573 }
0x1db5   :  { %14592 = vst [vmem:[#allocation344_spill] sm:$0xff] %v10453_v47 }
0x1db8   :  { %v10455_v53 = vpop.permute.xlu1 %4577 }
0x1db9   :  { %14593 = vst [vmem:[#allocation345_spill] sm:$0xff] %v10455_v53 }
0x1dbc   :  { %v4608_v1 = vpop.permute.xlu1 %4607 }
0x1dbd   :  { %v4609_v48 = vsel %vm4156_vm3, %v4606_v49, %v4608_v1  ;;  %v4671_v49 = vrot.slane %v7838_v36, %v8069_v13  ;;  %v7839_v36 = vld [vmem:[%s13917_s0 + $0xd1] ss:$8 sm:$0x3] }
0x1dbe   :  { %v4613_v44 = vmul.f32 %v9961_v40, %v4609_v48  ;;  %v4615_v54 = vmul.f32 %v9964_v18, %v4609_v48  ;;  %v4617_v55 = vmul.f32 %v10422_v45, %v4609_v48 }
0x1dc0   :  { %v4625_v63 = vrot.slane %v4613_v44, 7  ;;  %v4628_v9 = vrot.slane %v4615_v54, 7  ;;  %v4632_v26 = vrot.slane %v4617_v55, 7 }
0x1dc2   :  { %4636 = vrot.lane.b32.xlu1 %v4625_v63, %s8006_s5  ;;  %v4629_v43 = vsel %vm444_vm14, %v4625_v63, %v4628_v9  ;;  %v4633_v47 = vsel %vm444_vm14, %v4628_v9, %v4632_v26  ;;  %v4724_v63 = vrot.slane %v7839_v36, %v8071_v14 }
0x1dc6   :  { %4640 = vrot.lane.b32.xlu1 %v4629_v43, %s8006_s5 }
0x1dca   :  { %4644 = vrot.lane.b32.xlu1 %v4633_v47, %s8006_s5 }
0x1dce   :  { %4674 = vrot.lane.b32.xlu1 %v4671_v49, %s8005_s4 }
0x1dfb   :  { %v10468_v1 = vpop.permute.xlu0 %4634 }
0x1dfc   :  { %14594 = vst [vmem:[#allocation346_spill] sm:$0xff] %v10468_v1  ;;  %v7840_v1 = vld [vmem:[%s13917_s0 + $0xe4] ss:$8 sm:$0x3] }
0x1dff   :  { %v10470_v44 = vpop.permute.xlu0 %4638 }
0x1e00   :  { %14595 = vst [vmem:[#allocation347_spill] sm:$0xff] %v10470_v44 }
0x1e03   :  { %v10472_v54 = vpop.permute.xlu0 %4642 }
0x1e04   :  { %14596 = vst [vmem:[#allocation348_spill] sm:$0xff] %v10472_v54 }
0x1e07   :  { %v4673_v48 = vpop.permute.xlu0 %4672 }
0x1e08   :  { %v4679_v55 = vmul.f32 %v9937_v46, %v4673_v48  ;;  %v4681_v43 = vmul.f32 %v9940_v0, %v4673_v48  ;;  %v4683_v47 = vmul.f32 %v10400_v51, %v4673_v48 }
0x1e0a   :  { %4691 = vrot.lane.b32.xlu0 %v4679_v55, %s8006_s5 }
0x1e0e   :  { %4695 = vrot.lane.b32.xlu0 %v4681_v43, %s8006_s5 }
0x1e12   :  { %4699 = vrot.lane.b32.xlu0 %v4683_v47, %s8006_s5 }
0x1e16   :  { %4729 = vrot.lane.b32.xlu0 %v4724_v63, %s8005_s4  ;;  %v4728_v63 = vrot.slane %v7839_v36, %v8069_v13 }
0x1e34   :  { %v10485_v9 = vpop.permute.xlu1 %4636 }
0x1e35   :  { %14597 = vst [vmem:[#allocation349_spill] sm:$0xff] %v10485_v9  ;;  %v4791_v9 = vrot.slane %v7840_v1, %v8071_v14 }
0x1e38   :  { %v10487_v46 = vpop.permute.xlu1 %4640 }
0x1e39   :  { %14598 = vst [vmem:[#allocation350_spill] sm:$0xff] %v10487_v46 }
0x1e3c   :  { %v10489_v26 = vpop.permute.xlu1 %4644 }
0x1e3d   :  { %14599 = vst [vmem:[#allocation351_spill] sm:$0xff] %v10489_v26 }
0x1e40   :  { %v4675_v0 = vpop.permute.xlu1 %4674 }
0x1e41   :  { %v4676_v49 = vsel %vm4156_vm3, %v4673_v48, %v4675_v0  ;;  %v10506_v0 = vld [vmem:[#allocation2 + $0x10] sm:$0xff] }
0x1e42   :  { %v4680_v55 = vmul.f32 %v9961_v40, %v4676_v49  ;;  %v4682_v43 = vmul.f32 %v9964_v18, %v4676_v49  ;;  %v4684_v47 = vmul.f32 %v10422_v45, %v4676_v49 }
0x1e44   :  { %4693 = vrot.lane.b32.xlu1 %v4680_v55, %s8006_s5  ;;  %v10509_v55 = vld [vmem:[#allocation2 + $0x20] sm:$0xff] }
0x1e48   :  { %4697 = vrot.lane.b32.xlu1 %v4682_v43, %s8006_s5 }
0x1e4c   :  { %4701 = vrot.lane.b32.xlu1 %v4684_v47, %s8006_s5 }
0x1e50   :  { %4731 = vrot.lane.b32.xlu1 %v4728_v63, %s8005_s4 }
0x1e7c   :  { %v10500_v44 = vpop.permute.xlu0 %4691 }
0x1e7d   :  { %14600 = vst [vmem:[#allocation352_spill] sm:$0xff] %v10500_v44 }
0x1e80   :  { %v10502_v46 = vpop.permute.xlu0 %4695 }
0x1e81   :  { %14601 = vst [vmem:[#allocation353_spill] sm:$0xff] %v10502_v46 }
0x1e84   :  { %v10504_v48 = vpop.permute.xlu0 %4699 }
0x1e85   :  { %14602 = vst [vmem:[#allocation354_spill] sm:$0xff] %v10504_v48  ;;  %v10533_v48 = vld [vmem:[#allocation2 + $0x28] sm:$0xff] }
0x1e88   :  { %v4730_v40 = vpop.permute.xlu0 %4729 }
0x1e89   :  { %v4736_v18 = vmul.f32 %v10506_v0, %v4730_v40  ;;  %v4738_v49 = vmul.f32 %v10509_v55, %v4730_v40  ;;  %v4740_v43 = vmul.f32 %v10400_v51, %v4730_v40 }
0x1e8b   :  { %v4748_v36 = vrot.slane %v4736_v18, 1  ;;  %v4749_v47 = vrot.slane %v4738_v49, 1  ;;  %v4754_v44 = vrot.slane %v4740_v43, 1 }
0x1e8d   :  { %v4750_v63 = vsel %vm164_vm8, %v4748_v36, %v4749_v47  ;;  %v4755_v46 = vsel %vm164_vm8, %v4749_v47, %v4754_v44 }
0x1e8e   :  { %4758 = vrot.lane.b32.xlu0 %v4750_v63, %s8006_s5 }
0x1e92   :  { %4762 = vrot.lane.b32.xlu0 %v4755_v46, %s8006_s5  ;;  %v10530_v46 = vld [vmem:[#allocation2 + $0x18] sm:$0xff] }
0x1e96   :  { %4766 = vrot.lane.b32.xlu0 %v4754_v44, %s8006_s5 }
0x1e9a   :  { %4796 = vrot.lane.b32.xlu0 %v4791_v9, %s8005_s4 }
0x1eb6   :  { %v10523_v18 = vpop.permute.xlu1 %4693 }
0x1eb7   :  { %14603 = vst [vmem:[#allocation355_spill] sm:$0xff] %v10523_v18 }
0x1eba   :  { %v10525_v49 = vpop.permute.xlu1 %4697 }
0x1ebb   :  { %14604 = vst [vmem:[#allocation356_spill] sm:$0xff] %v10525_v49 }
0x1ebe   :  { %v10527_v43 = vpop.permute.xlu1 %4701 }
0x1ebf   :  { %14605 = vst [vmem:[#allocation357_spill] sm:$0xff] %v10527_v43 }
0x1ec2   :  { %v4732_v36 = vpop.permute.xlu1 %4731 }
0x1ec3   :  { %v4733_v47 = vsel %vm4156_vm3, %v4730_v40, %v4732_v36  ;;  %v4795_v40 = vrot.slane %v7840_v1, %v8069_v13 }
0x1ec4   :  { %v4737_v63 = vmul.f32 %v10530_v46, %v4733_v47  ;;  %v4739_v44 = vmul.f32 %v10533_v48, %v4733_v47  ;;  %v4741_v54 = vmul.f32 %v10422_v45, %v4733_v47 }
0x1ec6   :  { %v4751_v9 = vrot.slane %v4737_v63, 1  ;;  %v4752_v26 = vrot.slane %v4739_v44, 1  ;;  %v4756_v18 = vrot.slane %v4741_v54, 1 }
0x1ec8   :  { %v4753_v49 = vsel %vm164_vm8, %v4751_v9, %v4752_v26  ;;  %v4757_v43 = vsel %vm164_vm8, %v4752_v26, %v4756_v18 }
0x1ec9   :  { %4760 = vrot.lane.b32.xlu1 %v4753_v49, %s8006_s5 }
0x1ecd   :  { %4764 = vrot.lane.b32.xlu1 %v4757_v43, %s8006_s5 }
0x1ed1   :  { %4768 = vrot.lane.b32.xlu1 %v4756_v18, %s8006_s5 }
0x1ed5   :  { %4798 = vrot.lane.b32.xlu1 %v4795_v40, %s8005_s4 }
0x1f00   :  { %v10544_v36 = vpop.permute.xlu0 %4758 }
0x1f01   :  { %14606 = vst [vmem:[#allocation358_spill] sm:$0xff] %v10544_v36 }
0x1f04   :  { %v10546_v47 = vpop.permute.xlu0 %4762 }
0x1f05   :  { %14607 = vst [vmem:[#allocation359_spill] sm:$0xff] %v10546_v47  ;;  %v7841_v47 = vld [vmem:[%s13917_s0 + $0x7] ss:$8 sm:$0x3] }
0x1f06   :  { %v4858_v36 = vrot.slane %v7841_v47, %v8071_v14 }
0x1f08   :  { %v10548_v63 = vpop.permute.xlu0 %4766 }
0x1f09   :  { %14608 = vst [vmem:[#allocation360_spill] sm:$0xff] %v10548_v63 }
0x1f0c   :  { %v4797_v54 = vpop.permute.xlu0 %4796 }
0x1f0d   :  { %v4803_v44 = vmul.f32 %v10506_v0, %v4797_v54  ;;  %v4805_v49 = vmul.f32 %v10509_v55, %v4797_v54  ;;  %v4807_v26 = vmul.f32 %v10400_v51, %v4797_v54 }
0x1f0f   :  { %v4815_v43 = vrot.slane %v4803_v44, 2  ;;  %v4816_v9 = vrot.slane %v4805_v49, 2  ;;  %v4821_v1 = vrot.slane %v4807_v26, 2 }
0x1f11   :  { %v4817_v18 = vsel %vm212_vm9, %v4815_v43, %v4816_v9  ;;  %v4822_v40 = vsel %vm212_vm9, %v4816_v9, %v4821_v1 }
0x1f12   :  { %4825 = vrot.lane.b32.xlu0 %v4817_v18, %s8006_s5 }
0x1f16   :  { %4829 = vrot.lane.b32.xlu0 %v4822_v40, %s8006_s5 }
0x1f1a   :  { %4833 = vrot.lane.b32.xlu0 %v4821_v1, %s8006_s5 }
0x1f1e   :  { %4863 = vrot.lane.b32.xlu0 %v4858_v36, %s7995_s16 }
0x1f3b   :  { %v10563_v44 = vpop.permute.xlu1 %4760 }
0x1f3c   :  { %14609 = vst [vmem:[#allocation361_spill] sm:$0xff] %v10563_v44 }
0x1f3f   :  { %v10565_v49 = vpop.permute.xlu1 %4764 }
0x1f40   :  { %14610 = vst [vmem:[#allocation362_spill] sm:$0xff] %v10565_v49 }
0x1f43   :  { %v10567_v26 = vpop.permute.xlu1 %4768 }
0x1f44   :  { %14611 = vst [vmem:[#allocation363_spill] sm:$0xff] %v10567_v26 }
0x1f47   :  { %v4799_v43 = vpop.permute.xlu1 %4798 }
0x1f48   :  { %v4800_v9 = vsel %vm4156_vm3, %v4797_v54, %v4799_v43  ;;  %v4862_v54 = vrot.slane %v7841_v47, %v8069_v13  ;;  %vm4184_vm3 = vcmask 998400  }
0x1f49   :  { %v4804_v18 = vmul.f32 %v10530_v46, %v4800_v9  ;;  %v4806_v40 = vmul.f32 %v10533_v48, %v4800_v9  ;;  %v4808_v63 = vmul.f32 %v10422_v45, %v4800_v9 }
0x1f4b   :  { %v4818_v1 = vrot.slane %v4804_v18, 2  ;;  %v4819_v53 = vrot.slane %v4806_v40, 2  ;;  %v4823_v11 = vrot.slane %v4808_v63, 2 }
0x1f4d   :  { %v4820_v36 = vsel %vm212_vm9, %v4818_v1, %v4819_v53  ;;  %v4824_v49 = vsel %vm212_vm9, %v4819_v53, %v4823_v11 }
0x1f4e   :  { %4827 = vrot.lane.b32.xlu1 %v4820_v36, %s8006_s5 }
0x1f52   :  { %4831 = vrot.lane.b32.xlu1 %v4824_v49, %s8006_s5 }
0x1f56   :  { %4835 = vrot.lane.b32.xlu1 %v4823_v11, %s8006_s5  ;;  %v7842_v11 = vld [vmem:[%s13917_s0 + $0x22] ss:$8 sm:$0x3] }
0x1f57   :  { %v4917_v49 = vrot.slane %v7842_v11, %v8071_v14 }
0x1f5a   :  { %4865 = vrot.lane.b32.xlu1 %v4862_v54, %s7995_s16 }
0x1f84   :  { %v10580_v43 = vpop.permute.xlu0 %4825 }
0x1f85   :  { %14612 = vst [vmem:[#allocation364_spill] sm:$0xff] %v10580_v43 }
0x1f88   :  { %v10582_v9 = vpop.permute.xlu0 %4829 }
0x1f89   :  { %14613 = vst [vmem:[#allocation365_spill] sm:$0xff] %v10582_v9 }
0x1f8c   :  { %v10584_v18 = vpop.permute.xlu0 %4833 }
0x1f8d   :  { %14614 = vst [vmem:[#allocation366_spill] sm:$0xff] %v10584_v18 }
0x1f90   :  { %v4864_v63 = vpop.permute.xlu0 %4863 }
0x1f91   :  { %v4871_v40 = vmul.f32 %v10400_v51, %v4864_v63  ;;  %v4873_v53 = vmul.f32 %v10506_v0, %v4864_v63  ;;  %v4875_v47 = vmul.f32 %v10509_v55, %v4864_v63 }
0x1f93   :  { %4883 = vrot.lane.b32.xlu0 %v4871_v40, %s8007_s29 }
0x1f97   :  { %4887 = vrot.lane.b32.xlu0 %v4873_v53, %s8007_s29 }
0x1f9b   :  { %4891 = vrot.lane.b32.xlu0 %v4875_v47, %s8007_s29 }
0x1f9f   :  { %4922 = vrot.lane.b32.xlu0 %v4917_v49, %s7995_s16 }
0x1fc0   :  { %v10597_v1 = vpop.permute.xlu1 %4827 }
0x1fc1   :  { %14615 = vst [vmem:[#allocation367_spill] sm:$0xff] %v10597_v1 }
0x1fc4   :  { %v10599_v36 = vpop.permute.xlu1 %4831 }
0x1fc5   :  { %14616 = vst [vmem:[#allocation368_spill] sm:$0xff] %v10599_v36  ;;  %v4921_v36 = vrot.slane %v7842_v11, %v8069_v13 }
0x1fc8   :  { %v10601_v54 = vpop.permute.xlu1 %4835 }
0x1fc9   :  { %14617 = vst [vmem:[#allocation369_spill] sm:$0xff] %v10601_v54 }
0x1fcc   :  { %v4866_v40 = vpop.permute.xlu1 %4865 }
0x1fcd   :  { %v4868_v53 = vsel %vm4867_vm4, %v4864_v63, %v4866_v40 }
0x1fce   :  { %v4872_v9 = vmul.f32 %v10206_v32, %v4868_v53  ;;  %v4874_v47 = vmul.f32 %v10530_v46, %v4868_v53  ;;  %v4876_v49 = vmul.f32 %v10533_v48, %v4868_v53 }
0x1fd0   :  { %4885 = vrot.lane.b32.xlu1 %v4872_v9, %s8007_s29 }
0x1fd4   :  { %4889 = vrot.lane.b32.xlu1 %v4874_v47, %s8007_s29 }
0x1fd8   :  { %4893 = vrot.lane.b32.xlu1 %v4876_v49, %s8007_s29 }
0x1fdc   :  { %4924 = vrot.lane.b32.xlu1 %v4921_v36, %s7995_s16 }
0x2005   :  { %v10612_v43 = vpop.permute.xlu0 %4883 }
0x2006   :  { %14618 = vst [vmem:[#allocation370_spill] sm:$0xff] %v10612_v43 }
0x2009   :  { %v10614_v1 = vpop.permute.xlu0 %4887 }
0x200a   :  { %14619 = vst [vmem:[#allocation371_spill] sm:$0xff] %v10614_v1  ;;  %v7843_v1 = vld [vmem:[%s13917_s0 + $0x35] ss:$8 sm:$0x3] }
0x200b   :  { %v4984_v43 = vrot.slane %v7843_v1, %v8071_v14 }
0x200d   :  { %v10616_v63 = vpop.permute.xlu0 %4891 }
0x200e   :  { %14620 = vst [vmem:[#allocation372_spill] sm:$0xff] %v10616_v63 }
0x2011   :  { %v4923_v40 = vpop.permute.xlu0 %4922 }
0x2012   :  { %v4929_v9 = vmul.f32 %v10400_v51, %v4923_v40  ;;  %v4931_v44 = vmul.f32 %v10506_v0, %v4923_v40  ;;  %v4933_v47 = vmul.f32 %v10509_v55, %v4923_v40 }
0x2014   :  { %v4941_v53 = vrot.slane %v4929_v9, 1  ;;  %v4942_v18 = vrot.slane %v4931_v44, 1  ;;  %v4947_v11 = vrot.slane %v4933_v47, 1 }
0x2016   :  { %v4943_v49 = vsel %vm164_vm8, %v4941_v53, %v4942_v18  ;;  %v4948_v36 = vsel %vm164_vm8, %v4942_v18, %v4947_v11 }
0x2017   :  { %4951 = vrot.lane.b32.xlu0 %v4943_v49, %s8007_s29 }
0x201b   :  { %4955 = vrot.lane.b32.xlu0 %v4948_v36, %s8007_s29 }
0x201f   :  { %4959 = vrot.lane.b32.xlu0 %v4947_v11, %s8007_s29 }
0x2023   :  { %4989 = vrot.lane.b32.xlu0 %v4984_v43, %s7995_s16 }
0x2042   :  { %v10631_v44 = vpop.permute.xlu1 %4885 }
0x2043   :  { %14621 = vst [vmem:[#allocation373_spill] sm:$0xff] %v10631_v44 }
0x2046   :  { %v10633_v9 = vpop.permute.xlu1 %4889 }
0x2047   :  { %14622 = vst [vmem:[#allocation374_spill] sm:$0xff] %v10633_v9 }
0x204a   :  { %v10635_v47 = vpop.permute.xlu1 %4893 }
0x204b   :  { %14623 = vst [vmem:[#allocation375_spill] sm:$0xff] %v10635_v47 }
0x204e   :  { %v4925_v53 = vpop.permute.xlu1 %4924 }
0x204f   :  { %v4926_v18 = vsel %vm4867_vm4, %v4923_v40, %v4925_v53  ;;  %v4988_v40 = vrot.slane %v7843_v1, %v8069_v13 }
0x2050   :  { %v4930_v49 = vmul.f32 %v10206_v32, %v4926_v18  ;;  %v4932_v36 = vmul.f32 %v10530_v46, %v4926_v18  ;;  %v4934_v63 = vmul.f32 %v10533_v48, %v4926_v18 }
0x2052   :  { %v4944_v11 = vrot.slane %v4930_v49, 1  ;;  %v4945_v54 = vrot.slane %v4932_v36, 1  ;;  %v4949_v26 = vrot.slane %v4934_v63, 1 }
0x2054   :  { %v4946_v43 = vsel %vm164_vm8, %v4944_v11, %v4945_v54  ;;  %v4950_v9 = vsel %vm164_vm8, %v4945_v54, %v4949_v26 }
0x2055   :  { %4953 = vrot.lane.b32.xlu1 %v4946_v43, %s8007_s29 }
0x2059   :  { %4957 = vrot.lane.b32.xlu1 %v4950_v9, %s8007_s29 }
0x205d   :  { %4961 = vrot.lane.b32.xlu1 %v4949_v26, %s8007_s29 }
0x2061   :  { %4991 = vrot.lane.b32.xlu1 %v4988_v40, %s7995_s16 }
0x2089   :  { %v10648_v53 = vpop.permute.xlu0 %4951 }
0x208a   :  { %14624 = vst [vmem:[#allocation376_spill] sm:$0xff] %v10648_v53 }
0x208d   :  { %v10650_v18 = vpop.permute.xlu0 %4955 }
0x208e   :  { %14625 = vst [vmem:[#allocation377_spill] sm:$0xff] %v10650_v18  ;;  %v7844_v18 = vld [vmem:[%s13917_s0 + $0x50] ss:$8 sm:$0x3] }
0x208f   :  { %v5051_v53 = vrot.slane %v7844_v18, %v8071_v14 }
0x2091   :  { %v10652_v49 = vpop.permute.xlu0 %4959 }
0x2092   :  { %14626 = vst [vmem:[#allocation378_spill] sm:$0xff] %v10652_v49 }
0x2095   :  { %v4990_v63 = vpop.permute.xlu0 %4989 }
0x2096   :  { %v4996_v36 = vmul.f32 %v10400_v51, %v4990_v63  ;;  %v4998_v11 = vmul.f32 %v10506_v0, %v4990_v63  ;;  %v5000_v54 = vmul.f32 %v10509_v55, %v4990_v63 }
0x2098   :  { %v5008_v9 = vrot.slane %v4996_v36, 2  ;;  %v5009_v43 = vrot.slane %v4998_v11, 2  ;;  %v5014_v1 = vrot.slane %v5000_v54, 2 }
0x209a   :  { %v5010_v26 = vsel %vm212_vm9, %v5008_v9, %v5009_v43  ;;  %v5015_v40 = vsel %vm212_vm9, %v5009_v43, %v5014_v1 }
0x209b   :  { %5018 = vrot.lane.b32.xlu0 %v5010_v26, %s8007_s29 }
0x209f   :  { %5022 = vrot.lane.b32.xlu0 %v5015_v40, %s8007_s29 }
0x20a3   :  { %5026 = vrot.lane.b32.xlu0 %v5014_v1, %s8007_s29 }
0x20a7   :  { %5056 = vrot.lane.b32.xlu0 %v5051_v53, %s7995_s16 }
0x20c7   :  { %v10667_v36 = vpop.permute.xlu1 %4953 }
0x20c8   :  { %14627 = vst [vmem:[#allocation379_spill] sm:$0xff] %v10667_v36 }
0x20cb   :  { %v10669_v11 = vpop.permute.xlu1 %4957 }
0x20cc   :  { %14628 = vst [vmem:[#allocation380_spill] sm:$0xff] %v10669_v11 }
0x20cf   :  { %v10671_v54 = vpop.permute.xlu1 %4961 }
0x20d0   :  { %14629 = vst [vmem:[#allocation381_spill] sm:$0xff] %v10671_v54 }
0x20d3   :  { %v4992_v9 = vpop.permute.xlu1 %4991 }
0x20d4   :  { %v4993_v43 = vsel %vm4867_vm4, %v4990_v63, %v4992_v9  ;;  %v5055_v63 = vrot.slane %v7844_v18, %v8069_v13 }
0x20d5   :  { %v4997_v26 = vmul.f32 %v10206_v32, %v4993_v43  ;;  %v4999_v40 = vmul.f32 %v10530_v46, %v4993_v43  ;;  %v5001_v44 = vmul.f32 %v10533_v48, %v4993_v43 }
0x20d7   :  { %v5011_v1 = vrot.slane %v4997_v26, 2  ;;  %v5012_v49 = vrot.slane %v4999_v40, 2  ;;  %v5016_v47 = vrot.slane %v5001_v44, 2 }
0x20d9   :  { %v5013_v53 = vsel %vm212_vm9, %v5011_v1, %v5012_v49  ;;  %v5017_v11 = vsel %vm212_vm9, %v5012_v49, %v5016_v47 }
0x20da   :  { %5020 = vrot.lane.b32.xlu1 %v5013_v53, %s8007_s29 }
0x20de   :  { %5024 = vrot.lane.b32.xlu1 %v5017_v11, %s8007_s29 }
0x20e2   :  { %5028 = vrot.lane.b32.xlu1 %v5016_v47, %s8007_s29 }
0x20e6   :  { %5058 = vrot.lane.b32.xlu1 %v5055_v63, %s7995_s16 }
0x210d   :  { %v10684_v9 = vpop.permute.xlu0 %5018 }
0x210e   :  { %14630 = vst [vmem:[#allocation382_spill] sm:$0xff] %v10684_v9 }
0x2111   :  { %v10686_v43 = vpop.permute.xlu0 %5022 }
0x2112   :  { %14631 = vst [vmem:[#allocation383_spill] sm:$0xff] %v10686_v43  ;;  %v7845_v43 = vld [vmem:[%s13917_s0 + $0x63] ss:$8 sm:$0x3] }
0x2113   :  { %v5118_v9 = vrot.slane %v7845_v43, %v8071_v14 }
0x2115   :  { %v10688_v26 = vpop.permute.xlu0 %5026 }
0x2116   :  { %14632 = vst [vmem:[#allocation384_spill] sm:$0xff] %v10688_v26 }
0x2119   :  { %v5057_v44 = vpop.permute.xlu0 %5056 }
0x211a   :  { %v5063_v40 = vmul.f32 %v10400_v51, %v5057_v44  ;;  %v5065_v1 = vmul.f32 %v10506_v0, %v5057_v44  ;;  %v5067_v49 = vmul.f32 %v10509_v55, %v5057_v44 }
0x211c   :  { %v5075_v11 = vrot.slane %v5063_v40, 3  ;;  %v5076_v53 = vrot.slane %v5065_v1, 3  ;;  %v5081_v18 = vrot.slane %v5067_v49, 3 }
0x211e   :  { %v5077_v47 = vsel %vm260_vm10, %v5075_v11, %v5076_v53  ;;  %v5082_v63 = vsel %vm260_vm10, %v5076_v53, %v5081_v18 }
0x211f   :  { %5085 = vrot.lane.b32.xlu0 %v5077_v47, %s8007_s29 }
0x2123   :  { %5089 = vrot.lane.b32.xlu0 %v5082_v63, %s8007_s29 }
0x2127   :  { %5093 = vrot.lane.b32.xlu0 %v5081_v18, %s8007_s29 }
0x212b   :  { %5123 = vrot.lane.b32.xlu0 %v5118_v9, %s7995_s16 }
0x214c   :  { %v10703_v40 = vpop.permute.xlu1 %5020 }
0x214d   :  { %14633 = vst [vmem:[#allocation385_spill] sm:$0xff] %v10703_v40 }
0x2150   :  { %v10705_v1 = vpop.permute.xlu1 %5024 }
0x2151   :  { %14634 = vst [vmem:[#allocation386_spill] sm:$0xff] %v10705_v1 }
0x2154   :  { %v10707_v49 = vpop.permute.xlu1 %5028 }
0x2155   :  { %14635 = vst [vmem:[#allocation387_spill] sm:$0xff] %v10707_v49 }
0x2158   :  { %v5059_v11 = vpop.permute.xlu1 %5058 }
0x2159   :  { %v5060_v53 = vsel %vm4867_vm4, %v5057_v44, %v5059_v11  ;;  %v5122_v44 = vrot.slane %v7845_v43, %v8069_v13 }
0x215a   :  { %v5064_v47 = vmul.f32 %v10206_v32, %v5060_v53  ;;  %v5066_v63 = vmul.f32 %v10530_v46, %v5060_v53  ;;  %v5068_v36 = vmul.f32 %v10533_v48, %v5060_v53 }
0x215c   :  { %v5078_v18 = vrot.slane %v5064_v47, 3  ;;  %v5079_v26 = vrot.slane %v5066_v63, 3  ;;  %v5083_v54 = vrot.slane %v5068_v36, 3 }
0x215e   :  { %v5080_v9 = vsel %vm260_vm10, %v5078_v18, %v5079_v26  ;;  %v5084_v1 = vsel %vm260_vm10, %v5079_v26, %v5083_v54 }
0x215f   :  { %5087 = vrot.lane.b32.xlu1 %v5080_v9, %s8007_s29 }
0x2163   :  { %5091 = vrot.lane.b32.xlu1 %v5084_v1, %s8007_s29 }
0x2167   :  { %5095 = vrot.lane.b32.xlu1 %v5083_v54, %s8007_s29 }
0x216b   :  { %5125 = vrot.lane.b32.xlu1 %v5122_v44, %s7995_s16 }
0x2191   :  { %v10720_v11 = vpop.permute.xlu0 %5085 }
0x2192   :  { %14636 = vst [vmem:[#allocation388_spill] sm:$0xff] %v10720_v11 }
0x2195   :  { %v10722_v53 = vpop.permute.xlu0 %5089 }
0x2196   :  { %14637 = vst [vmem:[#allocation389_spill] sm:$0xff] %v10722_v53  ;;  %v7846_v53 = vld [vmem:[%s13917_s0 + $0x76] ss:$8 sm:$0x3] }
0x2197   :  { %v5185_v11 = vrot.slane %v7846_v53, %v8071_v14 }
0x2199   :  { %v10724_v47 = vpop.permute.xlu0 %5093 }
0x219a   :  { %14638 = vst [vmem:[#allocation390_spill] sm:$0xff] %v10724_v47 }
0x219d   :  { %v5124_v36 = vpop.permute.xlu0 %5123 }
0x219e   :  { %v5130_v63 = vmul.f32 %v10400_v51, %v5124_v36  ;;  %v5132_v18 = vmul.f32 %v10506_v0, %v5124_v36  ;;  %v5134_v26 = vmul.f32 %v10509_v55, %v5124_v36 }
0x21a0   :  { %v5142_v1 = vrot.slane %v5130_v63, 4  ;;  %v5143_v9 = vrot.slane %v5132_v18, 4  ;;  %v5148_v43 = vrot.slane %v5134_v26, 4 }
0x21a2   :  { %v5144_v54 = vsel %vm308_vm11, %v5142_v1, %v5143_v9  ;;  %v5149_v44 = vsel %vm308_vm11, %v5143_v9, %v5148_v43 }
0x21a3   :  { %5152 = vrot.lane.b32.xlu0 %v5144_v54, %s8007_s29 }
0x21a7   :  { %5156 = vrot.lane.b32.xlu0 %v5149_v44, %s8007_s29 }
0x21ab   :  { %5160 = vrot.lane.b32.xlu0 %v5148_v43, %s8007_s29 }
0x21af   :  { %5190 = vrot.lane.b32.xlu0 %v5185_v11, %s7995_s16 }
0x21d1   :  { %v10739_v63 = vpop.permute.xlu1 %5087 }
0x21d2   :  { %14639 = vst [vmem:[#allocation391_spill] sm:$0xff] %v10739_v63 }
0x21d5   :  { %v10741_v18 = vpop.permute.xlu1 %5091 }
0x21d6   :  { %14640 = vst [vmem:[#allocation392_spill] sm:$0xff] %v10741_v18 }
0x21d9   :  { %v10743_v26 = vpop.permute.xlu1 %5095 }
0x21da   :  { %14641 = vst [vmem:[#allocation393_spill] sm:$0xff] %v10743_v26 }
0x21dd   :  { %v5126_v1 = vpop.permute.xlu1 %5125 }
0x21de   :  { %v5127_v9 = vsel %vm4867_vm4, %v5124_v36, %v5126_v1  ;;  %v5189_v36 = vrot.slane %v7846_v53, %v8069_v13  ;;  %v7847_v53 = vld [vmem:[%s13917_s0 + $0x91] ss:$8 sm:$0x3] }
0x21df   :  { %v5131_v54 = vmul.f32 %v10206_v32, %v5127_v9  ;;  %v5133_v44 = vmul.f32 %v10530_v46, %v5127_v9  ;;  %v5135_v40 = vmul.f32 %v10533_v48, %v5127_v9 }
0x21e1   :  { %v5145_v43 = vrot.slane %v5131_v54, 4  ;;  %v5146_v47 = vrot.slane %v5133_v44, 4  ;;  %v5150_v49 = vrot.slane %v5135_v40, 4 }
0x21e3   :  { %v5147_v11 = vsel %vm308_vm11, %v5145_v43, %v5146_v47  ;;  %v5151_v18 = vsel %vm308_vm11, %v5146_v47, %v5150_v49 }
0x21e4   :  { %5154 = vrot.lane.b32.xlu1 %v5147_v11, %s8007_s29 }
0x21e8   :  { %5158 = vrot.lane.b32.xlu1 %v5151_v18, %s8007_s29  ;;  %v5244_v18 = vrot.slane %v7847_v53, %v8071_v14 }
0x21ec   :  { %5162 = vrot.lane.b32.xlu1 %v5150_v49, %s8007_s29 }
0x21f0   :  { %5192 = vrot.lane.b32.xlu1 %v5189_v36, %s7995_s16 }
0x2215   :  { %v10756_v32 = vpop.permute.xlu0 %5152 }
0x2216   :  { %14642 = vst [vmem:[#allocation394_spill] sm:$0xff] %v10756_v32 }
0x2219   :  { %v10758_v1 = vpop.permute.xlu0 %5156 }
0x221a   :  { %14643 = vst [vmem:[#allocation395_spill] sm:$0xff] %v10758_v1 }
0x221d   :  { %v10760_v9 = vpop.permute.xlu0 %5160 }
0x221e   :  { %14644 = vst [vmem:[#allocation396_spill] sm:$0xff] %v10760_v9 }
0x2221   :  { %v5191_v40 = vpop.permute.xlu0 %5190 }
0x2222   :  { %v5197_v54 = vmul.f32 %v10506_v0, %v5191_v40  ;;  %v5199_v44 = vmul.f32 %v10509_v55, %v5191_v40 }
0x2224   :  { %v5205_v47 = vrot.slane %v5197_v54, 5  ;;  %v5207_v43 = vrot.slane %v5199_v44, 5 }
0x2226   :  { %5211 = vrot.lane.b32.xlu0 %v5205_v47, %s8007_s29  ;;  %v5208_v49 = vsel %vm352_vm12, %v5205_v47, %v5207_v43 }
0x222a   :  { %5215 = vrot.lane.b32.xlu0 %v5208_v49, %s8007_s29 }
0x222e   :  { %5219 = vrot.lane.b32.xlu0 %v5207_v43, %s8007_s29 }
0x2232   :  { %5249 = vrot.lane.b32.xlu0 %v5244_v18, %s7995_s16  ;;  %v5248_v18 = vrot.slane %v7847_v53, %v8069_v13 }
0x2256   :  { %v10773_v11 = vpop.permute.xlu1 %5154 }
0x2257   :  { %14645 = vst [vmem:[#allocation397_spill] sm:$0xff] %v10773_v11 }
0x225a   :  { %v10775_v36 = vpop.permute.xlu1 %5158 }
0x225b   :  { %14646 = vst [vmem:[#allocation398_spill] sm:$0xff] %v10775_v36 }
0x225e   :  { %v10777_v54 = vpop.permute.xlu1 %5162 }
0x225f   :  { %14647 = vst [vmem:[#allocation399_spill] sm:$0xff] %v10777_v54 }
0x2262   :  { %v5193_v44 = vpop.permute.xlu1 %5192 }
0x2263   :  { %v5194_v47 = vsel %vm4867_vm4, %v5191_v40, %v5193_v44 }
0x2264   :  { %v5198_v49 = vmul.f32 %v10530_v46, %v5194_v47  ;;  %v5200_v1 = vmul.f32 %v10533_v48, %v5194_v47 }
0x2266   :  { %v5206_v32 = vrot.slane %v5198_v49, 5  ;;  %v5209_v63 = vrot.slane %v5200_v1, 5 }
0x2268   :  { %5213 = vrot.lane.b32.xlu1 %v5206_v32, %s8007_s29  ;;  %v5210_v43 = vsel %vm352_vm12, %v5206_v32, %v5209_v63 }
0x226c   :  { %5217 = vrot.lane.b32.xlu1 %v5210_v43, %s8007_s29 }
0x2270   :  { %5221 = vrot.lane.b32.xlu1 %v5209_v63, %s8007_s29 }
0x2274   :  { %5251 = vrot.lane.b32.xlu1 %v5248_v18, %s7995_s16  ;;  %v7848_v18 = vld [vmem:[%s13917_s0 + $0xa4] ss:$8 sm:$0x3] }
0x2298   :  { %v10788_v36 = vpop.permute.xlu0 %5211 }
0x2299   :  { %14648 = vst [vmem:[#allocation400_spill] sm:$0xff] %v10788_v36 }
0x229c   :  { %v10790_v40 = vpop.permute.xlu0 %5215 }
0x229d   :  { %14649 = vst [vmem:[#allocation401_spill] sm:$0xff] %v10790_v40 }
0x22a0   :  { %v10792_v44 = vpop.permute.xlu0 %5219 }
0x22a1   :  { %14650 = vst [vmem:[#allocation402_spill] sm:$0xff] %v10792_v44 }
0x22a4   :  { %v5250_v47 = vpop.permute.xlu0 %5249 }
0x22a5   :  { %v5256_v1 = vmul.f32 %v10506_v0, %v5250_v47  ;;  %v5258_v49 = vmul.f32 %v10509_v55, %v5250_v47  ;;  %v5260_v43 = vmul.f32 %v10400_v51, %v5250_v47 }
0x22a7   :  { %v5268_v32 = vrot.slane %v5256_v1, 6  ;;  %v5270_v11 = vrot.slane %v5258_v49, 6  ;;  %v5274_v53 = vrot.slane %v5260_v43, 6  ;;  %v5311_v1 = vrot.slane %v7848_v18, %v8071_v14 }
0x22a9   :  { %5278 = vrot.lane.b32.xlu0 %v5268_v32, %s8007_s29  ;;  %v5271_v63 = vsel %vm396_vm13, %v5268_v32, %v5270_v11  ;;  %v5275_v40 = vsel %vm396_vm13, %v5270_v11, %v5274_v53 }
0x22ad   :  { %5282 = vrot.lane.b32.xlu0 %v5271_v63, %s8007_s29 }
0x22b1   :  { %5286 = vrot.lane.b32.xlu0 %v5275_v40, %s8007_s29 }
0x22b5   :  { %5316 = vrot.lane.b32.xlu0 %v5311_v1, %s7995_s16 }
0x22da   :  { %v10807_v49 = vpop.permute.xlu1 %5213 }
0x22db   :  { %14651 = vst [vmem:[#allocation403_spill] sm:$0xff] %v10807_v49 }
0x22de   :  { %v10809_v36 = vpop.permute.xlu1 %5217 }
0x22df   :  { %14652 = vst [vmem:[#allocation404_spill] sm:$0xff] %v10809_v36 }
0x22e2   :  { %v10811_v32 = vpop.permute.xlu1 %5221 }
0x22e3   :  { %14653 = vst [vmem:[#allocation405_spill] sm:$0xff] %v10811_v32 }
0x22e6   :  { %v5252_v43 = vpop.permute.xlu1 %5251 }
0x22e7   :  { %v5253_v63 = vsel %vm4867_vm4, %v5250_v47, %v5252_v43  ;;  %v5315_v47 = vrot.slane %v7848_v18, %v8069_v13 }
0x22e8   :  { %v5257_v44 = vmul.f32 %v10530_v46, %v5253_v63  ;;  %v5259_v9 = vmul.f32 %v10533_v48, %v5253_v63  ;;  %v5261_v40 = vmul.f32 %v10422_v45, %v5253_v63 }
0x22ea   :  { %v5269_v11 = vrot.slane %v5257_v44, 6  ;;  %v5272_v53 = vrot.slane %v5259_v9, 6  ;;  %v5276_v1 = vrot.slane %v5261_v40, 6 }
0x22ec   :  { %5280 = vrot.lane.b32.xlu1 %v5269_v11, %s8007_s29  ;;  %v5273_v49 = vsel %vm396_vm13, %v5269_v11, %v5272_v53  ;;  %v5277_v36 = vsel %vm396_vm13, %v5272_v53, %v5276_v1  ;;  %v7849_v1 = vld [vmem:[%s13917_s0 + $0xb7] ss:$8 sm:$0x3] }
0x22f0   :  { %5284 = vrot.lane.b32.xlu1 %v5273_v49, %s8007_s29 }
0x22f4   :  { %5288 = vrot.lane.b32.xlu1 %v5277_v36, %s8007_s29 }
0x22f8   :  { %5318 = vrot.lane.b32.xlu1 %v5315_v47, %s7995_s16 }
0x231b   :  { %v10824_v43 = vpop.permute.xlu0 %5278 }
0x231c   :  { %14654 = vst [vmem:[#allocation406_spill] sm:$0xff] %v10824_v43 }
0x231f   :  { %v10826_v44 = vpop.permute.xlu0 %5282 }
0x2320   :  { %14655 = vst [vmem:[#allocation407_spill] sm:$0xff] %v10826_v44 }
0x2323   :  { %v10828_v9 = vpop.permute.xlu0 %5286 }
0x2324   :  { %14656 = vst [vmem:[#allocation408_spill] sm:$0xff] %v10828_v9 }
0x2327   :  { %v5317_v63 = vpop.permute.xlu0 %5316 }
0x2328   :  { %v5323_v40 = vmul.f32 %v10506_v0, %v5317_v63  ;;  %v5325_v11 = vmul.f32 %v10509_v55, %v5317_v63  ;;  %v5327_v53 = vmul.f32 %v10400_v51, %v5317_v63 }
0x232a   :  { %v5335_v49 = vrot.slane %v5323_v40, 7  ;;  %v5337_v32 = vrot.slane %v5325_v11, 7  ;;  %v5341_v18 = vrot.slane %v5327_v53, 7  ;;  %v5378_v40 = vrot.slane %v7849_v1, %v8071_v14 }
0x232c   :  { %5345 = vrot.lane.b32.xlu0 %v5335_v49, %s8007_s29  ;;  %v5338_v36 = vsel %vm444_vm14, %v5335_v49, %v5337_v32  ;;  %v5342_v47 = vsel %vm444_vm14, %v5337_v32, %v5341_v18 }
0x2330   :  { %5349 = vrot.lane.b32.xlu0 %v5338_v36, %s8007_s29 }
0x2334   :  { %5353 = vrot.lane.b32.xlu0 %v5342_v47, %s8007_s29 }
0x2338   :  { %5383 = vrot.lane.b32.xlu0 %v5378_v40, %s7995_s16 }
0x235e   :  { %v10843_v11 = vpop.permute.xlu1 %5280 }
0x235f   :  { %14657 = vst [vmem:[#allocation409_spill] sm:$0xff] %v10843_v11 }
0x2362   :  { %v10845_v44 = vpop.permute.xlu1 %5284 }
0x2363   :  { %14658 = vst [vmem:[#allocation410_spill] sm:$0xff] %v10845_v44 }
0x2366   :  { %v10847_v49 = vpop.permute.xlu1 %5288 }
0x2367   :  { %14659 = vst [vmem:[#allocation411_spill] sm:$0xff] %v10847_v49 }
0x236a   :  { %v5319_v53 = vpop.permute.xlu1 %5318 }
0x236b   :  { %v5320_v36 = vsel %vm4867_vm4, %v5317_v63, %v5319_v53  ;;  %v5382_v63 = vrot.slane %v7849_v1, %v8069_v13  ;;  %v7850_v1 = vld [vmem:[%s13917_s0 + $0xd2] ss:$8 sm:$0x3] }
0x236c   :  { %v5324_v43 = vmul.f32 %v10530_v46, %v5320_v36  ;;  %v5326_v9 = vmul.f32 %v10533_v48, %v5320_v36  ;;  %v5328_v18 = vmul.f32 %v10422_v45, %v5320_v36 }
0x236e   :  { %v5336_v32 = vrot.slane %v5324_v43, 7  ;;  %v5339_v47 = vrot.slane %v5326_v9, 7  ;;  %v5343_v40 = vrot.slane %v5328_v18, 7 }
0x2370   :  { %5347 = vrot.lane.b32.xlu1 %v5336_v32, %s8007_s29  ;;  %v5340_v11 = vsel %vm444_vm14, %v5336_v32, %v5339_v47  ;;  %v5344_v44 = vsel %vm444_vm14, %v5339_v47, %v5343_v40  ;;  %v5435_v32 = vrot.slane %v7850_v1, %v8071_v14 }
0x2374   :  { %5351 = vrot.lane.b32.xlu1 %v5340_v11, %s8007_s29 }
0x2378   :  { %5355 = vrot.lane.b32.xlu1 %v5344_v44, %s8007_s29 }
0x237c   :  { %5385 = vrot.lane.b32.xlu1 %v5382_v63, %s7995_s16 }
0x239e   :  { %v10860_v53 = vpop.permute.xlu0 %5345 }
0x239f   :  { %14660 = vst [vmem:[#allocation412_spill] sm:$0xff] %v10860_v53 }
0x23a2   :  { %v10862_v43 = vpop.permute.xlu0 %5349 }
0x23a3   :  { %14661 = vst [vmem:[#allocation413_spill] sm:$0xff] %v10862_v43 }
0x23a6   :  { %v10864_v9 = vpop.permute.xlu0 %5353 }
0x23a7   :  { %14662 = vst [vmem:[#allocation414_spill] sm:$0xff] %v10864_v9 }
0x23aa   :  { %v5384_v36 = vpop.permute.xlu0 %5383 }
0x23ab   :  { %v5390_v18 = vmul.f32 %v10506_v0, %v5384_v36  ;;  %v5392_v11 = vmul.f32 %v10509_v55, %v5384_v36  ;;  %v5394_v44 = vmul.f32 %v10400_v51, %v5384_v36 }
0x23ad   :  { %5402 = vrot.lane.b32.xlu0 %v5390_v18, %s8007_s29 }
0x23b1   :  { %5406 = vrot.lane.b32.xlu0 %v5392_v11, %s8007_s29 }
0x23b5   :  { %5410 = vrot.lane.b32.xlu0 %v5394_v44, %s8007_s29 }
0x23b9   :  { %5440 = vrot.lane.b32.xlu0 %v5435_v32, %s7995_s16  ;;  %v5439_v32 = vrot.slane %v7850_v1, %v8069_v13 }
0x23e2   :  { %v10877_v47 = vpop.permute.xlu1 %5347 }
0x23e3   :  { %14663 = vst [vmem:[#allocation415_spill] sm:$0xff] %v10877_v47 }
0x23e6   :  { %v10879_v40 = vpop.permute.xlu1 %5351 }
0x23e7   :  { %14664 = vst [vmem:[#allocation416_spill] sm:$0xff] %v10879_v40 }
0x23ea   :  { %v10881_v63 = vpop.permute.xlu1 %5355 }
0x23eb   :  { %14665 = vst [vmem:[#allocation417_spill] sm:$0xff] %v10881_v63 }
0x23ee   :  { %v5386_v18 = vpop.permute.xlu1 %5385 }
0x23ef   :  { %v5387_v11 = vsel %vm4867_vm4, %v5384_v36, %v5386_v18 }
0x23f0   :  { %v5391_v43 = vmul.f32 %v10530_v46, %v5387_v11  ;;  %v5393_v53 = vmul.f32 %v10533_v48, %v5387_v11  ;;  %v5395_v44 = vmul.f32 %v10422_v45, %v5387_v11 }
0x23f2   :  { %5404 = vrot.lane.b32.xlu1 %v5391_v43, %s8007_s29 }
0x23f6   :  { %5408 = vrot.lane.b32.xlu1 %v5393_v53, %s8007_s29 }
0x23fa   :  { %5412 = vrot.lane.b32.xlu1 %v5395_v44, %s8007_s29 }
0x23fe   :  { %5442 = vrot.lane.b32.xlu1 %v5439_v32, %s7995_s16 }
0x241f   :  { %v10892_v40 = vpop.permute.xlu0 %5402 }
0x2420   :  { %14666 = vst [vmem:[#allocation418_spill] sm:$0xff] %v10892_v40 }
0x2423   :  { %v10894_v47 = vpop.permute.xlu0 %5406 }
0x2424   :  { %14667 = vst [vmem:[#allocation419_spill] sm:$0xff] %v10894_v47  ;;  %v7851_v47 = vld [vmem:[%s13917_s0 + $0xe5] ss:$8 sm:$0x3] }
0x2425   :  { %v5502_v40 = vrot.slane %v7851_v47, %v8071_v14 }
0x2427   :  { %v10896_v36 = vpop.permute.xlu0 %5410 }
0x2428   :  { %14668 = vst [vmem:[#allocation420_spill] sm:$0xff] %v10896_v36 }
0x242b   :  { %v5441_v18 = vpop.permute.xlu0 %5440 }
0x242c   :  { %v5447_v43 = vmul.f32 %v10506_v0, %v5441_v18  ;;  %v5449_v9 = vmul.f32 %v10509_v55, %v5441_v18  ;;  %v5451_v53 = vmul.f32 %v10400_v51, %v5441_v18 }
0x242e   :  { %v5459_v11 = vrot.slane %v5447_v43, 1  ;;  %v5460_v63 = vrot.slane %v5449_v9, 1  ;;  %v5465_v1 = vrot.slane %v5451_v53, 1 }
0x2430   :  { %v5461_v44 = vsel %vm164_vm8, %v5459_v11, %v5460_v63  ;;  %v5466_v32 = vsel %vm164_vm8, %v5460_v63, %v5465_v1 }
0x2431   :  { %5469 = vrot.lane.b32.xlu0 %v5461_v44, %s8007_s29 }
0x2435   :  { %5473 = vrot.lane.b32.xlu0 %v5466_v32, %s8007_s29 }
0x2439   :  { %5477 = vrot.lane.b32.xlu0 %v5465_v1, %s8007_s29 }
0x243d   :  { %5507 = vrot.lane.b32.xlu0 %v5502_v40, %s7995_s16 }
0x2464   :  { %v10911_v9 = vpop.permute.xlu1 %5404 }
0x2465   :  { %14669 = vst [vmem:[#allocation421_spill] sm:$0xff] %v10911_v9 }
0x2468   :  { %v10913_v43 = vpop.permute.xlu1 %5408 }
0x2469   :  { %14670 = vst [vmem:[#allocation422_spill] sm:$0xff] %v10913_v43 }
0x246c   :  { %v10915_v53 = vpop.permute.xlu1 %5412 }
0x246d   :  { %14671 = vst [vmem:[#allocation423_spill] sm:$0xff] %v10915_v53 }
0x2470   :  { %v5443_v11 = vpop.permute.xlu1 %5442 }
0x2471   :  { %v5444_v63 = vsel %vm4867_vm4, %v5441_v18, %v5443_v11  ;;  %v5506_v18 = vrot.slane %v7851_v47, %v8069_v13 }
0x2472   :  { %v5448_v44 = vmul.f32 %v10530_v46, %v5444_v63  ;;  %v5450_v32 = vmul.f32 %v10533_v48, %v5444_v63  ;;  %v5452_v36 = vmul.f32 %v10422_v45, %v5444_v63 }
0x2474   :  { %v5462_v1 = vrot.slane %v5448_v44, 1  ;;  %v5463_v49 = vrot.slane %v5450_v32, 1  ;;  %v5467_v54 = vrot.slane %v5452_v36, 1 }
0x2476   :  { %v5464_v40 = vsel %vm164_vm8, %v5462_v1, %v5463_v49  ;;  %v5468_v43 = vsel %vm164_vm8, %v5463_v49, %v5467_v54 }
0x2477   :  { %5471 = vrot.lane.b32.xlu1 %v5464_v40, %s8007_s29 }
0x247b   :  { %5475 = vrot.lane.b32.xlu1 %v5468_v43, %s8007_s29 }
0x247f   :  { %5479 = vrot.lane.b32.xlu1 %v5467_v54, %s8007_s29 }
0x2483   :  { %5509 = vrot.lane.b32.xlu1 %v5506_v18, %s7995_s16 }
0x24a3   :  { %v10928_v11 = vpop.permute.xlu0 %5469 }
0x24a4   :  { %14672 = vst [vmem:[#allocation424_spill] sm:$0xff] %v10928_v11 }
0x24a7   :  { %v10930_v63 = vpop.permute.xlu0 %5473 }
0x24a8   :  { %14673 = vst [vmem:[#allocation425_spill] sm:$0xff] %v10930_v63  ;;  %v7852_v63 = vld [vmem:[%s13917_s0 + $0x10] ss:$8 sm:$0x3] }
0x24a9   :  { %v5569_v11 = vrot.slane %v7852_v63, %v8071_v14 }
0x24ab   :  { %v10932_v44 = vpop.permute.xlu0 %5477 }
0x24ac   :  { %14674 = vst [vmem:[#allocation426_spill] sm:$0xff] %v10932_v44 }
0x24af   :  { %v5508_v36 = vpop.permute.xlu0 %5507 }
0x24b0   :  { %v5514_v32 = vmul.f32 %v10506_v0, %v5508_v36  ;;  %v5516_v1 = vmul.f32 %v10509_v55, %v5508_v36  ;;  %v5518_v49 = vmul.f32 %v10400_v51, %v5508_v36 }
0x24b2   :  { %v5526_v43 = vrot.slane %v5514_v32, 2  ;;  %v5527_v40 = vrot.slane %v5516_v1, 2  ;;  %v5532_v47 = vrot.slane %v5518_v49, 2 }
0x24b4   :  { %v5528_v54 = vsel %vm212_vm9, %v5526_v43, %v5527_v40  ;;  %v5533_v18 = vsel %vm212_vm9, %v5527_v40, %v5532_v47 }
0x24b5   :  { %5536 = vrot.lane.b32.xlu0 %v5528_v54, %s8007_s29 }
0x24b9   :  { %5540 = vrot.lane.b32.xlu0 %v5533_v18, %s8007_s29 }
0x24bd   :  { %5544 = vrot.lane.b32.xlu0 %v5532_v47, %s8007_s29 }
0x24c1   :  { %5574 = vrot.lane.b32.xlu0 %v5569_v11, %s8008_s24 }
0x24e9   :  { %v10947_v51 = vpop.permute.xlu1 %5471 }
0x24ea   :  { %14675 = vst [vmem:[#allocation427_spill] sm:$0xff] %v10947_v51 }
0x24ed   :  { %v10949_v32 = vpop.permute.xlu1 %5475 }
0x24ee   :  { %14676 = vst [vmem:[#allocation428_spill] sm:$0xff] %v10949_v32 }
0x24f1   :  { %v10951_v1 = vpop.permute.xlu1 %5479 }
0x24f2   :  { %14677 = vst [vmem:[#allocation429_spill] sm:$0xff] %v10951_v1 }
0x24f5   :  { %v5510_v49 = vpop.permute.xlu1 %5509 }
0x24f6   :  { %v5511_v43 = vsel %vm4867_vm4, %v5508_v36, %v5510_v49  ;;  %v5573_v36 = vrot.slane %v7852_v63, %v8069_v13  ;;  %v7853_v63 = vld [vmem:[%s13917_s0 + $0x23] ss:$8 sm:$0x3]  ;;  %vm4895_vm4 = vcmask 990208  }
0x24f7   :  { %v5515_v40 = vmul.f32 %v10530_v46, %v5511_v43  ;;  %v5517_v54 = vmul.f32 %v10533_v48, %v5511_v43  ;;  %v5519_v47 = vmul.f32 %v10422_v45, %v5511_v43 }
0x24f9   :  { %v5529_v18 = vrot.slane %v5515_v40, 2  ;;  %v5530_v9 = vrot.slane %v5517_v54, 2  ;;  %v5534_v44 = vrot.slane %v5519_v47, 2  ;;  %v10970_v54 = vld [vmem:[#allocation2] sm:$0xff] }
0x24fb   :  { %v5531_v11 = vsel %vm212_vm9, %v5529_v18, %v5530_v9  ;;  %v5535_v32 = vsel %vm212_vm9, %v5530_v9, %v5534_v44 }
0x24fc   :  { %5538 = vrot.lane.b32.xlu1 %v5531_v11, %s8007_s29 }
0x2500   :  { %5542 = vrot.lane.b32.xlu1 %v5535_v32, %s8007_s29  ;;  %v5628_v32 = vrot.slane %v7853_v63, %v8071_v14 }
0x2504   :  { %5546 = vrot.lane.b32.xlu1 %v5534_v44, %s8007_s29 }
0x2508   :  { %5576 = vrot.lane.b32.xlu1 %v5573_v36, %s8008_s24 }
0x2527   :  { %v10964_v49 = vpop.permute.xlu0 %5536 }
0x2528   :  { %14678 = vst [vmem:[#allocation430_spill] sm:$0xff] %v10964_v49 }
0x252b   :  { %v10966_v45 = vpop.permute.xlu0 %5540 }
0x252c   :  { %14679 = vst [vmem:[#allocation431_spill] sm:$0xff] %v10966_v45  ;;  %v10990_v45 = vld [vmem:[#allocation2 + $0x8] sm:$0xff] }
0x252f   :  { %v10968_v43 = vpop.permute.xlu0 %5544 }
0x2530   :  { %14680 = vst [vmem:[#allocation432_spill] sm:$0xff] %v10968_v43 }
0x2533   :  { %v5575_v40 = vpop.permute.xlu0 %5574 }
0x2534   :  { %v5582_v47 = vmul.f32 %v10970_v54, %v5575_v40  ;;  %v5584_v9 = vmul.f32 %v10506_v0, %v5575_v40  ;;  %v5586_v44 = vmul.f32 %v10509_v55, %v5575_v40 }
0x2536   :  { %5594 = vrot.lane.b32.xlu0 %v5582_v47, %s8009_s25 }
0x253a   :  { %5598 = vrot.lane.b32.xlu0 %v5584_v9, %s8009_s25 }
0x253e   :  { %5602 = vrot.lane.b32.xlu0 %v5586_v44, %s8009_s25 }
0x2542   :  { %5633 = vrot.lane.b32.xlu0 %v5628_v32, %s8008_s24 }
0x256e   :  { %v10983_v18 = vpop.permute.xlu1 %5538 }
0x256f   :  { %14681 = vst [vmem:[#allocation433_spill] sm:$0xff] %v10983_v18 }
0x2572   :  { %v10985_v11 = vpop.permute.xlu1 %5542 }
0x2573   :  { %14682 = vst [vmem:[#allocation434_spill] sm:$0xff] %v10985_v11  ;;  %v5632_v11 = vrot.slane %v7853_v63, %v8069_v13 }
0x2576   :  { %v10987_v36 = vpop.permute.xlu1 %5546 }
0x2577   :  { %14683 = vst [vmem:[#allocation435_spill] sm:$0xff] %v10987_v36 }
0x257a   :  { %v5577_v47 = vpop.permute.xlu1 %5576 }
0x257b   :  { %v5579_v9 = vsel %vm5578_vm5, %v5575_v40, %v5577_v47 }
0x257c   :  { %v5583_v49 = vmul.f32 %v10990_v45, %v5579_v9  ;;  %v5585_v44 = vmul.f32 %v10530_v46, %v5579_v9  ;;  %v5587_v32 = vmul.f32 %v10533_v48, %v5579_v9 }
0x257e   :  { %5596 = vrot.lane.b32.xlu1 %v5583_v49, %s8009_s25 }
0x2582   :  { %5600 = vrot.lane.b32.xlu1 %v5585_v44, %s8009_s25 }
0x2586   :  { %5604 = vrot.lane.b32.xlu1 %v5587_v32, %s8009_s25 }
0x258a   :  { %5635 = vrot.lane.b32.xlu1 %v5632_v11, %s8008_s24 }
0x25a8   :  { %v11000_v18 = vpop.permute.xlu0 %5594 }
0x25a9   :  { %14684 = vst [vmem:[#allocation436_spill] sm:$0xff] %v11000_v18 }
0x25ac   :  { %v11002_v40 = vpop.permute.xlu0 %5598 }
0x25ad   :  { %14685 = vst [vmem:[#allocation437_spill] sm:$0xff] %v11002_v40  ;;  %v7854_v40 = vld [vmem:[%s13917_s0 + $0x36] ss:$8 sm:$0x3] }
0x25ae   :  { %v5695_v18 = vrot.slane %v7854_v40, %v8071_v14 }
0x25b0   :  { %v11004_v47 = vpop.permute.xlu0 %5602 }
0x25b1   :  { %14686 = vst [vmem:[#allocation438_spill] sm:$0xff] %v11004_v47 }
0x25b4   :  { %v5634_v51 = vpop.permute.xlu0 %5633 }
0x25b5   :  { %v5640_v49 = vmul.f32 %v10970_v54, %v5634_v51  ;;  %v5642_v43 = vmul.f32 %v10506_v0, %v5634_v51  ;;  %v5644_v44 = vmul.f32 %v10509_v55, %v5634_v51 }
0x25b7   :  { %v5652_v9 = vrot.slane %v5640_v49, 1  ;;  %v5653_v36 = vrot.slane %v5642_v43, 1  ;;  %v5658_v63 = vrot.slane %v5644_v44, 1 }
0x25b9   :  { %v5654_v32 = vsel %vm164_vm8, %v5652_v9, %v5653_v36  ;;  %v5659_v11 = vsel %vm164_vm8, %v5653_v36, %v5658_v63 }
0x25ba   :  { %5662 = vrot.lane.b32.xlu0 %v5654_v32, %s8009_s25 }
0x25be   :  { %5666 = vrot.lane.b32.xlu0 %v5659_v11, %s8009_s25 }
0x25c2   :  { %5670 = vrot.lane.b32.xlu0 %v5658_v63, %s8009_s25 }
0x25c6   :  { %5700 = vrot.lane.b32.xlu0 %v5695_v18, %s8008_s24 }
0x25f0   :  { %v11019_v43 = vpop.permute.xlu1 %5596 }
0x25f1   :  { %14687 = vst [vmem:[#allocation439_spill] sm:$0xff] %v11019_v43 }
0x25f4   :  { %v11021_v49 = vpop.permute.xlu1 %5600 }
0x25f5   :  { %14688 = vst [vmem:[#allocation440_spill] sm:$0xff] %v11021_v49 }
0x25f8   :  { %v11023_v44 = vpop.permute.xlu1 %5604 }
0x25f9   :  { %14689 = vst [vmem:[#allocation441_spill] sm:$0xff] %v11023_v44 }
0x25fc   :  { %v5636_v9 = vpop.permute.xlu1 %5635 }
0x25fd   :  { %v5637_v36 = vsel %vm5578_vm5, %v5634_v51, %v5636_v9  ;;  %v5699_v51 = vrot.slane %v7854_v40, %v8069_v13 }
0x25fe   :  { %v5641_v32 = vmul.f32 %v10990_v45, %v5637_v36  ;;  %v5643_v11 = vmul.f32 %v10530_v46, %v5637_v36  ;;  %v5645_v47 = vmul.f32 %v10533_v48, %v5637_v36 }
0x2600   :  { %v5655_v63 = vrot.slane %v5641_v32, 1  ;;  %v5656_v1 = vrot.slane %v5643_v11, 1  ;;  %v5660_v53 = vrot.slane %v5645_v47, 1 }
0x2602   :  { %v5657_v18 = vsel %vm164_vm8, %v5655_v63, %v5656_v1  ;;  %v5661_v49 = vsel %vm164_vm8, %v5656_v1, %v5660_v53 }
0x2603   :  { %5664 = vrot.lane.b32.xlu1 %v5657_v18, %s8009_s25 }
0x2607   :  { %5668 = vrot.lane.b32.xlu1 %v5661_v49, %s8009_s25 }
0x260b   :  { %5672 = vrot.lane.b32.xlu1 %v5660_v53, %s8009_s25 }
0x260f   :  { %5702 = vrot.lane.b32.xlu1 %v5699_v51, %s8008_s24 }
0x262c   :  { %v11036_v9 = vpop.permute.xlu0 %5662 }
0x262d   :  { %14690 = vst [vmem:[#allocation442_spill] sm:$0xff] %v11036_v9 }
0x2630   :  { %v11038_v36 = vpop.permute.xlu0 %5666 }
0x2631   :  { %14691 = vst [vmem:[#allocation443_spill] sm:$0xff] %v11038_v36  ;;  %v7855_v36 = vld [vmem:[%s13917_s0 + $0x51] ss:$8 sm:$0x3] }
0x2634   :  { %v11040_v32 = vpop.permute.xlu0 %5670 }
0x2635   :  { %14692 = vst [vmem:[#allocation444_spill] sm:$0xff] %v11040_v32 }
0x2638   :  { %v5701_v47 = vpop.permute.xlu0 %5700 }
0x2639   :  { %v5707_v11 = vmul.f32 %v10970_v54, %v5701_v47  ;;  %v5709_v63 = vmul.f32 %v10506_v0, %v5701_v47  ;;  %v5711_v1 = vmul.f32 %v10509_v55, %v5701_v47  ;;  %v5762_v0 = vrot.slane %v7855_v36, %v8071_v14 }
0x263b   :  { %v5719_v49 = vrot.slane %v5707_v11, 2  ;;  %v5720_v18 = vrot.slane %v5709_v63, 2  ;;  %v5725_v40 = vrot.slane %v5711_v1, 2 }
0x263d   :  { %v5721_v53 = vsel %vm212_vm9, %v5719_v49, %v5720_v18  ;;  %v5726_v51 = vsel %vm212_vm9, %v5720_v18, %v5725_v40 }
0x263e   :  { %5729 = vrot.lane.b32.xlu0 %v5721_v53, %s8009_s25 }
0x2642   :  { %5733 = vrot.lane.b32.xlu0 %v5726_v51, %s8009_s25 }
0x2646   :  { %5737 = vrot.lane.b32.xlu0 %v5725_v40, %s8009_s25 }
0x264a   :  { %5767 = vrot.lane.b32.xlu0 %v5762_v0, %s8008_s24 }
0x2675   :  { %v11055_v55 = vpop.permute.xlu1 %5664 }
0x2676   :  { %14693 = vst [vmem:[#allocation445_spill] sm:$0xff] %v11055_v55 }
0x2679   :  { %v11057_v11 = vpop.permute.xlu1 %5668 }
0x267a   :  { %14694 = vst [vmem:[#allocation446_spill] sm:$0xff] %v11057_v11 }
0x267d   :  { %v11059_v63 = vpop.permute.xlu1 %5672 }
0x267e   :  { %14695 = vst [vmem:[#allocation447_spill] sm:$0xff] %v11059_v63 }
0x2681   :  { %v5703_v1 = vpop.permute.xlu1 %5702 }
0x2682   :  { %v5704_v49 = vsel %vm5578_vm5, %v5701_v47, %v5703_v1  ;;  %v5766_v47 = vrot.slane %v7855_v36, %v8069_v13 }
0x2683   :  { %v5708_v18 = vmul.f32 %v10990_v45, %v5704_v49  ;;  %v5710_v53 = vmul.f32 %v10530_v46, %v5704_v49  ;;  %v5712_v51 = vmul.f32 %v10533_v48, %v5704_v49 }
0x2685   :  { %v5722_v40 = vrot.slane %v5708_v18, 2  ;;  %v5723_v9 = vrot.slane %v5710_v53, 2  ;;  %v5727_v43 = vrot.slane %v5712_v51, 2  ;;  %v11079_v53 = vld [vmem:[#allocation2 + $0x10] sm:$0xff] }
0x2687   :  { %v5724_v0 = vsel %vm212_vm9, %v5722_v40, %v5723_v9  ;;  %v5728_v11 = vsel %vm212_vm9, %v5723_v9, %v5727_v43 }
0x2688   :  { %5731 = vrot.lane.b32.xlu1 %v5724_v0, %s8009_s25 }
0x268c   :  { %5735 = vrot.lane.b32.xlu1 %v5728_v11, %s8009_s25  ;;  %v11082_v11 = vld [vmem:[#allocation2 + $0x20] sm:$0xff] }
0x2690   :  { %5739 = vrot.lane.b32.xlu1 %v5727_v43, %s8009_s25 }
0x2694   :  { %5769 = vrot.lane.b32.xlu1 %v5766_v47, %s8008_s24 }
0x26b0   :  { %v11072_v46 = vpop.permute.xlu0 %5729 }
0x26b1   :  { %14696 = vst [vmem:[#allocation448_spill] sm:$0xff] %v11072_v46 }
0x26b4   :  { %v11074_v48 = vpop.permute.xlu0 %5733 }
0x26b5   :  { %14697 = vst [vmem:[#allocation449_spill] sm:$0xff] %v11074_v48  ;;  %v7856_v48 = vld [vmem:[%s13917_s0 + $0x64] ss:$8 sm:$0x3] }
0x26b6   :  { %v5829_v46 = vrot.slane %v7856_v48, %v8071_v14 }
0x26b8   :  { %v11076_v1 = vpop.permute.xlu0 %5737 }
0x26b9   :  { %14698 = vst [vmem:[#allocation450_spill] sm:$0xff] %v11076_v1 }
0x26bc   :  { %v5768_v49 = vpop.permute.xlu0 %5767 }
0x26bd   :  { %v5774_v18 = vmul.f32 %v10970_v54, %v5768_v49  ;;  %v5776_v9 = vmul.f32 %v11079_v53, %v5768_v49  ;;  %v5778_v43 = vmul.f32 %v11082_v11, %v5768_v49 }
0x26bf   :  { %v5786_v36 = vrot.slane %v5774_v18, 3  ;;  %v5787_v51 = vrot.slane %v5776_v9, 3  ;;  %v5792_v0 = vrot.slane %v5778_v43, 3 }
0x26c1   :  { %v5788_v40 = vsel %vm260_vm10, %v5786_v36, %v5787_v51  ;;  %v5793_v47 = vsel %vm260_vm10, %v5787_v51, %v5792_v0 }
0x26c2   :  { %5796 = vrot.lane.b32.xlu0 %v5788_v40, %s8009_s25 }
0x26c6   :  { %5800 = vrot.lane.b32.xlu0 %v5793_v47, %s8009_s25  ;;  %v11103_v47 = vld [vmem:[#allocation2 + $0x18] sm:$0xff] }
0x26ca   :  { %5804 = vrot.lane.b32.xlu0 %v5792_v0, %s8009_s25  ;;  %v11106_v0 = vld [vmem:[#allocation2 + $0x28] sm:$0xff] }
0x26ce   :  { %5834 = vrot.lane.b32.xlu0 %v5829_v46, %s8008_s24 }
0x26fa   :  { %v11095_v18 = vpop.permute.xlu1 %5731 }
0x26fb   :  { %14699 = vst [vmem:[#allocation451_spill] sm:$0xff] %v11095_v18 }
0x26fe   :  { %v11097_v9 = vpop.permute.xlu1 %5735 }
0x26ff   :  { %14700 = vst [vmem:[#allocation452_spill] sm:$0xff] %v11097_v9 }
0x2702   :  { %v11099_v43 = vpop.permute.xlu1 %5739 }
0x2703   :  { %14701 = vst [vmem:[#allocation453_spill] sm:$0xff] %v11099_v43 }
0x2706   :  { %v5770_v36 = vpop.permute.xlu1 %5769 }
0x2707   :  { %v5771_v51 = vsel %vm5578_vm5, %v5768_v49, %v5770_v36  ;;  %v5833_v49 = vrot.slane %v7856_v48, %v8069_v13 }
0x2708   :  { %v5775_v40 = vmul.f32 %v10990_v45, %v5771_v51  ;;  %v5777_v55 = vmul.f32 %v11103_v47, %v5771_v51  ;;  %v5779_v1 = vmul.f32 %v11106_v0, %v5771_v51 }
0x270a   :  { %v5789_v46 = vrot.slane %v5775_v40, 3  ;;  %v5790_v32 = vrot.slane %v5777_v55, 3  ;;  %v5794_v18 = vrot.slane %v5779_v1, 3 }
0x270c   :  { %v5791_v9 = vsel %vm260_vm10, %v5789_v46, %v5790_v32  ;;  %v5795_v43 = vsel %vm260_vm10, %v5790_v32, %v5794_v18 }
0x270d   :  { %5798 = vrot.lane.b32.xlu1 %v5791_v9, %s8009_s25 }
0x2711   :  { %5802 = vrot.lane.b32.xlu1 %v5795_v43, %s8009_s25 }
0x2715   :  { %5806 = vrot.lane.b32.xlu1 %v5794_v18, %s8009_s25 }
0x2719   :  { %5836 = vrot.lane.b32.xlu1 %v5833_v49, %s8008_s24 }
0x2734   :  { %v11116_v36 = vpop.permute.xlu0 %5796 }
0x2735   :  { %14702 = vst [vmem:[#allocation454_spill] sm:$0xff] %v11116_v36 }
0x2738   :  { %v11118_v51 = vpop.permute.xlu0 %5800 }
0x2739   :  { %14703 = vst [vmem:[#allocation455_spill] sm:$0xff] %v11118_v51  ;;  %v7857_v51 = vld [vmem:[%s13917_s0 + $0x77] ss:$8 sm:$0x3] }
0x273a   :  { %v5896_v36 = vrot.slane %v7857_v51, %v8071_v14 }
0x273c   :  { %v11120_v55 = vpop.permute.xlu0 %5804 }
0x273d   :  { %14704 = vst [vmem:[#allocation456_spill] sm:$0xff] %v11120_v55 }
0x2740   :  { %v5835_v1 = vpop.permute.xlu0 %5834 }
0x2741   :  { %v5841_v40 = vmul.f32 %v10970_v54, %v5835_v1  ;;  %v5843_v9 = vmul.f32 %v11079_v53, %v5835_v1  ;;  %v5845_v32 = vmul.f32 %v11082_v11, %v5835_v1 }
0x2743   :  { %v5853_v43 = vrot.slane %v5841_v40, 4  ;;  %v5854_v46 = vrot.slane %v5843_v9, 4  ;;  %v5859_v48 = vrot.slane %v5845_v32, 4 }
0x2745   :  { %v5855_v18 = vsel %vm308_vm11, %v5853_v43, %v5854_v46  ;;  %v5860_v49 = vsel %vm308_vm11, %v5854_v46, %v5859_v48 }
0x2746   :  { %5863 = vrot.lane.b32.xlu0 %v5855_v18, %s8009_s25 }
0x274a   :  { %5867 = vrot.lane.b32.xlu0 %v5860_v49, %s8009_s25 }
0x274e   :  { %5871 = vrot.lane.b32.xlu0 %v5859_v48, %s8009_s25 }
0x2752   :  { %5901 = vrot.lane.b32.xlu0 %v5896_v36, %s8008_s24 }
0x277f   :  { %v11135_v40 = vpop.permute.xlu1 %5798 }
0x2780   :  { %14705 = vst [vmem:[#allocation457_spill] sm:$0xff] %v11135_v40 }
0x2783   :  { %v11137_v9 = vpop.permute.xlu1 %5802 }
0x2784   :  { %14706 = vst [vmem:[#allocation458_spill] sm:$0xff] %v11137_v9 }
0x2787   :  { %v11139_v32 = vpop.permute.xlu1 %5806 }
0x2788   :  { %14707 = vst [vmem:[#allocation459_spill] sm:$0xff] %v11139_v32 }
0x278b   :  { %v5837_v43 = vpop.permute.xlu1 %5836 }
0x278c   :  { %v5838_v46 = vsel %vm5578_vm5, %v5835_v1, %v5837_v43  ;;  %v5900_v1 = vrot.slane %v7857_v51, %v8069_v13  ;;  %v7858_v51 = vld [vmem:[%s13917_s0 + $0x92] ss:$8 sm:$0x3] }
0x278d   :  { %v5842_v18 = vmul.f32 %v10990_v45, %v5838_v46  ;;  %v5844_v49 = vmul.f32 %v11103_v47, %v5838_v46  ;;  %v5846_v55 = vmul.f32 %v11106_v0, %v5838_v46 }
0x278f   :  { %v5856_v48 = vrot.slane %v5842_v18, 4  ;;  %v5857_v63 = vrot.slane %v5844_v49, 4  ;;  %v5861_v44 = vrot.slane %v5846_v55, 4 }
0x2791   :  { %v5858_v36 = vsel %vm308_vm11, %v5856_v48, %v5857_v63  ;;  %v5862_v9 = vsel %vm308_vm11, %v5857_v63, %v5861_v44 }
0x2792   :  { %5865 = vrot.lane.b32.xlu1 %v5858_v36, %s8009_s25 }
0x2796   :  { %5869 = vrot.lane.b32.xlu1 %v5862_v9, %s8009_s25  ;;  %v5955_v9 = vrot.slane %v7858_v51, %v8071_v14 }
0x279a   :  { %5873 = vrot.lane.b32.xlu1 %v5861_v44, %s8009_s25 }
0x279e   :  { %5903 = vrot.lane.b32.xlu1 %v5900_v1, %s8008_s24 }
0x27b8   :  { %v11152_v43 = vpop.permute.xlu0 %5863 }
0x27b9   :  { %14708 = vst [vmem:[#allocation460_spill] sm:$0xff] %v11152_v43 }
0x27bc   :  { %v11154_v46 = vpop.permute.xlu0 %5867 }
0x27bd   :  { %14709 = vst [vmem:[#allocation461_spill] sm:$0xff] %v11154_v46 }
0x27c0   :  { %v11156_v18 = vpop.permute.xlu0 %5871 }
0x27c1   :  { %14710 = vst [vmem:[#allocation462_spill] sm:$0xff] %v11156_v18 }
0x27c4   :  { %v5902_v55 = vpop.permute.xlu0 %5901 }
0x27c5   :  { %v5908_v49 = vmul.f32 %v11079_v53, %v5902_v55  ;;  %v5910_v48 = vmul.f32 %v11082_v11, %v5902_v55 }
0x27c7   :  { %v5916_v63 = vrot.slane %v5908_v49, 5  ;;  %v5918_v36 = vrot.slane %v5910_v48, 5 }
0x27c9   :  { %5922 = vrot.lane.b32.xlu0 %v5916_v63, %s8009_s25  ;;  %v5919_v44 = vsel %vm352_vm12, %v5916_v63, %v5918_v36 }
0x27cd   :  { %5926 = vrot.lane.b32.xlu0 %v5919_v44, %s8009_s25 }
0x27d1   :  { %5930 = vrot.lane.b32.xlu0 %v5918_v36, %s8009_s25 }
0x27d5   :  { %5960 = vrot.lane.b32.xlu0 %v5955_v9, %s8008_s24  ;;  %v5959_v9 = vrot.slane %v7858_v51, %v8069_v13 }
0x2804   :  { %v11169_v1 = vpop.permute.xlu1 %5865 }
0x2805   :  { %14711 = vst [vmem:[#allocation463_spill] sm:$0xff] %v11169_v1 }
0x2808   :  { %v11171_v49 = vpop.permute.xlu1 %5869 }
0x2809   :  { %14712 = vst [vmem:[#allocation464_spill] sm:$0xff] %v11171_v49 }
0x280c   :  { %v11173_v48 = vpop.permute.xlu1 %5873 }
0x280d   :  { %14713 = vst [vmem:[#allocation465_spill] sm:$0xff] %v11173_v48 }
0x2810   :  { %v5904_v46 = vpop.permute.xlu1 %5903 }
0x2811   :  { %v5905_v63 = vsel %vm5578_vm5, %v5902_v55, %v5904_v46 }
0x2812   :  { %v5909_v44 = vmul.f32 %v11103_v47, %v5905_v63  ;;  %v5911_v43 = vmul.f32 %v11106_v0, %v5905_v63 }
0x2814   :  { %v5917_v40 = vrot.slane %v5909_v44, 5  ;;  %v5920_v18 = vrot.slane %v5911_v43, 5 }
0x2816   :  { %5924 = vrot.lane.b32.xlu1 %v5917_v40, %s8009_s25  ;;  %v5921_v36 = vsel %vm352_vm12, %v5917_v40, %v5920_v18 }
0x281a   :  { %5928 = vrot.lane.b32.xlu1 %v5921_v36, %s8009_s25 }
0x281e   :  { %5932 = vrot.lane.b32.xlu1 %v5920_v18, %s8009_s25 }
0x2822   :  { %5962 = vrot.lane.b32.xlu1 %v5959_v9, %s8008_s24  ;;  %v7859_v9 = vld [vmem:[%s13917_s0 + $0xa5] ss:$8 sm:$0x3] }
0x283b   :  { %v11184_v49 = vpop.permute.xlu0 %5922 }
0x283c   :  { %14714 = vst [vmem:[#allocation466_spill] sm:$0xff] %v11184_v49 }
0x283f   :  { %v11186_v46 = vpop.permute.xlu0 %5926 }
0x2840   :  { %14715 = vst [vmem:[#allocation467_spill] sm:$0xff] %v11186_v46 }
0x2843   :  { %v11188_v55 = vpop.permute.xlu0 %5930 }
0x2844   :  { %14716 = vst [vmem:[#allocation468_spill] sm:$0xff] %v11188_v55 }
0x2847   :  { %v5961_v63 = vpop.permute.xlu0 %5960 }
0x2848   :  { %v5967_v43 = vmul.f32 %v11079_v53, %v5961_v63  ;;  %v5969_v44 = vmul.f32 %v11082_v11, %v5961_v63  ;;  %v5971_v36 = vmul.f32 %v10970_v54, %v5961_v63 }
0x284a   :  { %v5979_v40 = vrot.slane %v5967_v43, 6  ;;  %v5981_v1 = vrot.slane %v5969_v44, 6  ;;  %v5985_v51 = vrot.slane %v5971_v36, 6  ;;  %v6022_v43 = vrot.slane %v7859_v9, %v8071_v14 }
0x284c   :  { %5989 = vrot.lane.b32.xlu0 %v5979_v40, %s8009_s25  ;;  %v5982_v18 = vsel %vm396_vm13, %v5979_v40, %v5981_v1  ;;  %v5986_v46 = vsel %vm396_vm13, %v5981_v1, %v5985_v51  ;;  %v11212_v51 = vld [vmem:[#allocation2 + $0x38] sm:$0xff] }
0x2850   :  { %5993 = vrot.lane.b32.xlu0 %v5982_v18, %s8009_s25 }
0x2854   :  { %5997 = vrot.lane.b32.xlu0 %v5986_v46, %s8009_s25 }
0x2858   :  { %6027 = vrot.lane.b32.xlu0 %v6022_v43, %s8008_s24 }
0x2888   :  { %v11203_v44 = vpop.permute.xlu1 %5924 }
0x2889   :  { %14717 = vst [vmem:[#allocation469_spill] sm:$0xff] %v11203_v44 }
0x288c   :  { %v11205_v49 = vpop.permute.xlu1 %5928 }
0x288d   :  { %14718 = vst [vmem:[#allocation470_spill] sm:$0xff] %v11205_v49 }
0x2890   :  { %v11207_v40 = vpop.permute.xlu1 %5932 }
0x2891   :  { %14719 = vst [vmem:[#allocation471_spill] sm:$0xff] %v11207_v40 }
0x2894   :  { %v5963_v36 = vpop.permute.xlu1 %5962 }
0x2895   :  { %v5964_v18 = vsel %vm5578_vm5, %v5961_v63, %v5963_v36  ;;  %v6026_v63 = vrot.slane %v7859_v9, %v8069_v13 }
0x2896   :  { %v5968_v55 = vmul.f32 %v11103_v47, %v5964_v18  ;;  %v5970_v48 = vmul.f32 %v11106_v0, %v5964_v18  ;;  %v5972_v46 = vmul.f32 %v11212_v51, %v5964_v18 }
0x2898   :  { %v5980_v1 = vrot.slane %v5968_v55, 6  ;;  %v5983_v32 = vrot.slane %v5970_v48, 6  ;;  %v5987_v43 = vrot.slane %v5972_v46, 6 }
0x289a   :  { %5991 = vrot.lane.b32.xlu1 %v5980_v1, %s8009_s25  ;;  %v5984_v49 = vsel %vm396_vm13, %v5980_v1, %v5983_v32  ;;  %v5988_v44 = vsel %vm396_vm13, %v5983_v32, %v5987_v43  ;;  %v7860_v43 = vld [vmem:[%s13917_s0 + $0xc0] ss:$8 sm:$0x3] }
0x289e   :  { %5995 = vrot.lane.b32.xlu1 %v5984_v49, %s8009_s25 }
0x28a2   :  { %5999 = vrot.lane.b32.xlu1 %v5988_v44, %s8009_s25 }
0x28a6   :  { %6029 = vrot.lane.b32.xlu1 %v6026_v63, %s8008_s24 }
0x28be   :  { %v11222_v55 = vpop.permute.xlu0 %5989 }
0x28bf   :  { %14720 = vst [vmem:[#allocation472_spill] sm:$0xff] %v11222_v55 }
0x28c2   :  { %v11224_v36 = vpop.permute.xlu0 %5993 }
0x28c3   :  { %14721 = vst [vmem:[#allocation473_spill] sm:$0xff] %v11224_v36 }
0x28c6   :  { %v11226_v48 = vpop.permute.xlu0 %5997 }
0x28c7   :  { %14722 = vst [vmem:[#allocation474_spill] sm:$0xff] %v11226_v48 }
0x28ca   :  { %v6028_v18 = vpop.permute.xlu0 %6027 }
0x28cb   :  { %v6034_v46 = vmul.f32 %v11079_v53, %v6028_v18  ;;  %v6036_v1 = vmul.f32 %v11082_v11, %v6028_v18  ;;  %v6038_v32 = vmul.f32 %v10970_v54, %v6028_v18 }
0x28cd   :  { %v6046_v49 = vrot.slane %v6034_v46, 7  ;;  %v6048_v40 = vrot.slane %v6036_v1, 7  ;;  %v6052_v44 = vrot.slane %v6038_v32, 7  ;;  %v6089_v46 = vrot.slane %v7860_v43, %v8071_v14 }
0x28cf   :  { %6056 = vrot.lane.b32.xlu0 %v6046_v49, %s8009_s25  ;;  %v6049_v9 = vsel %vm444_vm14, %v6046_v49, %v6048_v40  ;;  %v6053_v63 = vsel %vm444_vm14, %v6048_v40, %v6052_v44 }
0x28d3   :  { %6060 = vrot.lane.b32.xlu0 %v6049_v9, %s8009_s25 }
0x28d7   :  { %6064 = vrot.lane.b32.xlu0 %v6053_v63, %s8009_s25 }
0x28db   :  { %6094 = vrot.lane.b32.xlu0 %v6089_v46, %s8008_s24 }
0x290c   :  { %v11241_v1 = vpop.permute.xlu1 %5991 }
0x290d   :  { %14723 = vst [vmem:[#allocation475_spill] sm:$0xff] %v11241_v1 }
0x2910   :  { %v11243_v36 = vpop.permute.xlu1 %5995 }
0x2911   :  { %14724 = vst [vmem:[#allocation476_spill] sm:$0xff] %v11243_v36 }
0x2914   :  { %v11245_v49 = vpop.permute.xlu1 %5999 }
0x2915   :  { %14725 = vst [vmem:[#allocation477_spill] sm:$0xff] %v11245_v49 }
0x2918   :  { %v6030_v32 = vpop.permute.xlu1 %6029 }
0x2919   :  { %v6031_v9 = vsel %vm5578_vm5, %v6028_v18, %v6030_v32  ;;  %v6093_v18 = vrot.slane %v7860_v43, %v8069_v13  ;;  %v7861_v43 = vld [vmem:[%s13917_s0 + $0xd3] ss:$8 sm:$0x3] }
0x291a   :  { %v6035_v55 = vmul.f32 %v11103_v47, %v6031_v9  ;;  %v6037_v48 = vmul.f32 %v11106_v0, %v6031_v9  ;;  %v6039_v44 = vmul.f32 %v11212_v51, %v6031_v9 }
0x291c   :  { %v6047_v40 = vrot.slane %v6035_v55, 7  ;;  %v6050_v63 = vrot.slane %v6037_v48, 7  ;;  %v6054_v46 = vrot.slane %v6039_v44, 7 }
0x291e   :  { %6058 = vrot.lane.b32.xlu1 %v6047_v40, %s8009_s25  ;;  %v6051_v1 = vsel %vm444_vm14, %v6047_v40, %v6050_v63  ;;  %v6055_v36 = vsel %vm444_vm14, %v6050_v63, %v6054_v46  ;;  %v6146_v40 = vrot.slane %v7861_v43, %v8071_v14 }
0x2922   :  { %6062 = vrot.lane.b32.xlu1 %v6051_v1, %s8009_s25 }
0x2926   :  { %6066 = vrot.lane.b32.xlu1 %v6055_v36, %s8009_s25 }
0x292a   :  { %6096 = vrot.lane.b32.xlu1 %v6093_v18, %s8008_s24 }
0x2941   :  { %v11258_v32 = vpop.permute.xlu0 %6056 }
0x2942   :  { %14726 = vst [vmem:[#allocation478_spill] sm:$0xff] %v11258_v32 }
0x2945   :  { %v11260_v55 = vpop.permute.xlu0 %6060 }
0x2946   :  { %14727 = vst [vmem:[#allocation479_spill] sm:$0xff] %v11260_v55 }
0x2949   :  { %v11262_v48 = vpop.permute.xlu0 %6064 }
0x294a   :  { %14728 = vst [vmem:[#allocation480_spill] sm:$0xff] %v11262_v48 }
0x294d   :  { %v6095_v9 = vpop.permute.xlu0 %6094 }
0x294e   :  { %v6101_v44 = vmul.f32 %v11079_v53, %v6095_v9  ;;  %v6103_v1 = vmul.f32 %v11082_v11, %v6095_v9  ;;  %v6105_v36 = vmul.f32 %v10970_v54, %v6095_v9 }
0x2950   :  { %6113 = vrot.lane.b32.xlu0 %v6101_v44, %s8009_s25 }
0x2954   :  { %6117 = vrot.lane.b32.xlu0 %v6103_v1, %s8009_s25 }
0x2958   :  { %6121 = vrot.lane.b32.xlu0 %v6105_v36, %s8009_s25 }
0x295c   :  { %6151 = vrot.lane.b32.xlu0 %v6146_v40, %s8008_s24  ;;  %v6150_v40 = vrot.slane %v7861_v43, %v8069_v13 }
0x2990   :  { %v11275_v63 = vpop.permute.xlu1 %6058 }
0x2991   :  { %14729 = vst [vmem:[#allocation481_spill] sm:$0xff] %v11275_v63 }
0x2994   :  { %v11277_v46 = vpop.permute.xlu1 %6062 }
0x2995   :  { %14730 = vst [vmem:[#allocation482_spill] sm:$0xff] %v11277_v46 }
0x2998   :  { %v11279_v18 = vpop.permute.xlu1 %6066 }
0x2999   :  { %14731 = vst [vmem:[#allocation483_spill] sm:$0xff] %v11279_v18 }
0x299c   :  { %v6097_v44 = vpop.permute.xlu1 %6096 }
0x299d   :  { %v6098_v1 = vsel %vm5578_vm5, %v6095_v9, %v6097_v44 }
0x299e   :  { %v6102_v55 = vmul.f32 %v11103_v47, %v6098_v1  ;;  %v6104_v32 = vmul.f32 %v11106_v0, %v6098_v1  ;;  %v6106_v36 = vmul.f32 %v11212_v51, %v6098_v1 }
0x29a0   :  { %6115 = vrot.lane.b32.xlu1 %v6102_v55, %s8009_s25 }
0x29a4   :  { %6119 = vrot.lane.b32.xlu1 %v6104_v32, %s8009_s25 }
0x29a8   :  { %6123 = vrot.lane.b32.xlu1 %v6106_v36, %s8009_s25 }
0x29ac   :  { %6153 = vrot.lane.b32.xlu1 %v6150_v40, %s8008_s24 }
0x29c2   :  { %v11290_v46 = vpop.permute.xlu0 %6113 }
0x29c3   :  { %14732 = vst [vmem:[#allocation484_spill] sm:$0xff] %v11290_v46 }
0x29c6   :  { %v11292_v63 = vpop.permute.xlu0 %6117 }
0x29c7   :  { %14733 = vst [vmem:[#allocation485_spill] sm:$0xff] %v11292_v63  ;;  %v7862_v63 = vld [vmem:[%s13917_s0 + $0xe6] ss:$8 sm:$0x3] }
0x29c8   :  { %v6213_v46 = vrot.slane %v7862_v63, %v8071_v14 }
0x29ca   :  { %v11294_v9 = vpop.permute.xlu0 %6121 }
0x29cb   :  { %14734 = vst [vmem:[#allocation486_spill] sm:$0xff] %v11294_v9 }
0x29ce   :  { %v6152_v44 = vpop.permute.xlu0 %6151 }
0x29cf   :  { %v6158_v55 = vmul.f32 %v11079_v53, %v6152_v44  ;;  %v6160_v48 = vmul.f32 %v11082_v11, %v6152_v44  ;;  %v6162_v32 = vmul.f32 %v10970_v54, %v6152_v44 }
0x29d1   :  { %v6170_v1 = vrot.slane %v6158_v55, 1  ;;  %v6171_v18 = vrot.slane %v6160_v48, 1  ;;  %v6176_v43 = vrot.slane %v6162_v32, 1 }
0x29d3   :  { %v6172_v36 = vsel %vm164_vm8, %v6170_v1, %v6171_v18  ;;  %v6177_v40 = vsel %vm164_vm8, %v6171_v18, %v6176_v43 }
0x29d4   :  { %6180 = vrot.lane.b32.xlu0 %v6172_v36, %s8009_s25 }
0x29d8   :  { %6184 = vrot.lane.b32.xlu0 %v6177_v40, %s8009_s25 }
0x29dc   :  { %6188 = vrot.lane.b32.xlu0 %v6176_v43, %s8009_s25 }
0x29e0   :  { %6218 = vrot.lane.b32.xlu0 %v6213_v46, %s8008_s24 }
0x2a12   :  { %v11309_v48 = vpop.permute.xlu1 %6115 }
0x2a13   :  { %14735 = vst [vmem:[#allocation487_spill] sm:$0xff] %v11309_v48 }
0x2a16   :  { %v11311_v55 = vpop.permute.xlu1 %6119 }
0x2a17   :  { %14736 = vst [vmem:[#allocation488_spill] sm:$0xff] %v11311_v55 }
0x2a1a   :  { %v11313_v32 = vpop.permute.xlu1 %6123 }
0x2a1b   :  { %14737 = vst [vmem:[#allocation489_spill] sm:$0xff] %v11313_v32 }
0x2a1e   :  { %v6154_v1 = vpop.permute.xlu1 %6153 }
0x2a1f   :  { %v6155_v18 = vsel %vm5578_vm5, %v6152_v44, %v6154_v1  ;;  %v6217_v44 = vrot.slane %v7862_v63, %v8069_v13 }
0x2a20   :  { %v6159_v36 = vmul.f32 %v11103_v47, %v6155_v18  ;;  %v6161_v40 = vmul.f32 %v11106_v0, %v6155_v18  ;;  %v6163_v9 = vmul.f32 %v11212_v51, %v6155_v18 }
0x2a22   :  { %v6173_v43 = vrot.slane %v6159_v36, 1  ;;  %v6174_v49 = vrot.slane %v6161_v40, 1  ;;  %v6178_v26 = vrot.slane %v6163_v9, 1 }
0x2a24   :  { %v6175_v46 = vsel %vm164_vm8, %v6173_v43, %v6174_v49  ;;  %v6179_v55 = vsel %vm164_vm8, %v6174_v49, %v6178_v26 }
0x2a25   :  { %6182 = vrot.lane.b32.xlu1 %v6175_v46, %s8009_s25 }
0x2a29   :  { %6186 = vrot.lane.b32.xlu1 %v6179_v55, %s8009_s25 }
0x2a2d   :  { %6190 = vrot.lane.b32.xlu1 %v6178_v26, %s8009_s25 }
0x2a31   :  { %6220 = vrot.lane.b32.xlu1 %v6217_v44, %s8008_s24 }
0x2a46   :  { %v11326_v1 = vpop.permute.xlu0 %6180 }
0x2a47   :  { %14738 = vst [vmem:[#allocation490_spill] sm:$0xff] %v11326_v1 }
0x2a4a   :  { %v11328_v18 = vpop.permute.xlu0 %6184 }
0x2a4b   :  { %14739 = vst [vmem:[#allocation491_spill] sm:$0xff] %v11328_v18  ;;  %v7863_v18 = vld [vmem:[%s13917_s0 + $0x11] ss:$8 sm:$0x3] }
0x2a4c   :  { %v6280_v1 = vrot.slane %v7863_v18, %v8071_v14 }
0x2a4e   :  { %v11330_v36 = vpop.permute.xlu0 %6188 }
0x2a4f   :  { %14740 = vst [vmem:[#allocation492_spill] sm:$0xff] %v11330_v36 }
0x2a52   :  { %v6219_v9 = vpop.permute.xlu0 %6218 }
0x2a53   :  { %v6225_v40 = vmul.f32 %v11079_v53, %v6219_v9  ;;  %v6227_v43 = vmul.f32 %v11082_v11, %v6219_v9  ;;  %v6229_v49 = vmul.f32 %v10970_v54, %v6219_v9 }
0x2a55   :  { %v6237_v55 = vrot.slane %v6225_v40, 2  ;;  %v6238_v46 = vrot.slane %v6227_v43, 2  ;;  %v6243_v63 = vrot.slane %v6229_v49, 2 }
0x2a57   :  { %v6239_v26 = vsel %vm212_vm9, %v6237_v55, %v6238_v46  ;;  %v6244_v44 = vsel %vm212_vm9, %v6238_v46, %v6243_v63 }
0x2a58   :  { %6247 = vrot.lane.b32.xlu0 %v6239_v26, %s8009_s25 }
0x2a5c   :  { %6251 = vrot.lane.b32.xlu0 %v6244_v44, %s8009_s25 }
0x2a60   :  { %6255 = vrot.lane.b32.xlu0 %v6243_v63, %s8009_s25 }
0x2a64   :  { %6285 = vrot.lane.b32.xlu0 %v6280_v1, %s8010_s21 }
0x2a97   :  { %v11345_v40 = vpop.permute.xlu1 %6182 }
0x2a98   :  { %14741 = vst [vmem:[#allocation493_spill] sm:$0xff] %v11345_v40 }
0x2a9b   :  { %v11347_v43 = vpop.permute.xlu1 %6186 }
0x2a9c   :  { %14742 = vst [vmem:[#allocation494_spill] sm:$0xff] %v11347_v43 }
0x2a9f   :  { %v11349_v49 = vpop.permute.xlu1 %6190 }
0x2aa0   :  { %14743 = vst [vmem:[#allocation495_spill] sm:$0xff] %v11349_v49 }
0x2aa3   :  { %v6221_v55 = vpop.permute.xlu1 %6220 }
0x2aa4   :  { %v6222_v46 = vsel %vm5578_vm5, %v6219_v9, %v6221_v55  ;;  %v6284_v9 = vrot.slane %v7863_v18, %v8069_v13  ;;  %vm5606_vm5 = vcmask 982016  }
0x2aa5   :  { %v6226_v26 = vmul.f32 %v11103_v47, %v6222_v46  ;;  %v6228_v44 = vmul.f32 %v11106_v0, %v6222_v46  ;;  %v6230_v63 = vmul.f32 %v11212_v51, %v6222_v46 }
0x2aa7   :  { %v6240_v48 = vrot.slane %v6226_v26, 2  ;;  %v6241_v36 = vrot.slane %v6228_v44, 2  ;;  %v6245_v32 = vrot.slane %v6230_v63, 2 }
0x2aa9   :  { %v6242_v1 = vsel %vm212_vm9, %v6240_v48, %v6241_v36  ;;  %v6246_v43 = vsel %vm212_vm9, %v6241_v36, %v6245_v32 }
0x2aaa   :  { %6249 = vrot.lane.b32.xlu1 %v6242_v1, %s8009_s25 }
0x2aae   :  { %6253 = vrot.lane.b32.xlu1 %v6246_v43, %s8009_s25 }
0x2ab2   :  { %6257 = vrot.lane.b32.xlu1 %v6245_v32, %s8009_s25  ;;  %v7864_v32 = vld [vmem:[%s13917_s0 + $0x24] ss:$8 sm:$0x3] }
0x2ab3   :  { %v6339_v43 = vrot.slane %v7864_v32, %v8071_v14 }
0x2ab6   :  { %6287 = vrot.lane.b32.xlu1 %v6284_v9, %s8010_s21 }
0x2aca   :  { %v11362_v55 = vpop.permute.xlu0 %6247 }
0x2acb   :  { %14744 = vst [vmem:[#allocation496_spill] sm:$0xff] %v11362_v55 }
0x2ace   :  { %v11364_v46 = vpop.permute.xlu0 %6251 }
0x2acf   :  { %14745 = vst [vmem:[#allocation497_spill] sm:$0xff] %v11364_v46 }
0x2ad2   :  { %v11366_v26 = vpop.permute.xlu0 %6255 }
0x2ad3   :  { %14746 = vst [vmem:[#allocation498_spill] sm:$0xff] %v11366_v26 }
0x2ad6   :  { %v6286_v44 = vpop.permute.xlu0 %6285 }
0x2ad7   :  { %v6293_v48 = vmul.f32 %v10970_v54, %v6286_v44  ;;  %v6295_v36 = vmul.f32 %v11079_v53, %v6286_v44  ;;  %v6297_v18 = vmul.f32 %v11082_v11, %v6286_v44 }
0x2ad9   :  { %6305 = vrot.lane.b32.xlu0 %v6293_v48, %s8011_s22 }
0x2add   :  { %6309 = vrot.lane.b32.xlu0 %v6295_v36, %s8011_s22 }
0x2ae1   :  { %6313 = vrot.lane.b32.xlu0 %v6297_v18, %s8011_s22 }
0x2ae5   :  { %6344 = vrot.lane.b32.xlu0 %v6339_v43, %s8010_s21 }
0x2b1c   :  { %v11379_v63 = vpop.permute.xlu1 %6249 }
0x2b1d   :  { %14747 = vst [vmem:[#allocation499_spill] sm:$0xff] %v11379_v63 }
0x2b20   :  { %v11381_v1 = vpop.permute.xlu1 %6253 }
0x2b21   :  { %14748 = vst [vmem:[#allocation500_spill] sm:$0xff] %v11381_v1  ;;  %v6343_v1 = vrot.slane %v7864_v32, %v8069_v13 }
0x2b24   :  { %v11383_v9 = vpop.permute.xlu1 %6257 }
0x2b25   :  { %14749 = vst [vmem:[#allocation501_spill] sm:$0xff] %v11383_v9 }
0x2b28   :  { %v6288_v48 = vpop.permute.xlu1 %6287 }
0x2b29   :  { %v6290_v36 = vsel %vm6289_vm6, %v6286_v44, %v6288_v48 }
0x2b2a   :  { %v6294_v46 = vmul.f32 %v10990_v45, %v6290_v36  ;;  %v6296_v18 = vmul.f32 %v11103_v47, %v6290_v36  ;;  %v6298_v43 = vmul.f32 %v11106_v0, %v6290_v36 }
0x2b2c   :  { %6307 = vrot.lane.b32.xlu1 %v6294_v46, %s8011_s22 }
0x2b30   :  { %6311 = vrot.lane.b32.xlu1 %v6296_v18, %s8011_s22 }
0x2b34   :  { %6315 = vrot.lane.b32.xlu1 %v6298_v43, %s8011_s22 }
0x2b38   :  { %6346 = vrot.lane.b32.xlu1 %v6343_v1, %s8010_s21 }
0x2b4b   :  { %v11394_v55 = vpop.permute.xlu0 %6305 }
0x2b4c   :  { %14750 = vst [vmem:[#allocation502_spill] sm:$0xff] %v11394_v55 }
0x2b4f   :  { %v11396_v63 = vpop.permute.xlu0 %6309 }
0x2b50   :  { %14751 = vst [vmem:[#allocation503_spill] sm:$0xff] %v11396_v63  ;;  %v7865_v63 = vld [vmem:[%s13917_s0 + $0x37] ss:$8 sm:$0x3] }
0x2b51   :  { %v6406_v55 = vrot.slane %v7865_v63, %v8071_v14 }
0x2b53   :  { %v11398_v44 = vpop.permute.xlu0 %6313 }
0x2b54   :  { %14752 = vst [vmem:[#allocation504_spill] sm:$0xff] %v11398_v44 }
0x2b57   :  { %v6345_v48 = vpop.permute.xlu0 %6344 }
0x2b58   :  { %v6351_v46 = vmul.f32 %v10970_v54, %v6345_v48  ;;  %v6353_v40 = vmul.f32 %v11079_v53, %v6345_v48  ;;  %v6355_v18 = vmul.f32 %v11082_v11, %v6345_v48 }
0x2b5a   :  { %v6363_v36 = vrot.slane %v6351_v46, 1  ;;  %v6364_v26 = vrot.slane %v6353_v40, 1  ;;  %v6369_v32 = vrot.slane %v6355_v18, 1 }
0x2b5c   :  { %v6365_v43 = vsel %vm164_vm8, %v6363_v36, %v6364_v26  ;;  %v6370_v1 = vsel %vm164_vm8, %v6364_v26, %v6369_v32 }
0x2b5d   :  { %6373 = vrot.lane.b32.xlu0 %v6365_v43, %s8011_s22 }
0x2b61   :  { %6377 = vrot.lane.b32.xlu0 %v6370_v1, %s8011_s22 }
0x2b65   :  { %6381 = vrot.lane.b32.xlu0 %v6369_v32, %s8011_s22 }
0x2b69   :  { %6411 = vrot.lane.b32.xlu0 %v6406_v55, %s8010_s21 }
0x2b9e   :  { %v11413_v40 = vpop.permute.xlu1 %6307 }
0x2b9f   :  { %14753 = vst [vmem:[#allocation505_spill] sm:$0xff] %v11413_v40 }
0x2ba2   :  { %v11415_v46 = vpop.permute.xlu1 %6311 }
0x2ba3   :  { %14754 = vst [vmem:[#allocation506_spill] sm:$0xff] %v11415_v46 }
0x2ba6   :  { %v11417_v18 = vpop.permute.xlu1 %6315 }
0x2ba7   :  { %14755 = vst [vmem:[#allocation507_spill] sm:$0xff] %v11417_v18 }
0x2baa   :  { %v6347_v36 = vpop.permute.xlu1 %6346 }
0x2bab   :  { %v6348_v26 = vsel %vm6289_vm6, %v6345_v48, %v6347_v36  ;;  %v6410_v48 = vrot.slane %v7865_v63, %v8069_v13 }
0x2bac   :  { %v6352_v43 = vmul.f32 %v10990_v45, %v6348_v26  ;;  %v6354_v1 = vmul.f32 %v11103_v47, %v6348_v26  ;;  %v6356_v44 = vmul.f32 %v11106_v0, %v6348_v26 }
0x2bae   :  { %v6366_v32 = vrot.slane %v6352_v43, 1  ;;  %v6367_v9 = vrot.slane %v6354_v1, 1  ;;  %v6371_v49 = vrot.slane %v6356_v44, 1 }
0x2bb0   :  { %v6368_v55 = vsel %vm164_vm8, %v6366_v32, %v6367_v9  ;;  %v6372_v46 = vsel %vm164_vm8, %v6367_v9, %v6371_v49 }
0x2bb1   :  { %6375 = vrot.lane.b32.xlu1 %v6368_v55, %s8011_s22 }
0x2bb5   :  { %6379 = vrot.lane.b32.xlu1 %v6372_v46, %s8011_s22 }
0x2bb9   :  { %6383 = vrot.lane.b32.xlu1 %v6371_v49, %s8011_s22 }
0x2bbd   :  { %6413 = vrot.lane.b32.xlu1 %v6410_v48, %s8010_s21 }
0x2bcf   :  { %v11430_v36 = vpop.permute.xlu0 %6373 }
0x2bd0   :  { %14756 = vst [vmem:[#allocation508_spill] sm:$0xff] %v11430_v36 }
0x2bd3   :  { %v11432_v26 = vpop.permute.xlu0 %6377 }
0x2bd4   :  { %14757 = vst [vmem:[#allocation509_spill] sm:$0xff] %v11432_v26  ;;  %v7866_v26 = vld [vmem:[%s13917_s0 + $0x52] ss:$8 sm:$0x3] }
0x2bd5   :  { %v6473_v36 = vrot.slane %v7866_v26, %v8071_v14 }
0x2bd7   :  { %v11434_v43 = vpop.permute.xlu0 %6381 }
0x2bd8   :  { %14758 = vst [vmem:[#allocation510_spill] sm:$0xff] %v11434_v43 }
0x2bdb   :  { %v6412_v44 = vpop.permute.xlu0 %6411 }
0x2bdc   :  { %v6418_v1 = vmul.f32 %v10970_v54, %v6412_v44  ;;  %v6420_v32 = vmul.f32 %v11079_v53, %v6412_v44  ;;  %v6422_v9 = vmul.f32 %v11082_v11, %v6412_v44 }
0x2bde   :  { %v6430_v46 = vrot.slane %v6418_v1, 2  ;;  %v6431_v55 = vrot.slane %v6420_v32, 2  ;;  %v6436_v63 = vrot.slane %v6422_v9, 2 }
0x2be0   :  { %v6432_v49 = vsel %vm212_vm9, %v6430_v46, %v6431_v55  ;;  %v6437_v48 = vsel %vm212_vm9, %v6431_v55, %v6436_v63 }
0x2be1   :  { %6440 = vrot.lane.b32.xlu0 %v6432_v49, %s8011_s22 }
0x2be5   :  { %6444 = vrot.lane.b32.xlu0 %v6437_v48, %s8011_s22 }
0x2be9   :  { %6448 = vrot.lane.b32.xlu0 %v6436_v63, %s8011_s22 }
0x2bed   :  { %6478 = vrot.lane.b32.xlu0 %v6473_v36, %s8010_s21 }
0x2c23   :  { %v11449_v1 = vpop.permute.xlu1 %6375 }
0x2c24   :  { %14759 = vst [vmem:[#allocation511_spill] sm:$0xff] %v11449_v1 }
0x2c27   :  { %v11451_v32 = vpop.permute.xlu1 %6379 }
0x2c28   :  { %14760 = vst [vmem:[#allocation512_spill] sm:$0xff] %v11451_v32 }
0x2c2b   :  { %v11453_v9 = vpop.permute.xlu1 %6383 }
0x2c2c   :  { %14761 = vst [vmem:[#allocation513_spill] sm:$0xff] %v11453_v9 }
0x2c2f   :  { %v6414_v46 = vpop.permute.xlu1 %6413 }
0x2c30   :  { %v6415_v55 = vsel %vm6289_vm6, %v6412_v44, %v6414_v46  ;;  %v6477_v44 = vrot.slane %v7866_v26, %v8069_v13 }
0x2c31   :  { %v6419_v49 = vmul.f32 %v10990_v45, %v6415_v55  ;;  %v6421_v48 = vmul.f32 %v11103_v47, %v6415_v55  ;;  %v6423_v40 = vmul.f32 %v11106_v0, %v6415_v55 }
0x2c33   :  { %v6433_v63 = vrot.slane %v6419_v49, 2  ;;  %v6434_v43 = vrot.slane %v6421_v48, 2  ;;  %v6438_v18 = vrot.slane %v6423_v40, 2 }
0x2c35   :  { %v6435_v36 = vsel %vm212_vm9, %v6433_v63, %v6434_v43  ;;  %v6439_v32 = vsel %vm212_vm9, %v6434_v43, %v6438_v18 }
0x2c36   :  { %6442 = vrot.lane.b32.xlu1 %v6435_v36, %s8011_s22 }
0x2c3a   :  { %6446 = vrot.lane.b32.xlu1 %v6439_v32, %s8011_s22 }
0x2c3e   :  { %6450 = vrot.lane.b32.xlu1 %v6438_v18, %s8011_s22 }
0x2c42   :  { %6480 = vrot.lane.b32.xlu1 %v6477_v44, %s8010_s21 }
0x2c53   :  { %v11466_v46 = vpop.permute.xlu0 %6440 }
0x2c54   :  { %14762 = vst [vmem:[#allocation514_spill] sm:$0xff] %v11466_v46 }
0x2c57   :  { %v11468_v55 = vpop.permute.xlu0 %6444 }
0x2c58   :  { %14763 = vst [vmem:[#allocation515_spill] sm:$0xff] %v11468_v55  ;;  %v7867_v55 = vld [vmem:[%s13917_s0 + $0x65] ss:$8 sm:$0x3] }
0x2c59   :  { %v6540_v46 = vrot.slane %v7867_v55, %v8071_v14 }
0x2c5b   :  { %v11470_v49 = vpop.permute.xlu0 %6448 }
0x2c5c   :  { %14764 = vst [vmem:[#allocation516_spill] sm:$0xff] %v11470_v49 }
0x2c5f   :  { %v6479_v40 = vpop.permute.xlu0 %6478 }
0x2c60   :  { %v6485_v48 = vmul.f32 %v10970_v54, %v6479_v40  ;;  %v6487_v63 = vmul.f32 %v11079_v53, %v6479_v40  ;;  %v6489_v43 = vmul.f32 %v11082_v11, %v6479_v40 }
0x2c62   :  { %v6497_v32 = vrot.slane %v6485_v48, 3  ;;  %v6498_v36 = vrot.slane %v6487_v63, 3  ;;  %v6503_v26 = vrot.slane %v6489_v43, 3 }
0x2c64   :  { %v6499_v18 = vsel %vm260_vm10, %v6497_v32, %v6498_v36  ;;  %v6504_v44 = vsel %vm260_vm10, %v6498_v36, %v6503_v26 }
0x2c65   :  { %6507 = vrot.lane.b32.xlu0 %v6499_v18, %s8011_s22 }
0x2c69   :  { %6511 = vrot.lane.b32.xlu0 %v6504_v44, %s8011_s22 }
0x2c6d   :  { %6515 = vrot.lane.b32.xlu0 %v6503_v26, %s8011_s22 }
0x2c71   :  { %6545 = vrot.lane.b32.xlu0 %v6540_v46, %s8010_s21 }
0x2ca8   :  { %v11485_v48 = vpop.permute.xlu1 %6442 }
0x2ca9   :  { %14765 = vst [vmem:[#allocation517_spill] sm:$0xff] %v11485_v48 }
0x2cac   :  { %v11487_v63 = vpop.permute.xlu1 %6446 }
0x2cad   :  { %14766 = vst [vmem:[#allocation518_spill] sm:$0xff] %v11487_v63 }
0x2cb0   :  { %v11489_v43 = vpop.permute.xlu1 %6450 }
0x2cb1   :  { %14767 = vst [vmem:[#allocation519_spill] sm:$0xff] %v11489_v43 }
0x2cb4   :  { %v6481_v32 = vpop.permute.xlu1 %6480 }
0x2cb5   :  { %v6482_v36 = vsel %vm6289_vm6, %v6479_v40, %v6481_v32  ;;  %v6544_v40 = vrot.slane %v7867_v55, %v8069_v13 }
0x2cb6   :  { %v6486_v18 = vmul.f32 %v10990_v45, %v6482_v36  ;;  %v6488_v44 = vmul.f32 %v11103_v47, %v6482_v36  ;;  %v6490_v1 = vmul.f32 %v11106_v0, %v6482_v36 }
0x2cb8   :  { %v6500_v26 = vrot.slane %v6486_v18, 3  ;;  %v6501_v49 = vrot.slane %v6488_v44, 3  ;;  %v6505_v9 = vrot.slane %v6490_v1, 3 }
0x2cba   :  { %v6502_v46 = vsel %vm260_vm10, %v6500_v26, %v6501_v49  ;;  %v6506_v63 = vsel %vm260_vm10, %v6501_v49, %v6505_v9 }
0x2cbb   :  { %6509 = vrot.lane.b32.xlu1 %v6502_v46, %s8011_s22 }
0x2cbf   :  { %6513 = vrot.lane.b32.xlu1 %v6506_v63, %s8011_s22 }
0x2cc3   :  { %6517 = vrot.lane.b32.xlu1 %v6505_v9, %s8011_s22 }
0x2cc7   :  { %6547 = vrot.lane.b32.xlu1 %v6544_v40, %s8010_s21  ;;  %v7868_v40 = vld [vmem:[%s13917_s0 + $0x80] ss:$8 sm:$0x3] }
0x2cd7   :  { %v11502_v45 = vpop.permute.xlu0 %6507 }
0x2cd8   :  { %14768 = vst [vmem:[#allocation520_spill] sm:$0xff] %v11502_v45 }
0x2cdb   :  { %v11504_v32 = vpop.permute.xlu0 %6511 }
0x2cdc   :  { %14769 = vst [vmem:[#allocation521_spill] sm:$0xff] %v11504_v32 }
0x2cdf   :  { %v11506_v36 = vpop.permute.xlu0 %6515 }
0x2ce0   :  { %14770 = vst [vmem:[#allocation522_spill] sm:$0xff] %v11506_v36 }
0x2ce3   :  { %v6546_v1 = vpop.permute.xlu0 %6545 }
0x2ce4   :  { %v6552_v18 = vmul.f32 %v10970_v54, %v6546_v1  ;;  %v6554_v44 = vmul.f32 %v11079_v53, %v6546_v1  ;;  %v6556_v49 = vmul.f32 %v11082_v11, %v6546_v1  ;;  %v6607_v54 = vrot.slane %v7868_v40, %v8071_v14 }
0x2ce6   :  { %v6564_v63 = vrot.slane %v6552_v18, 4  ;;  %v6565_v26 = vrot.slane %v6554_v44, 4  ;;  %v6570_v55 = vrot.slane %v6556_v49, 4 }
0x2ce8   :  { %v6566_v9 = vsel %vm308_vm11, %v6564_v63, %v6565_v26  ;;  %v6571_v46 = vsel %vm308_vm11, %v6565_v26, %v6570_v55 }
0x2ce9   :  { %6574 = vrot.lane.b32.xlu0 %v6566_v9, %s8011_s22  ;;  %v11528_v9 = vld [vmem:[#allocation2 + $0x8] sm:$0xff] }
0x2cea   :  { %14774 = vst [vmem:[#allocation526_spill] sm:$0xff] %v11528_v9 }
0x2ced   :  { %6578 = vrot.lane.b32.xlu0 %v6571_v46, %s8011_s22 }
0x2cf1   :  { %6582 = vrot.lane.b32.xlu0 %v6570_v55, %s8011_s22 }
0x2cf5   :  { %6612 = vrot.lane.b32.xlu0 %v6607_v54, %s8010_s21 }
0x2d2d   :  { %v11521_v18 = vpop.permute.xlu1 %6509 }
0x2d2e   :  { %14771 = vst [vmem:[#allocation523_spill] sm:$0xff] %v11521_v18 }
0x2d31   :  { %v11523_v44 = vpop.permute.xlu1 %6513 }
0x2d32   :  { %14772 = vst [vmem:[#allocation524_spill] sm:$0xff] %v11523_v44 }
0x2d35   :  { %v11525_v49 = vpop.permute.xlu1 %6517 }
0x2d36   :  { %14773 = vst [vmem:[#allocation525_spill] sm:$0xff] %v11525_v49 }
0x2d39   :  { %v6548_v63 = vpop.permute.xlu1 %6547 }
0x2d3a   :  { %v6549_v26 = vsel %vm6289_vm6, %v6546_v1, %v6548_v63  ;;  %v6611_v1 = vrot.slane %v7868_v40, %v8069_v13  ;;  %v7869_v40 = vld [vmem:[%s13917_s0 + $0x93] ss:$8 sm:$0x3] }
0x2d3b   :  { %v6553_v46 = vmul.f32 %v11528_v9, %v6549_v26  ;;  %v6555_v32 = vmul.f32 %v11103_v47, %v6549_v26  ;;  %v6557_v55 = vmul.f32 %v11106_v0, %v6549_v26 }
0x2d3d   :  { %v6567_v45 = vrot.slane %v6553_v46, 4  ;;  %v6568_v48 = vrot.slane %v6555_v32, 4  ;;  %v6572_v54 = vrot.slane %v6557_v55, 4 }
0x2d3f   :  { %v6569_v18 = vsel %vm308_vm11, %v6567_v45, %v6568_v48  ;;  %v6573_v44 = vsel %vm308_vm11, %v6568_v48, %v6572_v54 }
0x2d40   :  { %6576 = vrot.lane.b32.xlu1 %v6569_v18, %s8011_s22 }
0x2d44   :  { %6580 = vrot.lane.b32.xlu1 %v6573_v44, %s8011_s22 }
0x2d48   :  { %6584 = vrot.lane.b32.xlu1 %v6572_v54, %s8011_s22  ;;  %v6666_v54 = vrot.slane %v7869_v40, %v8071_v14 }
0x2d4c   :  { %6614 = vrot.lane.b32.xlu1 %v6611_v1, %s8010_s21 }
0x2d5b   :  { %v11540_v63 = vpop.permute.xlu0 %6574 }
0x2d5c   :  { %14775 = vst [vmem:[#allocation527_spill] sm:$0xff] %v11540_v63 }
0x2d5f   :  { %v11542_v26 = vpop.permute.xlu0 %6578 }
0x2d60   :  { %14776 = vst [vmem:[#allocation528_spill] sm:$0xff] %v11542_v26 }
0x2d63   :  { %v11544_v32 = vpop.permute.xlu0 %6582 }
0x2d64   :  { %14777 = vst [vmem:[#allocation529_spill] sm:$0xff] %v11544_v32 }
0x2d67   :  { %v6613_v46 = vpop.permute.xlu0 %6612 }
0x2d68   :  { %v6619_v45 = vmul.f32 %v11079_v53, %v6613_v46  ;;  %v6621_v18 = vmul.f32 %v11082_v11, %v6613_v46 }
0x2d6a   :  { %v6627_v48 = vrot.slane %v6619_v45, 5  ;;  %v6629_v55 = vrot.slane %v6621_v18, 5 }
0x2d6c   :  { %6633 = vrot.lane.b32.xlu0 %v6627_v48, %s8011_s22  ;;  %v6630_v44 = vsel %vm352_vm12, %v6627_v48, %v6629_v55 }
0x2d70   :  { %6637 = vrot.lane.b32.xlu0 %v6630_v44, %s8011_s22 }
0x2d74   :  { %6641 = vrot.lane.b32.xlu0 %v6629_v55, %s8011_s22 }
0x2d78   :  { %6671 = vrot.lane.b32.xlu0 %v6666_v54, %s8010_s21  ;;  %v6670_v54 = vrot.slane %v7869_v40, %v8069_v13 }
0x2db2   :  { %v11557_v1 = vpop.permute.xlu1 %6576 }
0x2db3   :  { %14778 = vst [vmem:[#allocation530_spill] sm:$0xff] %v11557_v1 }
0x2db6   :  { %v11559_v45 = vpop.permute.xlu1 %6580 }
0x2db7   :  { %14779 = vst [vmem:[#allocation531_spill] sm:$0xff] %v11559_v45 }
0x2dba   :  { %v11561_v18 = vpop.permute.xlu1 %6584 }
0x2dbb   :  { %14780 = vst [vmem:[#allocation532_spill] sm:$0xff] %v11561_v18 }
0x2dbe   :  { %v6615_v26 = vpop.permute.xlu1 %6614 }
0x2dbf   :  { %v6616_v48 = vsel %vm6289_vm6, %v6613_v46, %v6615_v26 }
0x2dc0   :  { %v6620_v44 = vmul.f32 %v11103_v47, %v6616_v48  ;;  %v6622_v63 = vmul.f32 %v11106_v0, %v6616_v48 }
0x2dc2   :  { %v6628_v32 = vrot.slane %v6620_v44, 5  ;;  %v6631_v36 = vrot.slane %v6622_v63, 5 }
0x2dc4   :  { %6635 = vrot.lane.b32.xlu1 %v6628_v32, %s8011_s22  ;;  %v6632_v55 = vsel %vm352_vm12, %v6628_v32, %v6631_v36 }
0x2dc8   :  { %6639 = vrot.lane.b32.xlu1 %v6632_v55, %s8011_s22  ;;  %v11580_v55 = vld [vmem:[#allocation2] sm:$0xff] }
0x2dcc   :  { %6643 = vrot.lane.b32.xlu1 %v6631_v36, %s8011_s22 }
0x2dd0   :  { %6673 = vrot.lane.b32.xlu1 %v6670_v54, %s8010_s21 }
0x2dde   :  { %v11572_v45 = vpop.permute.xlu0 %6633 }
0x2ddf   :  { %14781 = vst [vmem:[#allocation533_spill] sm:$0xff] %v11572_v45 }
0x2de2   :  { %v11574_v26 = vpop.permute.xlu0 %6637 }
0x2de3   :  { %14782 = vst [vmem:[#allocation534_spill] sm:$0xff] %v11574_v26  ;;  %v7870_v26 = vld [vmem:[%s13917_s0 + $0xa6] ss:$8 sm:$0x3] }
0x2de6   :  { %v11576_v46 = vpop.permute.xlu0 %6641 }
0x2de7   :  { %14783 = vst [vmem:[#allocation535_spill] sm:$0xff] %v11576_v46 }
0x2dea   :  { %v6672_v48 = vpop.permute.xlu0 %6671 }
0x2deb   :  { %v6678_v63 = vmul.f32 %v11079_v53, %v6672_v48  ;;  %v6680_v44 = vmul.f32 %v11082_v11, %v6672_v48  ;;  %v6682_v36 = vmul.f32 %v11580_v55, %v6672_v48 }
0x2ded   :  { %v6690_v32 = vrot.slane %v6678_v63, 6  ;;  %v6692_v1 = vrot.slane %v6680_v44, 6  ;;  %v6696_v54 = vrot.slane %v6682_v36, 6  ;;  %v6733_v63 = vrot.slane %v7870_v26, %v8071_v14 }
0x2def   :  { %6700 = vrot.lane.b32.xlu0 %v6690_v32, %s8011_s22  ;;  %v6693_v40 = vsel %vm396_vm13, %v6690_v32, %v6692_v1  ;;  %v6697_v45 = vsel %vm396_vm13, %v6692_v1, %v6696_v54 }
0x2df3   :  { %6704 = vrot.lane.b32.xlu0 %v6693_v40, %s8011_s22 }
0x2df7   :  { %6708 = vrot.lane.b32.xlu0 %v6697_v45, %s8011_s22 }
0x2dfb   :  { %6738 = vrot.lane.b32.xlu0 %v6733_v63, %s8010_s21 }
0x2e36   :  { %v11593_v44 = vpop.permute.xlu1 %6635 }
0x2e37   :  { %14784 = vst [vmem:[#allocation536_spill] sm:$0xff] %v11593_v44 }
0x2e3a   :  { %v11595_v46 = vpop.permute.xlu1 %6639 }
0x2e3b   :  { %14785 = vst [vmem:[#allocation537_spill] sm:$0xff] %v11595_v46 }
0x2e3e   :  { %v11597_v32 = vpop.permute.xlu1 %6643 }
0x2e3f   :  { %14786 = vst [vmem:[#allocation538_spill] sm:$0xff] %v11597_v32 }
0x2e42   :  { %v6674_v36 = vpop.permute.xlu1 %6673 }
0x2e43   :  { %v6675_v40 = vsel %vm6289_vm6, %v6672_v48, %v6674_v36  ;;  %v6737_v48 = vrot.slane %v7870_v26, %v8069_v13 }
0x2e44   :  { %v6679_v18 = vmul.f32 %v11103_v47, %v6675_v40  ;;  %v6681_v49 = vmul.f32 %v11106_v0, %v6675_v40  ;;  %v6683_v45 = vmul.f32 %v11212_v51, %v6675_v40 }
0x2e46   :  { %v6691_v1 = vrot.slane %v6679_v18, 6  ;;  %v6694_v54 = vrot.slane %v6681_v49, 6  ;;  %v6698_v63 = vrot.slane %v6683_v45, 6 }
0x2e48   :  { %6702 = vrot.lane.b32.xlu1 %v6691_v1, %s8011_s22  ;;  %v6695_v44 = vsel %vm396_vm13, %v6691_v1, %v6694_v54  ;;  %v6699_v46 = vsel %vm396_vm13, %v6694_v54, %v6698_v63  ;;  %v7871_v63 = vld [vmem:[%s13917_s0 + $0xc1] ss:$8 sm:$0x3] }
0x2e4c   :  { %6706 = vrot.lane.b32.xlu1 %v6695_v44, %s8011_s22 }
0x2e50   :  { %6710 = vrot.lane.b32.xlu1 %v6699_v46, %s8011_s22 }
0x2e54   :  { %6740 = vrot.lane.b32.xlu1 %v6737_v48, %s8010_s21 }
0x2e61   :  { %v11610_v36 = vpop.permute.xlu0 %6700 }
0x2e62   :  { %14787 = vst [vmem:[#allocation539_spill] sm:$0xff] %v11610_v36 }
0x2e65   :  { %v11612_v18 = vpop.permute.xlu0 %6704 }
0x2e66   :  { %14788 = vst [vmem:[#allocation540_spill] sm:$0xff] %v11612_v18 }
0x2e69   :  { %v11614_v49 = vpop.permute.xlu0 %6708 }
0x2e6a   :  { %14789 = vst [vmem:[#allocation541_spill] sm:$0xff] %v11614_v49 }
0x2e6d   :  { %v6739_v40 = vpop.permute.xlu0 %6738 }
0x2e6e   :  { %v6745_v45 = vmul.f32 %v11079_v53, %v6739_v40  ;;  %v6747_v1 = vmul.f32 %v11082_v11, %v6739_v40  ;;  %v6749_v54 = vmul.f32 %v11580_v55, %v6739_v40  ;;  %v6800_v53 = vrot.slane %v7871_v63, %v8071_v14 }
0x2e70   :  { %v6757_v44 = vrot.slane %v6745_v45, 7  ;;  %v6759_v32 = vrot.slane %v6747_v1, 7  ;;  %v6763_v46 = vrot.slane %v6749_v54, 7 }
0x2e72   :  { %6767 = vrot.lane.b32.xlu0 %v6757_v44, %s8011_s22  ;;  %v6760_v26 = vsel %vm444_vm14, %v6757_v44, %v6759_v32  ;;  %v6764_v48 = vsel %vm444_vm14, %v6759_v32, %v6763_v46 }
0x2e76   :  { %6771 = vrot.lane.b32.xlu0 %v6760_v26, %s8011_s22 }
0x2e7a   :  { %6775 = vrot.lane.b32.xlu0 %v6764_v48, %s8011_s22 }
0x2e7e   :  { %6805 = vrot.lane.b32.xlu0 %v6800_v53, %s8010_s21 }
0x2eba   :  { %v11629_v11 = vpop.permute.xlu1 %6702 }
0x2ebb   :  { %14790 = vst [vmem:[#allocation542_spill] sm:$0xff] %v11629_v11 }
0x2ebe   :  { %v11631_v45 = vpop.permute.xlu1 %6706 }
0x2ebf   :  { %14791 = vst [vmem:[#allocation543_spill] sm:$0xff] %v11631_v45 }
0x2ec2   :  { %v11633_v1 = vpop.permute.xlu1 %6710 }
0x2ec3   :  { %14792 = vst [vmem:[#allocation544_spill] sm:$0xff] %v11633_v1 }
0x2ec6   :  { %v6741_v44 = vpop.permute.xlu1 %6740 }
0x2ec7   :  { %v6742_v54 = vsel %vm6289_vm6, %v6739_v40, %v6741_v44  ;;  %v6804_v40 = vrot.slane %v7871_v63, %v8069_v13 }
0x2ec8   :  { %v6746_v26 = vmul.f32 %v11103_v47, %v6742_v54  ;;  %v6748_v18 = vmul.f32 %v11106_v0, %v6742_v54  ;;  %v6750_v46 = vmul.f32 %v11212_v51, %v6742_v54  ;;  %v11652_v54 = vld [vmem:[#allocation2 + $0x10] sm:$0xff] }
0x2ec9   :  { %14796 = vst [vmem:[#allocation548_spill] sm:$0xff] %v11652_v54 }
0x2eca   :  { %v6758_v32 = vrot.slane %v6746_v26, 7  ;;  %v6761_v48 = vrot.slane %v6748_v18, 7  ;;  %v6765_v53 = vrot.slane %v6750_v46, 7 }
0x2ecc   :  { %6769 = vrot.lane.b32.xlu1 %v6758_v32, %s8011_s22  ;;  %v6762_v36 = vsel %vm444_vm14, %v6758_v32, %v6761_v48  ;;  %v6766_v45 = vsel %vm444_vm14, %v6761_v48, %v6765_v53  ;;  %v7872_v32 = vld [vmem:[%s13917_s0 + $0xd4] ss:$8 sm:$0x3] }
0x2ecd   :  { %v6857_v46 = vrot.slane %v7872_v32, %v8071_v14 }
0x2ed0   :  { %6773 = vrot.lane.b32.xlu1 %v6762_v36, %s8011_s22  ;;  %v11656_v36 = vld [vmem:[#allocation2 + $0x20] sm:$0xff] }
0x2ed4   :  { %6777 = vrot.lane.b32.xlu1 %v6766_v45, %s8011_s22 }
0x2ed8   :  { %6807 = vrot.lane.b32.xlu1 %v6804_v40, %s8010_s21 }
0x2ee4   :  { %v11646_v47 = vpop.permute.xlu0 %6767 }
0x2ee5   :  { %14793 = vst [vmem:[#allocation545_spill] sm:$0xff] %v11646_v47 }
0x2ee8   :  { %v11648_v0 = vpop.permute.xlu0 %6771 }
0x2ee9   :  { %14794 = vst [vmem:[#allocation546_spill] sm:$0xff] %v11648_v0  ;;  %v11674_v0 = vld [vmem:[#allocation2 + $0x18] sm:$0xff] }
0x2eea   :  { %14800 = vst [vmem:[#allocation552_spill] sm:$0xff] %v11674_v0 }
0x2eec   :  { %v11650_v18 = vpop.permute.xlu0 %6775 }
0x2eed   :  { %14795 = vst [vmem:[#allocation547_spill] sm:$0xff] %v11650_v18 }
0x2ef0   :  { %v6806_v44 = vpop.permute.xlu0 %6805 }
0x2ef1   :  { %v6812_v26 = vmul.f32 %v11652_v54, %v6806_v44  ;;  %v6814_v45 = vmul.f32 %v11656_v36, %v6806_v44  ;;  %v6816_v63 = vmul.f32 %v11580_v55, %v6806_v44 }
0x2ef3   :  { %6824 = vrot.lane.b32.xlu0 %v6812_v26, %s8011_s22 }
0x2ef7   :  { %6828 = vrot.lane.b32.xlu0 %v6814_v45, %s8011_s22 }
0x2efb   :  { %6832 = vrot.lane.b32.xlu0 %v6816_v63, %s8011_s22  ;;  %v11678_v63 = vld [vmem:[#allocation2 + $0x28] sm:$0xff] }
0x2efc   :  { %14801 = vst [vmem:[#allocation553_spill] sm:$0xff] %v11678_v63 }
0x2eff   :  { %6862 = vrot.lane.b32.xlu0 %v6857_v46, %s8010_s21 }
0x2f3e   :  { %v11667_v48 = vpop.permute.xlu1 %6769 }
0x2f3f   :  { %14797 = vst [vmem:[#allocation549_spill] sm:$0xff] %v11667_v48 }
0x2f42   :  { %v11669_v53 = vpop.permute.xlu1 %6773 }
0x2f43   :  { %14798 = vst [vmem:[#allocation550_spill] sm:$0xff] %v11669_v53  ;;  %v6861_v53 = vrot.slane %v7872_v32, %v8069_v13 }
0x2f46   :  { %v11671_v40 = vpop.permute.xlu1 %6777 }
0x2f47   :  { %14799 = vst [vmem:[#allocation551_spill] sm:$0xff] %v11671_v40 }
0x2f4a   :  { %v6808_v26 = vpop.permute.xlu1 %6807 }
0x2f4b   :  { %v6809_v45 = vsel %vm6289_vm6, %v6806_v44, %v6808_v26 }
0x2f4c   :  { %v6813_v47 = vmul.f32 %v11674_v0, %v6809_v45  ;;  %v6815_v11 = vmul.f32 %v11678_v63, %v6809_v45  ;;  %v6817_v46 = vmul.f32 %v11212_v51, %v6809_v45 }
0x2f4e   :  { %6826 = vrot.lane.b32.xlu1 %v6813_v47, %s8011_s22 }
0x2f52   :  { %6830 = vrot.lane.b32.xlu1 %v6815_v11, %s8011_s22 }
0x2f56   :  { %6834 = vrot.lane.b32.xlu1 %v6817_v46, %s8011_s22 }
0x2f5a   :  { %6864 = vrot.lane.b32.xlu1 %v6861_v53, %s8010_s21 }
0x2f65   :  { %v11686_v44 = vpop.permute.xlu0 %6824 }
0x2f66   :  { %14802 = vst [vmem:[#allocation554_spill] sm:$0xff] %v11686_v44 }
0x2f69   :  { %v11688_v26 = vpop.permute.xlu0 %6828 }
0x2f6a   :  { %14803 = vst [vmem:[#allocation555_spill] sm:$0xff] %v11688_v26  ;;  %v7873_v26 = vld [vmem:[%s13917_s0 + $0xe7] ss:$8 sm:$0x3] }
0x2f6b   :  { %v6924_v44 = vrot.slane %v7873_v26, %v8071_v14 }
0x2f6d   :  { %v11690_v48 = vpop.permute.xlu0 %6832 }
0x2f6e   :  { %14804 = vst [vmem:[#allocation556_spill] sm:$0xff] %v11690_v48 }
0x2f71   :  { %v6863_v47 = vpop.permute.xlu0 %6862 }
0x2f72   :  { %v6869_v18 = vmul.f32 %v11652_v54, %v6863_v47  ;;  %v6871_v40 = vmul.f32 %v11656_v36, %v6863_v47  ;;  %v6873_v11 = vmul.f32 %v11580_v55, %v6863_v47 }
0x2f74   :  { %v6881_v45 = vrot.slane %v6869_v18, 1  ;;  %v6882_v49 = vrot.slane %v6871_v40, 1  ;;  %v6887_v32 = vrot.slane %v6873_v11, 1 }
0x2f76   :  { %v6883_v46 = vsel %vm164_vm8, %v6881_v45, %v6882_v49  ;;  %v6888_v53 = vsel %vm164_vm8, %v6882_v49, %v6887_v32 }
0x2f77   :  { %6891 = vrot.lane.b32.xlu0 %v6883_v46, %s8011_s22 }
0x2f7b   :  { %6895 = vrot.lane.b32.xlu0 %v6888_v53, %s8011_s22 }
0x2f7f   :  { %6899 = vrot.lane.b32.xlu0 %v6887_v32, %s8011_s22 }
0x2f83   :  { %6929 = vrot.lane.b32.xlu0 %v6924_v44, %s8010_s21 }
0x2fc0   :  { %v11705_v18 = vpop.permute.xlu1 %6826 }
0x2fc1   :  { %14805 = vst [vmem:[#allocation557_spill] sm:$0xff] %v11705_v18 }
0x2fc4   :  { %v11707_v40 = vpop.permute.xlu1 %6830 }
0x2fc5   :  { %14806 = vst [vmem:[#allocation558_spill] sm:$0xff] %v11707_v40 }
0x2fc8   :  { %v11709_v11 = vpop.permute.xlu1 %6834 }
0x2fc9   :  { %14807 = vst [vmem:[#allocation559_spill] sm:$0xff] %v11709_v11 }
0x2fcc   :  { %v6865_v45 = vpop.permute.xlu1 %6864 }
0x2fcd   :  { %v6866_v49 = vsel %vm6289_vm6, %v6863_v47, %v6865_v45  ;;  %v7765_v47 = vld [vmem:[%s13917_s0 + $0x13] ss:$8 sm:$0x3]  ;;  %v6928_v45 = vrot.slane %v7873_v26, %v8069_v13 }
0x2fce   :  { %v6870_v46 = vmul.f32 %v11674_v0, %v6866_v49  ;;  %v6872_v53 = vmul.f32 %v11678_v63, %v6866_v49  ;;  %v6874_v48 = vmul.f32 %v11212_v51, %v6866_v49  ;;  %v11725_v51 = vrot.slane %v7765_v47, %v8069_v13 }
0x2fd0   :  { %v6884_v32 = vrot.slane %v6870_v46, 1  ;;  %v6885_v1 = vrot.slane %v6872_v53, 1  ;;  %v6889_v43 = vrot.slane %v6874_v48, 1  ;;  %14808 = vst [vmem:[#allocation560_spill] sm:$0xff] %v11725_v51  ;;  %v11728_v48 = vrot.slane %v7765_v47, %v8071_v14 }
0x2fd1   :  { %v7767_v47 = vld [vmem:[%s13917_s0 + $0x41] ss:$8 sm:$0x3] }
0x2fd2   :  { %v6886_v44 = vsel %vm164_vm8, %v6884_v32, %v6885_v1  ;;  %v6890_v40 = vsel %vm164_vm8, %v6885_v1, %v6889_v43  ;;  %14809 = vst [vmem:[#allocation561_spill] sm:$0xff] %v11728_v48  ;;  %v11733_v1 = vmul.f32 %v11678_v63, %v11725_v51  ;;  %v11749_v46 = vmul.f32 %v11656_v36, %v11728_v48 }
0x2fd3   :  { %6893 = vrot.lane.b32.xlu1 %v6886_v44, %s8011_s22 }
0x2fd4   :  { %14810 = vst [vmem:[#allocation562_spill] sm:$0xff] %v11733_v1  ;;  %14813 = vst [vmem:[#allocation565_spill] sm:$0xff] %v11749_v46  ;;  %v14820_v9 = vrot.slane %v11733_v1, 1 }
0x2fd7   :  { %6897 = vrot.lane.b32.xlu1 %v6890_v40, %s8011_s22  ;;  %v115_v40 = vld [vmem:[%s13917_s0] ss:$8 sm:$0x3] }
0x2fd8   :  { %v11742_v26 = vrot.slane %v115_v40, %v8069_v13  ;;  %v11752_v53 = vrot.slane %v115_v40, %v8071_v14 }
0x2fda   :  { %14811 = vst [vmem:[#allocation563_spill] sm:$0xff] %v11742_v26  ;;  %14814 = vst [vmem:[#allocation566_spill] sm:$0xff] %v11752_v53  ;;  %v132_v40 = vmul.f32 %v11678_v63, %v11742_v26  ;;  %v131_v0 = vmul.f32 %v11656_v36, %v11752_v53  ;;  %v14824_v53 = vrot.slane %v11749_v46, 1 }
0x2fdb   :  { %6901 = vrot.lane.b32.xlu1 %v6889_v43, %s8011_s22  ;;  %v7766_v43 = vld [vmem:[%s13917_s0 + $0x26] ss:$8 sm:$0x3] }
0x2fdc   :  { %v11745_v49 = vrot.slane %v7766_v43, %v8069_v13  ;;  %v11755_v32 = vrot.slane %v7766_v43, %v8071_v14  ;;  %v11772_v43 = vrot.slane %v7767_v47, %v8071_v14  ;;  %v186_v18 = vadd.f32 %v14820_v9, %v132_v40  ;;  %v7769_v40 = vld [vmem:[%s13917_s0 + $0x67] ss:$8 sm:$0x3] }
0x2fdd   :  { %v185_v48 = vadd.f32 %v14824_v53, %v131_v0  ;;  %v11811_v59 = vrot.slane %v7769_v40, %v8069_v13 }
0x2fde   :  { %14812 = vst [vmem:[#allocation564_spill] sm:$0xff] %v11745_v49  ;;  %14815 = vst [vmem:[#allocation567_spill] sm:$0xff] %v11755_v32  ;;  %v11767_v11 = vmul.f32 %v11678_v63, %v11745_v49  ;;  %v11776_v44 = vmul.f32 %v11656_v36, %v11755_v32  ;;  %v7768_v49 = vld [vmem:[%s13917_s0 + $0x54] ss:$8 sm:$0x3]  ;;  %v11806_v1 = vmul.f32 %v11656_v36, %v11772_v43 }
0x2fdf   :  { %6931 = vrot.lane.b32.xlu1 %v6928_v45, %s8010_s21  ;;  %v11762_v45 = vrot.slane %v7767_v47, %v8069_v13  ;;  %14818 = vst [vmem:[#allocation570_spill] sm:$0xff] %v11772_v43  ;;  %v11788_v26 = vrot.slane %v7768_v49, %v8069_v13  ;;  %v11798_v9 = vrot.slane %v7768_v49, %v8071_v14  ;;  %14827 = vst [vmem:[#allocation577_spill] sm:$0xff] %v11811_v59  ;;  %v7770_v49 = vld [vmem:[%s13917_s0 + $0x82] ss:$8 sm:$0x3] }
0x2fe0   :  { %14817 = vst [vmem:[#allocation569_spill] sm:$0xff] %v11767_v11  ;;  %14819 = vst [vmem:[#allocation571_spill] sm:$0xff] %v11776_v44  ;;  %v14214_v47 = vrot.slane %v11767_v11, 2  ;;  %v14830_v46 = vrot.slane %v11776_v44, 2  ;;  %v14836_v44 = vrot.slane %v11806_v1, 3 }
0x2fe1   :  { %14816 = vst [vmem:[#allocation568_spill] sm:$0xff] %v11762_v45  ;;  %14822 = vst [vmem:[#allocation573_spill] sm:$0xff] %v11788_v26  ;;  %v11793_v32 = vmul.f32 %v11678_v63, %v11762_v45  ;;  %v11834_v11 = vmul.f32 %v11656_v36, %v11798_v9 }
0x2fe2   :  { %14825 = vst [vmem:[#allocation575_spill] sm:$0xff] %v11798_v9  ;;  %14826 = vst [vmem:[#allocation576_spill] sm:$0xff] %v11806_v1  ;;  %v234_v45 = vadd.f32 %v14214_v47, %v186_v18  ;;  %v233_v43 = vadd.f32 %v14830_v46, %v185_v48  ;;  %v11826_v18 = vrot.slane %v7770_v49, %v8069_v13 }
0x2fe3   :  { %14823 = vst [vmem:[#allocation574_spill] sm:$0xff] %v11793_v32  ;;  %v14221_v53 = vrot.slane %v11793_v32, 3  ;;  %v11829_v47 = vrot.slane %v7769_v40, %v8071_v14  ;;  %14833 = vst [vmem:[#allocation582_spill] sm:$0xff] %v11834_v11  ;;  %v11843_v48 = vmul.f32 %v11678_v63, %v11811_v59  ;;  %v7771_v40 = vld [vmem:[%s13917_s0 + $0x95] ss:$8 sm:$0x3] }
0x2fe4   :  { %14831 = vst [vmem:[#allocation580_spill] sm:$0xff] %v11826_v18  ;;  %v281_v9 = vadd.f32 %v14836_v44, %v233_v43  ;;  %v11872_v1 = vrot.slane %v7771_v40, %v8071_v14 }
0x2fe5   :  { %14832 = vst [vmem:[#allocation581_spill] sm:$0xff] %v11829_v47  ;;  %v282_v19 = vadd.f32 %v14221_v53, %v234_v45  ;;  %v11854_v45 = vrot.slane %v7771_v40, %v8069_v13  ;;  %v11860_v53 = vld [vmem:[#allocation2 + $0x38] sm:$0xff] }
0x2fe6   :  { %v11904_v59 = vmul.f32 %v11656_v36, %v11872_v1 }
0x2fe7   :  { %14837 = vst [vmem:[#allocation585_spill] sm:$0xff] %v11854_v45 }
0x2fe8   :  { %14843 = vst [vmem:[#allocation588_spill] sm:$0xff] %v11904_v59 }
0x2fe9   :  { %v11785_v51 = vpop.permute.xlu0 %6891 }
0x2fea   :  { %14821 = vst [vmem:[#allocation572_spill] sm:$0xff] %v11785_v51  ;;  %v11821_v51 = vmul.f32 %v11678_v63, %v11788_v26  ;;  %v11839_v26 = vrot.slane %v7770_v49, %v8071_v14  ;;  %v11858_v49 = vmul.f32 %v11678_v63, %v11826_v18 }
0x2fec   :  { %14829 = vst [vmem:[#allocation579_spill] sm:$0xff] %v11821_v51  ;;  %14834 = vst [vmem:[#allocation583_spill] sm:$0xff] %v11839_v26  ;;  %v14838_v44 = vrot.slane %v11821_v51, 4  ;;  %v11877_v57 = vmul.f32 %v11656_v36, %v11839_v26  ;;  %v11894_v51 = vmul.f32 %v11678_v63, %v11854_v45 }
0x2fed   :  { %v11813_v0 = vpop.permute.xlu0 %6895 }
0x2fee   :  { %14828 = vst [vmem:[#allocation578_spill] sm:$0xff] %v11813_v0  ;;  %v11867_v0 = vmul.f32 %v11656_v36, %v11829_v47  ;;  %v330_v43 = vadd.f32 %v14838_v44, %v282_v19  ;;  %v14840_v47 = vrot.slane %v11834_v11, 4  ;;  %14841 = vst [vmem:[#allocation587_spill] sm:$0xff] %v11894_v51  ;;  %v437_v11 = vmul.f32 %v11860_v53, %v11854_v45 }
0x2ff0   :  { %v329_v16 = vadd.f32 %v14840_v47, %v281_v9  ;;  %v14239_v47 = vrot.slane %v11867_v0, 5  ;;  %v14842_v9 = vrot.slane %v11843_v48, 5 }
0x2ff1   :  { %v11845_v46 = vpop.permute.xlu0 %6899 }
0x2ff2   :  { %14835 = vst [vmem:[#allocation584_spill] sm:$0xff] %v11845_v46  ;;  %v389_v46 = vmul.f32 %v11860_v53, %v11826_v18  ;;  %v388_v18 = vmul.f32 %v11580_v55, %v11839_v26  ;;  %v369_v63 = vadd.f32 %v14239_v47, %v329_v16  ;;  %v7773_v16 = vld [vmem:[%s13917_s0 + $0xc3] ss:$8 sm:$0x3] }
0x2ff4   :  { %v405_v26 = vrot.slane %v389_v46, 6  ;;  %v436_v46 = vmul.f32 %v11580_v55, %v11872_v1 }
0x2ff5   :  { %v11881_v32 = vpop.permute.xlu0 %6929 }
0x2ff6   :  { %14839 = vst [vmem:[#allocation586_spill] sm:$0xff] %v11881_v32  ;;  %v6936_v19 = vmul.f32 %v11652_v54, %v11881_v32  ;;  %v6938_v40 = vmul.f32 %v11656_v36, %v11881_v32  ;;  %v6940_v44 = vmul.f32 %v11580_v55, %v11881_v32  ;;  %v370_v54 = vadd.f32 %v14842_v9, %v330_v43 }
0x2ff7   :  { %v403_v32 = vrot.slane %v388_v18, 6  ;;  %v453_v9 = vrot.slane %v437_v11, 7  ;;  %v7772_v18 = vld [vmem:[%s13917_s0 + $0xb0] ss:$8 sm:$0x3]  ;;  %v451_v43 = vrot.slane %v436_v46, 7 }
0x2ff8   :  { %v6948_v15 = vrot.slane %v6936_v19, 2  ;;  %v6949_v23 = vrot.slane %v6938_v40, 2  ;;  %v6954_v45 = vrot.slane %v6940_v44, 2  ;;  %v14844_v19 = vrot.slane %v11858_v49, 6 }
0x2ff9   :  { %v14845_v44 = vrot.slane %v11877_v57, 6  ;;  %v11927_v11 = vrot.slane %v7772_v18, %v8069_v13 }
0x2ffa   :  { %v6950_v62 = vsel %vm212_vm9, %v6948_v15, %v6949_v23  ;;  %v406_v40 = vsel %vm396_vm13, %v14844_v19, %v405_v26  ;;  %v14846_v19 = vrot.slane %v11894_v51, 7  ;;  %v11938_v15 = vrot.slane %v7772_v18, %v8071_v14 }
0x2ffb   :  { %6958 = vrot.lane.b32.xlu0 %v6950_v62, %s8011_s22  ;;  %v418_v21 = vadd.f32 %v406_v40, %v370_v54  ;;  %v404_v47 = vsel %vm396_vm13, %v14845_v44, %v403_v32  ;;  %v11930_v62 = vrot.slane %v7773_v16, %v8069_v13  ;;  %v6955_v54 = vsel %vm212_vm9, %v6949_v23, %v6954_v45  ;;  %v11948_v23 = vld [vmem:[%s13917_s0 + $0x12] ss:$8 sm:$0x3] }
0x2ffc   :  { %v417_v26 = vadd.f32 %v404_v47, %v369_v63  ;;  %v454_v40 = vsel %vm444_vm14, %v14846_v19, %v453_v9  ;;  %v11941_v32 = vrot.slane %v7773_v16, %v8071_v14  ;;  %v485_v44 = vmul.f32 %v11860_v53, %v11927_v11  ;;  %v7774_v63 = vld [vmem:[%s13917_s0 + $0xd6] ss:$8 sm:$0x3] }
0x2ffd   :  { %v466_v46 = vadd.f32 %v454_v40, %v418_v21  ;;  %v14847_v47 = vrot.slane %v11904_v59, 7  ;;  %v11957_v18 = vrot.slane %v7774_v63, %v8069_v13  ;;  %v11961_v21 = vmul.f32 %v11860_v53, %v11930_v62 }
0x2ffe   :  { %v6991_v19 = vrot.slane %v11948_v23, %v8071_v14  ;;  %v11969_v40 = vrot.slane %v7774_v63, %v8071_v14 }
0x2fff   :  { %6962 = vrot.lane.b32.xlu0 %v6955_v54, %s8011_s22  ;;  %v452_v9 = vsel %vm444_vm14, %v14847_v47, %v451_v43  ;;  %v484_v54 = vmul.f32 %v11580_v55, %v11938_v15  ;;  %v11973_v43 = vmul.f32 %v11580_v55, %v11941_v32  ;;  %v491_v47 = vadd.f32 %v485_v44, %v466_v46 }
0x3000   :  { %v465_v16 = vadd.f32 %v452_v9, %v417_v26  ;;  %v14244_v59 = vrot.slane %v11961_v21, 1  ;;  %v11978_v26 = vmul.f32 %v11860_v53, %v11957_v18  ;;  %v11984_v63 = vmul.f32 %v11580_v55, %v11969_v40 }
0x3001   :  { %14848 = vst [vmem:[#allocation589_spill] sm:$0xff] %v11973_v43 }
0x3002   :  { %14849 = vst [vmem:[#allocation590_spill] sm:$0xff] %v11978_v26  ;;  %v490_v9 = vadd.f32 %v484_v54, %v465_v16  ;;  %14850 = vst [vmem:[#allocation591_spill] sm:$0xff] %v11984_v63  ;;  %v538_v14 = vadd.f32 %v14244_v59, %v491_v47  ;;  %v14246_v46 = vrot.slane %v11978_v26, 2  ;;  %v14248_v16 = vrot.slane %v11984_v63, 2 }
0x3003   :  { %6966 = vrot.lane.b32.xlu0 %v6954_v45, %s8011_s22  ;;  %v14245_v45 = vrot.slane %v11973_v43, 1  ;;  %v699_v59 = vsel %vm629_vm7, %v8414_v8, %v8416_v17  ;;  %v900_v8 = vsel %vm629_vm7, %v8426_v30, %v8428_v4  ;;  %v1093_v30 = vsel %vm629_vm7, %v8517_v37, %v8519_v38 }
0x3004   :  { %v585_v54 = vadd.f32 %v14246_v46, %v538_v14  ;;  %v766_v14 = vsel %vm629_vm7, %v8418_v2, %v8420_v24  ;;  %v959_v2 = vsel %vm629_vm7, %v8434_v12, %v8436_v35  ;;  %v1150_v12 = vsel %vm629_vm7, %v8548_v3, %v8550_v28 }
0x3005   :  { %v537_v44 = vadd.f32 %v14245_v45, %v490_v9  ;;  %v1284_v37 = vsel %vm629_vm7, %v8616_v34, %v8620_v22  ;;  %v1343_v3 = vsel %vm1340_vm15, %v8647_v33, %v8653_v41  ;;  %v1477_v34 = vsel %vm1340_vm15, %v8718_v31, %v8727_v58 }
0x3006   :  { %v644_v47 = vadd.f32 %v8412_v5, %v585_v54  ;;  %v1544_v33 = vsel %vm1340_vm15, %v8754_v6, %v8763_v39 }
0x3007   :  { %6996 = vrot.lane.b32.xlu0 %v6991_v19, %s8012_s11  ;;  %v632_v19 = vsel %vm629_vm7, %v8410_v52, %v8412_v5  ;;  %v584_v51 = vadd.f32 %v14248_v16, %v537_v44  ;;  %v833_v52 = vsel %vm629_vm7, %v8422_v25, %v8424_v7  ;;  %v1026_v25 = vsel %vm629_vm7, %v8482_v61, %v8484_v27  ;;  %v14902_v16 = vld [vmem:[#allocation165_spill] sm:$0xff] }
0x3008   :  { %v711_v45 = vadd.f32 %v8416_v17, %v644_v47  ;;  %v1217_v61 = vsel %vm629_vm7, %v8581_v20, %v8585_v29  ;;  %v1410_v20 = vsel %vm1340_vm15, %v8682_v60, %v8691_v42  ;;  %v1611_v60 = vsel %vm1340_vm15, %v8790_v56, %v8803_v10 }
0x3009   :  { %v643_v9 = vadd.f32 %v632_v19, %v584_v51 }
0x300a   :  { %v778_v26 = vadd.f32 %v8420_v24, %v711_v45 }
0x300b   :  { %v710_v46 = vadd.f32 %v699_v59, %v643_v9 }
0x300c   :  { %v845_v5 = vadd.f32 %v8424_v7, %v778_v26 }
0x300d   :  { %v777_v44 = vadd.f32 %v766_v14, %v710_v46 }
0x300e   :  { %v912_v17 = vadd.f32 %v8428_v4, %v845_v5  ;;  %v14851_v5 = vld [vmem:[#allocation73_spill] sm:$0xff] }
0x300f   :  { %v844_v51 = vadd.f32 %v833_v52, %v777_v44  ;;  %v1670_v31 = vsel %vm1340_vm15, %v14851_v5, %v8840_v50  ;;  %v14870_v5 = vld [vmem:[#allocation111_spill] sm:$0xff] }
0x3010   :  { %v971_v24 = vadd.f32 %v8436_v35, %v912_v17  ;;  %v14853_v17 = vld [vmem:[#allocation78_spill] sm:$0xff] }
0x3011   :  { %v911_v59 = vadd.f32 %v900_v8, %v844_v51  ;;  %v14852_v51 = vld [vmem:[#allocation81_spill] sm:$0xff] }
0x3012   :  { %v1038_v7 = vadd.f32 %v8484_v27, %v971_v24  ;;  %v1737_v6 = vsel %vm1340_vm15, %v14853_v17, %v14852_v51  ;;  %v14855_v24 = vld [vmem:[#allocation84_spill] sm:$0xff] }
0x3013   :  { %v970_v45 = vadd.f32 %v959_v2, %v911_v59  ;;  %v14854_v59 = vld [vmem:[#allocation87_spill] sm:$0xff] }
0x3014   :  { %v1105_v4 = vadd.f32 %v8519_v38, %v1038_v7  ;;  %v1804_v56 = vsel %vm1340_vm15, %v14855_v24, %v14854_v59  ;;  %v14857_v7 = vld [vmem:[#allocation90_spill] sm:$0xff] }
0x3015   :  { %v1037_v26 = vadd.f32 %v1026_v25, %v970_v45  ;;  %v14856_v45 = vld [vmem:[#allocation93_spill] sm:$0xff]  ;;  %v14903_v24 = vld [vmem:[#allocation162_spill] sm:$0xff] }
0x3016   :  { %v1162_v35 = vadd.f32 %v8550_v28, %v1105_v4  ;;  %v14858_v4 = vld [vmem:[#allocation99_spill] sm:$0xff] }
0x3017   :  { %v1104_v46 = vadd.f32 %v1093_v30, %v1037_v26  ;;  %v1861_v30 = vsel %vm1340_vm15, %v14857_v7, %v14856_v45 }
0x3018   :  { %v1229_v27 = vadd.f32 %v8585_v29, %v1162_v35  ;;  %v14860_v35 = vld [vmem:[#allocation561_spill] sm:$0xff] }
0x3019   :  { %v1161_v54 = vadd.f32 %v1150_v12, %v1104_v46  ;;  %v14859_v12 = vld [vmem:[#allocation96_spill] sm:$0xff] }
0x301a   :  { %v1296_v38 = vadd.f32 %v8620_v22, %v1229_v27  ;;  %v1928_v46 = vsel %vm1340_vm15, %v14859_v12, %v14858_v4 }
0x301b   :  { %v1228_v19 = vadd.f32 %v1217_v61, %v1161_v54  ;;  %v12081_v61 = vmul.f32 %v11580_v55, %v14860_v35 }
0x301c   :  { %v1355_v47 = vadd.f32 %v8653_v41, %v1296_v38  ;;  %v14862_v38 = vld [vmem:[#allocation570_spill] sm:$0xff] }
0x301d   :  { %v1295_v28 = vadd.f32 %v1284_v37, %v1228_v19  ;;  %v14861_v37 = vld [vmem:[#allocation567_spill] sm:$0xff] }
0x301e   :  { %v1422_v9 = vadd.f32 %v8691_v42, %v1355_v47  ;;  %v12086_v19 = vmul.f32 %v11580_v55, %v14861_v37 }
0x301f   :  { %v1354_v29 = vadd.f32 %v1343_v3, %v1295_v28  ;;  %v12090_v3 = vmul.f32 %v11580_v55, %v14862_v38  ;;  %v14863_v28 = vld [vmem:[#allocation575_spill] sm:$0xff] }
0x3020   :  { %v1489_v14 = vadd.f32 %v8727_v58, %v1422_v9  ;;  %v12094_v47 = vmul.f32 %v11580_v55, %v14863_v28 }
0x3021   :  { %v1421_v22 = vadd.f32 %v1410_v20, %v1354_v29  ;;  %v14864_v20 = vld [vmem:[#allocation105_spill] sm:$0xff]  ;;  %v14865_v29 = vld [vmem:[#allocation102_spill] sm:$0xff] }
0x3022   :  { %v1556_v41 = vadd.f32 %v8763_v39, %v1489_v14  ;;  %v1995_v9 = vsel %vm1340_vm15, %v14865_v29, %v14864_v20 }
0x3023   :  { %v1488_v52 = vadd.f32 %v1477_v34, %v1421_v22  ;;  %v14866_v34 = vld [vmem:[#allocation560_spill] sm:$0xff]  ;;  %v14867_v22 = vld [vmem:[#allocation526_spill] sm:$0xff] }
0x3024   :  { %v1623_v42 = vadd.f32 %v8803_v10, %v1556_v41  ;;  %v12101_v14 = vmul.f32 %v14867_v22, %v14866_v34  ;;  %v14868_v41 = vld [vmem:[#allocation564_spill] sm:$0xff] }
0x3025   :  { %v1555_v44 = vadd.f32 %v1544_v33, %v1488_v52 }
0x3026   :  { %v1682_v58 = vadd.f32 %v8840_v50, %v1623_v42  ;;  %v168_v7 = vrot.slane %v12101_v14, 1 }
0x3027   :  { %v1622_v8 = vadd.f32 %v1611_v60, %v1555_v44  ;;  %v12106_v60 = vmul.f32 %v14867_v22, %v14868_v41  ;;  %v14869_v44 = vld [vmem:[#allocation568_spill] sm:$0xff] }
0x3028   :  { %v1749_v39 = vadd.f32 %v14852_v51, %v1682_v58  ;;  %v12110_v42 = vmul.f32 %v14867_v22, %v14869_v44  ;;  %v165_v58 = vrot.slane %v12081_v61, 1  ;;  %v14872_v51 = vld [vmem:[#allocation573_spill] sm:$0xff]  ;;  %v14877_v61 = vld [vmem:[#allocation123_spill] sm:$0xff] }
0x3029   :  { %v1681_v2 = vadd.f32 %v1670_v31, %v1622_v8  ;;  %v14871_v31 = vld [vmem:[#allocation108_spill] sm:$0xff]  ;;  %v12118_v17 = vmul.f32 %v14867_v22, %v14872_v51 }
0x302a   :  { %v1816_v10 = vadd.f32 %v14854_v59, %v1749_v39  ;;  %v2054_v8 = vsel %vm2051_vm0, %v14871_v31, %v14870_v5  ;;  %v14873_v39 = vld [vmem:[#allocation566_spill] sm:$0xff]  ;;  %v14880_v31 = vld [vmem:[#allocation129_spill] sm:$0xff] }
0x302b   :  { %v1748_v25 = vadd.f32 %v1737_v6, %v1681_v2  ;;  %v12123_v59 = vmul.f32 %v11580_v55, %v14873_v39 }
0x302c   :  { %v1873_v50 = vadd.f32 %v14856_v45, %v1816_v10  ;;  %v14875_v10 = vld [vmem:[#allocation114_spill] sm:$0xff] }
0x302d   :  { %v1815_v26 = vadd.f32 %v1804_v56, %v1748_v25  ;;  %v14874_v25 = vld [vmem:[#allocation117_spill] sm:$0xff] }
0x302e   :  { %v1940_v27 = vadd.f32 %v14858_v4, %v1873_v50  ;;  %v2121_v45 = vsel %vm2051_vm0, %v14875_v10, %v14874_v25  ;;  %v14876_v4 = vld [vmem:[#allocation563_spill] sm:$0xff] }
0x302f   :  { %v1872_v54 = vadd.f32 %v1861_v30, %v1815_v26  ;;  %v12135_v12 = vmul.f32 %v14867_v22, %v14876_v4 }
0x3030   :  { %v2007_v52 = vadd.f32 %v14864_v20, %v1940_v27  ;;  %v14879_v20 = vld [vmem:[#allocation548_spill] sm:$0xff] }
0x3031   :  { %v1939_v33 = vadd.f32 %v1928_v46, %v1872_v54  ;;  %v14878_v54 = vld [vmem:[#allocation120_spill] sm:$0xff]  ;;  %v12144_v29 = vmul.f32 %v14879_v20, %v14860_v35  ;;  %v12150_v22 = vmul.f32 %v14879_v20, %v14861_v37  ;;  %v14881_v35 = vld [vmem:[#allocation126_spill] sm:$0xff] }
0x3032   :  { %v2066_v2 = vadd.f32 %v14870_v5, %v2007_v52  ;;  %v2188_v27 = vsel %vm2051_vm0, %v14878_v54, %v14877_v61  ;;  %v12154_v52 = vmul.f32 %v14879_v20, %v14862_v38  ;;  %v12158_v5 = vmul.f32 %v14879_v20, %v14863_v28  ;;  %v14886_v54 = vld [vmem:[#allocation132_spill] sm:$0xff] }
0x3033   :  { %v2006_v6 = vadd.f32 %v1995_v9, %v1939_v33 }
0x3034   :  { %v2133_v50 = vadd.f32 %v14874_v25, %v2066_v2  ;;  %v14883_v25 = vld [vmem:[#allocation583_spill] sm:$0xff] }
0x3035   :  { %v2065_v26 = vadd.f32 %v2054_v8, %v2006_v6  ;;  %v2255_v8 = vsel %vm2051_vm0, %v14881_v35, %v14880_v31  ;;  %v14882_v6 = vld [vmem:[#allocation581_spill] sm:$0xff]  ;;  %v12169_v37 = vmul.f32 %v14879_v20, %v14883_v25 }
0x3036   :  { %v2200_v33 = vadd.f32 %v14877_v61, %v2133_v50  ;;  %v12165_v2 = vmul.f32 %v14879_v20, %v14882_v6  ;;  %v14885_v61 = vld [vmem:[#allocation135_spill] sm:$0xff]  ;;  %v14888_v25 = vld [vmem:[#allocation141_spill] sm:$0xff] }
0x3037   :  { %v2132_v14 = vadd.f32 %v2121_v45, %v2065_v26  ;;  %v14884_v45 = vld [vmem:[#allocation552_spill] sm:$0xff]  ;;  %v2322_v35 = vsel %vm2051_vm0, %v14886_v54, %v14885_v61  ;;  %v14889_v54 = vld [vmem:[#allocation138_spill] sm:$0xff] }
0x3038   :  { %v2267_v38 = vadd.f32 %v14880_v31, %v2200_v33  ;;  %v155_v26 = vmul.f32 %v14884_v45, %v14866_v34  ;;  %v12176_v28 = vmul.f32 %v14884_v45, %v14868_v41  ;;  %v12180_v50 = vmul.f32 %v14884_v45, %v14869_v44  ;;  %v14887_v31 = vld [vmem:[#allocation577_spill] sm:$0xff] }
0x3039   :  { %v2199_v10 = vadd.f32 %v2188_v27, %v2132_v14  ;;  %v12187_v27 = vmul.f32 %v14884_v45, %v14872_v51  ;;  %v12191_v14 = vmul.f32 %v14879_v20, %v11872_v1  ;;  %v166_v33 = vrot.slane %v12144_v29, 1 }
0x303a   :  { %v2334_v41 = vadd.f32 %v14885_v61, %v2267_v38  ;;  %v214_v44 = vrot.slane %v12150_v22, 2  ;;  %v12198_v6 = vmul.f32 %v14884_v45, %v14887_v31  ;;  %v2381_v51 = vsel %vm2051_vm0, %v14889_v54, %v14888_v25  ;;  %v14890_v61 = vld [vmem:[#allocation147_spill] sm:$0xff]  ;;  %v14891_v31 = vld [vmem:[#allocation144_spill] sm:$0xff]  ;;  %v14895_v38 = vld [vmem:[#allocation150_spill] sm:$0xff] }
0x303b   :  { %v2266_v34 = vadd.f32 %v2255_v8, %v2199_v10  ;;  %v12206_v1 = vmul.f32 %v14879_v20, %v11938_v15  ;;  %v169_v29 = vrot.slane %v155_v26, 1  ;;  %v217_v22 = vrot.slane %v12176_v28, 2  ;;  %v14893_v28 = vld [vmem:[#allocation580_spill] sm:$0xff]  ;;  %v14897_v26 = vld [vmem:[#allocation159_spill] sm:$0xff] }
0x303c   :  { %v2393_v10 = vadd.f32 %v14888_v25, %v2334_v41  ;;  %v2448_v9 = vsel %vm2051_vm0, %v14891_v31, %v14890_v61  ;;  %v12223_v41 = vmul.f32 %v14884_v45, %v14893_v28  ;;  %v14894_v25 = vld [vmem:[#allocation153_spill] sm:$0xff]  ;;  %v167_v54 = vsel %vm164_vm8, %v165_v58, %v166_v33 }
0x303d   :  { %v2333_v8 = vadd.f32 %v2322_v35, %v2266_v34  ;;  %v2515_v31 = vsel %vm2051_vm0, %v14895_v38, %v14894_v25  ;;  %v170_v28 = vsel %vm164_vm8, %v168_v7, %v169_v29  ;;  %v14898_v34 = vld [vmem:[#allocation156_spill] sm:$0xff]  ;;  %v12244_v58 = vmul.f32 %v14884_v45, %v11927_v11 }
0x303e   :  { %v2460_v35 = vadd.f32 %v14890_v61, %v2393_v10  ;;  %v2572_v55 = vsel %vm2051_vm0, %v14898_v34, %v14897_v26  ;;  %v181_v7 = vadd.f32 %v167_v54, %v12123_v59  ;;  %v130_v63 = vmul.f32 %v14884_v45, %v14876_v4 }
0x303f   :  { %v2392_v56 = vadd.f32 %v2381_v51, %v2333_v8  ;;  %v14896_v8 = vld [vmem:[#allocation585_spill] sm:$0xff]  ;;  %v129_v54 = vmul.f32 %v14879_v20, %v14873_v39  ;;  %v14911_v39 = vrot.slane %v12154_v52, 3 }
0x3040   :  { %v2527_v51 = vadd.f32 %v14894_v25, %v2460_v35  ;;  %v12233_v10 = vmul.f32 %v14884_v45, %v14896_v8  ;;  %v14900_v8 = vld [vmem:[#allocation562_spill] sm:$0xff] }
0x3041   :  { %v2459_v46 = vadd.f32 %v2448_v9, %v2392_v56  ;;  %v12248_v56 = vmul.f32 %v14879_v20, %v11941_v32  ;;  %v14901_v61 = vrot.slane %v14900_v8, 1  ;;  %v14908_v8 = vld [vmem:[#allocation168_spill] sm:$0xff] }
0x3042   :  { %v2584_v35 = vadd.f32 %v14897_v26, %v2527_v51 }
0x3043   :  { %v2526_v9 = vadd.f32 %v2515_v31, %v2459_v46  ;;  %v174_v34 = vsel %vm164_vm8, %v169_v29, %v14901_v61  ;;  %v14904_v31 = vrot.slane %v12086_v19, 2  ;;  %v14905_v29 = vld [vmem:[#allocation565_spill] sm:$0xff]  ;;  %v14910_v19 = vrot.slane %v12106_v60, 2 }
0x3044   :  { %v2651_v26 = vadd.f32 %v14902_v16, %v2584_v35  ;;  %v14906_v51 = vrot.slane %v14905_v29, 1  ;;  %v184_v4 = vadd.f32 %v174_v34, %v130_v63  ;;  %v14912_v35 = vrot.slane %v12090_v3, 3  ;;  %v14916_v34 = vld [vmem:[#allocation174_spill] sm:$0xff] }
0x3045   :  { %v12214_v30 = vpop.permute.xlu1 %6893  ;;  %v2583_v46 = vadd.f32 %v2572_v55, %v2526_v9  ;;  %v215_v59 = vsel %vm212_vm9, %v14904_v31, %v214_v44  ;;  %v218_v9 = vsel %vm212_vm9, %v14910_v19, %v217_v22  ;;  %v14913_v31 = vrot.slane %v12180_v50, 3  ;;  %v14917_v19 = vld [vmem:[#allocation571_spill] sm:$0xff] }
0x3046   :  { %14892 = vst [vmem:[#allocation73_spill] sm:$0xff] %v12214_v30  ;;  %v182_v30 = vadd.f32 %v170_v28, %v12135_v12  ;;  %v172_v61 = vsel %vm164_vm8, %v166_v33, %v14906_v51  ;;  %v263_v33 = vsel %vm260_vm10, %v14912_v35, %v14911_v39  ;;  %v14914_v29 = vrot.slane %v12110_v42, 3  ;;  %v14919_v35 = vld [vmem:[#allocation569_spill] sm:$0xff] }
0x3047   :  { %v183_v60 = vadd.f32 %v172_v61, %v129_v54  ;;  %v14918_v3 = vrot.slane %v14917_v19, 2  ;;  %v14920_v25 = vrot.slane %v14919_v35, 2  ;;  %v14923_v54 = vld [vmem:[#allocation586_spill] sm:$0xff]  ;;  %v14924_v61 = vld [vmem:[#allocation189_spill] sm:$0xff] }
0x3048   :  { %v266_v63 = vsel %vm260_vm10, %v14914_v29, %v14913_v31  ;;  %v14922_v31 = vld [vmem:[#allocation180_spill] sm:$0xff]  ;;  %v14927_v19 = vld [vmem:[#allocation574_spill] sm:$0xff] }
0x3049   :  { %v12240_v38 = vpop.permute.xlu1 %6897  ;;  %v220_v39 = vsel %vm212_vm9, %v214_v44, %v14918_v3  ;;  %v222_v42 = vsel %vm212_vm9, %v217_v22, %v14920_v25  ;;  %v14931_v3 = vld [vmem:[#allocation192_spill] sm:$0xff] }
0x304a   :  { %14899 = vst [vmem:[#allocation81_spill] sm:$0xff] %v12240_v38  ;;  %v2639_v38 = vsel %vm2051_vm0, %v14903_v24, %v14902_v16  ;;  %v14907_v24 = vld [vmem:[#allocation171_spill] sm:$0xff] }
0x304b   :  { %v2706_v12 = vsel %vm2051_vm0, %v14908_v8, %v14907_v24  ;;  %v2650_v55 = vadd.f32 %v2639_v38, %v2583_v46  ;;  %v2718_v16 = vadd.f32 %v14907_v24, %v2651_v26  ;;  %v14915_v38 = vld [vmem:[#allocation177_spill] sm:$0xff]  ;;  %v229_v26 = vadd.f32 %v215_v59, %v181_v7 }
0x304c   :  { %v2765_v46 = vsel %vm2762_vm1, %v14916_v34, %v14915_v38  ;;  %v230_v8 = vadd.f32 %v218_v9, %v182_v30  ;;  %v232_v34 = vadd.f32 %v222_v42, %v184_v4  ;;  %v14928_v4 = vrot.slane %v14927_v19, 3 }
0x304d   :  { %v12274_v28 = vpop.permute.xlu1 %6901  ;;  %v2717_v51 = vadd.f32 %v2706_v12, %v2650_v55  ;;  %v2777_v24 = vadd.f32 %v14915_v38, %v2718_v16  ;;  %v14925_v12 = vld [vmem:[#allocation186_spill] sm:$0xff]  ;;  %v14926_v16 = vld [vmem:[#allocation553_spill] sm:$0xff]  ;;  %v277_v9 = vadd.f32 %v263_v33, %v229_v26  ;;  %v231_v38 = vadd.f32 %v220_v39, %v183_v60 }
0x304e   :  { %14909 = vst [vmem:[#allocation78_spill] sm:$0xff] %v12274_v28  ;;  %v14921_v28 = vld [vmem:[#allocation183_spill] sm:$0xff]  ;;  %v2899_v44 = vsel %vm2762_vm1, %v14925_v12, %v14924_v61  ;;  %v14933_v33 = vrot.slane %v12094_v47, 4  ;;  %v14936_v12 = vld [vmem:[#allocation576_spill] sm:$0xff] }
0x304f   :  { %v2832_v29 = vsel %vm2762_vm1, %v14922_v31, %v14921_v28  ;;  %v2776_v7 = vadd.f32 %v2765_v46, %v2717_v51  ;;  %v2844_v59 = vadd.f32 %v14921_v28, %v2777_v24  ;;  %v14929_v46 = vrot.slane %v12180_v50, 3  ;;  %v14930_v24 = vld [vmem:[#allocation195_spill] sm:$0xff] }
0x3050   :  { %v2966_v35 = vsel %vm2762_vm1, %v14931_v3, %v14930_v24  ;;  %v14937_v47 = vrot.slane %v14936_v12, 3  ;;  %v446_v12 = vrot.slane %v12233_v10, 7  ;;  %v12391_v10 = vmul.f32 %v14879_v20, %v11969_v40 }
0x3051   :  { %v6932_v43 = vpop.permute.xlu1 %6931  ;;  %v270_v28 = vsel %vm260_vm10, %v14929_v46, %v14928_v4  ;;  %v2843_v51 = vadd.f32 %v2832_v29, %v2776_v7  ;;  %v14934_v29 = vld [vmem:[#allocation201_spill] sm:$0xff]  ;;  %v14935_v7 = vld [vmem:[#allocation198_spill] sm:$0xff]  ;;  %v6995_v20 = vrot.slane %v11948_v23, %v8069_v13 }
0x3052   :  { %v6933_v30 = vsel %vm6289_vm6, %v14923_v54, %v6932_v43  ;;  %v2911_v43 = vadd.f32 %v14924_v61, %v2844_v59  ;;  %v278_v54 = vadd.f32 %v266_v63, %v230_v8  ;;  %v280_v60 = vadd.f32 %v270_v28, %v232_v34  ;;  %v14941_v28 = vld [vmem:[#allocation207_spill] sm:$0xff] }
0x3053   :  { %v6937_v55 = vmul.f32 %v14884_v45, %v6933_v30  ;;  %v6939_v22 = vmul.f32 %v14926_v16, %v6933_v30  ;;  %v6941_v25 = vmul.f32 %v11860_v53, %v6933_v30  ;;  %v14932_v53 = vrot.slane %v12158_v5, 4 }
0x3054   :  { %v2910_v50 = vadd.f32 %v2899_v44, %v2843_v51  ;;  %v2978_v39 = vadd.f32 %v14930_v24, %v2911_v43  ;;  %v3033_v59 = vsel %vm2762_vm1, %v14935_v7, %v14934_v29  ;;  %v12333_v63 = vmul.f32 %v14884_v45, %v11930_v62  ;;  %v14943_v24 = vld [vmem:[#allocation579_spill] sm:$0xff] }
0x3055   :  { %v6951_v42 = vrot.slane %v6937_v55, 2  ;;  %v6952_v31 = vrot.slane %v6939_v22, 2  ;;  %v311_v26 = vsel %vm308_vm11, %v14933_v33, %v14932_v53  ;;  %v6956_v30 = vrot.slane %v6941_v25, 2  ;;  %v14946_v33 = vld [vmem:[#allocation213_spill] sm:$0xff] }
0x3056   :  { %v325_v8 = vadd.f32 %v311_v26, %v277_v9  ;;  %v14938_v55 = vrot.slane %v12154_v52, 3  ;;  %v2977_v44 = vadd.f32 %v2966_v35, %v2910_v50  ;;  %v14939_v22 = vrot.slane %v12187_v27, 4  ;;  %v14942_v9 = vld [vmem:[#allocation204_spill] sm:$0xff]  ;;  %v14947_v26 = vld [vmem:[#allocation210_spill] sm:$0xff] }
0x3057   :  { %v6953_v61 = vsel %vm212_vm9, %v6951_v42, %v6952_v31  ;;  %v14940_v25 = vrot.slane %v12118_v17, 4  ;;  %v3045_v46 = vadd.f32 %v14934_v29, %v2978_v39  ;;  %v3092_v51 = vsel %vm2762_vm1, %v14942_v9, %v14941_v28  ;;  %v14949_v27 = vld [vmem:[#allocation582_spill] sm:$0xff]  ;;  %v14957_v9 = vld [vmem:[#allocation225_spill] sm:$0xff] }
0x3058   :  { %v268_v34 = vsel %vm260_vm10, %v14938_v55, %v14937_v47  ;;  %6960 = vrot.lane.b32.xlu1 %v6953_v61, %s8011_s22  ;;  %v12352_v52 = vmul.f32 %v11656_v36, %v11941_v32  ;;  %v14944_v3 = vrot.slane %v14943_v24, 4  ;;  %v14945_v35 = vmov %v14939_v22  ;;  %v14952_v55 = vld [vmem:[#allocation219_spill] sm:$0xff] }
0x3059   :  { %v314_v19 = vsel %vm308_vm11, %v14940_v25, %v14939_v22  ;;  %v279_v4 = vadd.f32 %v268_v34, %v231_v38  ;;  %v3044_v42 = vadd.f32 %v3033_v59, %v2977_v44  ;;  %v3104_v38 = vadd.f32 %v14941_v28, %v3045_v46 }
0x305a   :  { %v326_v43 = vadd.f32 %v314_v19, %v278_v54  ;;  %v318_v17 = vsel %vm308_vm11, %v14945_v35, %v14944_v3  ;;  %v3159_v50 = vsel %vm2762_vm1, %v14947_v26, %v14946_v33  ;;  %v6957_v39 = vsel %vm212_vm9, %v6952_v31, %v6956_v30 }
0x305b   :  { %v328_v53 = vadd.f32 %v318_v17, %v280_v60  ;;  %v12366_v32 = vmul.f32 %v14926_v16, %v11930_v62  ;;  %v14948_v54 = vrot.slane %v12165_v2, 5  ;;  %v14950_v7 = vrot.slane %v14949_v27, 4  ;;  %v14953_v62 = vld [vmem:[#allocation216_spill] sm:$0xff] }
0x305c   :  { %v14951_v59 = vrot.slane %v12158_v5, 4  ;;  %v3103_v61 = vadd.f32 %v3092_v51, %v3044_v42  ;;  %6964 = vrot.lane.b32.xlu1 %v6957_v39, %s8011_s22  ;;  %v3171_v31 = vadd.f32 %v14946_v33, %v3104_v38  ;;  %v3226_v34 = vsel %vm2762_vm1, %v14953_v62, %v14952_v55  ;;  %v14958_v51 = vld [vmem:[#allocation222_spill] sm:$0xff]  ;;  %v14962_v38 = vld [vmem:[#allocation231_spill] sm:$0xff]  ;;  %v14963_v33 = vld [vmem:[#allocation228_spill] sm:$0xff] }
0x305d   :  { %v365_v29 = vadd.f32 %v14948_v54, %v325_v8  ;;  %v517_v8 = vrot.slane %v12248_v56, 1  ;;  %v14954_v44 = vrot.slane %v12198_v6, 5  ;;  %v14955_v5 = vrot.slane %v11843_v48, 5 }
0x305e   :  { %v316_v60 = vsel %vm308_vm11, %v14951_v59, %v14950_v7  ;;  %v3170_v46 = vadd.f32 %v3159_v50, %v3103_v61  ;;  %v3238_v28 = vadd.f32 %v14952_v55, %v3171_v31  ;;  %v3283_v56 = vsel %vm2762_vm1, %v14958_v51, %v14957_v9  ;;  %v14967_v7 = vld [vmem:[#allocation237_spill] sm:$0xff]  ;;  %v14968_v59 = vld [vmem:[#allocation234_spill] sm:$0xff] }
0x305f   :  { %v327_v47 = vadd.f32 %v316_v60, %v279_v4  ;;  %v366_v22 = vadd.f32 %v14954_v44, %v326_v43  ;;  %v14956_v25 = vmov %v14954_v44  ;;  %v14959_v43 = vrot.slane %v12169_v37, 6  ;;  %v14973_v44 = vld [vmem:[#allocation240_spill] sm:$0xff]  ;;  %v14974_v37 = vld [vmem:[#allocation587_spill] sm:$0xff]  ;;  %v14977_v51 = vld [vmem:[#allocation246_spill] sm:$0xff] }
0x3060   :  { %v358_v19 = vsel %vm352_vm12, %v14956_v25, %v14955_v5  ;;  %v14960_v48 = vrot.slane %v11867_v0, 5  ;;  %v14961_v6 = vmov %v14948_v54  ;;  %v3237_v35 = vadd.f32 %v3226_v34, %v3170_v46  ;;  %6968 = vrot.lane.b32.xlu1 %v6956_v30, %s8011_s22  ;;  %v14972_v34 = vld [vmem:[#allocation243_spill] sm:$0xff]  ;;  %s8013_s22 = smov 118  }
0x3061   :  { %v368_v4 = vadd.f32 %v358_v19, %v328_v53  ;;  %v413_v24 = vadd.f32 %v14959_v43, %v365_v29  ;;  %v12409_v17 = vmul.f32 %v14884_v45, %v11957_v18  ;;  %v3295_v53 = vadd.f32 %v14957_v9, %v3238_v28  ;;  %v14976_v9 = vld [vmem:[#allocation249_spill] sm:$0xff] }
0x3062   :  { %v356_v3 = vsel %vm352_vm12, %v14961_v6, %v14960_v48  ;;  %v3350_v0 = vsel %vm2762_vm1, %v14963_v33, %v14962_v38  ;;  %v518_v2 = vrot.slane %v12352_v52, 1  ;;  %v14964_v26 = vrot.slane %v12223_v41, 6 }
0x3063   :  { %v367_v42 = vadd.f32 %v356_v3, %v327_v47  ;;  %v14965_v30 = vrot.slane %v11858_v49, 6  ;;  %v3294_v45 = vadd.f32 %v3283_v56, %v3237_v35  ;;  %v520_v54 = vrot.slane %v12333_v63, 1 }
0x3064   :  { %v414_v50 = vadd.f32 %v14964_v26, %v366_v22  ;;  %v14966_v23 = vmov %v14964_v26  ;;  %v3362_v27 = vadd.f32 %v14962_v38, %v3295_v53  ;;  %v3417_v60 = vsel %vm2762_vm1, %v14968_v59, %v14967_v7  ;;  %6998 = vrot.lane.b32.xlu1 %v6995_v20, %s8012_s11  ;;  %v14982_v53 = vld [vmem:[#allocation252_spill] sm:$0xff] }
0x3065   :  { %v402_v39 = vsel %vm396_vm13, %v14966_v23, %v14965_v30  ;;  %v14969_v52 = vrot.slane %v12191_v14, 7  ;;  %v14970_v47 = vrot.slane %v11877_v57, 6  ;;  %v14971_v49 = vmov %v14959_v43 }
0x3066   :  { %v416_v29 = vadd.f32 %v402_v39, %v368_v4  ;;  %v3361_v31 = vadd.f32 %v3350_v0, %v3294_v45  ;;  %v521_v63 = vrot.slane %v12366_v32, 1  ;;  %v3429_v62 = vadd.f32 %v14967_v7, %v3362_v27  ;;  %v14985_v27 = vld [vmem:[#allocation267_spill] sm:$0xff]  ;;  %v14986_v7 = vld [vmem:[#allocation264_spill] sm:$0xff] }
0x3067   :  { %v461_v61 = vadd.f32 %v14969_v52, %v413_v24  ;;  %v400_v41 = vsel %vm396_vm13, %v14971_v49, %v14970_v47  ;;  %v3476_v22 = vsel %vm3473_vm2, %v14973_v44, %v14972_v34  ;;  %v554_v57 = vmul.f32 %v11656_v36, %v11969_v40  ;;  %v14978_v24 = vld [vmem:[#allocation588_spill] sm:$0xff]  ;;  %v14988_v49 = vld [vmem:[#allocation273_spill] sm:$0xff] }
0x3068   :  { %v415_v55 = vadd.f32 %v400_v41, %v367_v42  ;;  %v462_v5 = vadd.f32 %v446_v12, %v414_v50  ;;  %v14975_v25 = vrot.slane %v14974_v37, 7  ;;  %v3428_v46 = vadd.f32 %v3417_v60, %v3361_v31  ;;  %v14981_v42 = vld [vmem:[#allocation255_spill] sm:$0xff]  ;;  %v14989_v41 = vld [vmem:[#allocation270_spill] sm:$0xff] }
0x3069   :  { %v555_v4 = vmul.f32 %v14926_v16, %v11957_v18  ;;  %v3488_v28 = vadd.f32 %v14972_v34, %v3429_v62  ;;  %v3543_v56 = vsel %vm3473_vm2, %v14977_v51, %v14976_v9  ;;  %v564_v43 = vrot.slane %v12391_v10, 2  ;;  %v14990_v34 = vld [vmem:[#allocation589_spill] sm:$0xff]  ;;  %v14992_v37 = vld [vmem:[#allocation279_spill] sm:$0xff]  ;;  %v14996_v51 = vld [vmem:[#allocation590_spill] sm:$0xff] }
0x306a   :  { %v450_v19 = vsel %vm444_vm14, %v446_v12, %v14975_v25  ;;  %v486_v40 = vadd.f32 %v12206_v1, %v461_v61  ;;  %v14979_v48 = vrot.slane %v14978_v24, 7  ;;  %v14980_v6 = vmov %v14969_v52  ;;  %v14993_v25 = vld [vmem:[#allocation276_spill] sm:$0xff] }
0x306b   :  { %v464_v32 = vadd.f32 %v450_v19, %v416_v29  ;;  %v3487_v3 = vadd.f32 %v3476_v22, %v3428_v46  ;;  %v483_v18 = vmul.f32 %v14926_v16, %v11927_v11  ;;  %v3555_v20 = vadd.f32 %v14976_v9, %v3488_v28  ;;  %v14983_v11 = vld [vmem:[#allocation261_spill] sm:$0xff]  ;;  %v14984_v16 = vld [vmem:[#allocation258_spill] sm:$0xff]  ;;  %v14995_v28 = vld [vmem:[#allocation7_spill] sm:$0xff] }
0x306c   :  { %v448_v12 = vsel %vm444_vm14, %v14980_v6, %v14979_v48  ;;  %v3610_v38 = vsel %vm3473_vm2, %v14982_v53, %v14981_v42  ;;  %v519_v10 = vsel %vm164_vm8, %v517_v8, %v518_v2  ;;  %v567_v1 = vrot.slane %v12409_v17, 2  ;;  %v15003_v53 = vld [vmem:[#allocation9_spill] sm:$0xff] }
0x306d   :  { %v463_v35 = vadd.f32 %v448_v12, %v415_v55  ;;  %v487_v33 = vadd.f32 %v12244_v58, %v462_v5  ;;  %v3554_v14 = vadd.f32 %v3543_v56, %v3487_v3  ;;  %v482_v0 = vmul.f32 %v11656_v36, %v11938_v15  ;;  %v12479_v15 = vpop.permute.xlu0 %6958  ;;  %v15000_v3 = vld [vmem:[#allocation285_spill] sm:$0xff] }
0x306e   :  { %v489_v26 = vadd.f32 %v483_v18, %v464_v32  ;;  %v3622_v50 = vadd.f32 %v14981_v42, %v3555_v20  ;;  %v3677_v30 = vsel %vm3473_vm2, %v14984_v16, %v14983_v11  ;;  %v522_v23 = vsel %vm164_vm8, %v520_v54, %v521_v63  ;;  %v14994_v32 = vld [vmem:[#allocation8_spill] sm:$0xff]  ;;  %v15002_v42 = vld [vmem:[#allocation10_spill] sm:$0xff] }
0x306f   :  { %v565_v39 = vrot.slane %v554_v57, 2  ;;  %v568_v45 = vrot.slane %v555_v4, 2  ;;  %v3621_v8 = vadd.f32 %v3610_v38, %v3554_v14  ;;  %v533_v29 = vadd.f32 %v519_v10, %v486_v40  ;;  %v14998_v40 = vld [vmem:[#allocation591_spill] sm:$0xff]  ;;  %v15004_v10 = vld [vmem:[#allocation16_spill] sm:$0xff] }
0x3070   :  { %v488_v17 = vadd.f32 %v482_v0, %v463_v35  ;;  %v3689_v58 = vadd.f32 %v14983_v11, %v3622_v50  ;;  %v3744_v36 = vsel %vm3473_vm2, %v14986_v7, %v14985_v27  ;;  %v534_v59 = vadd.f32 %v522_v23, %v487_v33  ;;  %v15001_v35 = vld [vmem:[#allocation282_spill] sm:$0xff]  ;;  %v15006_v11 = vld [vmem:[#allocation291_spill] sm:$0xff]  ;;  %v15007_v16 = vld [vmem:[#allocation288_spill] sm:$0xff] }
0x3071   :  { %v14987_v60 = vrot.slane %v11961_v21, 1  ;;  %v3688_v61 = vadd.f32 %v3677_v30, %v3621_v8  ;;  %v3803_v31 = vsel %vm3473_vm2, %v14989_v41, %v14988_v49  ;;  %v566_v55 = vsel %vm212_vm9, %v564_v43, %v565_v39  ;;  %v12497_v46 = vpop.permute.xlu0 %6962  ;;  %v15008_v8 = vld [vmem:[#allocation20_spill] sm:$0xff] }
0x3072   :  { %v3756_v47 = vadd.f32 %v14985_v27, %v3689_v58  ;;  %v569_v62 = vsel %vm212_vm9, %v567_v1, %v568_v45  ;;  %v14991_v44 = vrot.slane %v14990_v34, 1  ;;  %v580_v21 = vadd.f32 %v566_v55, %v533_v29  ;;  %v15005_v1 = vld [vmem:[#allocation15_spill] sm:$0xff]  ;;  %v15014_v41 = vld [vmem:[#allocation24_spill] sm:$0xff] }
0x3073   :  { %v526_v52 = vsel %vm164_vm8, %v521_v63, %v14987_v60  ;;  %v3755_v57 = vadd.f32 %v3744_v36, %v3688_v61  ;;  %v3870_v19 = vsel %vm3473_vm2, %v14993_v25, %v14992_v37  ;;  %v581_v4 = vadd.f32 %v569_v62, %v534_v59  ;;  %v15009_v29 = vld [vmem:[#allocation19_spill] sm:$0xff]  ;;  %v15010_v59 = vld [vmem:[#allocation297_spill] sm:$0xff]  ;;  %v15011_v60 = vld [vmem:[#allocation294_spill] sm:$0xff] }
0x3074   :  { %v536_v54 = vadd.f32 %v526_v52, %v489_v26  ;;  %v524_v22 = vsel %vm164_vm8, %v518_v2, %v14991_v44  ;;  %v3815_v63 = vadd.f32 %v14988_v49, %v3756_v47  ;;  %v630_v9 = vsel %vm629_vm7, %v14995_v28, %v14994_v32  ;;  %v15012_v61 = vld [vmem:[#allocation18_spill] sm:$0xff] }
0x3075   :  { %v535_v5 = vadd.f32 %v524_v22, %v488_v17  ;;  %v14997_v56 = vrot.slane %v14996_v51, 2  ;;  %v3814_v43 = vadd.f32 %v3803_v31, %v3755_v57  ;;  %v14999_v24 = vrot.slane %v14998_v40, 2  ;;  %v12523_v23 = vpop.permute.xlu0 %6966  ;;  %v15015_v31 = vld [vmem:[#allocation23_spill] sm:$0xff]  ;;  %v15016_v44 = vld [vmem:[#allocation22_spill] sm:$0xff]  ;;  %v15017_v22 = vld [vmem:[#allocation21_spill] sm:$0xff] }
0x3076   :  { %v3882_v12 = vadd.f32 %v14992_v37, %v3815_v63  ;;  %v3937_v18 = vsel %vm3473_vm2, %v15001_v35, %v15000_v3  ;;  %v640_v20 = vadd.f32 %v14994_v32, %v581_v4  ;;  %v631_v38 = vsel %vm629_vm7, %v15003_v53, %v15002_v42  ;;  %v15019_v63 = vld [vmem:[#allocation300_spill] sm:$0xff]  ;;  %v15021_v4 = vld [vmem:[#allocation27_spill] sm:$0xff]  ;;  %v15022_v40 = vld [vmem:[#allocation309_spill] sm:$0xff] }
0x3077   :  { %v573_v2 = vsel %vm212_vm9, %v568_v45, %v14997_v56  ;;  %v571_v48 = vsel %vm212_vm9, %v565_v39, %v14999_v24  ;;  %v697_v33 = vsel %vm629_vm7, %v15005_v1, %v15004_v10  ;;  %v3881_v14 = vadd.f32 %v3870_v19, %v3814_v43  ;;  %v15020_v19 = vld [vmem:[#allocation28_spill] sm:$0xff]  ;;  %v15023_v24 = vld [vmem:[#allocation306_spill] sm:$0xff]  ;;  %v15025_v35 = vld [vmem:[#allocation25_spill] sm:$0xff] }
0x3078   :  { %v583_v6 = vadd.f32 %v573_v2, %v536_v54  ;;  %v639_v0 = vadd.f32 %v630_v9, %v580_v21  ;;  %v582_v26 = vadd.f32 %v571_v48, %v535_v5  ;;  %v3949_v50 = vadd.f32 %v15000_v3, %v3882_v12  ;;  %v15013_v54 = vld [vmem:[#allocation17_spill] sm:$0xff]  ;;  %v15018_v5 = vld [vmem:[#allocation303_spill] sm:$0xff]  ;;  %v12553_v9 = vld [vmem:[#allocation2] sm:$0xff] }
0x3079   :  { %v3994_v30 = vsel %vm3473_vm2, %v15007_v16, %v15006_v11  ;;  %v707_v45 = vadd.f32 %v15004_v10, %v640_v20  ;;  %v764_v17 = vsel %vm629_vm7, %v15009_v29, %v15008_v8  ;;  %v3948_v58 = vadd.f32 %v3937_v18, %v3881_v14  ;;  %v12548_v25 = vpop.permute.xlu0 %6996  ;;  %v15024_v3 = vld [vmem:[#allocation26_spill] sm:$0xff]  ;;  %v15026_v10 = vld [vmem:[#allocation315_spill] sm:$0xff]  ;;  %v15027_v1 = vld [vmem:[#allocation312_spill] sm:$0xff] }
0x307a   :  { %v642_v39 = vadd.f32 %v15002_v42, %v583_v6  ;;  %v641_v27 = vadd.f32 %v631_v38, %v582_v26  ;;  %v706_v7 = vadd.f32 %v697_v33, %v639_v0  ;;  %v4006_v36 = vadd.f32 %v15006_v11, %v3949_v50  ;;  %v12573_v50 = vld [vmem:[#allocation2 + $0x10] sm:$0xff]  ;;  %v15031_v29 = vld [vmem:[#allocation318_spill] sm:$0xff] }
0x307b   :  { %v4061_v52 = vsel %vm3473_vm2, %v15011_v60, %v15010_v59  ;;  %v698_v47 = vsel %vm629_vm7, %v15013_v54, %v15012_v61  ;;  %v774_v49 = vadd.f32 %v15008_v8, %v707_v45  ;;  %v831_v55 = vsel %vm629_vm7, %v15015_v31, %v15014_v41  ;;  %v15028_v16 = vld [vmem:[#allocation12_spill] sm:$0xff]  ;;  %v15030_v8 = vld [vmem:[#allocation321_spill] sm:$0xff]  ;;  %v12597_v31 = vld [vmem:[%s13917_s0 + $0x25] ss:$8 sm:$0x3] }
0x307c   :  { %v4005_v62 = vadd.f32 %v3994_v30, %v3948_v58  ;;  %v773_v34 = vadd.f32 %v764_v17, %v706_v7  ;;  %v765_v57 = vsel %vm629_vm7, %v15017_v22, %v15016_v44  ;;  %v4073_v21 = vadd.f32 %v15010_v59, %v4006_v36  ;;  %v15029_v30 = vld [vmem:[#allocation11_spill] sm:$0xff]  ;;  %v15032_v7 = vld [vmem:[#allocation30_spill] sm:$0xff]  ;;  %v15033_v36 = vld [vmem:[#allocation29_spill] sm:$0xff] }
0x307d   :  { %v4128_v37 = vsel %vm3473_vm2, %v15019_v63, %v15018_v5  ;;  %v898_v32 = vsel %vm629_vm7, %v15021_v4, %v15020_v19  ;;  %v7004_v51 = vmul.f32 %v12553_v9, %v12548_v25  ;;  %v841_v2 = vadd.f32 %v15014_v41, %v774_v49  ;;  %v15035_v49 = vld [vmem:[#allocation324_spill] sm:$0xff]  ;;  %v15039_v63 = vld [vmem:[#allocation13_spill] sm:$0xff] }
0x307e   :  { %v4072_v28 = vadd.f32 %v4061_v52, %v4005_v62  ;;  %v840_v56 = vadd.f32 %v831_v55, %v773_v34  ;;  %v4140_v43 = vadd.f32 %v15018_v5, %v4073_v21  ;;  %v4187_v48 = vsel %vm4184_vm3, %v15023_v24, %v15022_v40  ;;  %v15036_v62 = vld [vmem:[#allocation32_spill] sm:$0xff]  ;;  %v15037_v34 = vld [vmem:[#allocation31_spill] sm:$0xff]  ;;  %v15038_v5 = vld [vmem:[#allocation14_spill] sm:$0xff] }
0x307f   :  { %v708_v6 = vadd.f32 %v698_v47, %v641_v27  ;;  %v709_v12 = vadd.f32 %v15012_v61, %v642_v39  ;;  %v832_v18 = vsel %vm629_vm7, %v15025_v35, %v15024_v3  ;;  %7016 = vrot.lane.b32.xlu0 %v7004_v51, %s8013_s22  ;;  %v908_v53 = vadd.f32 %v15020_v19, %v841_v2  ;;  %v15034_v47 = vld [vmem:[#allocation327_spill] sm:$0xff]  ;;  %v15042_v2 = vld [vmem:[#allocation34_spill] sm:$0xff] }
0x3080   :  { %v4139_v20 = vadd.f32 %v4128_v37, %v4072_v28  ;;  %v907_v42 = vadd.f32 %v898_v32, %v840_v56  ;;  %v4199_v38 = vadd.f32 %v15022_v40, %v4140_v43  ;;  %v4254_v33 = vsel %vm4184_vm3, %v15027_v1, %v15026_v10  ;;  %v15040_v32 = vld [vmem:[#allocation333_spill] sm:$0xff]  ;;  %v15041_v28 = vld [vmem:[#allocation330_spill] sm:$0xff]  ;;  %v15046_v35 = vld [vmem:[#allocation35_spill] sm:$0xff] }
0x3081   :  { %v775_v14 = vadd.f32 %v765_v57, %v708_v6  ;;  %v776_v0 = vadd.f32 %v15016_v44, %v709_v12  ;;  %v7006_v11 = vmul.f32 %v12573_v50, %v12548_v25  ;;  %v957_v39 = vsel %vm629_vm7, %v15029_v30, %v15028_v16  ;;  %v12603_v57 = vld [vmem:[#allocation2 + $0x20] sm:$0xff]  ;;  %v15043_v43 = vld [vmem:[#allocation33_spill] sm:$0xff] }
0x3082   :  { %v4198_v26 = vadd.f32 %v4187_v48, %v4139_v20  ;;  %v4266_v45 = vadd.f32 %v15026_v10, %v4199_v38  ;;  %v4321_v17 = vsel %vm4184_vm3, %v15031_v29, %v15030_v8  ;;  %v899_v59 = vsel %vm629_vm7, %v15033_v36, %v15032_v7  ;;  %v15044_v48 = vld [vmem:[#allocation6_spill] sm:$0xff] }
0x3083   :  { %v842_v58 = vadd.f32 %v832_v18, %v775_v14  ;;  %v843_v27 = vadd.f32 %v15024_v3, %v776_v0  ;;  %7020 = vrot.lane.b32.xlu0 %v7006_v11, %s8013_s22  ;;  %v966_v52 = vadd.f32 %v957_v39, %v907_v42  ;;  %v967_v61 = vadd.f32 %v15028_v16, %v908_v53  ;;  %v15045_v3 = vld [vmem:[#allocation36_spill] sm:$0xff]  ;;  %v15047_v42 = vld [vmem:[#allocation339_spill] sm:$0xff]  ;;  %v15050_v11 = vld [vmem:[#allocation37_spill] sm:$0xff] }
0x3084   :  { %v4265_v60 = vadd.f32 %v4254_v33, %v4198_v26  ;;  %v4333_v54 = vadd.f32 %v15030_v8, %v4266_v45  ;;  %v4388_v41 = vsel %vm4184_vm3, %v15035_v49, %v15034_v47  ;;  %v958_v44 = vsel %vm629_vm7, %v15037_v34, %v15036_v62  ;;  %v15048_v53 = vld [vmem:[#allocation336_spill] sm:$0xff]  ;;  %v15049_v26 = vld [vmem:[#allocation38_spill] sm:$0xff]  ;;  %v15051_v39 = vld [vmem:[#allocation345_spill] sm:$0xff] }
0x3085   :  { %v910_v55 = vadd.f32 %v15032_v7, %v843_v27  ;;  %v7008_v21 = vmul.f32 %v12603_v57, %v12548_v25  ;;  %v1024_v37 = vsel %vm629_vm7, %v15039_v63, %v15038_v5  ;;  %v909_v19 = vadd.f32 %v899_v59, %v842_v58  ;;  %v15052_v45 = vld [vmem:[#allocation342_spill] sm:$0xff]  ;;  %v15053_v58 = vld [vmem:[#allocation40_spill] sm:$0xff]  ;;  %v15054_v27 = vld [vmem:[#allocation39_spill] sm:$0xff] }
0x3086   :  { %v4332_v22 = vadd.f32 %v4321_v17, %v4265_v60  ;;  %v4400_v4 = vadd.f32 %v15034_v47, %v4333_v54  ;;  %v4455_v51 = vsel %vm4184_vm3, %v15041_v28, %v15040_v32  ;;  %v1025_v40 = vsel %vm629_vm7, %v15043_v43, %v15042_v2  ;;  %v15055_v60 = vld [vmem:[#allocation42_spill] sm:$0xff]  ;;  %v15057_v47 = vld [vmem:[#allocation351_spill] sm:$0xff]  ;;  %v15058_v49 = vld [vmem:[#allocation348_spill] sm:$0xff] }
0x3087   :  { %v969_v56 = vadd.f32 %v15036_v62, %v910_v55  ;;  %7024 = vrot.lane.b32.xlu0 %v7008_v21, %s8013_s22  ;;  %v7050_v6 = vrot.slane %v12597_v31, %v15044_v48  ;;  %v968_v12 = vadd.f32 %v958_v44, %v909_v19  ;;  %v1091_v18 = vsel %vm629_vm7, %v15046_v35, %v15045_v3  ;;  %v15059_v34 = vld [vmem:[#allocation45_spill] sm:$0xff]  ;;  %v15060_v44 = vld [vmem:[#allocation43_spill] sm:$0xff]  ;;  %v15061_v63 = vld [vmem:[#allocation46_spill] sm:$0xff] }
0x3088   :  { %v4399_v24 = vadd.f32 %v4388_v41, %v4332_v22  ;;  %v4467_v20 = vadd.f32 %v15040_v32, %v4400_v4  ;;  %v4514_v38 = vsel %vm4184_vm3, %v15048_v53, %v15047_v42  ;;  %v1033_v10 = vadd.f32 %v1024_v37, %v966_v52  ;;  %v15056_v52 = vld [vmem:[#allocation41_spill] sm:$0xff]  ;;  %v15062_v37 = vld [vmem:[#allocation44_spill] sm:$0xff]  ;;  %v15064_v28 = vld [vmem:[#allocation354_spill] sm:$0xff] }
0x3089   :  { %v1034_v1 = vadd.f32 %v15038_v5, %v967_v61  ;;  %v1036_v33 = vadd.f32 %v15042_v2, %v969_v56  ;;  %v1035_v0 = vadd.f32 %v1025_v40, %v968_v12  ;;  %v1092_v16 = vsel %vm629_vm7, %v15050_v11, %v15049_v26  ;;  %v15063_v32 = vld [vmem:[#allocation357_spill] sm:$0xff]  ;;  %v15066_v12 = vld [vmem:[#allocation47_spill] sm:$0xff] }
0x308a   :  { %v4466_v14 = vadd.f32 %v4455_v51, %v4399_v24  ;;  %v4526_v30 = vadd.f32 %v15047_v42, %v4467_v20  ;;  %v4581_v8 = vsel %vm4184_vm3, %v15052_v45, %v15051_v39  ;;  %v1100_v29 = vadd.f32 %v1091_v18, %v1033_v10  ;;  %v15067_v18 = vld [vmem:[#allocation363_spill] sm:$0xff]  ;;  %v15068_v20 = vld [vmem:[#allocation360_spill] sm:$0xff]  ;;  %v15069_v10 = vld [vmem:[#allocation50_spill] sm:$0xff] }
0x308b   :  { %v1101_v17 = vadd.f32 %v15045_v3, %v1034_v1  ;;  %v1148_v7 = vsel %vm629_vm7, %v15054_v27, %v15053_v58  ;;  %7055 = vrot.lane.b32.xlu0 %v7050_v6, %s8012_s11  ;;  %v1103_v59 = vadd.f32 %v15049_v26, %v1036_v33  ;;  %v1149_v61 = vsel %vm629_vm7, %v15056_v52, %v15055_v60  ;;  %v15065_v6 = vld [vmem:[#allocation49_spill] sm:$0xff]  ;;  %v15070_v1 = vld [vmem:[#allocation48_spill] sm:$0xff]  ;;  %v15072_v11 = vld [vmem:[#allocation51_spill] sm:$0xff] }
0x308c   :  { %v4525_v36 = vadd.f32 %v4514_v38, %v4466_v14  ;;  %v4593_v54 = vadd.f32 %v15051_v39, %v4526_v30  ;;  %v4648_v41 = vsel %vm4184_vm3, %v15058_v49, %v15057_v47  ;;  %v1102_v55 = vadd.f32 %v1092_v16, %v1035_v0  ;;  %v15071_v26 = vld [vmem:[#allocation53_spill] sm:$0xff]  ;;  %v15074_v45 = vld [vmem:[#allocation366_spill] sm:$0xff]  ;;  %v15077_v52 = vld [vmem:[#allocation375_spill] sm:$0xff] }
0x308d   :  { %v1158_v62 = vadd.f32 %v15053_v58, %v1101_v17  ;;  %v1215_v22 = vsel %vm629_vm7, %v15060_v44, %v15059_v34  ;;  %v1157_v5 = vadd.f32 %v1148_v7, %v1100_v29  ;;  %v1216_v19 = vsel %vm629_vm7, %v15062_v37, %v15061_v63  ;;  %v15073_v39 = vld [vmem:[#allocation369_spill] sm:$0xff]  ;;  %v15075_v7 = vld [vmem:[#allocation54_spill] sm:$0xff] }
0x308e   :  { %v4592_v21 = vadd.f32 %v4581_v8, %v4525_v36  ;;  %v4660_v4 = vadd.f32 %v15057_v47, %v4593_v54  ;;  %v4705_v51 = vsel %vm4184_vm3, %v15064_v28, %v15063_v32  ;;  %v1159_v56 = vadd.f32 %v1149_v61, %v1102_v55  ;;  %v15076_v36 = vld [vmem:[#allocation52_spill] sm:$0xff]  ;;  %v15080_v55 = vld [vmem:[#allocation55_spill] sm:$0xff]  ;;  %v15083_v37 = vld [vmem:[#allocation381_spill] sm:$0xff] }
0x308f   :  { %v1160_v2 = vadd.f32 %v15055_v60, %v1103_v59  ;;  %v1225_v43 = vadd.f32 %v15059_v34, %v1158_v62  ;;  %v1224_v24 = vadd.f32 %v1215_v22, %v1157_v5  ;;  %v1282_v3 = vsel %vm629_vm7, %v15066_v12, %v15065_v6  ;;  %v15078_v61 = vld [vmem:[#allocation372_spill] sm:$0xff]  ;;  %v15081_v22 = vld [vmem:[#allocation58_spill] sm:$0xff] }
0x3090   :  { %v4659_v40 = vadd.f32 %v4648_v41, %v4592_v21  ;;  %v4717_v35 = vadd.f32 %v15063_v32, %v4660_v4  ;;  %v4772_v42 = vsel %vm4184_vm3, %v15068_v20, %v15067_v18  ;;  %v1226_v53 = vadd.f32 %v1216_v19, %v1159_v56  ;;  %v15079_v41 = vld [vmem:[#allocation57_spill] sm:$0xff]  ;;  %v15082_v21 = vld [vmem:[#allocation56_spill] sm:$0xff]  ;;  %v15084_v19 = vld [vmem:[#allocation378_spill] sm:$0xff] }
0x3091   :  { %v1227_v38 = vadd.f32 %v15061_v63, %v1160_v2  ;;  %v1283_v33 = vsel %vm629_vm7, %v15070_v1, %v15069_v10  ;;  %v1292_v0 = vadd.f32 %v15065_v6, %v1225_v43  ;;  %v1341_v16 = vsel %vm1340_vm15, %v15072_v11, %v15071_v26  ;;  %v15086_v56 = vld [vmem:[#allocation59_spill] sm:$0xff]  ;;  %v15088_v6 = vld [vmem:[#allocation60_spill] sm:$0xff]  ;;  %v15093_v11 = vld [vmem:[#allocation393_spill] sm:$0xff] }
0x3092   :  { %v4716_v14 = vadd.f32 %v4705_v51, %v4659_v40  ;;  %v4784_v30 = vadd.f32 %v15067_v18, %v4717_v35  ;;  %v4839_v8 = vsel %vm4184_vm3, %v15074_v45, %v15073_v39  ;;  %v1291_v29 = vadd.f32 %v1282_v3, %v1224_v24  ;;  %v15085_v51 = vld [vmem:[#allocation61_spill] sm:$0xff]  ;;  %v15087_v24 = vld [vmem:[#allocation62_spill] sm:$0xff]  ;;  %v15089_v35 = vld [vmem:[#allocation387_spill] sm:$0xff] }
0x3093   :  { %v1294_v17 = vadd.f32 %v15069_v10, %v1227_v38  ;;  %v1293_v27 = vadd.f32 %v1283_v33, %v1226_v53  ;;  %v1342_v59 = vsel %vm1340_vm15, %v15076_v36, %v15075_v7  ;;  %v4898_v54 = vsel %vm4895_vm4, %v15078_v61, %v15077_v52  ;;  %v15090_v18 = vld [vmem:[#allocation384_spill] sm:$0xff]  ;;  %v15091_v33 = vld [vmem:[#allocation65_spill] sm:$0xff]  ;;  %v15098_v36 = vld [vmem:[#allocation67_spill] sm:$0xff] }
0x3094   :  { %v4783_v58 = vadd.f32 %v4772_v42, %v4716_v14  ;;  %v4851_v60 = vadd.f32 %v15073_v39, %v4784_v30  ;;  %v1350_v47 = vadd.f32 %v1341_v16, %v1291_v29  ;;  %v1351_v49 = vadd.f32 %v15071_v26, %v1292_v0  ;;  %v15092_v14 = vld [vmem:[#allocation63_spill] sm:$0xff]  ;;  %v15094_v16 = vld [vmem:[#allocation390_spill] sm:$0xff]  ;;  %v15096_v29 = vld [vmem:[#allocation64_spill] sm:$0xff] }
0x3095   :  { %v1408_v62 = vsel %vm1340_vm15, %v15080_v55, %v15079_v41  ;;  %v1353_v44 = vadd.f32 %v15075_v7, %v1294_v17  ;;  %v1409_v5 = vsel %vm1340_vm15, %v15082_v21, %v15081_v22  ;;  %v4965_v4 = vsel %vm4895_vm4, %v15084_v19, %v15083_v37  ;;  %v15097_v7 = vld [vmem:[#allocation69_spill] sm:$0xff]  ;;  %v15100_v61 = vld [vmem:[#allocation396_spill] sm:$0xff]  ;;  %v15104_v21 = vld [vmem:[#allocation71_spill] sm:$0xff] }
0x3096   :  { %v4850_v34 = vadd.f32 %v4839_v8, %v4783_v58  ;;  %v4910_v63 = vadd.f32 %v15077_v52, %v4851_v60  ;;  %v1352_v32 = vadd.f32 %v1342_v59, %v1293_v27  ;;  %v1418_v28 = vadd.f32 %v15079_v41, %v1351_v49  ;;  %v15095_v8 = vld [vmem:[#allocation66_spill] sm:$0xff]  ;;  %v15099_v52 = vld [vmem:[#allocation399_spill] sm:$0xff]  ;;  %v15102_v55 = vld [vmem:[#allocation68_spill] sm:$0xff] }
0x3097   :  { %v1475_v2 = vsel %vm1340_vm15, %v15086_v56, %v15085_v51  ;;  %v1417_v40 = vadd.f32 %v1408_v62, %v1350_v47  ;;  %v1476_v12 = vsel %vm1340_vm15, %v15088_v6, %v15087_v24  ;;  %v5032_v20 = vsel %vm4895_vm4, %v15090_v18, %v15089_v35  ;;  %v15101_v41 = vld [vmem:[#allocation70_spill] sm:$0xff] }
0x3098   :  { %v4909_v43 = vadd.f32 %v4898_v54, %v4850_v34  ;;  %v4977_v3 = vadd.f32 %v15083_v37, %v4910_v63  ;;  %v1419_v42 = vadd.f32 %v1409_v5, %v1352_v32  ;;  %v1420_v53 = vadd.f32 %v15081_v22, %v1353_v44  ;;  %v15103_v22 = vld [vmem:[#allocation74_spill] sm:$0xff]  ;;  %v15105_v37 = vld [vmem:[#allocation405_spill] sm:$0xff] }
0x3099   :  { %v1485_v38 = vadd.f32 %v15085_v51, %v1418_v28  ;;  %v1484_v1 = vadd.f32 %v1475_v2, %v1417_v40  ;;  %v1542_v0 = vsel %vm1340_vm15, %v15092_v14, %v15091_v33  ;;  %v5099_v30 = vsel %vm4895_vm4, %v15094_v16, %v15093_v11  ;;  %v15106_v19 = vld [vmem:[#allocation402_spill] sm:$0xff]  ;;  %v15108_v40 = vld [vmem:[#allocation72_spill] sm:$0xff]  ;;  %v15114_v14 = vld [vmem:[#allocation77_spill] sm:$0xff] }
0x309a   :  { %v4976_v10 = vadd.f32 %v4965_v4, %v4909_v43  ;;  %v5044_v26 = vadd.f32 %v15089_v35, %v4977_v3  ;;  %v1486_v39 = vadd.f32 %v1476_v12, %v1419_v42  ;;  %v1487_v45 = vadd.f32 %v15087_v24, %v1420_v53  ;;  %v15107_v43 = vld [vmem:[#allocation75_spill] sm:$0xff]  ;;  %v15110_v3 = vld [vmem:[#allocation408_spill] sm:$0xff]  ;;  %v15116_v16 = vld [vmem:[#allocation414_spill] sm:$0xff] }
0x309b   :  { %v1543_v17 = vsel %vm1340_vm15, %v15096_v29, %v15095_v8  ;;  %v1552_v27 = vadd.f32 %v15091_v33, %v1485_v38  ;;  %v1609_v59 = vsel %vm1340_vm15, %v15098_v36, %v15097_v7  ;;  %v5166_v54 = vsel %vm4895_vm4, %v15100_v61, %v15099_v52  ;;  %v15109_v12 = vld [vmem:[#allocation411_spill] sm:$0xff]  ;;  %v15112_v53 = vld [vmem:[#allocation76_spill] sm:$0xff]  ;;  %v15118_v29 = vld [vmem:[#allocation82_spill] sm:$0xff] }
0x309c   :  { %v5043_v58 = vadd.f32 %v5032_v20, %v4976_v10  ;;  %v5111_v60 = vadd.f32 %v15093_v11, %v5044_v26  ;;  %v1551_v47 = vadd.f32 %v1542_v0, %v1484_v1  ;;  %v1554_v49 = vadd.f32 %v15095_v8, %v1487_v45  ;;  %v15111_v42 = vld [vmem:[#allocation79_spill] sm:$0xff]  ;;  %v15113_v33 = vld [vmem:[#allocation80_spill] sm:$0xff]  ;;  %v15115_v11 = vld [vmem:[#allocation417_spill] sm:$0xff] }
0x309d   :  { %v1610_v62 = vsel %vm1340_vm15, %v15102_v55, %v15101_v41  ;;  %v1553_v44 = vadd.f32 %v1543_v17, %v1486_v39  ;;  %v1668_v5 = vsel %vm1340_vm15, %v15104_v21, %v15103_v22  ;;  %v5225_v4 = vsel %vm4895_vm4, %v15106_v19, %v15105_v37  ;;  %v15117_v8 = vld [vmem:[#allocation85_spill] sm:$0xff]  ;;  %v15120_v36 = vld [vmem:[#allocation83_spill] sm:$0xff]  ;;  %v15122_v61 = vld [vmem:[#allocation420_spill] sm:$0xff] }
0x309e   :  { %v5110_v34 = vadd.f32 %v5099_v30, %v5043_v58  ;;  %v5178_v63 = vadd.f32 %v15099_v52, %v5111_v60  ;;  %v1618_v32 = vadd.f32 %v1609_v59, %v1551_v47  ;;  %v1619_v28 = vadd.f32 %v15097_v7, %v1552_v27  ;;  %v15119_v7 = vld [vmem:[#allocation86_spill] sm:$0xff]  ;;  %v15121_v52 = vld [vmem:[#allocation423_spill] sm:$0xff] }
0x309f   :  { %v1621_v51 = vadd.f32 %v15101_v41, %v1554_v49  ;;  %v1620_v2 = vadd.f32 %v1610_v62, %v1553_v44  ;;  %v1669_v24 = vsel %vm1340_vm15, %v15108_v40, %v15107_v43  ;;  %v5292_v35 = vsel %vm4895_vm4, %v15110_v3, %v15109_v12  ;;  %v15124_v44 = vld [vmem:[#allocation88_spill] sm:$0xff]  ;;  %v15130_v40 = vld [vmem:[#allocation94_spill] sm:$0xff] }
0x30a0   :  { %v5177_v56 = vadd.f32 %v5166_v54, %v5110_v34  ;;  %v5237_v6 = vadd.f32 %v15105_v37, %v5178_v63  ;;  %v1677_v18 = vadd.f32 %v1668_v5, %v1618_v32  ;;  %v1678_v20 = vadd.f32 %v15103_v22, %v1619_v28  ;;  %v15123_v34 = vld [vmem:[#allocation91_spill] sm:$0xff]  ;;  %v15125_v5 = vld [vmem:[#allocation429_spill] sm:$0xff]  ;;  %v15126_v63 = vld [vmem:[#allocation426_spill] sm:$0xff] }
0x30a1   :  { %v1735_v38 = vsel %vm1340_vm15, %v15112_v53, %v15111_v42  ;;  %v1680_v1 = vadd.f32 %v15107_v43, %v1621_v51  ;;  %v1736_v0 = vsel %vm1340_vm15, %v15114_v14, %v15113_v33  ;;  %v5359_v30 = vsel %vm4895_vm4, %v15116_v16, %v15115_v11  ;;  %v15127_v32 = vld [vmem:[#allocation92_spill] sm:$0xff]  ;;  %v15128_v28 = vld [vmem:[#allocation89_spill] sm:$0xff] }
0x30a2   :  { %v5236_v10 = vadd.f32 %v5225_v4, %v5177_v56  ;;  %v5304_v26 = vadd.f32 %v15109_v12, %v5237_v6  ;;  %v1679_v39 = vadd.f32 %v1669_v24, %v1620_v2  ;;  %v1745_v45 = vadd.f32 %v15111_v42, %v1678_v20  ;;  %v15129_v43 = vld [vmem:[#allocation97_spill] sm:$0xff]  ;;  %v15131_v12 = vld [vmem:[#allocation435_spill] sm:$0xff]  ;;  %v15132_v3 = vld [vmem:[#allocation432_spill] sm:$0xff] }
0x30a3   :  { %v1802_v17 = vsel %vm1340_vm15, %v15118_v29, %v15117_v8  ;;  %v1744_v27 = vadd.f32 %v1735_v38, %v1677_v18  ;;  %v1803_v59 = vsel %vm1340_vm15, %v15120_v36, %v15119_v7  ;;  %v5416_v54 = vsel %vm4895_vm4, %v15122_v61, %v15121_v52  ;;  %v15133_v38 = vld [vmem:[#allocation98_spill] sm:$0xff]  ;;  %v15135_v14 = vld [vmem:[#allocation441_spill] sm:$0xff]  ;;  %v15141_v36 = vld [vmem:[#allocation447_spill] sm:$0xff] }
0x30a4   :  { %v5303_v58 = vadd.f32 %v5292_v35, %v5236_v10  ;;  %v5371_v60 = vadd.f32 %v15115_v11, %v5304_v26  ;;  %v1746_v47 = vadd.f32 %v1736_v0, %v1679_v39  ;;  %v1747_v49 = vadd.f32 %v15113_v33, %v1680_v1  ;;  %v15134_v10 = vld [vmem:[#allocation95_spill] sm:$0xff]  ;;  %v15136_v0 = vld [vmem:[#allocation438_spill] sm:$0xff]  ;;  %v15138_v39 = vld [vmem:[#allocation100_spill] sm:$0xff] }
0x30a5   :  { %v1812_v41 = vadd.f32 %v15117_v8, %v1745_v45  ;;  %v1811_v62 = vadd.f32 %v1802_v17, %v1744_v27  ;;  %v1859_v22 = vsel %vm1340_vm15, %v15124_v44, %v15123_v34  ;;  %v5483_v37 = vsel %vm4895_vm4, %v15126_v63, %v15125_v5  ;;  %v15139_v17 = vld [vmem:[#allocation104_spill] sm:$0xff] }
0x30a6   :  { %v5370_v55 = vadd.f32 %v5359_v30, %v5303_v58  ;;  %v5428_v21 = vadd.f32 %v15121_v52, %v5371_v60  ;;  %v1813_v19 = vadd.f32 %v1803_v59, %v1746_v47  ;;  %v1814_v4 = vadd.f32 %v15119_v7, %v1747_v49  ;;  %v15137_v30 = vld [vmem:[#allocation103_spill] sm:$0xff]  ;;  %v15140_v58 = vld [vmem:[#allocation101_spill] sm:$0xff]  ;;  %v15142_v59 = vld [vmem:[#allocation444_spill] sm:$0xff] }
0x30a7   :  { %v1860_v51 = vsel %vm1340_vm15, %v15128_v28, %v15127_v32  ;;  %v1869_v2 = vadd.f32 %v15123_v34, %v1812_v41  ;;  %v1926_v24 = vsel %vm1340_vm15, %v15130_v40, %v15129_v43  ;;  %v5550_v35 = vsel %vm4895_vm4, %v15132_v3, %v15131_v12  ;;  %v15144_v47 = vld [vmem:[#allocation106_spill] sm:$0xff]  ;;  %v15146_v34 = vld [vmem:[#allocation107_spill] sm:$0xff] }
0x30a8   :  { %v5427_v56 = vadd.f32 %v5416_v54, %v5370_v55  ;;  %v5495_v6 = vadd.f32 %v15125_v5, %v5428_v21  ;;  %v1868_v18 = vadd.f32 %v1859_v22, %v1811_v62  ;;  %v1871_v20 = vadd.f32 %v15127_v32, %v1814_v4  ;;  %v15143_v54 = vld [vmem:[#allocation109_spill] sm:$0xff]  ;;  %v15145_v62 = vld [vmem:[#allocation110_spill] sm:$0xff]  ;;  %v15151_v40 = vld [vmem:[#allocation459_spill] sm:$0xff] }
0x30a9   :  { %v1870_v53 = vadd.f32 %v1860_v51, %v1813_v19  ;;  %v1927_v1 = vsel %vm1340_vm15, %v15134_v10, %v15133_v38  ;;  %v5609_v26 = vsel %vm5606_vm5, %v15136_v0, %v15135_v14  ;;  %v1936_v16 = vadd.f32 %v15129_v43, %v1869_v2  ;;  %v15147_v21 = vld [vmem:[#allocation453_spill] sm:$0xff]  ;;  %v15148_v5 = vld [vmem:[#allocation450_spill] sm:$0xff]  ;;  %v15149_v51 = vld [vmem:[#allocation115_spill] sm:$0xff] }
0x30aa   :  { %v5494_v42 = vadd.f32 %v5483_v37, %v5427_v56  ;;  %v5562_v33 = vadd.f32 %v15131_v12, %v5495_v6  ;;  %v1935_v11 = vadd.f32 %v1926_v24, %v1868_v18  ;;  %v1993_v45 = vsel %vm1340_vm15, %v15138_v39, %v15137_v30  ;;  %v15150_v56 = vld [vmem:[#allocation112_spill] sm:$0xff]  ;;  %v15154_v18 = vld [vmem:[#allocation113_spill] sm:$0xff]  ;;  %v15156_v10 = vld [vmem:[#allocation118_spill] sm:$0xff] }
0x30ab   :  { %v1938_v29 = vadd.f32 %v15133_v38, %v1871_v20  ;;  %v1994_v27 = vsel %vm1340_vm15, %v15140_v58, %v15139_v17  ;;  %v5676_v60 = vsel %vm5606_vm5, %v15142_v59, %v15141_v36  ;;  %v1937_v52 = vadd.f32 %v1927_v1, %v1870_v53  ;;  %v15152_v24 = vld [vmem:[#allocation456_spill] sm:$0xff]  ;;  %v15155_v38 = vld [vmem:[#allocation121_spill] sm:$0xff]  ;;  %v15158_v0 = vld [vmem:[#allocation462_spill] sm:$0xff] }
0x30ac   :  { %v5561_v8 = vadd.f32 %v5550_v35, %v5494_v42  ;;  %v5621_v7 = vadd.f32 %v15135_v14, %v5562_v33  ;;  %v2003_v61 = vadd.f32 %v15137_v30, %v1936_v16  ;;  %v2052_v49 = vsel %vm2051_vm0, %v15144_v47, %v15143_v54  ;;  %v15153_v35 = vld [vmem:[#allocation116_spill] sm:$0xff]  ;;  %v15157_v14 = vld [vmem:[#allocation465_spill] sm:$0xff]  ;;  %v15159_v30 = vld [vmem:[#allocation122_spill] sm:$0xff] }
0x30ad   :  { %v2002_v55 = vadd.f32 %v1993_v45, %v1935_v11  ;;  %v2053_v44 = vsel %vm2051_vm0, %v15146_v34, %v15145_v62  ;;  %v5743_v63 = vsel %vm5606_vm5, %v15148_v5, %v15147_v21  ;;  %v2004_v37 = vadd.f32 %v1994_v27, %v1937_v52  ;;  %v15160_v39 = vld [vmem:[#allocation119_spill] sm:$0xff]  ;;  %v15162_v58 = vld [vmem:[#allocation124_spill] sm:$0xff] }
0x30ae   :  { %v5620_v41 = vadd.f32 %v5609_v26, %v5561_v8  ;;  %v5688_v22 = vadd.f32 %v15141_v36, %v5621_v7  ;;  %v2005_v19 = vadd.f32 %v15139_v17, %v1938_v29  ;;  %v2062_v4 = vadd.f32 %v15143_v54, %v2003_v61  ;;  %v15161_v17 = vld [vmem:[#allocation127_spill] sm:$0xff]  ;;  %v15164_v59 = vld [vmem:[#allocation468_spill] sm:$0xff] }
0x30af   :  { %v2061_v28 = vadd.f32 %v2052_v49, %v2002_v55  ;;  %v2119_v2 = vsel %vm2051_vm0, %v15150_v56, %v15149_v51  ;;  %v5810_v6 = vsel %vm5606_vm5, %v15152_v24, %v15151_v40  ;;  %v2063_v12 = vadd.f32 %v2053_v44, %v2004_v37  ;;  %v15163_v36 = vld [vmem:[#allocation471_spill] sm:$0xff]  ;;  %v15166_v55 = vld [vmem:[#allocation125_spill] sm:$0xff]  ;;  %v15174_v24 = vld [vmem:[#allocation480_spill] sm:$0xff] }
0x30b0   :  { %v5687_v32 = vadd.f32 %v5676_v60, %v5620_v41  ;;  %v5755_v43 = vadd.f32 %v15147_v21, %v5688_v22  ;;  %v2064_v3 = vadd.f32 %v15145_v62, %v2005_v19  ;;  %v2120_v20 = vsel %vm2051_vm0, %v15154_v18, %v15153_v35  ;;  %v15165_v41 = vld [vmem:[#allocation128_spill] sm:$0xff]  ;;  %v15167_v44 = vld [vmem:[#allocation477_spill] sm:$0xff]  ;;  %v15168_v22 = vld [vmem:[#allocation474_spill] sm:$0xff] }
0x30b1   :  { %v2129_v53 = vadd.f32 %v15149_v51, %v2062_v4  ;;  %v2186_v1 = vsel %vm2051_vm0, %v15156_v10, %v15155_v38  ;;  %v5877_v26 = vsel %vm5606_vm5, %v15158_v0, %v15157_v14  ;;  %v2128_v11 = vadd.f32 %v2119_v2, %v2061_v28  ;;  %v15169_v37 = vld [vmem:[#allocation133_spill] sm:$0xff]  ;;  %v15170_v19 = vld [vmem:[#allocation130_spill] sm:$0xff]  ;;  %v15172_v56 = vld [vmem:[#allocation131_spill] sm:$0xff] }
0x30b2   :  { %v5754_v42 = vadd.f32 %v5743_v63, %v5687_v32  ;;  %v5822_v33 = vadd.f32 %v15151_v40, %v5755_v43  ;;  %v2131_v16 = vadd.f32 %v15153_v35, %v2064_v3  ;;  %v2187_v45 = vsel %vm2051_vm0, %v15160_v39, %v15159_v30  ;;  %v15171_v51 = vld [vmem:[#allocation134_spill] sm:$0xff]  ;;  %v15173_v40 = vld [vmem:[#allocation483_spill] sm:$0xff]  ;;  %v15176_v18 = vld [vmem:[#allocation136_spill] sm:$0xff] }
0x30b3   :  { %v2130_v29 = vadd.f32 %v2120_v20, %v2063_v12  ;;  %v2253_v27 = vsel %vm2051_vm0, %v15162_v58, %v15161_v17  ;;  %v5936_v60 = vsel %vm5606_vm5, %v15164_v59, %v15163_v36  ;;  %v2195_v52 = vadd.f32 %v2186_v1, %v2128_v11  ;;  %v15175_v35 = vld [vmem:[#allocation139_spill] sm:$0xff]  ;;  %v15178_v10 = vld [vmem:[#allocation137_spill] sm:$0xff]  ;;  %v15180_v0 = vld [vmem:[#allocation486_spill] sm:$0xff] }
0x30b4   :  { %v5821_v8 = vadd.f32 %v5810_v6, %v5754_v42  ;;  %v5889_v7 = vadd.f32 %v15157_v14, %v5822_v33  ;;  %v2196_v61 = vadd.f32 %v15155_v38, %v2129_v53  ;;  %v2198_v54 = vadd.f32 %v15159_v30, %v2131_v16  ;;  %v15177_v38 = vld [vmem:[#allocation140_spill] sm:$0xff]  ;;  %v15179_v14 = vld [vmem:[#allocation489_spill] sm:$0xff] }
0x30b5   :  { %v2197_v49 = vadd.f32 %v2187_v45, %v2130_v29  ;;  %v2254_v62 = vsel %vm2051_vm0, %v15166_v55, %v15165_v41  ;;  %v6003_v21 = vsel %vm5606_vm5, %v15168_v22, %v15167_v44  ;;  %v2262_v5 = vadd.f32 %v2253_v27, %v2195_v52  ;;  %v15182_v29 = vld [vmem:[#allocation142_spill] sm:$0xff]  ;;  %v15183_v27 = vld [vmem:[#allocation495_spill] sm:$0xff]  ;;  %v15188_v55 = vld [vmem:[#allocation148_spill] sm:$0xff] }
0x30b6   :  { %v5888_v47 = vadd.f32 %v5877_v26, %v5821_v8  ;;  %v5948_v34 = vadd.f32 %v15163_v36, %v5889_v7  ;;  %v2263_v63 = vadd.f32 %v15161_v17, %v2196_v61  ;;  %v2320_v4 = vsel %vm2051_vm0, %v15170_v19, %v15169_v37  ;;  %v15181_v8 = vld [vmem:[#allocation145_spill] sm:$0xff]  ;;  %v15184_v7 = vld [vmem:[#allocation492_spill] sm:$0xff]  ;;  %v15185_v52 = vld [vmem:[#allocation146_spill] sm:$0xff] }
0x30b7   :  { %v2265_v28 = vadd.f32 %v15165_v41, %v2198_v54  ;;  %v2321_v2 = vsel %vm2051_vm0, %v15172_v56, %v15171_v51  ;;  %v6070_v6 = vsel %vm5606_vm5, %v15174_v24, %v15173_v40  ;;  %v2264_v12 = vadd.f32 %v2254_v62, %v2197_v49  ;;  %v15186_v61 = vld [vmem:[#allocation143_spill] sm:$0xff]  ;;  %v15190_v22 = vld [vmem:[#allocation498_spill] sm:$0xff] }
0x30b8   :  { %v5947_v32 = vadd.f32 %v5936_v60, %v5888_v47  ;;  %v6015_v43 = vadd.f32 %v15167_v44, %v5948_v34  ;;  %v2330_v3 = vadd.f32 %v15169_v37, %v2263_v63  ;;  %v2379_v20 = vsel %vm2051_vm0, %v15176_v18, %v15175_v35  ;;  %v15187_v41 = vld [vmem:[#allocation151_spill] sm:$0xff]  ;;  %v15189_v44 = vld [vmem:[#allocation501_spill] sm:$0xff] }
0x30b9   :  { %v2329_v53 = vadd.f32 %v2320_v4, %v2262_v5  ;;  %v2380_v1 = vsel %vm2051_vm0, %v15178_v10, %v15177_v38  ;;  %v6127_v26 = vsel %vm5606_vm5, %v15180_v0, %v15179_v14  ;;  %v2331_v11 = vadd.f32 %v2321_v2, %v2264_v12  ;;  %v15191_v4 = vld [vmem:[#allocation152_spill] sm:$0xff]  ;;  %v15193_v56 = vld [vmem:[#allocation507_spill] sm:$0xff]  ;;  %v15196_v12 = vld [vmem:[#allocation154_spill] sm:$0xff] }
0x30ba   :  { %v6014_v42 = vadd.f32 %v6003_v21, %v5947_v32  ;;  %v6082_v33 = vadd.f32 %v15173_v40, %v6015_v43  ;;  %v2332_v16 = vadd.f32 %v15171_v51, %v2265_v28  ;;  %v2389_v30 = vadd.f32 %v15175_v35, %v2330_v3  ;;  %v15192_v32 = vld [vmem:[#allocation149_spill] sm:$0xff]  ;;  %v15194_v2 = vld [vmem:[#allocation504_spill] sm:$0xff] }
0x30bb   :  { %v2388_v45 = vadd.f32 %v2379_v20, %v2329_v53  ;;  %v2446_v17 = vsel %vm2051_vm0, %v15182_v29, %v15181_v8  ;;  %v6194_v36 = vsel %vm5606_vm5, %v15184_v7, %v15183_v27  ;;  %v2390_v59 = vadd.f32 %v2380_v1, %v2331_v11  ;;  %v15197_v20 = vld [vmem:[#allocation158_spill] sm:$0xff]  ;;  %v15199_v10 = vld [vmem:[#allocation513_spill] sm:$0xff]  ;;  %v15202_v11 = vld [vmem:[#allocation160_spill] sm:$0xff] }
0x30bc   :  { %v6081_v39 = vadd.f32 %v6070_v6, %v6014_v42  ;;  %v6139_v58 = vadd.f32 %v15179_v14, %v6082_v33  ;;  %v2391_v60 = vadd.f32 %v15177_v38, %v2332_v16  ;;  %v2447_v54 = vsel %vm2051_vm0, %v15186_v61, %v15185_v52  ;;  %v15195_v6 = vld [vmem:[#allocation157_spill] sm:$0xff]  ;;  %v15198_v42 = vld [vmem:[#allocation155_spill] sm:$0xff]  ;;  %v15200_v1 = vld [vmem:[#allocation510_spill] sm:$0xff] }
0x30bd   :  { %v2456_v49 = vadd.f32 %v15181_v8, %v2389_v30  ;;  %v2513_v62 = vsel %vm2051_vm0, %v15188_v55, %v15187_v41  ;;  %v6261_v21 = vsel %vm5606_vm5, %v15190_v22, %v15189_v44  ;;  %v2455_v5 = vadd.f32 %v2446_v17, %v2388_v45  ;;  %v15203_v45 = vld [vmem:[#allocation164_spill] sm:$0xff]  ;;  %v15204_v8 = vld [vmem:[#allocation161_spill] sm:$0xff] }
0x30be   :  { %v6138_v47 = vadd.f32 %v6127_v26, %v6081_v39  ;;  %v6206_v34 = vadd.f32 %v15183_v27, %v6139_v58  ;;  %v2458_v63 = vadd.f32 %v15185_v52, %v2391_v60  ;;  %vm6317_vm6 = vcmask 973824   ;;  %v15201_v26 = vld [vmem:[#allocation163_spill] sm:$0xff]  ;;  %v15206_v27 = vld [vmem:[#allocation516_spill] sm:$0xff]  ;;  %v15209_v55 = vld [vmem:[#allocation525_spill] sm:$0xff] }
0x30bf   :  { %v2457_v19 = vadd.f32 %v2447_v54, %v2390_v59  ;;  %v2514_v28 = vsel %vm2051_vm0, %v15192_v32, %v15191_v4  ;;  %v6320_v43 = vsel %vm6317_vm6, %v15194_v2, %v15193_v56  ;;  %v2522_v40 = vadd.f32 %v2513_v62, %v2455_v5  ;;  %v15205_v58 = vld [vmem:[#allocation519_spill] sm:$0xff]  ;;  %v15207_v54 = vld [vmem:[#allocation169_spill] sm:$0xff]  ;;  %v15210_v62 = vld [vmem:[#allocation522_spill] sm:$0xff] }
0x30c0   :  { %v6205_v37 = vadd.f32 %v6194_v36, %v6138_v47  ;;  %v6273_v51 = vadd.f32 %v15189_v44, %v6206_v34  ;;  %v2523_v24 = vadd.f32 %v15187_v41, %v2456_v49  ;;  %v2570_v3 = vsel %vm2051_vm0, %v15196_v12, %v15195_v6  ;;  %v15208_v47 = vld [vmem:[#allocation166_spill] sm:$0xff]  ;;  %v15212_v5 = vld [vmem:[#allocation167_spill] sm:$0xff]  ;;  %v15214_v32 = vld [vmem:[#allocation172_spill] sm:$0xff] }
0x30c1   :  { %v2525_v18 = vadd.f32 %v15191_v4, %v2458_v63  ;;  %v2571_v53 = vsel %vm2051_vm0, %v15198_v42, %v15197_v20  ;;  %v6387_v33 = vsel %vm6317_vm6, %v15200_v1, %v15199_v10  ;;  %v2524_v14 = vadd.f32 %v2514_v28, %v2457_v19  ;;  %v15213_v4 = vld [vmem:[#allocation175_spill] sm:$0xff]  ;;  %v15216_v2 = vld [vmem:[#allocation529_spill] sm:$0xff]  ;;  %v15220_v42 = vld [vmem:[#allocation178_spill] sm:$0xff] }
0x30c2   :  { %v6272_v35 = vadd.f32 %v6261_v21, %v6205_v37  ;;  %v6332_v38 = vadd.f32 %v15193_v56, %v6273_v51  ;;  %v2580_v0 = vadd.f32 %v15195_v6, %v2523_v24  ;;  %v2637_v16 = vsel %vm2051_vm0, %v15202_v11, %v15201_v26  ;;  %v15211_v21 = vld [vmem:[#allocation170_spill] sm:$0xff]  ;;  %v15215_v56 = vld [vmem:[#allocation532_spill] sm:$0xff]  ;;  %v15218_v12 = vld [vmem:[#allocation173_spill] sm:$0xff] }
0x30c3   :  { %v2579_v39 = vadd.f32 %v2570_v3, %v2522_v40  ;;  %v2638_v29 = vsel %vm2051_vm0, %v15204_v8, %v15203_v45  ;;  %v6454_v7 = vsel %vm6317_vm6, %v15206_v27, %v15205_v58  ;;  %v2581_v36 = vadd.f32 %v2571_v53, %v2524_v14  ;;  %v15217_v6 = vld [vmem:[#allocation176_spill] sm:$0xff]  ;;  %v15222_v1 = vld [vmem:[#allocation535_spill] sm:$0xff] }
0x30c4   :  { %v6331_v30 = vadd.f32 %v6320_v43, %v6272_v35  ;;  %v6399_v17 = vadd.f32 %v15199_v10, %v6332_v38  ;;  %v2582_v59 = vadd.f32 %v15197_v20, %v2525_v18  ;;  %v2647_v60 = vadd.f32 %v15201_v26, %v2580_v0  ;;  %v15219_v20 = vld [vmem:[#allocation181_spill] sm:$0xff]  ;;  %v15221_v10 = vld [vmem:[#allocation538_spill] sm:$0xff]  ;;  %v15224_v11 = vld [vmem:[#allocation179_spill] sm:$0xff] }
0x30c5   :  { %v2646_v61 = vadd.f32 %v2637_v16, %v2579_v39  ;;  %v2704_v49 = vsel %vm2051_vm0, %v15208_v47, %v15207_v54  ;;  %v6521_v34 = vsel %vm6317_vm6, %v15210_v62, %v15209_v55  ;;  %v2648_v44 = vadd.f32 %v2638_v29, %v2581_v36  ;;  %v15223_v26 = vld [vmem:[#allocation182_spill] sm:$0xff]  ;;  %v15225_v29 = vld [vmem:[#allocation544_spill] sm:$0xff]  ;;  %v15227_v36 = vld [vmem:[#allocation187_spill] sm:$0xff] }
0x30c6   :  { %v6398_v52 = vadd.f32 %v6387_v33, %v6331_v30  ;;  %v6466_v41 = vadd.f32 %v15205_v58, %v6399_v17  ;;  %v2649_v22 = vadd.f32 %v15203_v45, %v2582_v59  ;;  %v2705_v63 = vsel %vm2051_vm0, %v15212_v5, %v15211_v21  ;;  %v15226_v17 = vld [vmem:[#allocation541_spill] sm:$0xff]  ;;  %v15228_v59 = vld [vmem:[#allocation184_spill] sm:$0xff] }
0x30c7   :  { %v2714_v19 = vadd.f32 %v15207_v54, %v2647_v60  ;;  %v2763_v28 = vsel %vm2762_vm1, %v15214_v32, %v15213_v4  ;;  %v6588_v43 = vsel %vm6317_vm6, %v15216_v2, %v15215_v56  ;;  %v2713_v40 = vadd.f32 %v2704_v49, %v2646_v61  ;;  %v15233_v5 = vld [vmem:[#allocation193_spill] sm:$0xff] }
0x30c8   :  { %v6465_v37 = vadd.f32 %v6454_v7, %v6398_v52  ;;  %v6533_v51 = vadd.f32 %v15209_v55, %v6466_v41  ;;  %v2716_v24 = vadd.f32 %v15211_v21, %v2649_v22  ;;  %v2764_v3 = vsel %vm2762_vm1, %v15218_v12, %v15217_v6  ;;  %v15229_v41 = vld [vmem:[#allocation551_spill] sm:$0xff]  ;;  %v15232_v22 = vld [vmem:[#allocation185_spill] sm:$0xff] }
0x30c9   :  { %v2715_v18 = vadd.f32 %v2705_v63, %v2648_v44  ;;  %v2830_v53 = vsel %vm2762_vm1, %v15220_v42, %v15219_v20  ;;  %v6647_v33 = vsel %vm6317_vm6, %v15222_v1, %v15221_v10  ;;  %v2772_v14 = vadd.f32 %v2763_v28, %v2713_v40  ;;  %v15230_v55 = vld [vmem:[#allocation547_spill] sm:$0xff]  ;;  %v15231_v44 = vld [vmem:[#allocation188_spill] sm:$0xff]  ;;  %v15234_v63 = vld [vmem:[#allocation190_spill] sm:$0xff] }
0x30ca   :  { %v6532_v35 = vadd.f32 %v6521_v34, %v6465_v37  ;;  %v6600_v38 = vadd.f32 %v15215_v56, %v6533_v51  ;;  %v2773_v0 = vadd.f32 %v15213_v4, %v2714_v19  ;;  %v2831_v16 = vsel %vm2762_vm1, %v15224_v11, %v15223_v26  ;;  %v12990_v61 = vpop.permute.xlu1 %6960  ;;  %v15235_v51 = vld [vmem:[#allocation559_spill] sm:$0xff]  ;;  %v15236_v56 = vld [vmem:[#allocation556_spill] sm:$0xff]  ;;  %v15237_v40 = vld [vmem:[#allocation194_spill] sm:$0xff] }
0x30cb   :  { %v2774_v39 = vadd.f32 %v2764_v3, %v2715_v18  ;;  %v2775_v45 = vadd.f32 %v15217_v6, %v2716_v24  ;;  %v6714_v58 = vsel %vm6317_vm6, %v15226_v17, %v15225_v29  ;;  %v2839_v27 = vadd.f32 %v2830_v53, %v2772_v14  ;;  %v15238_v24 = vld [vmem:[#allocation191_spill] sm:$0xff]  ;;  %v15240_v3 = vld [vmem:[#allocation196_spill] sm:$0xff]  ;;  %v15244_v11 = vld [vmem:[#allocation202_spill] sm:$0xff] }
0x30cc   :  { %v6599_v30 = vadd.f32 %v6588_v43, %v6532_v35  ;;  %v6659_v8 = vadd.f32 %v15221_v10, %v6600_v38  ;;  %v2840_v7 = vadd.f32 %v15219_v20, %v2773_v0  ;;  %v2897_v60 = vsel %vm2762_vm1, %v15228_v59, %v15227_v36  ;;  %v15239_v12 = vld [vmem:[#allocation199_spill] sm:$0xff]  ;;  %v15241_v10 = vld [vmem:[#allocation78_spill] sm:$0xff]  ;;  %v15242_v1 = vld [vmem:[#allocation584_spill] sm:$0xff] }
0x30cd   :  { %v2841_v54 = vadd.f32 %v2831_v16, %v2774_v39  ;;  %v2842_v47 = vadd.f32 %v15223_v26, %v2775_v45  ;;  %v6781_v62 = vsel %vm6317_vm6, %v15230_v55, %v15229_v41  ;;  %v2898_v21 = vsel %vm2762_vm1, %v15232_v22, %v15231_v44  ;;  %v15243_v26 = vld [vmem:[#allocation205_spill] sm:$0xff]  ;;  %v15249_v55 = vld [vmem:[#allocation206_spill] sm:$0xff] }
0x30ce   :  { %v6658_v52 = vadd.f32 %v6647_v33, %v6599_v30  ;;  %v6726_v49 = vadd.f32 %v15225_v29, %v6659_v8  ;;  %v2907_v34 = vadd.f32 %v15227_v36, %v2840_v7  ;;  %v2964_v37 = vsel %vm2762_vm1, %v15234_v63, %v15233_v5  ;;  %v13016_v20 = vpop.permute.xlu1 %6964  ;;  %v15245_v29 = vld [vmem:[#allocation200_spill] sm:$0xff]  ;;  %v15246_v17 = vld [vmem:[#allocation197_spill] sm:$0xff] }
0x30cf   :  { %v2906_v4 = vadd.f32 %v2897_v60, %v2839_v27  ;;  %v2909_v32 = vadd.f32 %v15231_v44, %v2842_v47  ;;  %v6838_v2 = vsel %vm6317_vm6, %v15236_v56, %v15235_v51  ;;  %v2965_v6 = vsel %vm2762_vm1, %v15238_v24, %v15237_v40  ;;  %v15251_v63 = vld [vmem:[#allocation217_spill] sm:$0xff]  ;;  %v15256_v24 = vld [vmem:[#allocation220_spill] sm:$0xff] }
0x30d0   :  { %v6725_v19 = vadd.f32 %v6714_v58, %v6658_v52  ;;  %v6793_v28 = vadd.f32 %v15229_v41, %v6726_v49  ;;  %v2974_v43 = vadd.f32 %v15233_v5, %v2907_v34  ;;  %v3031_v35 = vsel %vm2762_vm1, %v15240_v3, %v15239_v12  ;;  %v15247_v52 = vld [vmem:[#allocation211_spill] sm:$0xff] }
0x30d1   :  { %v2908_v42 = vadd.f32 %v2898_v21, %v2841_v54  ;;  %v2973_v53 = vadd.f32 %v2964_v37, %v2906_v4  ;;  %v6905_v33 = vsel %vm6317_vm6, %v15242_v1, %v15241_v10  ;;  %v2976_v14 = vadd.f32 %v15237_v40, %v2909_v32  ;;  %v15248_v54 = vld [vmem:[#allocation208_spill] sm:$0xff]  ;;  %v15252_v37 = vld [vmem:[#allocation214_spill] sm:$0xff]  ;;  %v15254_v32 = vld [vmem:[#allocation209_spill] sm:$0xff] }
0x30d2   :  { %v6792_v18 = vadd.f32 %v6781_v62, %v6725_v19  ;;  %v6850_v38 = vadd.f32 %v15235_v51, %v6793_v28  ;;  %v3041_v0 = vadd.f32 %v15239_v12, %v2974_v43  ;;  %v3090_v16 = vsel %vm2762_vm1, %v15244_v11, %v15243_v26  ;;  %v6969_v59 = vpop.permute.xlu1 %6968  ;;  %v15250_v62 = vld [vmem:[#allocation203_spill] sm:$0xff] }
0x30d3   :  { %v2975_v39 = vadd.f32 %v2965_v6, %v2908_v42  ;;  %v3040_v45 = vadd.f32 %v3031_v35, %v2973_v53  ;;  %v3032_v58 = vsel %vm2762_vm1, %v15246_v17, %v15245_v29  ;;  %v3043_v27 = vadd.f32 %v15245_v29, %v2976_v14  ;;  %v15255_v40 = vld [vmem:[#allocation223_spill] sm:$0xff]  ;;  %v15257_v35 = vld [vmem:[#allocation218_spill] sm:$0xff]  ;;  %v15259_v14 = vld [vmem:[#allocation229_spill] sm:$0xff] }
0x30d4   :  { %v6849_v30 = vadd.f32 %v6838_v2, %v6792_v18  ;;  %v6917_v8 = vadd.f32 %v15241_v10, %v6850_v38  ;;  %v3100_v7 = vadd.f32 %v15243_v26, %v3041_v0  ;;  %v3157_v47 = vsel %vm2762_vm1, %v15248_v54, %v15247_v52  ;;  %v15258_v18 = vld [vmem:[#allocation215_spill] sm:$0xff]  ;;  %v15260_v0 = vld [vmem:[#allocation226_spill] sm:$0xff]  ;;  %v15264_v17 = vld [vmem:[#allocation232_spill] sm:$0xff] }
0x30d5   :  { %v3099_v60 = vadd.f32 %v3090_v16, %v3040_v45  ;;  %v6972_v49 = vsel %vm6317_vm6, %v12523_v23, %v6969_v59  ;;  %v3091_v34 = vsel %vm2762_vm1, %v15250_v62, %v15249_v55  ;;  %vm7000_vm7 = vcmask 80896   ;;  %v15253_v23 = vld [vmem:[#allocation212_spill] sm:$0xff]  ;;  %v13064_v38 = vld [vmem:[#allocation2 + $0x8] sm:$0xff]  ;;  %v15262_v16 = vld [vmem:[#allocation221_spill] sm:$0xff] }
0x30d6   :  { %v6916_v36 = vadd.f32 %v6905_v33, %v6849_v30  ;;  %v13038_v41 = vadd.f32 %v6969_v59, %v6917_v8  ;;  %v3167_v44 = vadd.f32 %v15247_v52, %v3100_v7  ;;  %v3042_v21 = vadd.f32 %v3032_v58, %v2975_v39  ;;  %v6999_v56 = vpop.permute.xlu1 %6998  ;;  %v15263_v29 = vld [vmem:[#allocation235_spill] sm:$0xff]  ;;  %v15265_v7 = vld [vmem:[#allocation230_spill] sm:$0xff]  ;;  %v13084_v52 = vld [vmem:[#allocation2 + $0x18] sm:$0xff] }
0x30d7   :  { %v3102_v5 = vadd.f32 %v15249_v55, %v3043_v27  ;;  %v3224_v19 = vsel %vm2762_vm1, %v15252_v37, %v15251_v63  ;;  %v3166_v4 = vadd.f32 %v3157_v47, %v3099_v60  ;;  %v3158_v28 = vsel %vm2762_vm1, %v15254_v32, %v15253_v23  ;;  %v15267_v55 = vld [vmem:[#allocation241_spill] sm:$0xff]  ;;  %v15268_v62 = vld [vmem:[#allocation238_spill] sm:$0xff]  ;;  %v15272_v32 = vld [vmem:[#allocation244_spill] sm:$0xff] }
0x30d8   :  { %v13044_v22 = vadd.f32 %v6972_v49, %v6916_v36  ;;  %v3234_v51 = vadd.f32 %v15251_v63, %v3167_v44  ;;  %v3101_v2 = vadd.f32 %v3091_v34, %v3042_v21  ;;  %v3281_v6 = vsel %vm2762_vm1, %v15256_v24, %v15255_v40  ;;  %v15266_v36 = vld [vmem:[#allocation227_spill] sm:$0xff]  ;;  %v15269_v21 = vld [vmem:[#allocation236_spill] sm:$0xff] }
0x30d9   :  { %v3169_v43 = vadd.f32 %v15253_v23, %v3102_v5  ;;  %v7001_v12 = vsel %vm7000_vm7, %v12548_v25, %v6999_v56  ;;  %v3233_v3 = vadd.f32 %v3224_v19, %v3166_v4  ;;  %v3225_v42 = vsel %vm2762_vm1, %v15258_v18, %v15257_v35  ;;  %v15261_v25 = vld [vmem:[#allocation224_spill] sm:$0xff]  ;;  %v15270_v5 = vld [vmem:[#allocation233_spill] sm:$0xff]  ;;  %v15271_v23 = vld [vmem:[#allocation247_spill] sm:$0xff] }
0x30da   :  { %v3291_v53 = vadd.f32 %v15255_v40, %v3234_v51  ;;  %v7005_v10 = vmul.f32 %v13064_v38, %v7001_v12  ;;  %v3168_v1 = vadd.f32 %v3158_v28, %v3101_v2  ;;  %v3348_v26 = vsel %vm2762_vm1, %v15260_v0, %v15259_v14  ;;  %v15273_v56 = vld [vmem:[#allocation242_spill] sm:$0xff]  ;;  %v15274_v2 = vld [vmem:[#allocation239_spill] sm:$0xff]  ;;  %v15275_v18 = vld [vmem:[#allocation253_spill] sm:$0xff] }
0x30db   :  { %v3236_v33 = vadd.f32 %v15257_v35, %v3169_v43  ;;  %v3290_v11 = vadd.f32 %v3281_v6, %v3233_v3  ;;  %v3282_v30 = vsel %vm2762_vm1, %v15262_v16, %v15261_v25  ;;  %v3415_v58 = vsel %vm2762_vm1, %v15264_v17, %v15263_v29  ;;  %v13104_v24 = vld [vmem:[#allocation2 + $0x28] sm:$0xff] }
0x30dc   :  { %v3358_v39 = vadd.f32 %v15259_v14, %v3291_v53  ;;  %7018 = vrot.lane.b32.xlu1 %v7005_v10, %s8013_s22  ;;  %v3235_v45 = vadd.f32 %v3225_v42, %v3168_v1  ;;  %v3349_v59 = vsel %vm2762_vm1, %v15266_v36, %v15265_v7  ;;  %v7007_v54 = vmul.f32 %v13084_v52, %v7001_v12  ;;  %v15276_v42 = vld [vmem:[#allocation250_spill] sm:$0xff]  ;;  %v15277_v1 = vld [vmem:[#allocation248_spill] sm:$0xff] }
0x30dd   :  { %v3293_v8 = vadd.f32 %v15261_v25, %v3236_v33  ;;  %v3357_v27 = vadd.f32 %v3348_v26, %v3290_v11  ;;  %v3474_v34 = vsel %vm3473_vm2, %v15268_v62, %v15267_v55  ;;  %v3416_v63 = vsel %vm2762_vm1, %v15270_v5, %v15269_v21  ;;  %v15278_v33 = vld [vmem:[#allocation245_spill] sm:$0xff]  ;;  %v15279_v11 = vld [vmem:[#allocation259_spill] sm:$0xff]  ;;  %v15280_v25 = vld [vmem:[#allocation256_spill] sm:$0xff] }
0x30de   :  { %v3425_v60 = vadd.f32 %v15263_v29, %v3358_v39  ;;  %v3292_v47 = vadd.f32 %v3282_v30, %v3235_v45  ;;  %v3541_v28 = vsel %vm3473_vm2, %v15272_v32, %v15271_v23  ;;  %v3475_v43 = vsel %vm3473_vm2, %v15274_v2, %v15273_v56  ;;  %v15281_v45 = vld [vmem:[#allocation254_spill] sm:$0xff]  ;;  %v15287_v62 = vld [vmem:[#allocation271_spill] sm:$0xff]  ;;  %v15291_v32 = vld [vmem:[#allocation277_spill] sm:$0xff] }
0x30df   :  { %v3360_v49 = vadd.f32 %v15265_v7, %v3293_v8  ;;  %v3424_v44 = vadd.f32 %v3415_v58, %v3357_v27  ;;  %v7009_v6 = vmul.f32 %v13104_v24, %v7001_v12  ;;  %v3608_v53 = vsel %vm3473_vm2, %v15276_v42, %v15275_v18  ;;  %v15282_v8 = vld [vmem:[#allocation251_spill] sm:$0xff]  ;;  %v15283_v27 = vld [vmem:[#allocation265_spill] sm:$0xff]  ;;  %v15284_v7 = vld [vmem:[#allocation262_spill] sm:$0xff] }
0x30e0   :  { %v3484_v37 = vadd.f32 %v15267_v55, %v3425_v60  ;;  %7022 = vrot.lane.b32.xlu1 %v7007_v54, %s8013_s22  ;;  %v3359_v19 = vadd.f32 %v3349_v59, %v3292_v47  ;;  %v3542_v14 = vsel %vm3473_vm2, %v15278_v33, %v15277_v1  ;;  %v7054_v26 = vrot.slane %v12597_v31, %v8069_v13  ;;  %v15285_v60 = vld [vmem:[#allocation260_spill] sm:$0xff]  ;;  %v15286_v54 = vld [vmem:[#allocation257_spill] sm:$0xff]  ;;  %v15297_v33 = vld [vmem:[#allocation278_spill] sm:$0xff] }
0x30e1   :  { %v3427_v4 = vadd.f32 %v15269_v21, %v3360_v49  ;;  %v3483_v51 = vadd.f32 %v3474_v34, %v3424_v44  ;;  %v3675_v16 = vsel %vm3473_vm2, %v15280_v25, %v15279_v11  ;;  %v3609_v29 = vsel %vm3473_vm2, %v15282_v8, %v15281_v45  ;;  %v15288_v34 = vld [vmem:[#allocation268_spill] sm:$0xff]  ;;  %v15300_v25 = vld [vmem:[#allocation286_spill] sm:$0xff]  ;;  %v15302_v8 = vld [vmem:[#allocation281_spill] sm:$0xff] }
0x30e2   :  { %v3551_v40 = vadd.f32 %v15271_v23, %v3484_v37  ;;  %v3426_v3 = vadd.f32 %v3416_v63, %v3359_v19  ;;  %v3742_v36 = vsel %vm3473_vm2, %v15284_v7, %v15283_v27  ;;  %v3676_v47 = vsel %vm3473_vm2, %v15286_v54, %v15285_v60  ;;  %v15289_v63 = vld [vmem:[#allocation266_spill] sm:$0xff]  ;;  %v15290_v37 = vld [vmem:[#allocation263_spill] sm:$0xff]  ;;  %v15296_v42 = vld [vmem:[#allocation280_spill] sm:$0xff] }
0x30e3   :  { %v3486_v35 = vadd.f32 %v15273_v56, %v3427_v4  ;;  %v3550_v10 = vadd.f32 %v3541_v28, %v3483_v51  ;;  %v3801_v44 = vsel %vm3473_vm2, %v15288_v34, %v15287_v62  ;;  %v3743_v19 = vsel %vm3473_vm2, %v15290_v37, %v15289_v63  ;;  %v15292_v28 = vld [vmem:[#allocation274_spill] sm:$0xff]  ;;  %v15303_v7 = vld [vmem:[#allocation295_spill] sm:$0xff]  ;;  %v15307_v34 = vld [vmem:[#allocation301_spill] sm:$0xff] }
0x30e4   :  { %v3618_v0 = vadd.f32 %v15275_v18, %v3551_v40  ;;  %7026 = vrot.lane.b32.xlu1 %v7009_v6, %s8013_s22  ;;  %v3485_v12 = vadd.f32 %v3475_v43, %v3426_v3  ;;  %v3868_v51 = vsel %vm3473_vm2, %v15292_v28, %v15291_v32  ;;  %v15293_v43 = vld [vmem:[#allocation272_spill] sm:$0xff]  ;;  %v15294_v40 = vld [vmem:[#allocation269_spill] sm:$0xff]  ;;  %v15295_v18 = vld [vmem:[#allocation283_spill] sm:$0xff]  ;;  %vm7028_vm15 = vcmask 965632  }
0x30e5   :  { %v3553_v30 = vadd.f32 %v15277_v1, %v3486_v35  ;;  %v3617_v39 = vadd.f32 %v3608_v53, %v3550_v10  ;;  %v3802_v6 = vsel %vm3473_vm2, %v15294_v40, %v15293_v43  ;;  %v3935_v53 = vsel %vm3473_vm2, %v15296_v42, %v15295_v18  ;;  %v15305_v54 = vld [vmem:[#allocation290_spill] sm:$0xff]  ;;  %v15309_v37 = vld [vmem:[#allocation296_spill] sm:$0xff] }
0x30e6   :  { %v3685_v17 = vadd.f32 %v15279_v11, %v3618_v0  ;;  %v3552_v58 = vadd.f32 %v3542_v14, %v3485_v12  ;;  %v15298_v14 = vld [vmem:[#allocation275_spill] sm:$0xff]  ;;  %v15299_v11 = vld [vmem:[#allocation289_spill] sm:$0xff] }
0x30e7   :  { %v3620_v31 = vadd.f32 %v15281_v45, %v3553_v30  ;;  %v3684_v59 = vadd.f32 %v3675_v16, %v3617_v39  ;;  %v3869_v0 = vsel %vm3473_vm2, %v15298_v14, %v15297_v33  ;;  %v3992_v16 = vsel %vm3473_vm2, %v15300_v25, %v15299_v11  ;;  %v15301_v45 = vld [vmem:[#allocation284_spill] sm:$0xff] }
0x30e8   :  { %v3752_v49 = vadd.f32 %v15283_v27, %v3685_v17  ;;  %7057 = vrot.lane.b32.xlu1 %v7054_v26, %s8012_s11  ;;  %v3619_v55 = vadd.f32 %v3609_v29, %v3552_v58  ;;  %v3936_v29 = vsel %vm3473_vm2, %v15302_v8, %v15301_v45 }
0x30e9   :  { %v3687_v21 = vadd.f32 %v15285_v60, %v3620_v31  ;;  %v3751_v5 = vadd.f32 %v3742_v36, %v3684_v59  ;;  %v15304_v36 = vld [vmem:[#allocation292_spill] sm:$0xff] }
0x30ea   :  { %v3811_v4 = vadd.f32 %v15287_v62, %v3752_v49  ;;  %v3686_v23 = vadd.f32 %v3676_v47, %v3619_v55  ;;  %v4059_v31 = vsel %vm3473_vm2, %v15304_v36, %v15303_v7  ;;  %v15306_v47 = vld [vmem:[#allocation287_spill] sm:$0xff] }
0x30eb   :  { %v3754_v56 = vadd.f32 %v15289_v63, %v3687_v21  ;;  %v3810_v2 = vadd.f32 %v3801_v44, %v3751_v5  ;;  %v3993_v49 = vsel %vm3473_vm2, %v15306_v47, %v15305_v54  ;;  %v15308_v44 = vld [vmem:[#allocation298_spill] sm:$0xff]  ;;  %v15322_v36 = vld [vmem:[#allocation311_spill] sm:$0xff] }
0x30ec   :  { %v3878_v3 = vadd.f32 %v15291_v32, %v3811_v4  ;;  %v3753_v35 = vadd.f32 %v3743_v19, %v3686_v23  ;;  %v4126_v21 = vsel %vm3473_vm2, %v15308_v44, %v15307_v34  ;;  %v15310_v19 = vld [vmem:[#allocation293_spill] sm:$0xff] }
0x30ed   :  { %v3813_v10 = vadd.f32 %v15293_v43, %v3754_v56  ;;  %v3877_v1 = vadd.f32 %v3868_v51, %v3810_v2  ;;  %v4060_v4 = vsel %vm3473_vm2, %v15310_v19, %v15309_v37  ;;  %v15311_v51 = vld [vmem:[#allocation307_spill] sm:$0xff]  ;;  %v15312_v56 = vld [vmem:[#allocation304_spill] sm:$0xff] }
0x30ee   :  { %v3945_v26 = vadd.f32 %v15295_v18, %v3878_v3  ;;  %v3812_v12 = vadd.f32 %v3802_v6, %v3753_v35  ;;  %v4185_v2 = vsel %vm4184_vm3, %v15312_v56, %v15311_v51  ;;  %v15313_v6 = vld [vmem:[#allocation302_spill] sm:$0xff]  ;;  %v15314_v3 = vld [vmem:[#allocation299_spill] sm:$0xff] }
0x30ef   :  { %v3880_v30 = vadd.f32 %v15297_v33, %v3813_v10  ;;  %v3944_v39 = vadd.f32 %v3935_v53, %v3877_v1  ;;  %v4127_v35 = vsel %vm3473_vm2, %v15314_v3, %v15313_v6  ;;  %v15315_v53 = vld [vmem:[#allocation313_spill] sm:$0xff]  ;;  %v15316_v10 = vld [vmem:[#allocation310_spill] sm:$0xff] }
0x30f0   :  { %v4002_v17 = vadd.f32 %v15299_v11, %v3945_v26  ;;  %v3879_v27 = vadd.f32 %v3869_v0, %v3812_v12  ;;  %v4252_v1 = vsel %vm4184_vm3, %v15316_v10, %v15315_v53  ;;  %v15317_v0 = vld [vmem:[#allocation308_spill] sm:$0xff]  ;;  %v15318_v26 = vld [vmem:[#allocation305_spill] sm:$0xff] }
0x30f1   :  { %v13167_v58 = vpop.permute.xlu0 %7016  ;;  %v3947_v59 = vadd.f32 %v15301_v45, %v3880_v30  ;;  %v4001_v60 = vadd.f32 %v3992_v16, %v3944_v39  ;;  %v4186_v12 = vsel %vm4184_vm3, %v15318_v26, %v15317_v0  ;;  %v15319_v30 = vld [vmem:[#allocation319_spill] sm:$0xff]  ;;  %v15320_v39 = vld [vmem:[#allocation316_spill] sm:$0xff]  ;;  %v15331_v3 = vld [vmem:[#allocation337_spill] sm:$0xff] }
0x30f2   :  { %v4069_v55 = vadd.f32 %v15303_v7, %v4002_v17  ;;  %v3946_v62 = vadd.f32 %v3936_v29, %v3879_v27  ;;  %v4319_v45 = vsel %vm4184_vm3, %v15320_v39, %v15319_v30  ;;  %v15321_v7 = vld [vmem:[#allocation314_spill] sm:$0xff]  ;;  %v15333_v10 = vld [vmem:[#allocation332_spill] sm:$0xff] }
0x30f3   :  { %v4004_v5 = vadd.f32 %v15305_v54, %v3947_v59  ;;  %v4068_v63 = vadd.f32 %v4059_v31, %v4001_v60  ;;  %v4253_v31 = vsel %vm4184_vm3, %v15322_v36, %v15321_v7  ;;  %v15323_v59 = vld [vmem:[#allocation325_spill] sm:$0xff]  ;;  %v15324_v60 = vld [vmem:[#allocation322_spill] sm:$0xff]  ;;  %v15336_v26 = vld [vmem:[#allocation340_spill] sm:$0xff] }
0x30f4   :  { %v4136_v23 = vadd.f32 %v15307_v34, %v4069_v55  ;;  %v4003_v28 = vadd.f32 %v3993_v49, %v3946_v62  ;;  %v4386_v54 = vsel %vm4184_vm3, %v15324_v60, %v15323_v59  ;;  %v15325_v55 = vld [vmem:[#allocation320_spill] sm:$0xff]  ;;  %v15326_v62 = vld [vmem:[#allocation317_spill] sm:$0xff]  ;;  %v15340_v36 = vld [vmem:[#allocation346_spill] sm:$0xff] }
0x30f5   :  { %v13185_v32 = vpop.permute.xlu0 %7020  ;;  %v4071_v43 = vadd.f32 %v15309_v37, %v4004_v5  ;;  %v4135_v40 = vadd.f32 %v4126_v21, %v4068_v63  ;;  %v4320_v34 = vsel %vm4184_vm3, %v15326_v62, %v15325_v55  ;;  %v15327_v5 = vld [vmem:[#allocation331_spill] sm:$0xff]  ;;  %v15328_v63 = vld [vmem:[#allocation328_spill] sm:$0xff] }
0x30f6   :  { %v4195_v18 = vadd.f32 %v15311_v51, %v4136_v23  ;;  %v4070_v42 = vadd.f32 %v4060_v4, %v4003_v28  ;;  %v4453_v37 = vsel %vm4184_vm3, %v15328_v63, %v15327_v5 }
0x30f7   :  { %v4138_v33 = vadd.f32 %v15313_v6, %v4071_v43  ;;  %v4194_v14 = vadd.f32 %v4185_v2, %v4135_v40  ;;  %v15329_v2 = vld [vmem:[#allocation326_spill] sm:$0xff]  ;;  %v15330_v43 = vld [vmem:[#allocation323_spill] sm:$0xff] }
0x30f8   :  { %v4262_v11 = vadd.f32 %v15315_v53, %v4195_v18  ;;  %v4137_v16 = vadd.f32 %v4127_v35, %v4070_v42  ;;  %v4387_v40 = vsel %vm4184_vm3, %v15330_v43, %v15329_v2  ;;  %v15332_v35 = vld [vmem:[#allocation334_spill] sm:$0xff] }
0x30f9   :  { %v13203_v25 = vpop.permute.xlu0 %7024  ;;  %v4197_v8 = vadd.f32 %v15317_v0, %v4138_v33  ;;  %v4261_v29 = vadd.f32 %v4252_v1, %v4194_v14  ;;  %v15334_v1 = vld [vmem:[#allocation329_spill] sm:$0xff]  ;;  %v15335_v0 = vld [vmem:[#allocation343_spill] sm:$0xff]  ;;  %v15348_v43 = vld [vmem:[#allocation358_spill] sm:$0xff] }
0x30fa   :  { %v4329_v17 = vadd.f32 %v15319_v30, %v4262_v11  ;;  %v4196_v27 = vadd.f32 %v4186_v12, %v4137_v16  ;;  %v4454_v33 = vsel %vm4184_vm3, %v15334_v1, %v15333_v10  ;;  %v4579_v12 = vsel %vm4184_vm3, %v15336_v26, %v15335_v0 }
0x30fb   :  { %v4264_v47 = vadd.f32 %v15321_v7, %v4197_v8  ;;  %v4328_v49 = vadd.f32 %v4319_v45, %v4261_v29  ;;  %v15337_v8 = vld [vmem:[#allocation338_spill] sm:$0xff]  ;;  %v15338_v29 = vld [vmem:[#allocation335_spill] sm:$0xff]  ;;  %v15339_v7 = vld [vmem:[#allocation349_spill] sm:$0xff] }
0x30fc   :  { %v4396_v44 = vadd.f32 %v15323_v59, %v4329_v17  ;;  %v4263_v28 = vadd.f32 %v4253_v31, %v4196_v27  ;;  %v4513_v17 = vsel %vm4184_vm3, %v15338_v29, %v15337_v8  ;;  %v4646_v31 = vsel %vm4184_vm3, %v15340_v36, %v15339_v7  ;;  %v15357_v36 = vld [vmem:[#allocation368_spill] sm:$0xff] }
0x30fd   :  { %v13221_v21 = vpop.permute.xlu0 %7055  ;;  %v4331_v51 = vadd.f32 %v15325_v55, %v4264_v47  ;;  %v4395_v56 = vadd.f32 %v4386_v54, %v4328_v49  ;;  %v15341_v47 = vld [vmem:[#allocation344_spill] sm:$0xff]  ;;  %v15342_v49 = vld [vmem:[#allocation341_spill] sm:$0xff] }
0x30fe   :  { %v7062_v19 = vmul.f32 %v12553_v9, %v13221_v21  ;;  %v7064_v4 = vmul.f32 %v12573_v50, %v13221_v21  ;;  %v7066_v23 = vmul.f32 %v12603_v57, %v13221_v21  ;;  %v4463_v6 = vadd.f32 %v15327_v5, %v4396_v44  ;;  %v15344_v44 = vld [vmem:[#allocation352_spill] sm:$0xff] }
0x30ff   :  { %v4512_v9 = vsel %vm4184_vm3, %v15332_v35, %v15331_v3  ;;  %v4330_v50 = vadd.f32 %v4320_v34, %v4263_v28  ;;  %v4398_v53 = vadd.f32 %v15329_v2, %v4331_v51  ;;  %v4462_v57 = vadd.f32 %v4453_v37, %v4395_v56  ;;  %v15343_v34 = vld [vmem:[#allocation355_spill] sm:$0xff]  ;;  %v15347_v2 = vld [vmem:[#allocation361_spill] sm:$0xff] }
0x3100   :  { %v7074_v18 = vrot.slane %v7062_v19, 1  ;;  %v7075_v42 = vrot.slane %v7064_v4, 1  ;;  %v4522_v14 = vadd.f32 %v15331_v3, %v4463_v6  ;;  %v7080_v11 = vrot.slane %v7066_v23, 1  ;;  %v15345_v23 = vld [vmem:[#allocation350_spill] sm:$0xff]  ;;  %v15346_v28 = vld [vmem:[#allocation347_spill] sm:$0xff] }
0x3101   :  { %v4397_v30 = vadd.f32 %v4387_v40, %v4330_v50  ;;  %v4465_v39 = vadd.f32 %v15333_v10, %v4398_v53  ;;  %v4521_v45 = vadd.f32 %v4512_v9, %v4462_v57  ;;  %v4580_v55 = vsel %vm4184_vm3, %v15342_v49, %v15341_v47  ;;  %v13279_v6 = vld [vmem:[%s13917_s0 + $0x40] ss:$8 sm:$0x3]  ;;  %v15352_v10 = vld [vmem:[#allocation364_spill] sm:$0xff] }
0x3102   :  { %v7076_v16 = vsel %vm164_vm8, %v7074_v18, %v7075_v42  ;;  %v4589_v27 = vadd.f32 %v15335_v0, %v4522_v14  ;;  %v4703_v5 = vsel %vm4184_vm3, %v15344_v44, %v15343_v34  ;;  %v7081_v63 = vsel %vm164_vm8, %v7075_v42, %v7080_v11  ;;  %v15349_v18 = vld [vmem:[#allocation356_spill] sm:$0xff]  ;;  %v15350_v42 = vld [vmem:[#allocation353_spill] sm:$0xff]  ;;  %v15351_v57 = vld [vmem:[#allocation367_spill] sm:$0xff] }
0x3103   :  { %7084 = vrot.lane.b32.xlu0 %v7076_v16, %s8013_s22  ;;  %v4464_v59 = vadd.f32 %v4454_v33, %v4397_v30  ;;  %v4524_v60 = vadd.f32 %v15337_v8, %v4465_v39  ;;  %v4588_v54 = vadd.f32 %v4579_v12, %v4521_v45  ;;  %v4647_v51 = vsel %vm4184_vm3, %v15346_v28, %v15345_v23  ;;  %v15353_v12 = vld [vmem:[#allocation362_spill] sm:$0xff]  ;;  %v15354_v16 = vld [vmem:[#allocation359_spill] sm:$0xff]  ;;  %v15355_v45 = vld [vmem:[#allocation373_spill] sm:$0xff] }
0x3104   :  { %v4656_v62 = vadd.f32 %v15339_v7, %v4589_v27  ;;  %v4770_v40 = vsel %vm4184_vm3, %v15348_v43, %v15347_v2  ;;  %v4704_v50 = vsel %vm4184_vm3, %v15350_v42, %v15349_v18  ;;  %v4837_v1 = vsel %vm4184_vm3, %v15352_v10, %v15351_v57  ;;  %v15356_v8 = vld [vmem:[#allocation370_spill] sm:$0xff]  ;;  %v15368_v42 = vld [vmem:[#allocation388_spill] sm:$0xff] }
0x3105   :  { %v4523_v37 = vadd.f32 %v4513_v17, %v4464_v59  ;;  %v4655_v19 = vadd.f32 %v4646_v31, %v4588_v54  ;;  %v4591_v4 = vadd.f32 %v15341_v47, %v4524_v60  ;;  %v7121_v0 = vrot.slane %v13279_v6, %v8069_v13  ;;  %v13303_v17 = vld [vmem:[%s13917_s0 + $0x53] ss:$8 sm:$0x3]  ;;  %v15359_v54 = vld [vmem:[#allocation379_spill] sm:$0xff] }
0x3106   :  { %v4713_v56 = vadd.f32 %v15343_v34, %v4656_v62  ;;  %v4771_v30 = vsel %vm4184_vm3, %v15354_v16, %v15353_v12  ;;  %v4896_v29 = vsel %vm4895_vm4, %v15356_v8, %v15355_v45  ;;  %v15358_v31 = vld [vmem:[#allocation365_spill] sm:$0xff]  ;;  %v15360_v47 = vld [vmem:[#allocation376_spill] sm:$0xff]  ;;  %v7188_v34 = vrot.slane %v13303_v17, %v8069_v13  ;;  %v15372_v16 = vld [vmem:[#allocation394_spill] sm:$0xff] }
0x3107   :  { %7088 = vrot.lane.b32.xlu0 %v7081_v63, %s8013_s22  ;;  %v4590_v3 = vadd.f32 %v4580_v55, %v4523_v37  ;;  %v4712_v35 = vadd.f32 %v4703_v5, %v4655_v19  ;;  %v4658_v9 = vadd.f32 %v15345_v23, %v4591_v4  ;;  %v4838_v59 = vsel %vm4184_vm3, %v15358_v31, %v15357_v36  ;;  %v15361_v5 = vld [vmem:[#allocation374_spill] sm:$0xff]  ;;  %v15362_v63 = vld [vmem:[#allocation371_spill] sm:$0xff]  ;;  %v15363_v4 = vld [vmem:[#allocation385_spill] sm:$0xff] }
0x3108   :  { %v4780_v53 = vadd.f32 %v15347_v2, %v4713_v56  ;;  %v4963_v49 = vsel %vm4895_vm4, %v15360_v47, %v15359_v54  ;;  %v4897_v37 = vsel %vm4895_vm4, %v15362_v63, %v15361_v5  ;;  %v15364_v23 = vld [vmem:[#allocation382_spill] sm:$0xff]  ;;  %v15375_v31 = vld [vmem:[#allocation403_spill] sm:$0xff]  ;;  %v15379_v63 = vld [vmem:[#allocation409_spill] sm:$0xff] }
0x3109   :  { %v4657_v33 = vadd.f32 %v4647_v51, %v4590_v3  ;;  %v4779_v14 = vadd.f32 %v4770_v40, %v4712_v35  ;;  %v4715_v26 = vadd.f32 %v15349_v18, %v4658_v9  ;;  %v5030_v28 = vsel %vm4895_vm4, %v15364_v23, %v15363_v4  ;;  %v13327_v51 = vld [vmem:[%s13917_s0 + $0x66] ss:$8 sm:$0x3]  ;;  %v15365_v40 = vld [vmem:[#allocation380_spill] sm:$0xff]  ;;  %v15366_v3 = vld [vmem:[#allocation377_spill] sm:$0xff] }
0x310a   :  { %v4847_v39 = vadd.f32 %v15351_v57, %v4780_v53  ;;  %v4964_v35 = vsel %vm4895_vm4, %v15366_v3, %v15365_v40  ;;  %v15367_v18 = vld [vmem:[#allocation391_spill] sm:$0xff]  ;;  %v7255_v10 = vrot.slane %v13327_v51, %v8069_v13 }
0x310b   :  { %7092 = vrot.lane.b32.xlu0 %v7080_v11, %s8013_s22  ;;  %v4714_v11 = vadd.f32 %v4704_v50, %v4657_v33  ;;  %v4846_v27 = vadd.f32 %v4837_v1, %v4779_v14  ;;  %v4782_v7 = vadd.f32 %v15353_v12, %v4715_v26  ;;  %v5097_v50 = vsel %vm4895_vm4, %v15368_v42, %v15367_v18  ;;  %v15369_v33 = vld [vmem:[#allocation386_spill] sm:$0xff]  ;;  %v15370_v14 = vld [vmem:[#allocation383_spill] sm:$0xff]  ;;  %v15371_v12 = vld [vmem:[#allocation397_spill] sm:$0xff] }
0x310c   :  { %v4906_v60 = vadd.f32 %v15355_v45, %v4847_v39  ;;  %v13351_v39 = vld [vmem:[%s13917_s0 + $0x81] ss:$8 sm:$0x3] }
0x310d   :  { %v4781_v55 = vadd.f32 %v4771_v30, %v4714_v11  ;;  %v4905_v62 = vadd.f32 %v4896_v29, %v4846_v27  ;;  %v4849_v44 = vadd.f32 %v15357_v36, %v4782_v7  ;;  %v5164_v30 = vsel %vm4895_vm4, %v15372_v16, %v15371_v12  ;;  %v15373_v11 = vld [vmem:[#allocation392_spill] sm:$0xff]  ;;  %v15374_v27 = vld [vmem:[#allocation389_spill] sm:$0xff]  ;;  %v13399_v16 = vld [vmem:[%s13917_s0 + $0xa7] ss:$8 sm:$0x3] }
0x310e   :  { %v4973_v19 = vadd.f32 %v15359_v54, %v4906_v60  ;;  %v5098_v7 = vsel %vm4895_vm4, %v15374_v27, %v15373_v11 }
0x310f   :  { %7124 = vrot.lane.b32.xlu0 %v7121_v0, %s8012_s11  ;;  %v4848_v56 = vadd.f32 %v4838_v59, %v4781_v55  ;;  %v4972_v2 = vadd.f32 %v4963_v49, %v4905_v62  ;;  %v4908_v43 = vadd.f32 %v15361_v5, %v4849_v44  ;;  %v5031_v0 = vsel %vm4895_vm4, %v15370_v14, %v15369_v33  ;;  %v15376_v59 = vld [vmem:[#allocation400_spill] sm:$0xff]  ;;  %v15377_v62 = vld [vmem:[#allocation398_spill] sm:$0xff] }
0x3110   :  { %v5040_v9 = vadd.f32 %v15363_v4, %v4973_v19  ;;  %v5223_v60 = vsel %vm4895_vm4, %v15376_v59, %v15375_v31  ;;  %v7322_v49 = vrot.slane %v13351_v39, %v8069_v13  ;;  %v13375_v4 = vld [vmem:[%s13917_s0 + $0x94] ss:$8 sm:$0x3] }
0x3111   :  { %v4907_v53 = vadd.f32 %v4897_v37, %v4848_v56  ;;  %v5039_v57 = vadd.f32 %v5030_v28, %v4972_v2  ;;  %v4975_v1 = vadd.f32 %v15365_v40, %v4908_v43  ;;  %v15380_v37 = vld [vmem:[#allocation406_spill] sm:$0xff]  ;;  %v15381_v2 = vld [vmem:[#allocation404_spill] sm:$0xff]  ;;  %v15382_v43 = vld [vmem:[#allocation401_spill] sm:$0xff] }
0x3112   :  { %v5107_v26 = vadd.f32 %v15367_v18, %v5040_v9  ;;  %v5290_v19 = vsel %vm4895_vm4, %v15380_v37, %v15379_v63  ;;  %v5224_v40 = vsel %vm4895_vm4, %v15382_v43, %v15381_v2  ;;  %v15384_v9 = vld [vmem:[#allocation412_spill] sm:$0xff]  ;;  %v15398_v43 = vld [vmem:[#allocation425_spill] sm:$0xff] }
0x3113   :  { %7191 = vrot.lane.b32.xlu0 %v7188_v34, %s8012_s11  ;;  %v4974_v45 = vadd.f32 %v4964_v35, %v4907_v53  ;;  %v5106_v8 = vadd.f32 %v5097_v50, %v5039_v57  ;;  %v5042_v29 = vadd.f32 %v15369_v33, %v4975_v1  ;;  %v15378_v34 = vld [vmem:[#allocation395_spill] sm:$0xff]  ;;  %v7381_v53 = vrot.slane %v13375_v4, %v8069_v13 }
0x3114   :  { %v5174_v36 = vadd.f32 %v15371_v12, %v5107_v26  ;;  %v5165_v44 = vsel %vm4895_vm4, %v15378_v34, %v15377_v62  ;;  %v15383_v35 = vld [vmem:[#allocation415_spill] sm:$0xff]  ;;  %v15388_v26 = vld [vmem:[#allocation418_spill] sm:$0xff] }
0x3115   :  { %v5041_v54 = vadd.f32 %v5031_v0, %v4974_v45  ;;  %v5173_v47 = vadd.f32 %v5164_v30, %v5106_v8  ;;  %v5109_v55 = vadd.f32 %v15373_v11, %v5042_v29  ;;  %v5357_v18 = vsel %vm4895_vm4, %v15384_v9, %v15383_v35  ;;  %v15386_v1 = vld [vmem:[#allocation407_spill] sm:$0xff]  ;;  %v15387_v0 = vld [vmem:[#allocation421_spill] sm:$0xff]  ;;  %v15389_v29 = vld [vmem:[#allocation416_spill] sm:$0xff] }
0x3116   :  { %v5233_v5 = vadd.f32 %v15375_v31, %v5174_v36  ;;  %v5414_v12 = vsel %vm4895_vm4, %v15388_v26, %v15387_v0  ;;  %v15390_v11 = vld [vmem:[#allocation413_spill] sm:$0xff]  ;;  %v15391_v36 = vld [vmem:[#allocation427_spill] sm:$0xff]  ;;  %v15392_v31 = vld [vmem:[#allocation424_spill] sm:$0xff] }
0x3117   :  { %7258 = vrot.lane.b32.xlu0 %v7255_v10, %s8012_s11  ;;  %v5108_v23 = vadd.f32 %v5098_v7, %v5041_v54  ;;  %v5232_v28 = vadd.f32 %v5223_v60, %v5173_v47  ;;  %v5176_v56 = vadd.f32 %v15377_v62, %v5109_v55  ;;  %v15385_v10 = vld [vmem:[#allocation410_spill] sm:$0xff]  ;;  %v5358_v27 = vsel %vm4895_vm4, %v15390_v11, %v15389_v29  ;;  %v15394_v62 = vld [vmem:[#allocation419_spill] sm:$0xff]  ;;  %v15400_v9 = vld [vmem:[#allocation436_spill] sm:$0xff] }
0x3118   :  { %v5300_v3 = vadd.f32 %v15379_v63, %v5233_v5  ;;  %v5291_v33 = vsel %vm4895_vm4, %v15386_v1, %v15385_v10  ;;  %v5481_v59 = vsel %vm4895_vm4, %v15392_v31, %v15391_v36  ;;  %v7448_v47 = vrot.slane %v13399_v16, %v8069_v13  ;;  %v15393_v55 = vld [vmem:[#allocation422_spill] sm:$0xff]  ;;  %v15395_v5 = vld [vmem:[#allocation433_spill] sm:$0xff]  ;;  %v15402_v1 = vld [vmem:[#allocation431_spill] sm:$0xff] }
0x3119   :  { %v5175_v42 = vadd.f32 %v5165_v44, %v5108_v23  ;;  %v5299_v50 = vadd.f32 %v5290_v19, %v5232_v28  ;;  %v5235_v57 = vadd.f32 %v15381_v2, %v5176_v56  ;;  %v5415_v34 = vsel %vm4895_vm4, %v15394_v62, %v15393_v55  ;;  %v15396_v63 = vld [vmem:[#allocation430_spill] sm:$0xff]  ;;  %v13423_v19 = vld [vmem:[%s13917_s0 + $0xd5] ss:$8 sm:$0x3]  ;;  %v15407_v31 = vld [vmem:[#allocation451_spill] sm:$0xff] }
0x311a   :  { %v5367_v14 = vadd.f32 %v15383_v35, %v5300_v3  ;;  %v5548_v37 = vsel %vm4895_vm4, %v15396_v63, %v15395_v5  ;;  %v15397_v2 = vld [vmem:[#allocation428_spill] sm:$0xff]  ;;  %v15399_v35 = vld [vmem:[#allocation439_spill] sm:$0xff]  ;;  %v15404_v26 = vld [vmem:[#allocation442_spill] sm:$0xff] }
0x311b   :  { %7325 = vrot.lane.b32.xlu0 %v7322_v49, %s8012_s11  ;;  %v5234_v30 = vadd.f32 %v5224_v40, %v5175_v42  ;;  %v5366_v45 = vadd.f32 %v5357_v18, %v5299_v50  ;;  %v5302_v8 = vadd.f32 %v15385_v10, %v5235_v57  ;;  %v5482_v40 = vsel %vm4895_vm4, %v15398_v43, %v15397_v2  ;;  %v15401_v10 = vld [vmem:[#allocation434_spill] sm:$0xff]  ;;  %v15405_v11 = vld [vmem:[#allocation440_spill] sm:$0xff]  ;;  %v15411_v63 = vld [vmem:[#allocation457_spill] sm:$0xff] }
0x311c   :  { %v5424_v7 = vadd.f32 %v15387_v0, %v5367_v14  ;;  %v5607_v18 = vsel %vm5606_vm5, %v15400_v9, %v15399_v35  ;;  %v15403_v0 = vld [vmem:[#allocation445_spill] sm:$0xff]  ;;  %v15409_v62 = vld [vmem:[#allocation446_spill] sm:$0xff] }
0x311d   :  { %v5301_v60 = vadd.f32 %v5291_v33, %v5234_v30  ;;  %v5423_v54 = vadd.f32 %v5414_v12, %v5366_v45  ;;  %v5369_v49 = vadd.f32 %v15389_v29, %v5302_v8  ;;  %v5549_v33 = vsel %vm4895_vm4, %v15402_v1, %v15401_v10  ;;  %v13447_v30 = vld [vmem:[%s13917_s0 + $0xc2] ss:$8 sm:$0x3] }
0x311e   :  { %v5491_v44 = vadd.f32 %v15391_v36, %v5424_v7  ;;  %v5674_v12 = vsel %vm5606_vm5, %v15404_v26, %v15403_v0 }
0x311f   :  { %7384 = vrot.lane.b32.xlu0 %v7381_v53, %s8012_s11  ;;  %v5368_v23 = vadd.f32 %v5358_v27, %v5301_v60  ;;  %v5490_v28 = vadd.f32 %v5481_v59, %v5423_v54  ;;  %v5426_v56 = vadd.f32 %v15393_v55, %v5369_v49  ;;  %v7572_v53 = vrot.slane %v13423_v19, %v8069_v13  ;;  %v15406_v27 = vld [vmem:[#allocation437_spill] sm:$0xff]  ;;  %v15408_v59 = vld [vmem:[#allocation448_spill] sm:$0xff] }
0x3120   :  { %v5558_v3 = vadd.f32 %v15395_v5, %v5491_v44  ;;  %v5608_v7 = vsel %vm5606_vm5, %v15406_v27, %v15405_v11  ;;  %v5741_v60 = vsel %vm5606_vm5, %v15408_v59, %v15407_v31  ;;  %v7515_v49 = vrot.slane %v13447_v30, %v8069_v13 }
0x3121   :  { %v5425_v42 = vadd.f32 %v5415_v34, %v5368_v23  ;;  %v5557_v50 = vadd.f32 %v5548_v37, %v5490_v28  ;;  %v5493_v57 = vadd.f32 %v15397_v2, %v5426_v56  ;;  %v15410_v34 = vld [vmem:[#allocation443_spill] sm:$0xff]  ;;  %v15412_v37 = vld [vmem:[#allocation454_spill] sm:$0xff]  ;;  %v13471_v28 = vld [vmem:[%s13917_s0 + $0xf0] ss:$8 sm:$0x3] }
0x3122   :  { %v5617_v14 = vadd.f32 %v15399_v35, %v5558_v3  ;;  %v5675_v44 = vsel %vm5606_vm5, %v15410_v34, %v15409_v62  ;;  %v5808_v23 = vsel %vm5606_vm5, %v15412_v37, %v15411_v63  ;;  %v15414_v3 = vld [vmem:[#allocation449_spill] sm:$0xff]  ;;  %v15425_v34 = vld [vmem:[#allocation470_spill] sm:$0xff] }
0x3123   :  { %7451 = vrot.lane.b32.xlu0 %v7448_v47, %s8012_s11  ;;  %v5492_v45 = vadd.f32 %v5482_v40, %v5425_v42  ;;  %v5616_v8 = vadd.f32 %v5607_v18, %v5557_v50  ;;  %v5560_v29 = vadd.f32 %v15401_v10, %v5493_v57  ;;  %v15413_v40 = vld [vmem:[#allocation452_spill] sm:$0xff]  ;;  %v15415_v18 = vld [vmem:[#allocation463_spill] sm:$0xff]  ;;  %v7639_v10 = vrot.slane %v13471_v28, %v8069_v13  ;;  %v15427_v37 = vld [vmem:[#allocation481_spill] sm:$0xff] }
0x3124   :  { %v5684_v36 = vadd.f32 %v15403_v0, %v5617_v14  ;;  %v5742_v35 = vsel %vm5606_vm5, %v15414_v3, %v15413_v40  ;;  %v15416_v42 = vld [vmem:[#allocation460_spill] sm:$0xff]  ;;  %v15418_v14 = vld [vmem:[#allocation455_spill] sm:$0xff] }
0x3125   :  { %v5559_v54 = vadd.f32 %v5549_v33, %v5492_v45  ;;  %v5683_v47 = vadd.f32 %v5674_v12, %v5616_v8  ;;  %v5619_v55 = vadd.f32 %v15405_v11, %v5560_v29  ;;  %v5875_v50 = vsel %vm5606_vm5, %v15416_v42, %v15415_v18  ;;  %v15417_v33 = vld [vmem:[#allocation458_spill] sm:$0xff]  ;;  %v15419_v12 = vld [vmem:[#allocation469_spill] sm:$0xff]  ;;  %v15429_v3 = vld [vmem:[#allocation476_spill] sm:$0xff] }
0x3126   :  { %v5751_v5 = vadd.f32 %v15407_v31, %v5684_v36  ;;  %v5809_v0 = vsel %vm5606_vm5, %v15418_v14, %v15417_v33  ;;  %v15420_v45 = vld [vmem:[#allocation466_spill] sm:$0xff]  ;;  %v15422_v36 = vld [vmem:[#allocation461_spill] sm:$0xff]  ;;  %v15431_v42 = vld [vmem:[#allocation487_spill] sm:$0xff] }
0x3127   :  { %7575 = vrot.lane.b32.xlu0 %v7572_v53, %s8012_s11  ;;  %v5618_v56 = vadd.f32 %v5608_v7, %v5559_v54  ;;  %v5750_v2 = vadd.f32 %v5741_v60, %v5683_v47  ;;  %v5686_v43 = vadd.f32 %v15409_v62, %v5619_v55  ;;  %v5934_v8 = vsel %vm5606_vm5, %v15420_v45, %v15419_v12  ;;  %v15421_v7 = vld [vmem:[#allocation464_spill] sm:$0xff]  ;;  %v15423_v60 = vld [vmem:[#allocation475_spill] sm:$0xff]  ;;  %v15436_v45 = vld [vmem:[#allocation490_spill] sm:$0xff] }
0x3128   :  { %v5818_v9 = vadd.f32 %v15411_v63, %v5751_v5  ;;  %v5876_v31 = vsel %vm5606_vm5, %v15422_v36, %v15421_v7  ;;  %v15424_v54 = vld [vmem:[#allocation472_spill] sm:$0xff]  ;;  %v15434_v14 = vld [vmem:[#allocation479_spill] sm:$0xff]  ;;  %v15438_v36 = vld [vmem:[#allocation485_spill] sm:$0xff] }
0x3129   :  { %v5685_v53 = vadd.f32 %v5675_v44, %v5618_v56  ;;  %v5817_v57 = vadd.f32 %v5808_v23, %v5750_v2  ;;  %v5753_v1 = vadd.f32 %v15413_v40, %v5686_v43  ;;  %v6001_v47 = vsel %vm5606_vm5, %v15424_v54, %v15423_v60  ;;  %v15426_v44 = vld [vmem:[#allocation467_spill] sm:$0xff]  ;;  %v15428_v23 = vld [vmem:[#allocation478_spill] sm:$0xff]  ;;  %v15440_v54 = vld [vmem:[#allocation496_spill] sm:$0xff] }
0x312a   :  { %v5885_v26 = vadd.f32 %v15415_v18, %v5818_v9  ;;  %v5935_v5 = vsel %vm5606_vm5, %v15426_v44, %v15425_v34  ;;  %v6068_v56 = vsel %vm5606_vm5, %v15428_v23, %v15427_v37  ;;  %v15442_v44 = vld [vmem:[#allocation491_spill] sm:$0xff]  ;;  %v15444_v23 = vld [vmem:[#allocation502_spill] sm:$0xff] }
0x312b   :  { %7518 = vrot.lane.b32.xlu0 %v7515_v49, %s8012_s11  ;;  %v5752_v29 = vadd.f32 %v5742_v35, %v5685_v53  ;;  %v5884_v11 = vadd.f32 %v5875_v50, %v5817_v57  ;;  %v5820_v27 = vadd.f32 %v15417_v33, %v5753_v1  ;;  %v15430_v35 = vld [vmem:[#allocation473_spill] sm:$0xff]  ;;  %v15432_v50 = vld [vmem:[#allocation484_spill] sm:$0xff]  ;;  %v15433_v33 = vld [vmem:[#allocation482_spill] sm:$0xff] }
0x312c   :  { %v5944_v59 = vadd.f32 %v15419_v12, %v5885_v26  ;;  %v6002_v9 = vsel %vm5606_vm5, %v15430_v35, %v15429_v3  ;;  %v6125_v53 = vsel %vm5606_vm5, %v15432_v50, %v15431_v42  ;;  %v15435_v12 = vld [vmem:[#allocation493_spill] sm:$0xff]  ;;  %v15448_v50 = vld [vmem:[#allocation508_spill] sm:$0xff] }
0x312d   :  { %v5819_v49 = vadd.f32 %v5809_v0, %v5752_v29  ;;  %v5943_v55 = vadd.f32 %v5934_v8, %v5884_v11  ;;  %v5887_v62 = vadd.f32 %v15421_v7, %v5820_v27  ;;  %v6069_v0 = vsel %vm5606_vm5, %v15434_v14, %v15433_v33  ;;  %v15437_v7 = vld [vmem:[#allocation488_spill] sm:$0xff]  ;;  %v15446_v35 = vld [vmem:[#allocation497_spill] sm:$0xff]  ;;  %v15450_v14 = vld [vmem:[#allocation503_spill] sm:$0xff] }
0x312e   :  { %v6011_v63 = vadd.f32 %v15423_v60, %v5944_v59  ;;  %v6192_v8 = vsel %vm5606_vm5, %v15436_v45, %v15435_v12  ;;  %v15439_v60 = vld [vmem:[#allocation499_spill] sm:$0xff]  ;;  %v15452_v45 = vld [vmem:[#allocation514_spill] sm:$0xff] }
0x312f   :  { %7642 = vrot.lane.b32.xlu0 %v7639_v10, %s8012_s11  ;;  %v5886_v2 = vadd.f32 %v5876_v31, %v5819_v49  ;;  %v6010_v43 = vadd.f32 %v6001_v47, %v5943_v55  ;;  %v5946_v40 = vadd.f32 %v15425_v34, %v5887_v62  ;;  %v6126_v31 = vsel %vm5606_vm5, %v15438_v36, %v15437_v7  ;;  %v15441_v34 = vld [vmem:[#allocation494_spill] sm:$0xff]  ;;  %v15454_v36 = vld [vmem:[#allocation509_spill] sm:$0xff] }
0x3130   :  { %v6078_v18 = vadd.f32 %v15427_v37, %v6011_v63  ;;  %v6259_v47 = vsel %vm5606_vm5, %v15440_v54, %v15439_v60  ;;  %v15443_v37 = vld [vmem:[#allocation505_spill] sm:$0xff]  ;;  %v15456_v54 = vld [vmem:[#allocation520_spill] sm:$0xff] }
0x3131   :  { %v5945_v57 = vadd.f32 %v5935_v5, %v5886_v2  ;;  %v6077_v10 = vadd.f32 %v6068_v56, %v6010_v43  ;;  %v6013_v1 = vadd.f32 %v15429_v3, %v5946_v40  ;;  %v6193_v5 = vsel %vm5606_vm5, %v15442_v44, %v15441_v34  ;;  %v15445_v3 = vld [vmem:[#allocation500_spill] sm:$0xff]  ;;  %v15458_v44 = vld [vmem:[#allocation515_spill] sm:$0xff] }
0x3132   :  { %v6135_v26 = vadd.f32 %v15431_v42, %v6078_v18  ;;  %v6318_v56 = vsel %vm6317_vm6, %v15444_v23, %v15443_v37  ;;  %v15447_v42 = vld [vmem:[#allocation511_spill] sm:$0xff] }
0x3133   :  { %v6012_v29 = vadd.f32 %v6002_v9, %v5945_v57  ;;  %v6134_v11 = vadd.f32 %v6125_v53, %v6077_v10  ;;  %v6080_v27 = vadd.f32 %v15433_v33, %v6013_v1  ;;  %v6260_v9 = vsel %vm5606_vm5, %v15446_v35, %v15445_v3  ;;  %v15449_v33 = vld [vmem:[#allocation506_spill] sm:$0xff]  ;;  %v15460_v23 = vld [vmem:[#allocation527_spill] sm:$0xff]  ;;  %v15462_v35 = vld [vmem:[#allocation521_spill] sm:$0xff] }
0x3134   :  { %v6202_v59 = vadd.f32 %v15435_v12, %v6135_v26  ;;  %v6385_v53 = vsel %vm6317_vm6, %v15448_v50, %v15447_v42  ;;  %v15451_v12 = vld [vmem:[#allocation517_spill] sm:$0xff] }
0x3135   :  { %v6079_v49 = vadd.f32 %v6069_v0, %v6012_v29  ;;  %v6201_v55 = vadd.f32 %v6192_v8, %v6134_v11  ;;  %v6137_v62 = vadd.f32 %v15437_v7, %v6080_v27  ;;  %v6319_v0 = vsel %vm6317_vm6, %v15450_v14, %v15449_v33  ;;  %v15453_v7 = vld [vmem:[#allocation512_spill] sm:$0xff]  ;;  %v15464_v50 = vld [vmem:[#allocation533_spill] sm:$0xff] }
0x3136   :  { %v6269_v63 = vadd.f32 %v15439_v60, %v6202_v59  ;;  %v6452_v8 = vsel %vm6317_vm6, %v15452_v45, %v15451_v12  ;;  %v15455_v60 = vld [vmem:[#allocation523_spill] sm:$0xff]  ;;  %v15466_v14 = vld [vmem:[#allocation528_spill] sm:$0xff] }
0x3137   :  { %v6136_v2 = vadd.f32 %v6126_v31, %v6079_v49  ;;  %v6268_v43 = vadd.f32 %v6259_v47, %v6201_v55  ;;  %v6204_v40 = vadd.f32 %v15441_v34, %v6137_v62  ;;  %v6386_v31 = vsel %vm6317_vm6, %v15454_v36, %v15453_v7  ;;  %v15457_v34 = vld [vmem:[#allocation518_spill] sm:$0xff]  ;;  %v15468_v45 = vld [vmem:[#allocation539_spill] sm:$0xff] }
0x3138   :  { %v6328_v18 = vadd.f32 %v15443_v37, %v6269_v63  ;;  %v6519_v47 = vsel %vm6317_vm6, %v15456_v54, %v15455_v60  ;;  %v15459_v37 = vld [vmem:[#allocation530_spill] sm:$0xff]  ;;  %v15472_v54 = vld [vmem:[#allocation545_spill] sm:$0xff] }
0x3139   :  { %v6203_v57 = vadd.f32 %v6193_v5, %v6136_v2  ;;  %v6327_v10 = vadd.f32 %v6318_v56, %v6268_v43  ;;  %v6271_v1 = vadd.f32 %v15445_v3, %v6204_v40  ;;  %v6453_v5 = vsel %vm6317_vm6, %v15458_v44, %v15457_v34  ;;  %v15461_v3 = vld [vmem:[#allocation524_spill] sm:$0xff]  ;;  %v15470_v36 = vld [vmem:[#allocation534_spill] sm:$0xff] }
0x313a   :  { %v6395_v26 = vadd.f32 %v15447_v42, %v6328_v18  ;;  %v6586_v56 = vsel %vm6317_vm6, %v15460_v23, %v15459_v37  ;;  %v15463_v42 = vld [vmem:[#allocation536_spill] sm:$0xff]  ;;  %v15476_v23 = vld [vmem:[#allocation554_spill] sm:$0xff] }
0x313b   :  { %v6270_v29 = vadd.f32 %v6260_v9, %v6203_v57  ;;  %v6394_v11 = vadd.f32 %v6385_v53, %v6327_v10  ;;  %v6330_v27 = vadd.f32 %v15449_v33, %v6271_v1  ;;  %v6520_v9 = vsel %vm6317_vm6, %v15462_v35, %v15461_v3  ;;  %v15465_v33 = vld [vmem:[#allocation531_spill] sm:$0xff]  ;;  %v15474_v44 = vld [vmem:[#allocation540_spill] sm:$0xff]  ;;  %v15478_v35 = vld [vmem:[#allocation546_spill] sm:$0xff] }
0x313c   :  { %v6462_v59 = vadd.f32 %v15451_v12, %v6395_v26  ;;  %v6645_v53 = vsel %vm6317_vm6, %v15464_v50, %v15463_v42  ;;  %v15467_v12 = vld [vmem:[#allocation542_spill] sm:$0xff]  ;;  %v15480_v50 = vld [vmem:[#allocation572_spill] sm:$0xff] }
0x313d   :  { %v6329_v49 = vadd.f32 %v6319_v0, %v6270_v29  ;;  %v6461_v55 = vadd.f32 %v6452_v8, %v6394_v11  ;;  %v6397_v62 = vadd.f32 %v15453_v7, %v6330_v27  ;;  %v6587_v0 = vsel %vm6317_vm6, %v15466_v14, %v15465_v33  ;;  %v15469_v7 = vld [vmem:[#allocation537_spill] sm:$0xff]  ;;  %v15482_v14 = vld [vmem:[#allocation555_spill] sm:$0xff] }
0x313e   :  { %v6529_v63 = vadd.f32 %v15455_v60, %v6462_v59  ;;  %v6712_v8 = vsel %vm6317_vm6, %v15468_v45, %v15467_v12  ;;  %v15471_v60 = vld [vmem:[#allocation549_spill] sm:$0xff] }
0x313f   :  { %v6396_v2 = vadd.f32 %v6386_v31, %v6329_v49  ;;  %v6528_v43 = vadd.f32 %v6519_v47, %v6461_v55  ;;  %v6464_v40 = vadd.f32 %v15457_v34, %v6397_v62  ;;  %v6646_v31 = vsel %vm6317_vm6, %v15470_v36, %v15469_v7  ;;  %v15473_v34 = vld [vmem:[#allocation543_spill] sm:$0xff] }
0x3140   :  { %v6596_v18 = vadd.f32 %v15459_v37, %v6529_v63  ;;  %v6779_v47 = vsel %vm6317_vm6, %v15472_v54, %v15471_v60  ;;  %v15475_v37 = vld [vmem:[#allocation557_spill] sm:$0xff] }
0x3141   :  { %v6463_v57 = vadd.f32 %v6453_v5, %v6396_v2  ;;  %v6595_v10 = vadd.f32 %v6586_v56, %v6528_v43  ;;  %v6531_v1 = vadd.f32 %v15461_v3, %v6464_v40  ;;  %v6713_v5 = vsel %vm6317_vm6, %v15474_v44, %v15473_v34  ;;  %v15477_v3 = vld [vmem:[#allocation550_spill] sm:$0xff] }
0x3142   :  { %v6655_v26 = vadd.f32 %v15463_v42, %v6596_v18  ;;  %v6836_v56 = vsel %vm6317_vm6, %v15476_v23, %v15475_v37  ;;  %v15479_v42 = vld [vmem:[#allocation73_spill] sm:$0xff] }
0x3143   :  { %v6530_v29 = vadd.f32 %v6520_v9, %v6463_v57  ;;  %v6654_v11 = vadd.f32 %v6645_v53, %v6595_v10  ;;  %v6598_v27 = vadd.f32 %v15465_v33, %v6531_v1  ;;  %v6780_v9 = vsel %vm6317_vm6, %v15478_v35, %v15477_v3  ;;  %v15481_v33 = vld [vmem:[#allocation558_spill] sm:$0xff] }
0x3144   :  { %v6722_v59 = vadd.f32 %v15467_v12, %v6655_v26  ;;  %v6903_v53 = vsel %vm6317_vm6, %v15480_v50, %v15479_v42  ;;  %v6970_v12 = vsel %vm6317_vm6, %v12479_v15, %v12990_v61  ;;  %v6971_v15 = vsel %vm6317_vm6, %v12497_v46, %v13016_v20 }
0x3145   :  { %v6597_v49 = vadd.f32 %v6587_v0, %v6530_v29  ;;  %v6721_v55 = vadd.f32 %v6712_v8, %v6654_v11  ;;  %v6657_v62 = vadd.f32 %v15469_v7, %v6598_v27  ;;  %v6837_v0 = vsel %vm6317_vm6, %v15482_v14, %v15481_v33  ;;  %v15483_v11 = vld [vmem:[#allocation81_spill] sm:$0xff]  ;;  %v15484_v27 = vld [vmem:[#allocation578_spill] sm:$0xff] }
0x3146   :  { %v6789_v63 = vadd.f32 %v15471_v60, %v6722_v59  ;;  %v6904_v7 = vsel %vm6317_vm6, %v15484_v27, %v15483_v11 }
0x3147   :  { %v6656_v2 = vadd.f32 %v6646_v31, %v6597_v49  ;;  %v6788_v43 = vadd.f32 %v6779_v47, %v6721_v55  ;;  %v6724_v40 = vadd.f32 %v15473_v34, %v6657_v62 }
0x3148   :  { %v6846_v18 = vadd.f32 %v15475_v37, %v6789_v63 }
0x3149   :  { %v6723_v57 = vadd.f32 %v6713_v5, %v6656_v2  ;;  %v6845_v10 = vadd.f32 %v6836_v56, %v6788_v43  ;;  %v6791_v1 = vadd.f32 %v15477_v3, %v6724_v40 }
0x314a   :  { %v6913_v26 = vadd.f32 %v15479_v42, %v6846_v18  ;;  %v7251_v18 = vrot.slane %v13327_v51, %v15044_v48  ;;  %v7318_v42 = vrot.slane %v13351_v39, %v15044_v48  ;;  %v7568_v51 = vrot.slane %v13423_v19, %v15044_v48 }
0x314b   :  { %v6790_v45 = vadd.f32 %v6780_v9, %v6723_v57  ;;  %v6912_v8 = vadd.f32 %v6903_v53, %v6845_v10  ;;  %v6848_v29 = vadd.f32 %v15481_v33, %v6791_v1  ;;  %v7511_v39 = vrot.slane %v13447_v30, %v15044_v48 }
0x314c   :  { %v6980_v36 = vadd.f32 %v12990_v61, %v6913_v26 }
0x314d   :  { %v6847_v31 = vadd.f32 %v6837_v0, %v6790_v45  ;;  %v6979_v59 = vadd.f32 %v6970_v12, %v6912_v8  ;;  %v6915_v54 = vadd.f32 %v15483_v11, %v6848_v29  ;;  %v13693_v45 = vld [vmem:[#allocation2] sm:$0xff]  ;;  %v13696_v29 = vld [vmem:[#allocation2 + $0x10] sm:$0xff] }
0x314e   :  { %v7019_v60 = vpop.permute.xlu1 %7018 }
0x314f   :  { %v7029_v47 = vsel %vm7028_vm15, %v13167_v58, %v7019_v60  ;;  %v7039_v49 = vadd.f32 %v7019_v60, %v6980_v36  ;;  %v6914_v55 = vadd.f32 %v6904_v7, %v6847_v31  ;;  %v6982_v34 = vadd.f32 %v13016_v20, %v6915_v54  ;;  %v13701_v36 = vld [vmem:[#allocation2 + $0x20] sm:$0xff] }
0x3150   :  { %v7038_v62 = vadd.f32 %v7029_v47, %v6979_v59 }
0x3151   :  { %v6981_v44 = vadd.f32 %v6971_v15, %v6914_v55 }
0x3152   :  { %v7023_v5 = vpop.permute.xlu1 %7022 }
0x3153   :  { %v7030_v61 = vsel %vm7028_vm15, %v13185_v32, %v7023_v5  ;;  %v7041_v63 = vadd.f32 %v7023_v5, %v6982_v34 }
0x3154   :  { %v7040_v37 = vadd.f32 %v7030_v61, %v6981_v44 }
0x3156   :  { %v7027_v23 = vpop.permute.xlu1 %7026 }
0x3157   :  { %v7031_v56 = vsel %vm7028_vm15, %v13203_v25, %v7027_v23  ;;  %v13638_v46 = vadd.f32 %v7027_v23, %v13038_v41 }
0x3158   :  { %v13641_v58 = vadd.f32 %v7031_v56, %v13044_v22  ;;  %v7117_v22 = vrot.slane %v13279_v6, %v15044_v48  ;;  %v7377_v6 = vrot.slane %v13375_v4, %v15044_v48  ;;  %v7635_v4 = vrot.slane %v13471_v28, %v15044_v48 }
0x315a   :  { %v7058_v2 = vpop.permute.xlu1 %7057 }
0x315b   :  { %v7059_v20 = vsel %vm7000_vm7, %v13221_v21, %v7058_v2  ;;  %v7184_v21 = vrot.slane %v13303_v17, %v15044_v48  ;;  %v7444_v17 = vrot.slane %v13399_v16, %v15044_v48 }
0x315c   :  { %v7063_v43 = vmul.f32 %v13064_v38, %v7059_v20  ;;  %v7065_v32 = vmul.f32 %v13084_v52, %v7059_v20  ;;  %v7067_v40 = vmul.f32 %v13104_v24, %v7059_v20 }
0x315e   :  { %v7077_v3 = vrot.slane %v7063_v43, 1  ;;  %v7078_v35 = vrot.slane %v7065_v32, 1  ;;  %v7082_v9 = vrot.slane %v7067_v40, 1 }
0x3160   :  { %v7079_v25 = vsel %vm164_vm8, %v7077_v3, %v7078_v35  ;;  %v7083_v41 = vsel %vm164_vm8, %v7078_v35, %v7082_v9 }
0x3161   :  { %7086 = vrot.lane.b32.xlu1 %v7079_v25, %s8013_s22 }
0x3165   :  { %7090 = vrot.lane.b32.xlu1 %v7083_v41, %s8013_s22 }
0x3169   :  { %7122 = vrot.lane.b32.xlu1 %v7117_v22, %s8012_s11 }
0x316d   :  { %7189 = vrot.lane.b32.xlu1 %v7184_v21, %s8012_s11 }
0x3171   :  { %7256 = vrot.lane.b32.xlu1 %v7251_v18, %s8012_s11 }
0x3175   :  { %7323 = vrot.lane.b32.xlu1 %v7318_v42, %s8012_s11  ;;  %v7085_v16 = vpop.permute.xlu0 %7084 }
0x3179   :  { %7382 = vrot.lane.b32.xlu1 %v7377_v6, %s8012_s11  ;;  %v7089_v50 = vpop.permute.xlu0 %7088 }
0x317d   :  { %7449 = vrot.lane.b32.xlu1 %v7444_v17, %s8012_s11  ;;  %v13683_v10 = vpop.permute.xlu0 %7092 }
0x3181   :  { %7573 = vrot.lane.b32.xlu1 %v7568_v51, %s8012_s11  ;;  %v7125_v0 = vpop.permute.xlu0 %7124 }
0x3185   :  { %7516 = vrot.lane.b32.xlu1 %v7511_v39, %s8012_s11 }
0x3189   :  { %7640 = vrot.lane.b32.xlu1 %v7635_v4, %s8012_s11 }
0x318d   :  { %7094 = vrot.lane.b32.xlu1 %v7082_v9, %s8013_s22 }
0x31d3   :  { %v7087_v53 = vpop.permute.xlu1 %7086 }
0x31d4   :  { %v7096_v57 = vsel %vm7028_vm15, %v7085_v16, %v7087_v53  ;;  %v13681_v19 = vadd.f32 %v7087_v53, %v7039_v49  ;;  %v7192_v49 = vpop.permute.xlu0 %7191 }
0x31d5   :  { %v13685_v1 = vadd.f32 %v7096_v57, %v7038_v62 }
0x31d7   :  { %v7091_v30 = vpop.permute.xlu1 %7090 }
0x31d8   :  { %v7097_v33 = vsel %vm7028_vm15, %v7089_v50, %v7091_v30  ;;  %v13688_v14 = vadd.f32 %v7091_v30, %v7041_v63  ;;  %v7259_v25 = vpop.permute.xlu0 %7258 }
0x31d9   :  { %v13690_v28 = vadd.f32 %v7097_v33, %v7040_v37 }
0x31db   :  { %v7123_v26 = vpop.permute.xlu1 %7122 }
0x31dc   :  { %v7126_v12 = vsel %vm7000_vm7, %v7123_v26, %v7125_v0  ;;  %v7129_v8 = vmul.f32 %v13693_v45, %v7123_v26  ;;  %v7131_v11 = vmul.f32 %v13696_v29, %v7123_v26  ;;  %v7133_v31 = vmul.f32 %v13701_v36, %v7123_v26 }
0x31dd   :  { %v7130_v27 = vmul.f32 %v13064_v38, %v7126_v12  ;;  %v7132_v7 = vmul.f32 %v13084_v52, %v7126_v12  ;;  %v7134_v59 = vmul.f32 %v13104_v24, %v7126_v12 }
0x31de   :  { %v7141_v60 = vrot.slane %v7129_v8, 2  ;;  %v7142_v54 = vrot.slane %v7131_v11, 2  ;;  %v7147_v62 = vrot.slane %v7133_v31, 2  ;;  %v7326_v11 = vpop.permute.xlu0 %7325 }
0x31df   :  { %v7144_v15 = vrot.slane %v7130_v27, 2  ;;  %v7145_v47 = vrot.slane %v7132_v7, 2  ;;  %v7190_v55 = vpop.permute.xlu1 %7189  ;;  %v7149_v5 = vrot.slane %v7134_v59, 2 }
0x31e0   :  { %v7143_v34 = vsel %vm212_vm9, %v7141_v60, %v7142_v54  ;;  %v7193_v61 = vsel %vm7000_vm7, %v7190_v55, %v7192_v49  ;;  %v7196_v63 = vmul.f32 %v13693_v45, %v7190_v55  ;;  %v7198_v37 = vmul.f32 %v13696_v29, %v7190_v55 }
0x31e1   :  { %7151 = vrot.lane.b32.xlu0 %v7143_v34, %s8013_s22  ;;  %v7146_v44 = vsel %vm212_vm9, %v7144_v15, %v7145_v47  ;;  %v7148_v23 = vsel %vm212_vm9, %v7142_v54, %v7147_v62  ;;  %v7197_v56 = vmul.f32 %v13064_v38, %v7193_v61  ;;  %v7199_v2 = vmul.f32 %v13084_v52, %v7193_v61  ;;  %v13749_v54 = vld [vmem:[#allocation2 + $0x18] sm:$0xff] }
0x31e2   :  { %7153 = vrot.lane.b32.xlu1 %v7146_v44, %s8013_s22  ;;  %v7150_v20 = vsel %vm212_vm9, %v7145_v47, %v7149_v5  ;;  %v7200_v43 = vmul.f32 %v13701_v36, %v7190_v55  ;;  %v7208_v32 = vrot.slane %v7196_v63, 3  ;;  %v7209_v40 = vrot.slane %v7198_v37, 3 }
0x31e3   :  { %v7201_v3 = vmul.f32 %v13104_v24, %v7193_v61  ;;  %v7211_v35 = vrot.slane %v7197_v56, 3  ;;  %v7212_v9 = vrot.slane %v7199_v2, 3  ;;  %v7257_v41 = vpop.permute.xlu1 %7256 }
0x31e4   :  { %v7214_v22 = vrot.slane %v7200_v43, 3  ;;  %v7210_v21 = vsel %vm260_vm10, %v7208_v32, %v7209_v40  ;;  %v7260_v6 = vsel %vm7000_vm7, %v7257_v41, %v7259_v25  ;;  %v7263_v17 = vmul.f32 %v13693_v45, %v7257_v41 }
0x31e5   :  { %7155 = vrot.lane.b32.xlu0 %v7148_v23, %s8013_s22  ;;  %v7213_v18 = vsel %vm260_vm10, %v7211_v35, %v7212_v9  ;;  %v7216_v42 = vrot.slane %v7201_v3, 3  ;;  %v7265_v51 = vmul.f32 %v13696_v29, %v7257_v41  ;;  %v7264_v4 = vmul.f32 %v13064_v38, %v7260_v6 }
0x31e6   :  { %7157 = vrot.lane.b32.xlu1 %v7150_v20, %s8013_s22  ;;  %v7215_v39 = vsel %vm260_vm10, %v7209_v40, %v7214_v22  ;;  %v7266_v16 = vmul.f32 %v13084_v52, %v7260_v6  ;;  %v7267_v53 = vmul.f32 %v13701_v36, %v7257_v41  ;;  %v7275_v57 = vrot.slane %v7263_v17, 4  ;;  %v13766_v20 = vld [vmem:[#allocation2 + $0x28] sm:$0xff] }
0x31e7   :  { %v7217_v50 = vsel %vm260_vm10, %v7212_v9, %v7216_v42  ;;  %v7276_v30 = vrot.slane %v7265_v51, 4  ;;  %v7268_v33 = vmul.f32 %v13104_v24, %v7260_v6  ;;  %v7278_v0 = vrot.slane %v7264_v4, 4  ;;  %v7324_v27 = vpop.permute.xlu1 %7323  ;;  %v13772_v9 = vld [vmem:[#allocation2 + $0x38] sm:$0xff] }
0x31e8   :  { %v7279_v26 = vrot.slane %v7266_v16, 4  ;;  %v7281_v38 = vrot.slane %v7267_v53, 4  ;;  %v7327_v31 = vsel %vm7000_vm7, %v7324_v27, %v7326_v11  ;;  %v7330_v60 = vmul.f32 %v13696_v29, %v7324_v27 }
0x31e9   :  { %7159 = vrot.lane.b32.xlu0 %v7147_v62, %s8013_s22  ;;  %v7277_v52 = vsel %vm308_vm11, %v7275_v57, %v7276_v30  ;;  %v7283_v8 = vrot.slane %v7268_v33, 4  ;;  %v7331_v15 = vmul.f32 %v13749_v54, %v7327_v31  ;;  %v7332_v47 = vmul.f32 %v13701_v36, %v7324_v27 }
0x31ea   :  { %7161 = vrot.lane.b32.xlu1 %v7149_v5, %s8013_s22  ;;  %v7280_v12 = vsel %vm308_vm11, %v7278_v0, %v7279_v26  ;;  %v7282_v7 = vsel %vm308_vm11, %v7276_v30, %v7281_v38  ;;  %v7333_v49 = vmul.f32 %v13104_v24, %v7327_v31  ;;  %v7338_v55 = vrot.slane %v7330_v60, 5  ;;  %v7385_v5 = vpop.permute.xlu0 %7384 }
0x31eb   :  { %v7284_v59 = vsel %vm308_vm11, %v7279_v26, %v7283_v8  ;;  %v7339_v62 = vrot.slane %v7331_v15, 5  ;;  %v7340_v34 = vrot.slane %v7332_v47, 5  ;;  %v7383_v61 = vpop.permute.xlu1 %7382 }
0x31ec   :  { %v7342_v44 = vrot.slane %v7333_v49, 5  ;;  %v7386_v37 = vsel %vm7000_vm7, %v7383_v61, %v7385_v5  ;;  %v7389_v23 = vmul.f32 %v13696_v29, %v7383_v61  ;;  %v7391_v56 = vmul.f32 %v13701_v36, %v7383_v61 }
0x31ed   :  { %7218 = vrot.lane.b32.xlu0 %v7210_v21, %s8013_s22  ;;  %v7341_v63 = vsel %vm352_vm12, %v7338_v55, %v7340_v34  ;;  %v7390_v2 = vmul.f32 %v13749_v54, %v7386_v37  ;;  %v7392_v43 = vmul.f32 %v13766_v20, %v7386_v37  ;;  %v7393_v40 = vmul.f32 %v13693_v45, %v7383_v61 }
0x31ee   :  { %7220 = vrot.lane.b32.xlu1 %v7213_v18, %s8013_s22  ;;  %v7343_v24 = vsel %vm352_vm12, %v7339_v62, %v7342_v44  ;;  %v7401_v32 = vrot.slane %v7389_v23, 6  ;;  %v7403_v3 = vrot.slane %v7391_v56, 6  ;;  %v7394_v25 = vmul.f32 %v13772_v9, %v7386_v37 }
0x31ef   :  { %v7402_v35 = vrot.slane %v7390_v2, 6  ;;  %v7405_v41 = vrot.slane %v7392_v43, 6  ;;  %v7450_v21 = vpop.permute.xlu1 %7449  ;;  %v7407_v18 = vrot.slane %v7393_v40, 6 }
0x31f0   :  { %v7409_v51 = vrot.slane %v7394_v25, 6  ;;  %v7458_v4 = vmul.f32 %v13701_v36, %v7450_v21  ;;  %v7460_v33 = vmul.f32 %v13693_v45, %v7450_v21 }
0x31f1   :  { %7222 = vrot.lane.b32.xlu0 %v7215_v39, %s8013_s22  ;;  %v7406_v17 = vsel %vm396_vm13, %v7402_v35, %v7405_v41  ;;  %v7456_v39 = vmul.f32 %v13696_v29, %v7450_v21  ;;  %v7408_v16 = vsel %vm396_vm13, %v7403_v3, %v7407_v18 }
0x31f2   :  { %7224 = vrot.lane.b32.xlu1 %v7217_v50, %s8013_s22  ;;  %v7410_v57 = vsel %vm396_vm13, %v7405_v41, %v7409_v51  ;;  %v7470_v0 = vrot.slane %v7458_v4, 7  ;;  %v7474_v11 = vrot.slane %v7460_v33, 7 }
0x31f3   :  { %v7468_v30 = vrot.slane %v7456_v39, 7 }
0x31f4   :  { %v7475_v15 = vsel %vm444_vm14, %v7470_v0, %v7474_v11 }
0x31f5   :  { %7226 = vrot.lane.b32.xlu0 %v7214_v22, %s8013_s22  ;;  %v7452_v22 = vpop.permute.xlu0 %7451  ;;  %v7471_v27 = vsel %vm444_vm14, %v7468_v30, %v7470_v0 }
0x31f6   :  { %7228 = vrot.lane.b32.xlu1 %v7216_v42, %s8013_s22  ;;  %v7404_v42 = vsel %vm396_vm13, %v7401_v32, %v7403_v3  ;;  %v7453_v6 = vsel %vm7000_vm7, %v7450_v21, %v7452_v22 }
0x31f7   :  { %v7457_v50 = vmul.f32 %v13749_v54, %v7453_v6  ;;  %v7459_v53 = vmul.f32 %v13766_v20, %v7453_v6 }
0x31f9   :  { %7285 = vrot.lane.b32.xlu0 %v7277_v52, %s8013_s22  ;;  %v7576_v26 = vpop.permute.xlu0 %7575  ;;  %v7469_v52 = vrot.slane %v7457_v50, 7 }
0x31fa   :  { %7287 = vrot.lane.b32.xlu1 %v7280_v12, %s8013_s22  ;;  %v7461_v12 = vmul.f32 %v13772_v9, %v7453_v6 }
0x31fc   :  { %v7476_v31 = vrot.slane %v7461_v12, 7 }
0x31fd   :  { %7289 = vrot.lane.b32.xlu0 %v7282_v7, %s8013_s22 }
0x31fe   :  { %7291 = vrot.lane.b32.xlu1 %v7284_v59, %s8013_s22  ;;  %v7519_v59 = vpop.permute.xlu0 %7518 }
0x3201   :  { %7293 = vrot.lane.b32.xlu0 %v7281_v38, %s8013_s22  ;;  %v7574_v38 = vpop.permute.xlu1 %7573 }
0x3202   :  { %7295 = vrot.lane.b32.xlu1 %v7283_v8, %s8013_s22  ;;  %v7472_v8 = vrot.slane %v7459_v53, 7  ;;  %v7580_v5 = vmul.f32 %v13696_v29, %v7574_v38  ;;  %v7582_v61 = vmul.f32 %v13701_v36, %v7574_v38  ;;  %v7584_v56 = vmul.f32 %v13693_v45, %v7574_v38  ;;  %v7643_v25 = vpop.permute.xlu0 %7642 }
0x3204   :  { %v7473_v7 = vsel %vm444_vm14, %v7469_v52, %v7472_v8  ;;  %v7477_v49 = vsel %vm444_vm14, %v7472_v8, %v7476_v31  ;;  %v7592_v2 = vrot.slane %v7580_v5, 1  ;;  %v7593_v43 = vrot.slane %v7582_v61, 1 }
0x3205   :  { %7344 = vrot.lane.b32.xlu0 %v7338_v55, %s8013_s22  ;;  %v7517_v60 = vpop.permute.xlu1 %7516  ;;  %v7598_v22 = vrot.slane %v7584_v56, 1 }
0x3206   :  { %7346 = vrot.lane.b32.xlu1 %v7339_v62, %s8013_s22  ;;  %v7520_v47 = vsel %vm7000_vm7, %v7517_v60, %v7519_v59  ;;  %v7523_v55 = vmul.f32 %v13696_v29, %v7517_v60  ;;  %v7527_v23 = vmul.f32 %v13693_v45, %v7517_v60  ;;  %v7594_v21 = vsel %vm164_vm8, %v7592_v2, %v7593_v43 }
0x3207   :  { %v7524_v62 = vmul.f32 %v13749_v54, %v7520_v47  ;;  %v7599_v39 = vsel %vm164_vm8, %v7593_v43, %v7598_v22 }
0x3209   :  { %7348 = vrot.lane.b32.xlu0 %v7341_v63, %s8013_s22  ;;  %v7526_v63 = vmul.f32 %v13766_v20, %v7520_v47  ;;  %v7641_v41 = vpop.permute.xlu1 %7640 }
0x320a   :  { %7350 = vrot.lane.b32.xlu1 %v7343_v24, %s8013_s22  ;;  %v7644_v6 = vsel %vm7000_vm7, %v7641_v41, %v7643_v25  ;;  %v7649_v51 = vmul.f32 %v13701_v36, %v7641_v41  ;;  %v7651_v53 = vmul.f32 %v13693_v45, %v7641_v41 }
0x320b   :  { %v7648_v4 = vmul.f32 %v13749_v54, %v7644_v6 }
0x320d   :  { %7352 = vrot.lane.b32.xlu0 %v7340_v34, %s8013_s22  ;;  %v7577_v34 = vsel %vm7000_vm7, %v7574_v38, %v7576_v26  ;;  %v7095_v38 = vpop.permute.xlu1 %7094 }
0x320e   :  { %7354 = vrot.lane.b32.xlu1 %v7342_v44, %s8013_s22  ;;  %v7525_v44 = vmul.f32 %v13701_v36, %v7517_v60  ;;  %v7581_v37 = vmul.f32 %v13749_v54, %v7577_v34  ;;  %v7583_v24 = vmul.f32 %v13766_v20, %v7577_v34  ;;  %v7585_v40 = vmul.f32 %v13772_v9, %v7577_v34 }
0x320f   :  { %v7662_v36 = vrot.slane %v7648_v4, 2  ;;  %v7665_v54 = vrot.slane %v7651_v53, 2  ;;  %v7098_v59 = vsel %vm7028_vm15, %v13683_v10, %v7095_v38 }
0x3210   :  { %v7595_v3 = vrot.slane %v7581_v37, 1 }
0x3211   :  { %7411 = vrot.lane.b32.xlu0 %v7401_v32, %s8013_s22  ;;  %v7528_v32 = vmul.f32 %v13772_v9, %v7520_v47 }
0x3212   :  { %7413 = vrot.lane.b32.xlu1 %v7402_v35, %s8013_s22  ;;  %v7596_v35 = vrot.slane %v7583_v24, 1 }
0x3214   :  { %v7597_v18 = vsel %vm164_vm8, %v7595_v3, %v7596_v35 }
0x3215   :  { %7415 = vrot.lane.b32.xlu0 %v7404_v42, %s8013_s22  ;;  %v7600_v42 = vrot.slane %v7585_v40, 1 }
0x3216   :  { %7417 = vrot.lane.b32.xlu1 %v7406_v17, %s8013_s22  ;;  %v7647_v17 = vmul.f32 %v13696_v29, %v7641_v41  ;;  %v7652_v29 = vmul.f32 %v13772_v9, %v7644_v6 }
0x3217   :  { %v7601_v50 = vsel %vm164_vm8, %v7596_v35, %v7600_v42  ;;  %vm7735_vm8 = vcmask 228352  }
0x3218   :  { %v7667_v26 = vrot.slane %v7652_v29, 2 }
0x3219   :  { %7419 = vrot.lane.b32.xlu0 %v7408_v16, %s8013_s22  ;;  %v7650_v16 = vmul.f32 %v13766_v20, %v7644_v6 }
0x321a   :  { %7421 = vrot.lane.b32.xlu1 %v7410_v57, %s8013_s22  ;;  %v7659_v57 = vrot.slane %v7647_v17, 2 }
0x321b   :  { %v7663_v33 = vrot.slane %v7650_v16, 2 }
0x321d   :  { %7478 = vrot.lane.b32.xlu0 %v7468_v30, %s8013_s22  ;;  %v7660_v30 = vrot.slane %v7649_v51, 2  ;;  %v7664_v0 = vsel %vm212_vm9, %v7662_v36, %v7663_v33  ;;  %v7668_v9 = vsel %vm212_vm9, %v7663_v33, %v7667_v26 }
0x321e   :  { %7480 = vrot.lane.b32.xlu1 %v7469_v52, %s8013_s22 }
0x321f   :  { %v7661_v20 = vsel %vm212_vm9, %v7659_v57, %v7660_v30  ;;  %v7666_v45 = vsel %vm212_vm9, %v7660_v30, %v7665_v54 }
0x3221   :  { %7482 = vrot.lane.b32.xlu0 %v7471_v27, %s8013_s22 }
0x3222   :  { %7484 = vrot.lane.b32.xlu1 %v7473_v7, %s8013_s22 }
0x3225   :  { %7486 = vrot.lane.b32.xlu0 %v7475_v15, %s8013_s22 }
0x3226   :  { %7488 = vrot.lane.b32.xlu1 %v7477_v49, %s8013_s22  ;;  %v7110_v49 = vadd.f32 %v7095_v38, %v13638_v46 }
0x3229   :  { %7535 = vrot.lane.b32.xlu0 %v7523_v55, %s8013_s22 }
0x322a   :  { %7537 = vrot.lane.b32.xlu1 %v7524_v62, %s8013_s22  ;;  %v7109_v62 = vadd.f32 %v7098_v59, %v13641_v58  ;;  %v7696_v59 = vld [vmem:[%s13918_s1] sm:$0x3]  ;;  %s8014_s1 = smov [#allocation3]  }
0x322b   :  { %s7744_s6 = sshll.u32 %s8014_s1, 4  ;;  %s7745_s6 = int_to_ptr.vmem [resolvable:$true] %s7744_s6 }
0x322c   :  { %s7965_s7 = scalar_lea.vmem %s7745_s6, 512  ;;  %p7970_p1 = scmp.lt.s32.totalorder %s7745_s6, %s7745_s6 }
0x322d   :  { %7539 = vrot.lane.b32.xlu0 %v7525_v44, %s8013_s22  ;;  %p7966_p0 = scmp.ne.s32.totalorder %s7745_s6, %s7965_s7  ;;  %p7971_p2 = scmp.lt.s32.totalorder %s7965_s7, %s7965_s7 }
0x322e   :  { %7541 = vrot.lane.b32.xlu1 %v7526_v63, %s8013_s22 }
0x322f   :  { %p7972_p3 = por %p7971_p2, %p7970_p1 }
0x3231   :  { %7543 = vrot.lane.b32.xlu0 %v7527_v23, %s8013_s22  ;;  %p7973_p4 = pnand %p7972_p3, %p7966_p0 }
0x3232   :  { %7545 = vrot.lane.b32.xlu1 %v7528_v32, %s8013_s22 }
0x3235   :  { %7602 = vrot.lane.b32.xlu0 %v7594_v21, %s8013_s22 }
0x3236   :  { %7604 = vrot.lane.b32.xlu1 %v7597_v18, %s8013_s22 }
0x3239   :  { %7606 = vrot.lane.b32.xlu0 %v7599_v39, %s8013_s22 }
0x323a   :  { %7608 = vrot.lane.b32.xlu1 %v7601_v50, %s8013_s22 }
0x323d   :  { %7610 = vrot.lane.b32.xlu0 %v7598_v22, %s8013_s22 }
0x323e   :  { %7612 = vrot.lane.b32.xlu1 %v7600_v42, %s8013_s22 }
0x3241   :  { %7669 = vrot.lane.b32.xlu0 %v7661_v20, %s8013_s22 }
0x3242   :  { %7671 = vrot.lane.b32.xlu1 %v7664_v0, %s8013_s22 }
0x3245   :  { %7673 = vrot.lane.b32.xlu0 %v7666_v45, %s8013_s22 }
0x3246   :  { %7675 = vrot.lane.b32.xlu1 %v7668_v9, %s8013_s22 }
0x3249   :  { %7677 = vrot.lane.b32.xlu0 %v7665_v54, %s8013_s22 }
0x324a   :  { %7679 = vrot.lane.b32.xlu1 %v7667_v26, %s8013_s22 }
0x3253   :  { %v7152_v52 = vpop.permute.xlu0 %7151 }
0x3254   :  { %v7154_v12 = vpop.permute.xlu1 %7153 }
0x3255   :  { %v7163_v8 = vsel %vm7028_vm15, %v7152_v52, %v7154_v12  ;;  %v7173_v11 = vadd.f32 %v7154_v12, %v13681_v19 }
0x3256   :  { %v7172_v27 = vadd.f32 %v7163_v8, %v13685_v1 }
0x3257   :  { %v7156_v7 = vpop.permute.xlu0 %7155 }
0x3258   :  { %v7158_v31 = vpop.permute.xlu1 %7157 }
0x3259   :  { %v7164_v60 = vsel %vm7028_vm15, %v7156_v7, %v7158_v31  ;;  %v7175_v15 = vadd.f32 %v7158_v31, %v13688_v14 }
0x325a   :  { %v7174_v47 = vadd.f32 %v7164_v60, %v13690_v28 }
0x325b   :  { %v7160_v55 = vpop.permute.xlu0 %7159 }
0x325c   :  { %v7162_v34 = vpop.permute.xlu1 %7161 }
0x325d   :  { %v7165_v19 = vsel %vm7028_vm15, %v7160_v55, %v7162_v34  ;;  %v7177_v1 = vadd.f32 %v7162_v34, %v7110_v49 }
0x325e   :  { %v7176_v44 = vadd.f32 %v7165_v19, %v7109_v62  ;;  %v13871_v19 = vrot.slane %v7696_v59, %v15044_v48 }
0x325f   :  { %v7219_v5 = vpop.permute.xlu0 %7218 }
0x3260   :  { %v7221_v61 = vpop.permute.xlu1 %7220 }
0x3261   :  { %v7230_v10 = vsel %vm7028_vm15, %v7219_v5, %v7221_v61  ;;  %v7240_v63 = vadd.f32 %v7221_v61, %v7173_v11 }
0x3262   :  { %v7239_v37 = vadd.f32 %v7230_v10, %v7172_v27 }
0x3263   :  { %v7223_v24 = vpop.permute.xlu0 %7222 }
0x3264   :  { %v7225_v14 = vpop.permute.xlu1 %7224 }
0x3265   :  { %v7231_v28 = vsel %vm7028_vm15, %v7223_v24, %v7225_v14  ;;  %v7242_v23 = vadd.f32 %v7225_v14, %v7175_v15  ;;  %v13877_v24 = vrot.slane %v7696_v59, %v8069_v13 }
0x3266   :  { %v7241_v46 = vadd.f32 %v7231_v28, %v7174_v47 }
0x3267   :  { %v7227_v56 = vpop.permute.xlu0 %7226 }
0x3268   :  { %v7229_v2 = vpop.permute.xlu1 %7228 }
0x3269   :  { %v7232_v58 = vsel %vm7028_vm15, %v7227_v56, %v7229_v2  ;;  %v7244_v43 = vadd.f32 %v7229_v2, %v7177_v1 }
0x326a   :  { %v7243_v32 = vadd.f32 %v7232_v58, %v7176_v44 }
0x326b   :  { %v7286_v40 = vpop.permute.xlu0 %7285 }
0x326c   :  { %v7288_v3 = vpop.permute.xlu1 %7287 }
0x326d   :  { %v7297_v35 = vsel %vm7028_vm15, %v7286_v40, %v7288_v3  ;;  %v7307_v25 = vadd.f32 %v7288_v3, %v7240_v63 }
0x326e   :  { %v7306_v41 = vadd.f32 %v7297_v35, %v7239_v37 }
0x326f   :  { %v7290_v22 = vpop.permute.xlu0 %7289 }
0x3270   :  { %v7292_v21 = vpop.permute.xlu1 %7291 }
0x3271   :  { %v7298_v60 = vsel %vm7028_vm15, %v7290_v22, %v7292_v21  ;;  %v7309_v55 = vadd.f32 %v7292_v21, %v7242_v23 }
0x3272   :  { %v7308_v10 = vadd.f32 %v7298_v60, %v7241_v46 }
0x3273   :  { %v7294_v18 = vpop.permute.xlu0 %7293 }
0x3274   :  { %v7296_v42 = vpop.permute.xlu1 %7295 }
0x3275   :  { %v7299_v1 = vsel %vm7028_vm15, %v7294_v18, %v7296_v42  ;;  %v7311_v58 = vadd.f32 %v7296_v42, %v7244_v43 }
0x3276   :  { %v7310_v2 = vadd.f32 %v7299_v1, %v7243_v32 }
0x3277   :  { %v7345_v6 = vpop.permute.xlu0 %7344 }
0x3278   :  { %v7347_v17 = vpop.permute.xlu1 %7346 }
0x3279   :  { %v7356_v31 = vsel %vm7028_vm15, %v7345_v6, %v7347_v17  ;;  %v7366_v15 = vadd.f32 %v7347_v17, %v7307_v25 }
0x327a   :  { %v7365_v62 = vadd.f32 %v7356_v31, %v7306_v41 }
0x327b   :  { %v7349_v51 = vpop.permute.xlu0 %7348 }
0x327c   :  { %v7351_v39 = vpop.permute.xlu1 %7350 }
0x327d   :  { %v7357_v44 = vsel %vm7028_vm15, %v7349_v51, %v7351_v39  ;;  %v7368_v63 = vadd.f32 %v7351_v39, %v7309_v55 }
0x327e   :  { %v7367_v40 = vadd.f32 %v7357_v44, %v7308_v10 }
0x327f   :  { %v7353_v4 = vpop.permute.xlu0 %7352 }
0x3280   :  { %v7355_v16 = vpop.permute.xlu1 %7354 }
0x3281   :  { %v7358_v14 = vsel %vm7028_vm15, %v7353_v4, %v7355_v16  ;;  %v7370_v21 = vadd.f32 %v7355_v16, %v7311_v58 }
0x3282   :  { %v7369_v22 = vadd.f32 %v7358_v14, %v7310_v2 }
0x3283   :  { %v7412_v50 = vpop.permute.xlu0 %7411 }
0x3284   :  { %v7414_v53 = vpop.permute.xlu1 %7413 }
0x3285   :  { %v7423_v47 = vsel %vm7028_vm15, %v7412_v50, %v7414_v53  ;;  %v7433_v5 = vadd.f32 %v7414_v53, %v7366_v15 }
0x3286   :  { %v7432_v37 = vadd.f32 %v7423_v47, %v7365_v62 }
0x3287   :  { %v7416_v57 = vpop.permute.xlu0 %7415 }
0x3288   :  { %v7418_v30 = vpop.permute.xlu1 %7417 }
0x3289   :  { %v7424_v28 = vsel %vm7028_vm15, %v7416_v57, %v7418_v30  ;;  %v7435_v25 = vadd.f32 %v7418_v30, %v7368_v63 }
0x328a   :  { %v7434_v18 = vadd.f32 %v7424_v28, %v7367_v40 }
0x328b   :  { %v7420_v29 = vpop.permute.xlu0 %7419 }
0x328c   :  { %v7422_v36 = vpop.permute.xlu1 %7421 }
0x328d   :  { %v7425_v17 = vsel %vm7028_vm15, %v7420_v29, %v7422_v36  ;;  %v7437_v42 = vadd.f32 %v7422_v36, %v7370_v21 }
0x328f   :  { %v7479_v33 = vpop.permute.xlu0 %7478 }
0x3290   :  { %v7481_v54 = vpop.permute.xlu1 %7480 }
0x3291   :  { %v7490_v61 = vsel %vm7028_vm15, %v7479_v33, %v7481_v54  ;;  %v7500_v23 = vadd.f32 %v7481_v54, %v7433_v5 }
0x3292   :  { %v7499_v3 = vadd.f32 %v7490_v61, %v7432_v37 }
0x3293   :  { %v7483_v20 = vpop.permute.xlu0 %7482 }
0x3294   :  { %v7485_v0 = vpop.permute.xlu1 %7484 }
0x3295   :  { %v7491_v46 = vsel %vm7028_vm15, %v7483_v20, %v7485_v0  ;;  %v7502_v51 = vadd.f32 %v7485_v0, %v7435_v25  ;;  %v7436_v20 = vadd.f32 %v7425_v17, %v7369_v22 }
0x3296   :  { %v7501_v4 = vadd.f32 %v7491_v46, %v7434_v18 }
0x3297   :  { %v7487_v26 = vpop.permute.xlu0 %7486 }
0x3298   :  { %v7489_v45 = vpop.permute.xlu1 %7488 }
0x3299   :  { %v7492_v50 = vsel %vm7028_vm15, %v7487_v26, %v7489_v45 }
0x329a   :  { %v7503_v36 = vadd.f32 %v7492_v50, %v7436_v20 }
0x329b   :  { %v7536_v9 = vpop.permute.xlu0 %7535 }
0x329c   :  { %v7538_v38 = vpop.permute.xlu1 %7537 }
0x329d   :  { %v7547_v48 = vsel %vm7028_vm15, %v7536_v9, %v7538_v38  ;;  %v7557_v41 = vadd.f32 %v7538_v38, %v7500_v23  ;;  %v7504_v9 = vadd.f32 %v7489_v45, %v7437_v42 }
0x329e   :  { %v7556_v6 = vadd.f32 %v7547_v48, %v7499_v3 }
0x329f   :  { %v7540_v52 = vpop.permute.xlu0 %7539 }
0x32a0   :  { %v7542_v12 = vpop.permute.xlu1 %7541 }
0x32a1   :  { %v7548_v39 = vsel %vm7028_vm15, %v7540_v52, %v7542_v12  ;;  %v7559_v30 = vadd.f32 %v7542_v12, %v7502_v51 }
0x32a2   :  { %v7558_v29 = vadd.f32 %v7548_v39, %v7501_v4 }
0x32a3   :  { %v7544_v8 = vpop.permute.xlu0 %7543 }
0x32a4   :  { %v7546_v11 = vpop.permute.xlu1 %7545 }
0x32a5   :  { %v7549_v38 = vsel %vm7028_vm15, %v7544_v8, %v7546_v11 }
0x32a6   :  { %v7560_v47 = vadd.f32 %v7549_v38, %v7503_v36 }
0x32a7   :  { %v7603_v27 = vpop.permute.xlu0 %7602 }
0x32a8   :  { %v7605_v7 = vpop.permute.xlu1 %7604 }
0x32a9   :  { %v7614_v13 = vsel %vm7028_vm15, %v7603_v27, %v7605_v7  ;;  %v7624_v32 = vadd.f32 %v7605_v7, %v7557_v41  ;;  %v7561_v7 = vadd.f32 %v7546_v11, %v7504_v9 }
0x32aa   :  { %v7623_v53 = vadd.f32 %v7614_v13, %v7556_v6 }
0x32ab   :  { %v7607_v49 = vpop.permute.xlu0 %7606 }
0x32ac   :  { %v7609_v34 = vpop.permute.xlu1 %7608 }
0x32ad   :  { %v7615_v33 = vsel %vm7028_vm15, %v7607_v49, %v7609_v34  ;;  %v7626_v52 = vadd.f32 %v7609_v34, %v7559_v30 }
0x32ae   :  { %v7625_v31 = vadd.f32 %v7615_v33, %v7558_v29 }
0x32af   :  { %v7611_v56 = vpop.permute.xlu0 %7610 }
0x32b0   :  { %v7613_v35 = vpop.permute.xlu1 %7612 }
0x32b1   :  { %v7616_v59 = vsel %vm7028_vm15, %v7611_v56, %v7613_v35  ;;  %v7628_v55 = vadd.f32 %v7613_v35, %v7561_v7 }
0x32b2   :  { %v7627_v34 = vadd.f32 %v7616_v59, %v7560_v47 }
0x32b3   :  { %v7670_v43 = vpop.permute.xlu0 %7669 }
0x32b4   :  { %v7672_v57 = vpop.permute.xlu1 %7671 }
0x32b5   :  { %v7681_v16 = vsel %vm7028_vm15, %v7670_v43, %v7672_v57  ;;  %v7691_v54 = vadd.f32 %v7672_v57, %v7624_v32 }
0x32b6   :  { %v7690_v0 = vadd.f32 %v7681_v16, %v7623_v53 }
0x32b7   :  { %v7674_v27 = vpop.permute.xlu0 %7673  ;;  %v7709_v12 = vadd.f32 %v13877_v24, %v7691_v54 }
0x32b8   :  { %v7676_v26 = vpop.permute.xlu1 %7675  ;;  %v7708_v45 = vadd.f32 %v13871_v19, %v7690_v0 }
0x32b9   :  { %v7682_v60 = vsel %vm7028_vm15, %v7674_v27, %v7676_v26  ;;  %v7693_v15 = vadd.f32 %v7676_v26, %v7626_v52  ;;  %v7723_v44 = vrot.slane %v7709_v12, 3 }
0x32ba   :  { %v7692_v49 = vadd.f32 %v7682_v60, %v7625_v31  ;;  %v7720_v63 = vrot.slane %v7708_v45, 3 }
0x32bb   :  { %v7711_v8 = vadd.f32 %v13877_v24, %v7693_v15  ;;  %v7678_v62 = vpop.permute.xlu0 %7677 }
0x32bc   :  { %v7710_v11 = vadd.f32 %v13871_v19, %v7692_v49  ;;  %v7680_v1 = vpop.permute.xlu1 %7679 }
0x32bd   :  { %v7724_v5 = vrot.slane %v7711_v8, 3  ;;  %v7683_v61 = vsel %vm7028_vm15, %v7678_v62, %v7680_v1  ;;  %v7695_v10 = vadd.f32 %v7680_v1, %v7628_v55 }
0x32be   :  { %v7721_v37 = vrot.slane %v7710_v11, 3  ;;  %v7694_v14 = vadd.f32 %v7683_v61, %v7627_v34 }
0x32bf   :  { %v7725_v28 = vsel %vm260_vm10, %v7723_v44, %v7724_v5  ;;  %v7713_v23 = vadd.f32 %v13877_v24, %v7695_v10 }
0x32c0   :  { %v7722_v48 = vsel %vm260_vm10, %v7720_v63, %v7721_v37  ;;  %7736 = vst.msk [vmem:[#allocation3 + $0x8] sm:$0xff] %vm7735_vm8, %v7725_v28  ;;  %v7712_v56 = vadd.f32 %v13871_v19, %v7694_v14 }
0x32c1   :  { %7734 = vst [vmem:[#allocation3] sm:$0xff] %v7722_v48  ;;  %v7728_v2 = vrot.slane %v7713_v23, 3 }
0x32c2   :  { %v7726_v58 = vrot.slane %v7712_v56, 3 }
0x32c3   :  { %v7729_v40 = vsel %vm260_vm10, %v7724_v5, %v7728_v2 }
0x32c4   :  { %v7727_v3 = vsel %vm260_vm10, %v7721_v37, %v7726_v58  ;;  %7738 = vst.msk [vmem:[#allocation3 + $0x18] sm:$0xff] %vm7735_vm8, %v7729_v40 }
0x32c5   :  { %7737 = vst [vmem:[#allocation3 + $0x10] sm:$0xff] %v7727_v3 }
0x32c6   :  { %7976 = shalt.err (!%p7973_p4)
}
0x32c7   :  { %s7977_s10 = scalar_lea.hbm %s13920_s3, 512 }
0x32c8   :  { %p7978_p5 = scmp.ne.s32.totalorder %s13920_s3, %s7977_s10  ;;  %p7981_p6 = scmp.lt.u32.totalorder %s7977_s10, %s13920_s3 }
0x32ca   :  { %p7983_p7 = pnand %p7981_p6, %p7978_p5 }
0x32cc   :  { %7986 = shalt.err (!%p7983_p7)
}
0x32cd   :  { %s8015_s14 = smov 256   ;;  %s8016_s15 = smov 16  }
0x32ce   :  { %7750 = dma.vmem_to_hbm [thread:$0]  %s7745_s6, 512, %s13920_s3, [#allocation4], %s8015_s14, %s8015_s14, %s8016_s15  }
0x32cf   :  { %7987 = dma.done.wait [#allocation4], 512  }
0x32d0   :  { %7988 = vsyncadd [#allocation4], 4294966784 }
0x32d1   :  { %7754 = vsyncpa [#allocation4], 1 }

</bundles_post_ra>
